<compile_context>
chip_gen: v5e
topology: v5e:2x2
jax: 0.10.0
libtpu: 0.0.40
codegen_flags: <defaults>
</compile_context>

<pallas_src>
import functools
import math

import jax
import jax.numpy as jnp
from jax import lax
from jax.experimental import pallas as pl
from jax.experimental.pallas import tpu as pltpu

BN_EPS = 1e-5
LANE = 128                       # lane width / tail chunk size
VMEM_LIMIT = 32 * 1024 * 1024    # well under v7x's 64 MiB per-TC VMEM


def _bn_scale_shift(bn, conv_bias):
    """Fold BatchNorm (eval mode) + conv bias into per-channel scale/shift."""
    scale = bn["gamma"] / jnp.sqrt(bn["var"] + BN_EPS)
    shift = (conv_bias - bn["mean"]) * scale + bn["beta"]
    return scale.astype(jnp.float32), shift.astype(jnp.float32)


def _round_up(x, m):
    return ((x + m - 1) // m) * m


# ---------------------------------------------------------------------------
# Fused block kernel
# ---------------------------------------------------------------------------
def _make_block_kernel(Cmid, Wp, M, TM):
    n_chunks = M // TM

    def kernel(x_ref, wa_ref, t1_ref, tsk_ref, mask_ref, s_ref, ssk_ref,
               w2_ref, t2_ref, w3_ref, t3_ref, o_ref, y1p_ref):
        xb = x_ref[0]                                              # (Cin, HW) bf16

        # conv1 + conv_skip as ONE matmul (BN scales pre-folded into wa).
        zcat = jnp.dot(wa_ref[...], xb,
                       preferred_element_type=jnp.float32)         # (Cmid+Cout, HW)
        fill = jnp.maximum(t1_ref[...], 0.0)                       # relu(bn1(bias))
        y1 = jnp.maximum(zcat[:Cmid] + t1_ref[...], 0.0) - fill    # (Cmid, HW)
        skr = zcat[Cmid:]                                          # sk - tsk

        # In-kernel stride-s dilation via scatter matmuls (MXU slack):
        #   y1p (padded conv2 input, zero ring) and the skip map in output layout.
        scat1 = jnp.dot(y1.astype(jnp.bfloat16), s_ref[...],
                        preferred_element_type=jnp.float32)        # (Cmid, Lpad)
        y1p_ref[...] = (scat1 + fill * mask_ref[...]).astype(y1p_ref.dtype)

        skd = jnp.dot(skr.astype(jnp.bfloat16), ssk_ref[...],
                      preferred_element_type=jnp.float32)          # (Cout, M)
        o_ref[0] = skd + tsk_ref[...]                              # pre-fill with skip

        # Tail: 3x3 conv (9 taps concatenated -> one 9*Cmid-deep matmul),
        # bn2+relu, 1x1 conv3, bn3+relu, residual add; chunked over M so the
        # per-chunk intermediates stay register resident.
        for c in range(n_chunks):
            m0 = c * TM
            slabs = [y1p_ref[:, ki * Wp + kj + m0: ki * Wp + kj + m0 + TM]
                     for ki in range(3) for kj in range(3)]
            slab = jnp.concatenate(slabs, axis=0)                  # (9*Cmid, TM) bf16
            y2 = jnp.dot(w2_ref[...], slab,
                         preferred_element_type=jnp.float32)
            y2 = jnp.maximum(y2 + t2_ref[...], 0.0)                # bn2 + relu
            y3 = jnp.dot(w3_ref[...], y2.astype(jnp.bfloat16),
                         preferred_element_type=jnp.float32)
            y3 = jnp.maximum(y3 + t3_ref[...], 0.0)                # bn3 + relu
            o_ref[0, :, m0:m0 + TM] = o_ref[0, :, m0:m0 + TM] + y3

    return kernel


# ---------------------------------------------------------------------------
# Block forward (wrapper: weight folding, scatter constants, one pallas_call)
# ---------------------------------------------------------------------------
def resnet_dec_block_forward(params, x, *, stride):
    N, Cin, H, W = x.shape
    s = stride
    Hs, Ws = H * s, W * s                    # = (H-1)*s + 1 + (s-1)
    # Flattened padded layout: +1 zero ring, row width padded so M % 128 == 0.
    Wp = Ws + 2
    while (Hs * Wp) % LANE != 0:
        Wp += 1
    Hp = Hs + 2
    M = Hs * Wp                              # tail lane width (garbage cols sliced later)
    Lpad = _round_up(Hp * Wp + 2, LANE)      # padded-layout length (+2 tap overrun)
    TM = LANE
    HW = H * W

    Cmid = params["conv1_w"].shape[1]
    Cout = params["conv3_w"].shape[1]

    # ---- fold BN scales into weights; shifts stay as per-channel vectors ----
    s1, t1 = _bn_scale_shift(params["bn1"], params["conv1_b"])
    s2, t2 = _bn_scale_shift(params["bn2"], params["conv2_b"])
    s3, t3 = _bn_scale_shift(params["bn3"], params["conv3_b"])
    ssk, tsk = _bn_scale_shift(params["bn_skip"], params["skip_b"])

    w1m = jnp.transpose(params["conv1_w"][:, :, 0, 0]) * s1[:, None]     # (Cmid, Cin)
    wskm = jnp.transpose(params["skip_w"][:, :, 0, 0]) * ssk[:, None]    # (Cout, Cin)
    wa = jnp.concatenate([w1m, wskm], axis=0).astype(jnp.bfloat16)       # (Cmid+Cout, Cin)
    w3m = (jnp.transpose(params["conv3_w"][:, :, 0, 0]) * s3[:, None]
           ).astype(jnp.bfloat16)                                        # (Cout, Cmid)

    # ConvTranspose2d(3x3, stride 1, pad 1) == 3x3 conv, flipped kernel, chans
    # swapped.  Lay out as (Cmid, 9*Cmid) matching the tap-concatenated slab.
    w2 = params["conv2_w"]                                               # (in, out, 3, 3)
    w2c = jnp.transpose(w2, (1, 2, 3, 0))[:, ::-1, ::-1, :]              # (out, a, b, in)
    w2cat = (s2[:, None, None, None] * w2c).reshape(Cmid, 9 * Cmid
                                                    ).astype(jnp.bfloat16)

    # ---- scatter constants for the in-kernel dilation ----
    ridx = jnp.arange(HW)
    dcol = (ridx // W * s + 1) * Wp + (ridx % W * s + 1)   # padded-layout target
    S = (dcol[:, None] == jnp.arange(Lpad)[None, :]).astype(jnp.bfloat16)  # (HW, Lpad)
    Ssk = S[:, Wp + 1:Wp + 1 + M]                          # output-layout targets (HW, M)

    l = jnp.arange(Lpad)
    r_p, c_p = l // Wp, l % Wp
    mask = ((r_p >= 1) & (r_p <= Hs) & (c_p >= 1) & (c_p <= Ws)
            ).astype(jnp.float32).reshape(1, Lpad)         # interior (non-ring) pixels

    col = lambda v: v.reshape(-1, 1).astype(jnp.float32)
    x_flat = x.reshape(N, Cin, HW).astype(jnp.bfloat16)
    CA = Cmid + Cout

    out_flat = pl.pallas_call(
        _make_block_kernel(Cmid, Wp, M, TM),
        out_shape=jax.ShapeDtypeStruct((N, Cout, M), jnp.float32),
        grid=(N,),
        in_specs=[
            pl.BlockSpec((1, Cin, HW), lambda n: (n, 0, 0)),   # x
            pl.BlockSpec((CA, Cin), lambda n: (0, 0)),         # wa (conv1 ++ skip)
            pl.BlockSpec((Cmid, 1), lambda n: (0, 0)),         # t1
            pl.BlockSpec((Cout, 1), lambda n: (0, 0)),         # tsk
            pl.BlockSpec((1, Lpad), lambda n: (0, 0)),         # interior mask
            pl.BlockSpec((HW, Lpad), lambda n: (0, 0)),        # scatter S (padded)
            pl.BlockSpec((HW, M), lambda n: (0, 0)),           # scatter S (output)
            pl.BlockSpec((Cmid, 9 * Cmid), lambda n: (0, 0)),  # w2cat
            pl.BlockSpec((Cmid, 1), lambda n: (0, 0)),         # t2
            pl.BlockSpec((Cout, Cmid), lambda n: (0, 0)),      # w3
            pl.BlockSpec((Cout, 1), lambda n: (0, 0)),         # t3
        ],
        out_specs=pl.BlockSpec((1, Cout, M), lambda n: (n, 0, 0)),
        scratch_shapes=[pltpu.VMEM((Cmid, Lpad), jnp.bfloat16)],
        compiler_params=pltpu.CompilerParams(
            dimension_semantics=("parallel",),
            vmem_limit_bytes=VMEM_LIMIT),
    )(x_flat, wa, col(t1), col(tsk), mask, S, Ssk, w2cat, col(t2), w3m, col(t3))

    return out_flat.reshape(N, Cout, Hs, Wp)[:, :, :, :Ws]


# ---------------------------------------------------------------------------
# Pure-JAX reference (PyTorch ConvTranspose2d + BatchNorm eval semantics)
# ---------------------------------------------------------------------------
def _bn_eval(bn, y):
    inv = bn["gamma"] / jnp.sqrt(bn["var"] + BN_EPS)
    return (y - bn["mean"][None, :, None, None]) * inv[None, :, None, None] \
        + bn["beta"][None, :, None, None]


def _conv_t_ref(x, w, b, *, stride, padding, output_padding):
    k = w.shape[2]
    w_conv = jnp.transpose(w, (1, 0, 2, 3))[:, :, ::-1, ::-1]
    lo, hi = k - 1 - padding, k - 1 - padding + output_padding
    y = lax.conv_general_dilated(
        x, w_conv, window_strides=(1, 1), padding=[(lo, hi), (lo, hi)],
        lhs_dilation=(stride, stride),
        dimension_numbers=("NCHW", "OIHW", "NCHW"),
        precision=lax.Precision.HIGHEST)
    return y + b[None, :, None, None]


def ref_forward(params, x, *, stride):
    y = _conv_t_ref(x, params["conv1_w"], params["conv1_b"],
                    stride=stride, padding=0, output_padding=stride - 1)
    y = jax.nn.relu(_bn_eval(params["bn1"], y))
    y = _conv_t_ref(y, params["conv2_w"], params["conv2_b"],
                    stride=1, padding=1, output_padding=0)
    y = jax.nn.relu(_bn_eval(params["bn2"], y))
    y = _conv_t_ref(y, params["conv3_w"], params["conv3_b"],
                    stride=1, padding=0, output_padding=0)
    y = jax.nn.relu(_bn_eval(params["bn3"], y))
    sk = _conv_t_ref(x, params["skip_w"], params["skip_b"],
                     stride=stride, padding=0, output_padding=stride - 1)
    return y + _bn_eval(params["bn_skip"], sk)


# ---------------------------------------------------------------------------
# Deterministic parameter construction (shapes from the PyTorch __init__)
# ---------------------------------------------------------------------------
def init_params(cin, cmid, cout, seed=0):
    key = jax.random.PRNGKey(seed)
    ctr = [0]

    def nk():
        ctr[0] += 1
        return jax.random.fold_in(key, ctr[0])

    def nrm(shape, std):
        return (std * jax.random.normal(nk(), shape)).astype(jnp.float32)

    def bn(c):
        return {
            "gamma": (1.0 + 0.1 * jax.random.normal(nk(), (c,))).astype(jnp.float32),
            "beta": (0.1 * jax.random.normal(nk(), (c,))).astype(jnp.float32),
            "mean": (0.1 * jax.random.normal(nk(), (c,))).astype(jnp.float32),
            "var": (0.5 + jax.random.uniform(nk(), (c,))).astype(jnp.float32),
        }

    def convt(ci, co, k):
        return nrm((ci, co, k, k), 1.0 / math.sqrt(ci * k * k)), nrm((co,), 0.01)

    c1w, c1b = convt(cin, cmid, 1)
    c2w, c2b = convt(cmid, cmid, 3)
    c3w, c3b = convt(cmid, cout, 1)
    skw, skb = convt(cin, cout, 1)
    return {"conv1_w": c1w, "conv1_b": c1b, "bn1": bn(cmid),
            "conv2_w": c2w, "conv2_b": c2b, "bn2": bn(cmid),
            "conv3_w": c3w, "conv3_b": c3b, "bn3": bn(cout),
            "skip_w": skw, "skip_b": skb, "bn_skip": bn(cout)}


if __name__ == "__main__":
    CIN, CMID, COUT = 16, 32, 64
    N, H, W = 2, 16, 16

    params = init_params(CIN, CMID, COUT, seed=0)
    x = jax.random.normal(jax.random.PRNGKey(0), (N, CIN, H, W), dtype=jnp.float32)

    for stride in (2, 1):
        fwd = jax.jit(functools.partial(resnet_dec_block_forward, stride=stride))
        out = jax.block_until_ready(fwd(params, x))
        assert out.shape == (N, COUT, H * stride, W * stride), out.shape
        assert bool(jnp.isfinite(out).all())
        ref = ref_forward(params, x, stride=stride)
        err = float(jnp.max(jnp.abs(out - ref)))
        tol = 0.06 + 0.04 * float(jnp.max(jnp.abs(ref)))   # bf16 operands, f32 accum
        assert err < tol, (stride, err, tol)

    print("KERNEL_OK")
</pallas_src>

<mosaic_0001>
module attributes {stable_mosaic.version = 11 : i64} {
  func.func @kernel(%arg0: i32, %arg1: memref<1x16x256xbf16, #tpu.memory_space<vmem>>, %arg2: memref<96x16xbf16, #tpu.memory_space<vmem>>, %arg3: memref<32x1xf32, #tpu.memory_space<vmem>>, %arg4: memref<64x1xf32, #tpu.memory_space<vmem>>, %arg5: memref<1x1280xf32, #tpu.memory_space<vmem>>, %arg6: memref<256x1280xbf16, #tpu.memory_space<vmem>>, %arg7: memref<256x1152xbf16, #tpu.memory_space<vmem>>, %arg8: memref<32x288xbf16, #tpu.memory_space<vmem>>, %arg9: memref<32x1xf32, #tpu.memory_space<vmem>>, %arg10: memref<64x32xbf16, #tpu.memory_space<vmem>>, %arg11: memref<64x1xf32, #tpu.memory_space<vmem>>, %arg12: memref<1x64x1152xf32, #tpu.memory_space<vmem>>, %arg13: memref<32x1280xbf16, #tpu.memory_space<vmem>>) attributes {dimension_semantics = [#tpu.dimension_semantics<parallel>], iteration_bounds = array<i64: 2>, scalar_prefetch = 0 : i64, scratch_operands = 1 : i64, tpu.core_type = #tpu.core_type<tc>, window_params = [{transform_indices = @transform_0, window_bounds = array<i64: 1, 16, 256>}, {pipeline_mode = #tpu.pipeline_mode<synchronous>, transform_indices = @transform_1, window_bounds = array<i64: 96, 16>}, {pipeline_mode = #tpu.pipeline_mode<synchronous>, transform_indices = @transform_2, window_bounds = array<i64: 32, 1>}, {pipeline_mode = #tpu.pipeline_mode<synchronous>, transform_indices = @transform_3, window_bounds = array<i64: 64, 1>}, {pipeline_mode = #tpu.pipeline_mode<synchronous>, transform_indices = @transform_4, window_bounds = array<i64: 1, 1280>}, {pipeline_mode = #tpu.pipeline_mode<synchronous>, transform_indices = @transform_5, window_bounds = array<i64: 256, 1280>}, {pipeline_mode = #tpu.pipeline_mode<synchronous>, transform_indices = @transform_6, window_bounds = array<i64: 256, 1152>}, {pipeline_mode = #tpu.pipeline_mode<synchronous>, transform_indices = @transform_7, window_bounds = array<i64: 32, 288>}, {pipeline_mode = #tpu.pipeline_mode<synchronous>, transform_indices = @transform_8, window_bounds = array<i64: 32, 1>}, {pipeline_mode = #tpu.pipeline_mode<synchronous>, transform_indices = @transform_9, window_bounds = array<i64: 64, 32>}, {pipeline_mode = #tpu.pipeline_mode<synchronous>, transform_indices = @transform_10, window_bounds = array<i64: 64, 1>}, {transform_indices = @transform_11, window_bounds = array<i64: 1, 64, 1152>}]} {
    %c0 = arith.constant 0 : index
    %c0_0 = arith.constant 0 : index
    %c0_1 = arith.constant 0 : index
    %0 = vector.load %arg1[%c0, %c0_0, %c0_1] : memref<1x16x256xbf16, #tpu.memory_space<vmem>>, vector<1x16x256xbf16>
    %1 = vector.shape_cast %0 : vector<1x16x256xbf16> to vector<16x256xbf16>
    %c0_2 = arith.constant 0 : index
    %c0_3 = arith.constant 0 : index
    %2 = vector.load %arg2[%c0_2, %c0_3] : memref<96x16xbf16, #tpu.memory_space<vmem>>, vector<96x16xbf16>
    %cst = arith.constant dense<0.000000e+00> : vector<96x256xf32>
    %3 = tpu.matmul %2, %1, %cst {dimension_numbers = #tpu.dot_dimension_numbers<[1], [0], [0], [1], [0, 0, 1, 1], [], []>} : vector<96x16xbf16>, vector<16x256xbf16>, vector<96x256xf32> -> vector<96x256xf32>
    %c0_4 = arith.constant 0 : index
    %c0_5 = arith.constant 0 : index
    %4 = vector.load %arg3[%c0_4, %c0_5] : memref<32x1xf32, #tpu.memory_space<vmem>>, vector<32x1xf32>
    %cst_6 = arith.constant 0.000000e+00 : f32
    %5 = vector.broadcast %cst_6 : f32 to vector<32x1xf32>
    %6 = arith.maximumf %4, %5 : vector<32x1xf32>
    %7 = vector.extract_strided_slice %3 {offsets = [0, 0], sizes = [32, 256], strides = [1, 1]} : vector<96x256xf32> to vector<32x256xf32>
    %c0_7 = arith.constant 0 : index
    %c0_8 = arith.constant 0 : index
    %8 = vector.load %arg3[%c0_7, %c0_8] : memref<32x1xf32, #tpu.memory_space<vmem>>, vector<32x1xf32>
    %9 = vector.broadcast %8 : vector<32x1xf32> to vector<32x256xf32>
    %10 = arith.addf %7, %9 : vector<32x256xf32>
    %cst_9 = arith.constant 0.000000e+00 : f32
    %11 = vector.broadcast %cst_9 : f32 to vector<32x256xf32>
    %12 = arith.maximumf %10, %11 : vector<32x256xf32>
    %13 = vector.broadcast %6 : vector<32x1xf32> to vector<32x256xf32>
    %14 = arith.subf %12, %13 : vector<32x256xf32>
    %15 = vector.extract_strided_slice %3 {offsets = [32, 0], sizes = [64, 256], strides = [1, 1]} : vector<96x256xf32> to vector<64x256xf32>
    %16 = arith.truncf %14 : vector<32x256xf32> to vector<32x256xbf16>
    %c0_10 = arith.constant 0 : index
    %c0_11 = arith.constant 0 : index
    %17 = vector.load %arg6[%c0_10, %c0_11] : memref<256x1280xbf16, #tpu.memory_space<vmem>>, vector<256x1280xbf16>
    %cst_12 = arith.constant dense<0.000000e+00> : vector<32x1280xf32>
    %18 = tpu.matmul %16, %17, %cst_12 {dimension_numbers = #tpu.dot_dimension_numbers<[1], [0], [0], [1], [0, 0, 1, 1], [], []>} : vector<32x256xbf16>, vector<256x1280xbf16>, vector<32x1280xf32> -> vector<32x1280xf32>
    %c0_13 = arith.constant 0 : index
    %c0_14 = arith.constant 0 : index
    %19 = vector.load %arg5[%c0_13, %c0_14] : memref<1x1280xf32, #tpu.memory_space<vmem>>, vector<1x1280xf32>
    %20 = vector.broadcast %6 : vector<32x1xf32> to vector<32x1280xf32>
    %21 = vector.broadcast %19 : vector<1x1280xf32> to vector<32x1280xf32>
    %22 = arith.mulf %20, %21 : vector<32x1280xf32>
    %23 = arith.addf %18, %22 : vector<32x1280xf32>
    %24 = arith.truncf %23 : vector<32x1280xf32> to vector<32x1280xbf16>
    %c0_15 = arith.constant 0 : index
    %c0_16 = arith.constant 0 : index
    %25 = vector.load %arg13[%c0_15, %c0_16] : memref<32x1280xbf16, #tpu.memory_space<vmem>>, vector<32x1280xbf16>
    tpu.vector_store %arg13[%c0_15, %c0_16], %24 {strides = array<i32>} : memref<32x1280xbf16, #tpu.memory_space<vmem>>, vector<32x1280xbf16>,
    %26 = arith.truncf %15 : vector<64x256xf32> to vector<64x256xbf16>
    %c0_17 = arith.constant 0 : index
    %c0_18 = arith.constant 0 : index
    %27 = vector.load %arg7[%c0_17, %c0_18] : memref<256x1152xbf16, #tpu.memory_space<vmem>>, vector<256x1152xbf16>
    %cst_19 = arith.constant dense<0.000000e+00> : vector<64x1152xf32>
    %28 = tpu.matmul %26, %27, %cst_19 {dimension_numbers = #tpu.dot_dimension_numbers<[1], [0], [0], [1], [0, 0, 1, 1], [], []>} : vector<64x256xbf16>, vector<256x1152xbf16>, vector<64x1152xf32> -> vector<64x1152xf32>
    %c0_20 = arith.constant 0 : index
    %c0_21 = arith.constant 0 : index
    %29 = vector.load %arg4[%c0_20, %c0_21] : memref<64x1xf32, #tpu.memory_space<vmem>>, vector<64x1xf32>
    %30 = vector.broadcast %29 : vector<64x1xf32> to vector<64x1152xf32>
    %31 = arith.addf %28, %30 : vector<64x1152xf32>
    %c0_22 = arith.constant 0 : index
    %c0_23 = arith.constant 0 : index
    %c0_24 = arith.constant 0 : index
    %32 = vector.load %arg12[%c0_22, %c0_23, %c0_24] : memref<1x64x1152xf32, #tpu.memory_space<vmem>>, vector<1x64x1152xf32>
    %33 = vector.shape_cast %32 : vector<1x64x1152xf32> to vector<64x1152xf32>
    %34 = vector.shape_cast %31 : vector<64x1152xf32> to vector<1x64x1152xf32>
    tpu.vector_store %arg12[%c0_22, %c0_23, %c0_24], %34 {strides = array<i32>} : memref<1x64x1152xf32, #tpu.memory_space<vmem>>, vector<1x64x1152xf32>,
    %c0_25 = arith.constant 0 : index
    %c0_26 = arith.constant 0 : index
    %35 = vector.load %arg13[%c0_25, %c0_26] : memref<32x1280xbf16, #tpu.memory_space<vmem>>, vector<32x128xbf16>
    %c0_27 = arith.constant 0 : index
    %c1 = arith.constant 1 : index
    %36 = vector.load %arg13[%c0_27, %c1] : memref<32x1280xbf16, #tpu.memory_space<vmem>>, vector<32x128xbf16>
    %c0_28 = arith.constant 0 : index
    %c2 = arith.constant 2 : index
    %37 = vector.load %arg13[%c0_28, %c2] : memref<32x1280xbf16, #tpu.memory_space<vmem>>, vector<32x128xbf16>
    %c0_29 = arith.constant 0 : index
    %c36 = arith.constant 36 : index
    %38 = vector.load %arg13[%c0_29, %c36] : memref<32x1280xbf16, #tpu.memory_space<vmem>>, vector<32x128xbf16>
    %c0_30 = arith.constant 0 : index
    %c37 = arith.constant 37 : index
    %39 = vector.load %arg13[%c0_30, %c37] : memref<32x1280xbf16, #tpu.memory_space<vmem>>, vector<32x128xbf16>
    %c0_31 = arith.constant 0 : index
    %c38 = arith.constant 38 : index
    %40 = vector.load %arg13[%c0_31, %c38] : memref<32x1280xbf16, #tpu.memory_space<vmem>>, vector<32x128xbf16>
    %c0_32 = arith.constant 0 : index
    %c72 = arith.constant 72 : index
    %41 = vector.load %arg13[%c0_32, %c72] : memref<32x1280xbf16, #tpu.memory_space<vmem>>, vector<32x128xbf16>
    %c0_33 = arith.constant 0 : index
    %c73 = arith.constant 73 : index
    %42 = vector.load %arg13[%c0_33, %c73] : memref<32x1280xbf16, #tpu.memory_space<vmem>>, vector<32x128xbf16>
    %c0_34 = arith.constant 0 : index
    %c74 = arith.constant 74 : index
    %43 = vector.load %arg13[%c0_34, %c74] : memref<32x1280xbf16, #tpu.memory_space<vmem>>, vector<32x128xbf16>
    %44 = tpu.concatenate %35, %36, %37, %38, %39, %40, %41, %42, %43 in 0 : vector<32x128xbf16>, vector<32x128xbf16>, vector<32x128xbf16>, vector<32x128xbf16>, vector<32x128xbf16>, vector<32x128xbf16>, vector<32x128xbf16>, vector<32x128xbf16>, vector<32x128xbf16> -> vector<288x128xbf16>
    %c0_35 = arith.constant 0 : index
    %c0_36 = arith.constant 0 : index
    %45 = vector.load %arg8[%c0_35, %c0_36] : memref<32x288xbf16, #tpu.memory_space<vmem>>, vector<32x288xbf16>
    %cst_37 = arith.constant dense<0.000000e+00> : vector<32x128xf32>
    %46 = tpu.matmul %45, %44, %cst_37 {dimension_numbers = #tpu.dot_dimension_numbers<[1], [0], [0], [1], [0, 0, 1, 1], [], []>} : vector<32x288xbf16>, vector<288x128xbf16>, vector<32x128xf32> -> vector<32x128xf32>
    %c0_38 = arith.constant 0 : index
    %c0_39 = arith.constant 0 : index
    %47 = vector.load %arg9[%c0_38, %c0_39] : memref<32x1xf32, #tpu.memory_space<vmem>>, vector<32x1xf32>
    %48 = vector.broadcast %47 : vector<32x1xf32> to vector<32x128xf32>
    %49 = arith.addf %46, %48 : vector<32x128xf32>
    %cst_40 = arith.constant 0.000000e+00 : f32
    %50 = vector.broadcast %cst_40 : f32 to vector<32x128xf32>
    %51 = arith.maximumf %49, %50 : vector<32x128xf32>
    %c0_41 = arith.constant 0 : index
    %c0_42 = arith.constant 0 : index
    %52 = vector.load %arg10[%c0_41, %c0_42] : memref<64x32xbf16, #tpu.memory_space<vmem>>, vector<64x32xbf16>
    %53 = arith.truncf %51 : vector<32x128xf32> to vector<32x128xbf16>
    %cst_43 = arith.constant dense<0.000000e+00> : vector<64x128xf32>
    %54 = tpu.matmul %52, %53, %cst_43 {dimension_numbers = #tpu.dot_dimension_numbers<[1], [0], [0], [1], [0, 0, 1, 1], [], []>} : vector<64x32xbf16>, vector<32x128xbf16>, vector<64x128xf32> -> vector<64x128xf32>
    %c0_44 = arith.constant 0 : index
    %c0_45 = arith.constant 0 : index
    %55 = vector.load %arg11[%c0_44, %c0_45] : memref<64x1xf32, #tpu.memory_space<vmem>>, vector<64x1xf32>
    %56 = vector.broadcast %55 : vector<64x1xf32> to vector<64x128xf32>
    %57 = arith.addf %54, %56 : vector<64x128xf32>
    %cst_46 = arith.constant 0.000000e+00 : f32
    %58 = vector.broadcast %cst_46 : f32 to vector<64x128xf32>
    %59 = arith.maximumf %57, %58 : vector<64x128xf32>
    %c0_47 = arith.constant 0 : index
    %c0_48 = arith.constant 0 : index
    %c0_49 = arith.constant 0 : index
    %60 = vector.load %arg12[%c0_47, %c0_48, %c0_49] : memref<1x64x1152xf32, #tpu.memory_space<vmem>>, vector<1x64x128xf32>
    %61 = vector.shape_cast %60 : vector<1x64x128xf32> to vector<64x128xf32>
    %62 = arith.addf %61, %59 : vector<64x128xf32>
    %c0_50 = arith.constant 0 : index
    %c0_51 = arith.constant 0 : index
    %c0_52 = arith.constant 0 : index
    %63 = vector.load %arg12[%c0_50, %c0_51, %c0_52] : memref<1x64x1152xf32, #tpu.memory_space<vmem>>, vector<1x64x128xf32>
    %64 = vector.shape_cast %63 : vector<1x64x128xf32> to vector<64x128xf32>
    %65 = vector.shape_cast %62 : vector<64x128xf32> to vector<1x64x128xf32>
    tpu.vector_store %arg12[%c0_50, %c0_51, %c0_52], %65 {strides = array<i32>} : memref<1x64x1152xf32, #tpu.memory_space<vmem>>, vector<1x64x128xf32>,
    %c0_53 = arith.constant 0 : index
    %c128 = arith.constant 128 : index
    %66 = vector.load %arg13[%c0_53, %c128] : memref<32x1280xbf16, #tpu.memory_space<vmem>>, vector<32x128xbf16>
    %c0_54 = arith.constant 0 : index
    %c129 = arith.constant 129 : index
    %67 = vector.load %arg13[%c0_54, %c129] : memref<32x1280xbf16, #tpu.memory_space<vmem>>, vector<32x128xbf16>
    %c0_55 = arith.constant 0 : index
    %c130 = arith.constant 130 : index
    %68 = vector.load %arg13[%c0_55, %c130] : memref<32x1280xbf16, #tpu.memory_space<vmem>>, vector<32x128xbf16>
    %c0_56 = arith.constant 0 : index
    %c164 = arith.constant 164 : index
    %69 = vector.load %arg13[%c0_56, %c164] : memref<32x1280xbf16, #tpu.memory_space<vmem>>, vector<32x128xbf16>
    %c0_57 = arith.constant 0 : index
    %c165 = arith.constant 165 : index
    %70 = vector.load %arg13[%c0_57, %c165] : memref<32x1280xbf16, #tpu.memory_space<vmem>>, vector<32x128xbf16>
    %c0_58 = arith.constant 0 : index
    %c166 = arith.constant 166 : index
    %71 = vector.load %arg13[%c0_58, %c166] : memref<32x1280xbf16, #tpu.memory_space<vmem>>, vector<32x128xbf16>
    %c0_59 = arith.constant 0 : index
    %c200 = arith.constant 200 : index
    %72 = vector.load %arg13[%c0_59, %c200] : memref<32x1280xbf16, #tpu.memory_space<vmem>>, vector<32x128xbf16>
    %c0_60 = arith.constant 0 : index
    %c201 = arith.constant 201 : index
    %73 = vector.load %arg13[%c0_60, %c201] : memref<32x1280xbf16, #tpu.memory_space<vmem>>, vector<32x128xbf16>
    %c0_61 = arith.constant 0 : index
    %c202 = arith.constant 202 : index
    %74 = vector.load %arg13[%c0_61, %c202] : memref<32x1280xbf16, #tpu.memory_space<vmem>>, vector<32x128xbf16>
    %75 = tpu.concatenate %66, %67, %68, %69, %70, %71, %72, %73, %74 in 0 : vector<32x128xbf16>, vector<32x128xbf16>, vector<32x128xbf16>, vector<32x128xbf16>, vector<32x128xbf16>, vector<32x128xbf16>, vector<32x128xbf16>, vector<32x128xbf16>, vector<32x128xbf16> -> vector<288x128xbf16>
    %c0_62 = arith.constant 0 : index
    %c0_63 = arith.constant 0 : index
    %76 = vector.load %arg8[%c0_62, %c0_63] : memref<32x288xbf16, #tpu.memory_space<vmem>>, vector<32x288xbf16>
    %cst_64 = arith.constant dense<0.000000e+00> : vector<32x128xf32>
    %77 = tpu.matmul %76, %75, %cst_64 {dimension_numbers = #tpu.dot_dimension_numbers<[1], [0], [0], [1], [0, 0, 1, 1], [], []>} : vector<32x288xbf16>, vector<288x128xbf16>, vector<32x128xf32> -> vector<32x128xf32>
    %c0_65 = arith.constant 0 : index
    %c0_66 = arith.constant 0 : index
    %78 = vector.load %arg9[%c0_65, %c0_66] : memref<32x1xf32, #tpu.memory_space<vmem>>, vector<32x1xf32>
    %79 = vector.broadcast %78 : vector<32x1xf32> to vector<32x128xf32>
    %80 = arith.addf %77, %79 : vector<32x128xf32>
    %cst_67 = arith.constant 0.000000e+00 : f32
    %81 = vector.broadcast %cst_67 : f32 to vector<32x128xf32>
    %82 = arith.maximumf %80, %81 : vector<32x128xf32>
    %c0_68 = arith.constant 0 : index
    %c0_69 = arith.constant 0 : index
    %83 = vector.load %arg10[%c0_68, %c0_69] : memref<64x32xbf16, #tpu.memory_space<vmem>>, vector<64x32xbf16>
    %84 = arith.truncf %82 : vector<32x128xf32> to vector<32x128xbf16>
    %cst_70 = arith.constant dense<0.000000e+00> : vector<64x128xf32>
    %85 = tpu.matmul %83, %84, %cst_70 {dimension_numbers = #tpu.dot_dimension_numbers<[1], [0], [0], [1], [0, 0, 1, 1], [], []>} : vector<64x32xbf16>, vector<32x128xbf16>, vector<64x128xf32> -> vector<64x128xf32>
    %c0_71 = arith.constant 0 : index
    %c0_72 = arith.constant 0 : index
    %86 = vector.load %arg11[%c0_71, %c0_72] : memref<64x1xf32, #tpu.memory_space<vmem>>, vector<64x1xf32>
    %87 = vector.broadcast %86 : vector<64x1xf32> to vector<64x128xf32>
    %88 = arith.addf %85, %87 : vector<64x128xf32>
    %cst_73 = arith.constant 0.000000e+00 : f32
    %89 = vector.broadcast %cst_73 : f32 to vector<64x128xf32>
    %90 = arith.maximumf %88, %89 : vector<64x128xf32>
    %c0_74 = arith.constant 0 : index
    %c0_75 = arith.constant 0 : index
    %c128_76 = arith.constant 128 : index
    %91 = vector.load %arg12[%c0_74, %c0_75, %c128_76] : memref<1x64x1152xf32, #tpu.memory_space<vmem>>, vector<1x64x128xf32>
    %92 = vector.shape_cast %91 : vector<1x64x128xf32> to vector<64x128xf32>
    %93 = arith.addf %92, %90 : vector<64x128xf32>
    %c0_77 = arith.constant 0 : index
    %c0_78 = arith.constant 0 : index
    %c128_79 = arith.constant 128 : index
    %94 = vector.load %arg12[%c0_77, %c0_78, %c128_79] : memref<1x64x1152xf32, #tpu.memory_space<vmem>>, vector<1x64x128xf32>
    %95 = vector.shape_cast %94 : vector<1x64x128xf32> to vector<64x128xf32>
    %96 = vector.shape_cast %93 : vector<64x128xf32> to vector<1x64x128xf32>
    tpu.vector_store %arg12[%c0_77, %c0_78, %c128_79], %96 {strides = array<i32>} : memref<1x64x1152xf32, #tpu.memory_space<vmem>>, vector<1x64x128xf32>,
    %c0_80 = arith.constant 0 : index
    %c256 = arith.constant 256 : index
    %97 = vector.load %arg13[%c0_80, %c256] : memref<32x1280xbf16, #tpu.memory_space<vmem>>, vector<32x128xbf16>
    %c0_81 = arith.constant 0 : index
    %c257 = arith.constant 257 : index
    %98 = vector.load %arg13[%c0_81, %c257] : memref<32x1280xbf16, #tpu.memory_space<vmem>>, vector<32x128xbf16>
    %c0_82 = arith.constant 0 : index
    %c258 = arith.constant 258 : index
    %99 = vector.load %arg13[%c0_82, %c258] : memref<32x1280xbf16, #tpu.memory_space<vmem>>, vector<32x128xbf16>
    %c0_83 = arith.constant 0 : index
    %c292 = arith.constant 292 : index
    %100 = vector.load %arg13[%c0_83, %c292] : memref<32x1280xbf16, #tpu.memory_space<vmem>>, vector<32x128xbf16>
    %c0_84 = arith.constant 0 : index
    %c293 = arith.constant 293 : index
    %101 = vector.load %arg13[%c0_84, %c293] : memref<32x1280xbf16, #tpu.memory_space<vmem>>, vector<32x128xbf16>
    %c0_85 = arith.constant 0 : index
    %c294 = arith.constant 294 : index
    %102 = vector.load %arg13[%c0_85, %c294] : memref<32x1280xbf16, #tpu.memory_space<vmem>>, vector<32x128xbf16>
    %c0_86 = arith.constant 0 : index
    %c328 = arith.constant 328 : index
    %103 = vector.load %arg13[%c0_86, %c328] : memref<32x1280xbf16, #tpu.memory_space<vmem>>, vector<32x128xbf16>
    %c0_87 = arith.constant 0 : index
    %c329 = arith.constant 329 : index
    %104 = vector.load %arg13[%c0_87, %c329] : memref<32x1280xbf16, #tpu.memory_space<vmem>>, vector<32x128xbf16>
    %c0_88 = arith.constant 0 : index
    %c330 = arith.constant 330 : index
    %105 = vector.load %arg13[%c0_88, %c330] : memref<32x1280xbf16, #tpu.memory_space<vmem>>, vector<32x128xbf16>
    %106 = tpu.concatenate %97, %98, %99, %100, %101, %102, %103, %104, %105 in 0 : vector<32x128xbf16>, vector<32x128xbf16>, vector<32x128xbf16>, vector<32x128xbf16>, vector<32x128xbf16>, vector<32x128xbf16>, vector<32x128xbf16>, vector<32x128xbf16>, vector<32x128xbf16> -> vector<288x128xbf16>
    %c0_89 = arith.constant 0 : index
    %c0_90 = arith.constant 0 : index
    %107 = vector.load %arg8[%c0_89, %c0_90] : memref<32x288xbf16, #tpu.memory_space<vmem>>, vector<32x288xbf16>
    %cst_91 = arith.constant dense<0.000000e+00> : vector<32x128xf32>
    %108 = tpu.matmul %107, %106, %cst_91 {dimension_numbers = #tpu.dot_dimension_numbers<[1], [0], [0], [1], [0, 0, 1, 1], [], []>} : vector<32x288xbf16>, vector<288x128xbf16>, vector<32x128xf32> -> vector<32x128xf32>
    %c0_92 = arith.constant 0 : index
    %c0_93 = arith.constant 0 : index
    %109 = vector.load %arg9[%c0_92, %c0_93] : memref<32x1xf32, #tpu.memory_space<vmem>>, vector<32x1xf32>
    %110 = vector.broadcast %109 : vector<32x1xf32> to vector<32x128xf32>
    %111 = arith.addf %108, %110 : vector<32x128xf32>
    %cst_94 = arith.constant 0.000000e+00 : f32
    %112 = vector.broadcast %cst_94 : f32 to vector<32x128xf32>
    %113 = arith.maximumf %111, %112 : vector<32x128xf32>
    %c0_95 = arith.constant 0 : index
    %c0_96 = arith.constant 0 : index
    %114 = vector.load %arg10[%c0_95, %c0_96] : memref<64x32xbf16, #tpu.memory_space<vmem>>, vector<64x32xbf16>
    %115 = arith.truncf %113 : vector<32x128xf32> to vector<32x128xbf16>
    %cst_97 = arith.constant dense<0.000000e+00> : vector<64x128xf32>
    %116 = tpu.matmul %114, %115, %cst_97 {dimension_numbers = #tpu.dot_dimension_numbers<[1], [0], [0], [1], [0, 0, 1, 1], [], []>} : vector<64x32xbf16>, vector<32x128xbf16>, vector<64x128xf32> -> vector<64x128xf32>
    %c0_98 = arith.constant 0 : index
    %c0_99 = arith.constant 0 : index
    %117 = vector.load %arg11[%c0_98, %c0_99] : memref<64x1xf32, #tpu.memory_space<vmem>>, vector<64x1xf32>
    %118 = vector.broadcast %117 : vector<64x1xf32> to vector<64x128xf32>
    %119 = arith.addf %116, %118 : vector<64x128xf32>
    %cst_100 = arith.constant 0.000000e+00 : f32
    %120 = vector.broadcast %cst_100 : f32 to vector<64x128xf32>
    %121 = arith.maximumf %119, %120 : vector<64x128xf32>
    %c0_101 = arith.constant 0 : index
    %c0_102 = arith.constant 0 : index
    %c256_103 = arith.constant 256 : index
    %122 = vector.load %arg12[%c0_101, %c0_102, %c256_103] : memref<1x64x1152xf32, #tpu.memory_space<vmem>>, vector<1x64x128xf32>
    %123 = vector.shape_cast %122 : vector<1x64x128xf32> to vector<64x128xf32>
    %124 = arith.addf %123, %121 : vector<64x128xf32>
    %c0_104 = arith.constant 0 : index
    %c0_105 = arith.constant 0 : index
    %c256_106 = arith.constant 256 : index
    %125 = vector.load %arg12[%c0_104, %c0_105, %c256_106] : memref<1x64x1152xf32, #tpu.memory_space<vmem>>, vector<1x64x128xf32>
    %126 = vector.shape_cast %125 : vector<1x64x128xf32> to vector<64x128xf32>
    %127 = vector.shape_cast %124 : vector<64x128xf32> to vector<1x64x128xf32>
    tpu.vector_store %arg12[%c0_104, %c0_105, %c256_106], %127 {strides = array<i32>} : memref<1x64x1152xf32, #tpu.memory_space<vmem>>, vector<1x64x128xf32>,
    %c0_107 = arith.constant 0 : index
    %c384 = arith.constant 384 : index
    %128 = vector.load %arg13[%c0_107, %c384] : memref<32x1280xbf16, #tpu.memory_space<vmem>>, vector<32x128xbf16>
    %c0_108 = arith.constant 0 : index
    %c385 = arith.constant 385 : index
    %129 = vector.load %arg13[%c0_108, %c385] : memref<32x1280xbf16, #tpu.memory_space<vmem>>, vector<32x128xbf16>
    %c0_109 = arith.constant 0 : index
    %c386 = arith.constant 386 : index
    %130 = vector.load %arg13[%c0_109, %c386] : memref<32x1280xbf16, #tpu.memory_space<vmem>>, vector<32x128xbf16>
    %c0_110 = arith.constant 0 : index
    %c420 = arith.constant 420 : index
    %131 = vector.load %arg13[%c0_110, %c420] : memref<32x1280xbf16, #tpu.memory_space<vmem>>, vector<32x128xbf16>
    %c0_111 = arith.constant 0 : index
    %c421 = arith.constant 421 : index
    %132 = vector.load %arg13[%c0_111, %c421] : memref<32x1280xbf16, #tpu.memory_space<vmem>>, vector<32x128xbf16>
    %c0_112 = arith.constant 0 : index
    %c422 = arith.constant 422 : index
    %133 = vector.load %arg13[%c0_112, %c422] : memref<32x1280xbf16, #tpu.memory_space<vmem>>, vector<32x128xbf16>
    %c0_113 = arith.constant 0 : index
    %c456 = arith.constant 456 : index
    %134 = vector.load %arg13[%c0_113, %c456] : memref<32x1280xbf16, #tpu.memory_space<vmem>>, vector<32x128xbf16>
    %c0_114 = arith.constant 0 : index
    %c457 = arith.constant 457 : index
    %135 = vector.load %arg13[%c0_114, %c457] : memref<32x1280xbf16, #tpu.memory_space<vmem>>, vector<32x128xbf16>
    %c0_115 = arith.constant 0 : index
    %c458 = arith.constant 458 : index
    %136 = vector.load %arg13[%c0_115, %c458] : memref<32x1280xbf16, #tpu.memory_space<vmem>>, vector<32x128xbf16>
    %137 = tpu.concatenate %128, %129, %130, %131, %132, %133, %134, %135, %136 in 0 : vector<32x128xbf16>, vector<32x128xbf16>, vector<32x128xbf16>, vector<32x128xbf16>, vector<32x128xbf16>, vector<32x128xbf16>, vector<32x128xbf16>, vector<32x128xbf16>, vector<32x128xbf16> -> vector<288x128xbf16>
    %c0_116 = arith.constant 0 : index
    %c0_117 = arith.constant 0 : index
    %138 = vector.load %arg8[%c0_116, %c0_117] : memref<32x288xbf16, #tpu.memory_space<vmem>>, vector<32x288xbf16>
    %cst_118 = arith.constant dense<0.000000e+00> : vector<32x128xf32>
    %139 = tpu.matmul %138, %137, %cst_118 {dimension_numbers = #tpu.dot_dimension_numbers<[1], [0], [0], [1], [0, 0, 1, 1], [], []>} : vector<32x288xbf16>, vector<288x128xbf16>, vector<32x128xf32> -> vector<32x128xf32>
    %c0_119 = arith.constant 0 : index
    %c0_120 = arith.constant 0 : index
    %140 = vector.load %arg9[%c0_119, %c0_120] : memref<32x1xf32, #tpu.memory_space<vmem>>, vector<32x1xf32>
    %141 = vector.broadcast %140 : vector<32x1xf32> to vector<32x128xf32>
    %142 = arith.addf %139, %141 : vector<32x128xf32>
    %cst_121 = arith.constant 0.000000e+00 : f32
    %143 = vector.broadcast %cst_121 : f32 to vector<32x128xf32>
    %144 = arith.maximumf %142, %143 : vector<32x128xf32>
    %c0_122 = arith.constant 0 : index
    %c0_123 = arith.constant 0 : index
    %145 = vector.load %arg10[%c0_122, %c0_123] : memref<64x32xbf16, #tpu.memory_space<vmem>>, vector<64x32xbf16>
    %146 = arith.truncf %144 : vector<32x128xf32> to vector<32x128xbf16>
    %cst_124 = arith.constant dense<0.000000e+00> : vector<64x128xf32>
    %147 = tpu.matmul %145, %146, %cst_124 {dimension_numbers = #tpu.dot_dimension_numbers<[1], [0], [0], [1], [0, 0, 1, 1], [], []>} : vector<64x32xbf16>, vector<32x128xbf16>, vector<64x128xf32> -> vector<64x128xf32>
    %c0_125 = arith.constant 0 : index
    %c0_126 = arith.constant 0 : index
    %148 = vector.load %arg11[%c0_125, %c0_126] : memref<64x1xf32, #tpu.memory_space<vmem>>, vector<64x1xf32>
    %149 = vector.broadcast %148 : vector<64x1xf32> to vector<64x128xf32>
    %150 = arith.addf %147, %149 : vector<64x128xf32>
    %cst_127 = arith.constant 0.000000e+00 : f32
    %151 = vector.broadcast %cst_127 : f32 to vector<64x128xf32>
    %152 = arith.maximumf %150, %151 : vector<64x128xf32>
    %c0_128 = arith.constant 0 : index
    %c0_129 = arith.constant 0 : index
    %c384_130 = arith.constant 384 : index
    %153 = vector.load %arg12[%c0_128, %c0_129, %c384_130] : memref<1x64x1152xf32, #tpu.memory_space<vmem>>, vector<1x64x128xf32>
    %154 = vector.shape_cast %153 : vector<1x64x128xf32> to vector<64x128xf32>
    %155 = arith.addf %154, %152 : vector<64x128xf32>
    %c0_131 = arith.constant 0 : index
    %c0_132 = arith.constant 0 : index
    %c384_133 = arith.constant 384 : index
    %156 = vector.load %arg12[%c0_131, %c0_132, %c384_133] : memref<1x64x1152xf32, #tpu.memory_space<vmem>>, vector<1x64x128xf32>
    %157 = vector.shape_cast %156 : vector<1x64x128xf32> to vector<64x128xf32>
    %158 = vector.shape_cast %155 : vector<64x128xf32> to vector<1x64x128xf32>
    tpu.vector_store %arg12[%c0_131, %c0_132, %c384_133], %158 {strides = array<i32>} : memref<1x64x1152xf32, #tpu.memory_space<vmem>>, vector<1x64x128xf32>,
    %c0_134 = arith.constant 0 : index
    %c512 = arith.constant 512 : index
    %159 = vector.load %arg13[%c0_134, %c512] : memref<32x1280xbf16, #tpu.memory_space<vmem>>, vector<32x128xbf16>
    %c0_135 = arith.constant 0 : index
    %c513 = arith.constant 513 : index
    %160 = vector.load %arg13[%c0_135, %c513] : memref<32x1280xbf16, #tpu.memory_space<vmem>>, vector<32x128xbf16>
    %c0_136 = arith.constant 0 : index
    %c514 = arith.constant 514 : index
    %161 = vector.load %arg13[%c0_136, %c514] : memref<32x1280xbf16, #tpu.memory_space<vmem>>, vector<32x128xbf16>
    %c0_137 = arith.constant 0 : index
    %c548 = arith.constant 548 : index
    %162 = vector.load %arg13[%c0_137, %c548] : memref<32x1280xbf16, #tpu.memory_space<vmem>>, vector<32x128xbf16>
    %c0_138 = arith.constant 0 : index
    %c549 = arith.constant 549 : index
    %163 = vector.load %arg13[%c0_138, %c549] : memref<32x1280xbf16, #tpu.memory_space<vmem>>, vector<32x128xbf16>
    %c0_139 = arith.constant 0 : index
    %c550 = arith.constant 550 : index
    %164 = vector.load %arg13[%c0_139, %c550] : memref<32x1280xbf16, #tpu.memory_space<vmem>>, vector<32x128xbf16>
    %c0_140 = arith.constant 0 : index
    %c584 = arith.constant 584 : index
    %165 = vector.load %arg13[%c0_140, %c584] : memref<32x1280xbf16, #tpu.memory_space<vmem>>, vector<32x128xbf16>
    %c0_141 = arith.constant 0 : index
    %c585 = arith.constant 585 : index
    %166 = vector.load %arg13[%c0_141, %c585] : memref<32x1280xbf16, #tpu.memory_space<vmem>>, vector<32x128xbf16>
    %c0_142 = arith.constant 0 : index
    %c586 = arith.constant 586 : index
    %167 = vector.load %arg13[%c0_142, %c586] : memref<32x1280xbf16, #tpu.memory_space<vmem>>, vector<32x128xbf16>
    %168 = tpu.concatenate %159, %160, %161, %162, %163, %164, %165, %166, %167 in 0 : vector<32x128xbf16>, vector<32x128xbf16>, vector<32x128xbf16>, vector<32x128xbf16>, vector<32x128xbf16>, vector<32x128xbf16>, vector<32x128xbf16>, vector<32x128xbf16>, vector<32x128xbf16> -> vector<288x128xbf16>
    %c0_143 = arith.constant 0 : index
    %c0_144 = arith.constant 0 : index
    %169 = vector.load %arg8[%c0_143, %c0_144] : memref<32x288xbf16, #tpu.memory_space<vmem>>, vector<32x288xbf16>
    %cst_145 = arith.constant dense<0.000000e+00> : vector<32x128xf32>
    %170 = tpu.matmul %169, %168, %cst_145 {dimension_numbers = #tpu.dot_dimension_numbers<[1], [0], [0], [1], [0, 0, 1, 1], [], []>} : vector<32x288xbf16>, vector<288x128xbf16>, vector<32x128xf32> -> vector<32x128xf32>
    %c0_146 = arith.constant 0 : index
    %c0_147 = arith.constant 0 : index
    %171 = vector.load %arg9[%c0_146, %c0_147] : memref<32x1xf32, #tpu.memory_space<vmem>>, vector<32x1xf32>
    %172 = vector.broadcast %171 : vector<32x1xf32> to vector<32x128xf32>
    %173 = arith.addf %170, %172 : vector<32x128xf32>
    %cst_148 = arith.constant 0.000000e+00 : f32
    %174 = vector.broadcast %cst_148 : f32 to vector<32x128xf32>
    %175 = arith.maximumf %173, %174 : vector<32x128xf32>
    %c0_149 = arith.constant 0 : index
    %c0_150 = arith.constant 0 : index
    %176 = vector.load %arg10[%c0_149, %c0_150] : memref<64x32xbf16, #tpu.memory_space<vmem>>, vector<64x32xbf16>
    %177 = arith.truncf %175 : vector<32x128xf32> to vector<32x128xbf16>
    %cst_151 = arith.constant dense<0.000000e+00> : vector<64x128xf32>
    %178 = tpu.matmul %176, %177, %cst_151 {dimension_numbers = #tpu.dot_dimension_numbers<[1], [0], [0], [1], [0, 0, 1, 1], [], []>} : vector<64x32xbf16>, vector<32x128xbf16>, vector<64x128xf32> -> vector<64x128xf32>
    %c0_152 = arith.constant 0 : index
    %c0_153 = arith.constant 0 : index
    %179 = vector.load %arg11[%c0_152, %c0_153] : memref<64x1xf32, #tpu.memory_space<vmem>>, vector<64x1xf32>
    %180 = vector.broadcast %179 : vector<64x1xf32> to vector<64x128xf32>
    %181 = arith.addf %178, %180 : vector<64x128xf32>
    %cst_154 = arith.constant 0.000000e+00 : f32
    %182 = vector.broadcast %cst_154 : f32 to vector<64x128xf32>
    %183 = arith.maximumf %181, %182 : vector<64x128xf32>
    %c0_155 = arith.constant 0 : index
    %c0_156 = arith.constant 0 : index
    %c512_157 = arith.constant 512 : index
    %184 = vector.load %arg12[%c0_155, %c0_156, %c512_157] : memref<1x64x1152xf32, #tpu.memory_space<vmem>>, vector<1x64x128xf32>
    %185 = vector.shape_cast %184 : vector<1x64x128xf32> to vector<64x128xf32>
    %186 = arith.addf %185, %183 : vector<64x128xf32>
    %c0_158 = arith.constant 0 : index
    %c0_159 = arith.constant 0 : index
    %c512_160 = arith.constant 512 : index
    %187 = vector.load %arg12[%c0_158, %c0_159, %c512_160] : memref<1x64x1152xf32, #tpu.memory_space<vmem>>, vector<1x64x128xf32>
    %188 = vector.shape_cast %187 : vector<1x64x128xf32> to vector<64x128xf32>
    %189 = vector.shape_cast %186 : vector<64x128xf32> to vector<1x64x128xf32>
    tpu.vector_store %arg12[%c0_158, %c0_159, %c512_160], %189 {strides = array<i32>} : memref<1x64x1152xf32, #tpu.memory_space<vmem>>, vector<1x64x128xf32>,
    %c0_161 = arith.constant 0 : index
    %c640 = arith.constant 640 : index
    %190 = vector.load %arg13[%c0_161, %c640] : memref<32x1280xbf16, #tpu.memory_space<vmem>>, vector<32x128xbf16>
    %c0_162 = arith.constant 0 : index
    %c641 = arith.constant 641 : index
    %191 = vector.load %arg13[%c0_162, %c641] : memref<32x1280xbf16, #tpu.memory_space<vmem>>, vector<32x128xbf16>
    %c0_163 = arith.constant 0 : index
    %c642 = arith.constant 642 : index
    %192 = vector.load %arg13[%c0_163, %c642] : memref<32x1280xbf16, #tpu.memory_space<vmem>>, vector<32x128xbf16>
    %c0_164 = arith.constant 0 : index
    %c676 = arith.constant 676 : index
    %193 = vector.load %arg13[%c0_164, %c676] : memref<32x1280xbf16, #tpu.memory_space<vmem>>, vector<32x128xbf16>
    %c0_165 = arith.constant 0 : index
    %c677 = arith.constant 677 : index
    %194 = vector.load %arg13[%c0_165, %c677] : memref<32x1280xbf16, #tpu.memory_space<vmem>>, vector<32x128xbf16>
    %c0_166 = arith.constant 0 : index
    %c678 = arith.constant 678 : index
    %195 = vector.load %arg13[%c0_166, %c678] : memref<32x1280xbf16, #tpu.memory_space<vmem>>, vector<32x128xbf16>
    %c0_167 = arith.constant 0 : index
    %c712 = arith.constant 712 : index
    %196 = vector.load %arg13[%c0_167, %c712] : memref<32x1280xbf16, #tpu.memory_space<vmem>>, vector<32x128xbf16>
    %c0_168 = arith.constant 0 : index
    %c713 = arith.constant 713 : index
    %197 = vector.load %arg13[%c0_168, %c713] : memref<32x1280xbf16, #tpu.memory_space<vmem>>, vector<32x128xbf16>
    %c0_169 = arith.constant 0 : index
    %c714 = arith.constant 714 : index
    %198 = vector.load %arg13[%c0_169, %c714] : memref<32x1280xbf16, #tpu.memory_space<vmem>>, vector<32x128xbf16>
    %199 = tpu.concatenate %190, %191, %192, %193, %194, %195, %196, %197, %198 in 0 : vector<32x128xbf16>, vector<32x128xbf16>, vector<32x128xbf16>, vector<32x128xbf16>, vector<32x128xbf16>, vector<32x128xbf16>, vector<32x128xbf16>, vector<32x128xbf16>, vector<32x128xbf16> -> vector<288x128xbf16>
    %c0_170 = arith.constant 0 : index
    %c0_171 = arith.constant 0 : index
    %200 = vector.load %arg8[%c0_170, %c0_171] : memref<32x288xbf16, #tpu.memory_space<vmem>>, vector<32x288xbf16>
    %cst_172 = arith.constant dense<0.000000e+00> : vector<32x128xf32>
    %201 = tpu.matmul %200, %199, %cst_172 {dimension_numbers = #tpu.dot_dimension_numbers<[1], [0], [0], [1], [0, 0, 1, 1], [], []>} : vector<32x288xbf16>, vector<288x128xbf16>, vector<32x128xf32> -> vector<32x128xf32>
    %c0_173 = arith.constant 0 : index
    %c0_174 = arith.constant 0 : index
    %202 = vector.load %arg9[%c0_173, %c0_174] : memref<32x1xf32, #tpu.memory_space<vmem>>, vector<32x1xf32>
    %203 = vector.broadcast %202 : vector<32x1xf32> to vector<32x128xf32>
    %204 = arith.addf %201, %203 : vector<32x128xf32>
    %cst_175 = arith.constant 0.000000e+00 : f32
    %205 = vector.broadcast %cst_175 : f32 to vector<32x128xf32>
    %206 = arith.maximumf %204, %205 : vector<32x128xf32>
    %c0_176 = arith.constant 0 : index
    %c0_177 = arith.constant 0 : index
    %207 = vector.load %arg10[%c0_176, %c0_177] : memref<64x32xbf16, #tpu.memory_space<vmem>>, vector<64x32xbf16>
    %208 = arith.truncf %206 : vector<32x128xf32> to vector<32x128xbf16>
    %cst_178 = arith.constant dense<0.000000e+00> : vector<64x128xf32>
    %209 = tpu.matmul %207, %208, %cst_178 {dimension_numbers = #tpu.dot_dimension_numbers<[1], [0], [0], [1], [0, 0, 1, 1], [], []>} : vector<64x32xbf16>, vector<32x128xbf16>, vector<64x128xf32> -> vector<64x128xf32>
    %c0_179 = arith.constant 0 : index
    %c0_180 = arith.constant 0 : index
    %210 = vector.load %arg11[%c0_179, %c0_180] : memref<64x1xf32, #tpu.memory_space<vmem>>, vector<64x1xf32>
    %211 = vector.broadcast %210 : vector<64x1xf32> to vector<64x128xf32>
    %212 = arith.addf %209, %211 : vector<64x128xf32>
    %cst_181 = arith.constant 0.000000e+00 : f32
    %213 = vector.broadcast %cst_181 : f32 to vector<64x128xf32>
    %214 = arith.maximumf %212, %213 : vector<64x128xf32>
    %c0_182 = arith.constant 0 : index
    %c0_183 = arith.constant 0 : index
    %c640_184 = arith.constant 640 : index
    %215 = vector.load %arg12[%c0_182, %c0_183, %c640_184] : memref<1x64x1152xf32, #tpu.memory_space<vmem>>, vector<1x64x128xf32>
    %216 = vector.shape_cast %215 : vector<1x64x128xf32> to vector<64x128xf32>
    %217 = arith.addf %216, %214 : vector<64x128xf32>
    %c0_185 = arith.constant 0 : index
    %c0_186 = arith.constant 0 : index
    %c640_187 = arith.constant 640 : index
    %218 = vector.load %arg12[%c0_185, %c0_186, %c640_187] : memref<1x64x1152xf32, #tpu.memory_space<vmem>>, vector<1x64x128xf32>
    %219 = vector.shape_cast %218 : vector<1x64x128xf32> to vector<64x128xf32>
    %220 = vector.shape_cast %217 : vector<64x128xf32> to vector<1x64x128xf32>
    tpu.vector_store %arg12[%c0_185, %c0_186, %c640_187], %220 {strides = array<i32>} : memref<1x64x1152xf32, #tpu.memory_space<vmem>>, vector<1x64x128xf32>,
    %c0_188 = arith.constant 0 : index
    %c768 = arith.constant 768 : index
    %221 = vector.load %arg13[%c0_188, %c768] : memref<32x1280xbf16, #tpu.memory_space<vmem>>, vector<32x128xbf16>
    %c0_189 = arith.constant 0 : index
    %c769 = arith.constant 769 : index
    %222 = vector.load %arg13[%c0_189, %c769] : memref<32x1280xbf16, #tpu.memory_space<vmem>>, vector<32x128xbf16>
    %c0_190 = arith.constant 0 : index
    %c770 = arith.constant 770 : index
    %223 = vector.load %arg13[%c0_190, %c770] : memref<32x1280xbf16, #tpu.memory_space<vmem>>, vector<32x128xbf16>
    %c0_191 = arith.constant 0 : index
    %c804 = arith.constant 804 : index
    %224 = vector.load %arg13[%c0_191, %c804] : memref<32x1280xbf16, #tpu.memory_space<vmem>>, vector<32x128xbf16>
    %c0_192 = arith.constant 0 : index
    %c805 = arith.constant 805 : index
    %225 = vector.load %arg13[%c0_192, %c805] : memref<32x1280xbf16, #tpu.memory_space<vmem>>, vector<32x128xbf16>
    %c0_193 = arith.constant 0 : index
    %c806 = arith.constant 806 : index
    %226 = vector.load %arg13[%c0_193, %c806] : memref<32x1280xbf16, #tpu.memory_space<vmem>>, vector<32x128xbf16>
    %c0_194 = arith.constant 0 : index
    %c840 = arith.constant 840 : index
    %227 = vector.load %arg13[%c0_194, %c840] : memref<32x1280xbf16, #tpu.memory_space<vmem>>, vector<32x128xbf16>
    %c0_195 = arith.constant 0 : index
    %c841 = arith.constant 841 : index
    %228 = vector.load %arg13[%c0_195, %c841] : memref<32x1280xbf16, #tpu.memory_space<vmem>>, vector<32x128xbf16>
    %c0_196 = arith.constant 0 : index
    %c842 = arith.constant 842 : index
    %229 = vector.load %arg13[%c0_196, %c842] : memref<32x1280xbf16, #tpu.memory_space<vmem>>, vector<32x128xbf16>
    %230 = tpu.concatenate %221, %222, %223, %224, %225, %226, %227, %228, %229 in 0 : vector<32x128xbf16>, vector<32x128xbf16>, vector<32x128xbf16>, vector<32x128xbf16>, vector<32x128xbf16>, vector<32x128xbf16>, vector<32x128xbf16>, vector<32x128xbf16>, vector<32x128xbf16> -> vector<288x128xbf16>
    %c0_197 = arith.constant 0 : index
    %c0_198 = arith.constant 0 : index
    %231 = vector.load %arg8[%c0_197, %c0_198] : memref<32x288xbf16, #tpu.memory_space<vmem>>, vector<32x288xbf16>
    %cst_199 = arith.constant dense<0.000000e+00> : vector<32x128xf32>
    %232 = tpu.matmul %231, %230, %cst_199 {dimension_numbers = #tpu.dot_dimension_numbers<[1], [0], [0], [1], [0, 0, 1, 1], [], []>} : vector<32x288xbf16>, vector<288x128xbf16>, vector<32x128xf32> -> vector<32x128xf32>
    %c0_200 = arith.constant 0 : index
    %c0_201 = arith.constant 0 : index
    %233 = vector.load %arg9[%c0_200, %c0_201] : memref<32x1xf32, #tpu.memory_space<vmem>>, vector<32x1xf32>
    %234 = vector.broadcast %233 : vector<32x1xf32> to vector<32x128xf32>
    %235 = arith.addf %232, %234 : vector<32x128xf32>
    %cst_202 = arith.constant 0.000000e+00 : f32
    %236 = vector.broadcast %cst_202 : f32 to vector<32x128xf32>
    %237 = arith.maximumf %235, %236 : vector<32x128xf32>
    %c0_203 = arith.constant 0 : index
    %c0_204 = arith.constant 0 : index
    %238 = vector.load %arg10[%c0_203, %c0_204] : memref<64x32xbf16, #tpu.memory_space<vmem>>, vector<64x32xbf16>
    %239 = arith.truncf %237 : vector<32x128xf32> to vector<32x128xbf16>
    %cst_205 = arith.constant dense<0.000000e+00> : vector<64x128xf32>
    %240 = tpu.matmul %238, %239, %cst_205 {dimension_numbers = #tpu.dot_dimension_numbers<[1], [0], [0], [1], [0, 0, 1, 1], [], []>} : vector<64x32xbf16>, vector<32x128xbf16>, vector<64x128xf32> -> vector<64x128xf32>
    %c0_206 = arith.constant 0 : index
    %c0_207 = arith.constant 0 : index
    %241 = vector.load %arg11[%c0_206, %c0_207] : memref<64x1xf32, #tpu.memory_space<vmem>>, vector<64x1xf32>
    %242 = vector.broadcast %241 : vector<64x1xf32> to vector<64x128xf32>
    %243 = arith.addf %240, %242 : vector<64x128xf32>
    %cst_208 = arith.constant 0.000000e+00 : f32
    %244 = vector.broadcast %cst_208 : f32 to vector<64x128xf32>
    %245 = arith.maximumf %243, %244 : vector<64x128xf32>
    %c0_209 = arith.constant 0 : index
    %c0_210 = arith.constant 0 : index
    %c768_211 = arith.constant 768 : index
    %246 = vector.load %arg12[%c0_209, %c0_210, %c768_211] : memref<1x64x1152xf32, #tpu.memory_space<vmem>>, vector<1x64x128xf32>
    %247 = vector.shape_cast %246 : vector<1x64x128xf32> to vector<64x128xf32>
    %248 = arith.addf %247, %245 : vector<64x128xf32>
    %c0_212 = arith.constant 0 : index
    %c0_213 = arith.constant 0 : index
    %c768_214 = arith.constant 768 : index
    %249 = vector.load %arg12[%c0_212, %c0_213, %c768_214] : memref<1x64x1152xf32, #tpu.memory_space<vmem>>, vector<1x64x128xf32>
    %250 = vector.shape_cast %249 : vector<1x64x128xf32> to vector<64x128xf32>
    %251 = vector.shape_cast %248 : vector<64x128xf32> to vector<1x64x128xf32>
    tpu.vector_store %arg12[%c0_212, %c0_213, %c768_214], %251 {strides = array<i32>} : memref<1x64x1152xf32, #tpu.memory_space<vmem>>, vector<1x64x128xf32>,
    %c0_215 = arith.constant 0 : index
    %c896 = arith.constant 896 : index
    %252 = vector.load %arg13[%c0_215, %c896] : memref<32x1280xbf16, #tpu.memory_space<vmem>>, vector<32x128xbf16>
    %c0_216 = arith.constant 0 : index
    %c897 = arith.constant 897 : index
    %253 = vector.load %arg13[%c0_216, %c897] : memref<32x1280xbf16, #tpu.memory_space<vmem>>, vector<32x128xbf16>
    %c0_217 = arith.constant 0 : index
    %c898 = arith.constant 898 : index
    %254 = vector.load %arg13[%c0_217, %c898] : memref<32x1280xbf16, #tpu.memory_space<vmem>>, vector<32x128xbf16>
    %c0_218 = arith.constant 0 : index
    %c932 = arith.constant 932 : index
    %255 = vector.load %arg13[%c0_218, %c932] : memref<32x1280xbf16, #tpu.memory_space<vmem>>, vector<32x128xbf16>
    %c0_219 = arith.constant 0 : index
    %c933 = arith.constant 933 : index
    %256 = vector.load %arg13[%c0_219, %c933] : memref<32x1280xbf16, #tpu.memory_space<vmem>>, vector<32x128xbf16>
    %c0_220 = arith.constant 0 : index
    %c934 = arith.constant 934 : index
    %257 = vector.load %arg13[%c0_220, %c934] : memref<32x1280xbf16, #tpu.memory_space<vmem>>, vector<32x128xbf16>
    %c0_221 = arith.constant 0 : index
    %c968 = arith.constant 968 : index
    %258 = vector.load %arg13[%c0_221, %c968] : memref<32x1280xbf16, #tpu.memory_space<vmem>>, vector<32x128xbf16>
    %c0_222 = arith.constant 0 : index
    %c969 = arith.constant 969 : index
    %259 = vector.load %arg13[%c0_222, %c969] : memref<32x1280xbf16, #tpu.memory_space<vmem>>, vector<32x128xbf16>
    %c0_223 = arith.constant 0 : index
    %c970 = arith.constant 970 : index
    %260 = vector.load %arg13[%c0_223, %c970] : memref<32x1280xbf16, #tpu.memory_space<vmem>>, vector<32x128xbf16>
    %261 = tpu.concatenate %252, %253, %254, %255, %256, %257, %258, %259, %260 in 0 : vector<32x128xbf16>, vector<32x128xbf16>, vector<32x128xbf16>, vector<32x128xbf16>, vector<32x128xbf16>, vector<32x128xbf16>, vector<32x128xbf16>, vector<32x128xbf16>, vector<32x128xbf16> -> vector<288x128xbf16>
    %c0_224 = arith.constant 0 : index
    %c0_225 = arith.constant 0 : index
    %262 = vector.load %arg8[%c0_224, %c0_225] : memref<32x288xbf16, #tpu.memory_space<vmem>>, vector<32x288xbf16>
    %cst_226 = arith.constant dense<0.000000e+00> : vector<32x128xf32>
    %263 = tpu.matmul %262, %261, %cst_226 {dimension_numbers = #tpu.dot_dimension_numbers<[1], [0], [0], [1], [0, 0, 1, 1], [], []>} : vector<32x288xbf16>, vector<288x128xbf16>, vector<32x128xf32> -> vector<32x128xf32>
    %c0_227 = arith.constant 0 : index
    %c0_228 = arith.constant 0 : index
    %264 = vector.load %arg9[%c0_227, %c0_228] : memref<32x1xf32, #tpu.memory_space<vmem>>, vector<32x1xf32>
    %265 = vector.broadcast %264 : vector<32x1xf32> to vector<32x128xf32>
    %266 = arith.addf %263, %265 : vector<32x128xf32>
    %cst_229 = arith.constant 0.000000e+00 : f32
    %267 = vector.broadcast %cst_229 : f32 to vector<32x128xf32>
    %268 = arith.maximumf %266, %267 : vector<32x128xf32>
    %c0_230 = arith.constant 0 : index
    %c0_231 = arith.constant 0 : index
    %269 = vector.load %arg10[%c0_230, %c0_231] : memref<64x32xbf16, #tpu.memory_space<vmem>>, vector<64x32xbf16>
    %270 = arith.truncf %268 : vector<32x128xf32> to vector<32x128xbf16>
    %cst_232 = arith.constant dense<0.000000e+00> : vector<64x128xf32>
    %271 = tpu.matmul %269, %270, %cst_232 {dimension_numbers = #tpu.dot_dimension_numbers<[1], [0], [0], [1], [0, 0, 1, 1], [], []>} : vector<64x32xbf16>, vector<32x128xbf16>, vector<64x128xf32> -> vector<64x128xf32>
    %c0_233 = arith.constant 0 : index
    %c0_234 = arith.constant 0 : index
    %272 = vector.load %arg11[%c0_233, %c0_234] : memref<64x1xf32, #tpu.memory_space<vmem>>, vector<64x1xf32>
    %273 = vector.broadcast %272 : vector<64x1xf32> to vector<64x128xf32>
    %274 = arith.addf %271, %273 : vector<64x128xf32>
    %cst_235 = arith.constant 0.000000e+00 : f32
    %275 = vector.broadcast %cst_235 : f32 to vector<64x128xf32>
    %276 = arith.maximumf %274, %275 : vector<64x128xf32>
    %c0_236 = arith.constant 0 : index
    %c0_237 = arith.constant 0 : index
    %c896_238 = arith.constant 896 : index
    %277 = vector.load %arg12[%c0_236, %c0_237, %c896_238] : memref<1x64x1152xf32, #tpu.memory_space<vmem>>, vector<1x64x128xf32>
    %278 = vector.shape_cast %277 : vector<1x64x128xf32> to vector<64x128xf32>
    %279 = arith.addf %278, %276 : vector<64x128xf32>
    %c0_239 = arith.constant 0 : index
    %c0_240 = arith.constant 0 : index
    %c896_241 = arith.constant 896 : index
    %280 = vector.load %arg12[%c0_239, %c0_240, %c896_241] : memref<1x64x1152xf32, #tpu.memory_space<vmem>>, vector<1x64x128xf32>
    %281 = vector.shape_cast %280 : vector<1x64x128xf32> to vector<64x128xf32>
    %282 = vector.shape_cast %279 : vector<64x128xf32> to vector<1x64x128xf32>
    tpu.vector_store %arg12[%c0_239, %c0_240, %c896_241], %282 {strides = array<i32>} : memref<1x64x1152xf32, #tpu.memory_space<vmem>>, vector<1x64x128xf32>,
    %c0_242 = arith.constant 0 : index
    %c1024 = arith.constant 1024 : index
    %283 = vector.load %arg13[%c0_242, %c1024] : memref<32x1280xbf16, #tpu.memory_space<vmem>>, vector<32x128xbf16>
    %c0_243 = arith.constant 0 : index
    %c1025 = arith.constant 1025 : index
    %284 = vector.load %arg13[%c0_243, %c1025] : memref<32x1280xbf16, #tpu.memory_space<vmem>>, vector<32x128xbf16>
    %c0_244 = arith.constant 0 : index
    %c1026 = arith.constant 1026 : index
    %285 = vector.load %arg13[%c0_244, %c1026] : memref<32x1280xbf16, #tpu.memory_space<vmem>>, vector<32x128xbf16>
    %c0_245 = arith.constant 0 : index
    %c1060 = arith.constant 1060 : index
    %286 = vector.load %arg13[%c0_245, %c1060] : memref<32x1280xbf16, #tpu.memory_space<vmem>>, vector<32x128xbf16>
    %c0_246 = arith.constant 0 : index
    %c1061 = arith.constant 1061 : index
    %287 = vector.load %arg13[%c0_246, %c1061] : memref<32x1280xbf16, #tpu.memory_space<vmem>>, vector<32x128xbf16>
    %c0_247 = arith.constant 0 : index
    %c1062 = arith.constant 1062 : index
    %288 = vector.load %arg13[%c0_247, %c1062] : memref<32x1280xbf16, #tpu.memory_space<vmem>>, vector<32x128xbf16>
    %c0_248 = arith.constant 0 : index
    %c1096 = arith.constant 1096 : index
    %289 = vector.load %arg13[%c0_248, %c1096] : memref<32x1280xbf16, #tpu.memory_space<vmem>>, vector<32x128xbf16>
    %c0_249 = arith.constant 0 : index
    %c1097 = arith.constant 1097 : index
    %290 = vector.load %arg13[%c0_249, %c1097] : memref<32x1280xbf16, #tpu.memory_space<vmem>>, vector<32x128xbf16>
    %c0_250 = arith.constant 0 : index
    %c1098 = arith.constant 1098 : index
    %291 = vector.load %arg13[%c0_250, %c1098] : memref<32x1280xbf16, #tpu.memory_space<vmem>>, vector<32x128xbf16>
    %292 = tpu.concatenate %283, %284, %285, %286, %287, %288, %289, %290, %291 in 0 : vector<32x128xbf16>, vector<32x128xbf16>, vector<32x128xbf16>, vector<32x128xbf16>, vector<32x128xbf16>, vector<32x128xbf16>, vector<32x128xbf16>, vector<32x128xbf16>, vector<32x128xbf16> -> vector<288x128xbf16>
    %c0_251 = arith.constant 0 : index
    %c0_252 = arith.constant 0 : index
    %293 = vector.load %arg8[%c0_251, %c0_252] : memref<32x288xbf16, #tpu.memory_space<vmem>>, vector<32x288xbf16>
    %cst_253 = arith.constant dense<0.000000e+00> : vector<32x128xf32>
    %294 = tpu.matmul %293, %292, %cst_253 {dimension_numbers = #tpu.dot_dimension_numbers<[1], [0], [0], [1], [0, 0, 1, 1], [], []>} : vector<32x288xbf16>, vector<288x128xbf16>, vector<32x128xf32> -> vector<32x128xf32>
    %c0_254 = arith.constant 0 : index
    %c0_255 = arith.constant 0 : index
    %295 = vector.load %arg9[%c0_254, %c0_255] : memref<32x1xf32, #tpu.memory_space<vmem>>, vector<32x1xf32>
    %296 = vector.broadcast %295 : vector<32x1xf32> to vector<32x128xf32>
    %297 = arith.addf %294, %296 : vector<32x128xf32>
    %cst_256 = arith.constant 0.000000e+00 : f32
    %298 = vector.broadcast %cst_256 : f32 to vector<32x128xf32>
    %299 = arith.maximumf %297, %298 : vector<32x128xf32>
    %c0_257 = arith.constant 0 : index
    %c0_258 = arith.constant 0 : index
    %300 = vector.load %arg10[%c0_257, %c0_258] : memref<64x32xbf16, #tpu.memory_space<vmem>>, vector<64x32xbf16>
    %301 = arith.truncf %299 : vector<32x128xf32> to vector<32x128xbf16>
    %cst_259 = arith.constant dense<0.000000e+00> : vector<64x128xf32>
    %302 = tpu.matmul %300, %301, %cst_259 {dimension_numbers = #tpu.dot_dimension_numbers<[1], [0], [0], [1], [0, 0, 1, 1], [], []>} : vector<64x32xbf16>, vector<32x128xbf16>, vector<64x128xf32> -> vector<64x128xf32>
    %c0_260 = arith.constant 0 : index
    %c0_261 = arith.constant 0 : index
    %303 = vector.load %arg11[%c0_260, %c0_261] : memref<64x1xf32, #tpu.memory_space<vmem>>, vector<64x1xf32>
    %304 = vector.broadcast %303 : vector<64x1xf32> to vector<64x128xf32>
    %305 = arith.addf %302, %304 : vector<64x128xf32>
    %cst_262 = arith.constant 0.000000e+00 : f32
    %306 = vector.broadcast %cst_262 : f32 to vector<64x128xf32>
    %307 = arith.maximumf %305, %306 : vector<64x128xf32>
    %c0_263 = arith.constant 0 : index
    %c0_264 = arith.constant 0 : index
    %c1024_265 = arith.constant 1024 : index
    %308 = vector.load %arg12[%c0_263, %c0_264, %c1024_265] : memref<1x64x1152xf32, #tpu.memory_space<vmem>>, vector<1x64x128xf32>
    %309 = vector.shape_cast %308 : vector<1x64x128xf32> to vector<64x128xf32>
    %310 = arith.addf %309, %307 : vector<64x128xf32>
    %c0_266 = arith.constant 0 : index
    %c0_267 = arith.constant 0 : index
    %c1024_268 = arith.constant 1024 : index
    %311 = vector.load %arg12[%c0_266, %c0_267, %c1024_268] : memref<1x64x1152xf32, #tpu.memory_space<vmem>>, vector<1x64x128xf32>
    %312 = vector.shape_cast %311 : vector<1x64x128xf32> to vector<64x128xf32>
    %313 = vector.shape_cast %310 : vector<64x128xf32> to vector<1x64x128xf32>
    tpu.vector_store %arg12[%c0_266, %c0_267, %c1024_268], %313 {strides = array<i32>} : memref<1x64x1152xf32, #tpu.memory_space<vmem>>, vector<1x64x128xf32>,
    return
  }
  func.func @transform_0(%arg0: i32) -> (i32, i32, i32) {
    %c0_i32 = arith.constant 0 : i32
    %c0_i32_0 = arith.constant 0 : i32
    %c0_i32_1 = arith.constant 0 : i32
    return %arg0, %c0_i32, %c0_i32_0 : i32, i32, i32
  }
  func.func @transform_1(%arg0: i32) -> (i32, i32) {
    %c0_i32 = arith.constant 0 : i32
    %c0_i32_0 = arith.constant 0 : i32
    %c0_i32_1 = arith.constant 0 : i32
    return %c0_i32, %c0_i32_0 : i32, i32
  }
  func.func @transform_2(%arg0: i32) -> (i32, i32) {
    %c0_i32 = arith.constant 0 : i32
    %c0_i32_0 = arith.constant 0 : i32
    %c0_i32_1 = arith.constant 0 : i32
    return %c0_i32, %c0_i32_0 : i32, i32
  }
  func.func @transform_3(%arg0: i32) -> (i32, i32) {
    %c0_i32 = arith.constant 0 : i32
    %c0_i32_0 = arith.constant 0 : i32
    %c0_i32_1 = arith.constant 0 : i32
    return %c0_i32, %c0_i32_0 : i32, i32
  }
  func.func @transform_4(%arg0: i32) -> (i32, i32) {
    %c0_i32 = arith.constant 0 : i32
    %c0_i32_0 = arith.constant 0 : i32
    %c0_i32_1 = arith.constant 0 : i32
    return %c0_i32, %c0_i32_0 : i32, i32
  }
  func.func @transform_5(%arg0: i32) -> (i32, i32) {
    %c0_i32 = arith.constant 0 : i32
    %c0_i32_0 = arith.constant 0 : i32
    %c0_i32_1 = arith.constant 0 : i32
    return %c0_i32, %c0_i32_0 : i32, i32
  }
  func.func @transform_6(%arg0: i32) -> (i32, i32) {
    %c0_i32 = arith.constant 0 : i32
    %c0_i32_0 = arith.constant 0 : i32
    %c0_i32_1 = arith.constant 0 : i32
    return %c0_i32, %c0_i32_0 : i32, i32
  }
  func.func @transform_7(%arg0: i32) -> (i32, i32) {
    %c0_i32 = arith.constant 0 : i32
    %c0_i32_0 = arith.constant 0 : i32
    %c0_i32_1 = arith.constant 0 : i32
    return %c0_i32, %c0_i32_0 : i32, i32
  }
  func.func @transform_8(%arg0: i32) -> (i32, i32) {
    %c0_i32 = arith.constant 0 : i32
    %c0_i32_0 = arith.constant 0 : i32
    %c0_i32_1 = arith.constant 0 : i32
    return %c0_i32, %c0_i32_0 : i32, i32
  }
  func.func @transform_9(%arg0: i32) -> (i32, i32) {
    %c0_i32 = arith.constant 0 : i32
    %c0_i32_0 = arith.constant 0 : i32
    %c0_i32_1 = arith.constant 0 : i32
    return %c0_i32, %c0_i32_0 : i32, i32
  }
  func.func @transform_10(%arg0: i32) -> (i32, i32) {
    %c0_i32 = arith.constant 0 : i32
    %c0_i32_0 = arith.constant 0 : i32
    %c0_i32_1 = arith.constant 0 : i32
    return %c0_i32, %c0_i32_0 : i32, i32
  }
  func.func @transform_11(%arg0: i32) -> (i32, i32, i32) {
    %c0_i32 = arith.constant 0 : i32
    %c0_i32_0 = arith.constant 0 : i32
    %c0_i32_1 = arith.constant 0 : i32
    return %arg0, %c0_i32, %c0_i32_0 : i32, i32, i32
  }
}

</mosaic_0001>

<bundles_post_ra>
// kernel: resnet_dec_block_forward.1
= control target key start
LH: loop header
LB: loop body
LE: loop exit
PB: predicated region body
PF: predicated region fallthrough
CT: control target
= control target key end

     0   :  { %s9834_s17 = smov 0   ;;  %s14711_s0 = inlined_call_operand.vmem [shape: bf16[2,16,256], index: 0, kind: input, shape index: {}]   ;;  %s14712_s1 = inlined_call_operand.vmem [shape: bf16[96,16], index: 1, kind: input, shape index: {}]   ;;  %s14713_s2 = inlined_call_operand.vmem [shape: f32[32,1], index: 2, kind: input, shape index: {}]   ;;  %s14714_s3 = inlined_call_operand.vmem [shape: f32[64,1], index: 3, kind: input, shape index: {}]   ;;  %s14715_s4 = inlined_call_operand.vmem [shape: f32[1,1280], index: 4, kind: input, shape index: {}]   ;;  %s14716_s5 = inlined_call_operand.vmem [shape: bf16[256,1280], index: 5, kind: input, shape index: {}]   ;;  %s14717_s6 = inlined_call_operand.vmem [shape: bf16[256,1152], index: 6, kind: input, shape index: {}]   ;;  %s14718_s7 = inlined_call_operand.vmem [shape: bf16[32,288], index: 7, kind: input, shape index: {}]   ;;  %s14719_s8 = inlined_call_operand.vmem [shape: f32[32,1], index: 8, kind: input, shape index: {}]   ;;  %s14720_s9 = inlined_call_operand.vmem [shape: bf16[64,32], index: 9, kind: input, shape index: {}]   ;;  %s14721_s10 = inlined_call_operand.vmem [shape: f32[64,1], index: 10, kind: input, shape index: {}]   ;;  %s14722_s11 = inlined_call_operand.vmem [shape: f32[2,64,1152], index: 11, kind: output, shape index: {}]  }
   0x1 LB: > { %s7377_s18 = sadd.s32 4294967295, %s9763_s17   ;;  %p7381_p0 = scmp.ge.s32.totalorder %s9763_s17, 1  ;;  %s9763_s17 = sphi %s9834_s17, %s21_s17  }
   0x2   : > { %p337_p1 = scmp.lt.s32.totalorder %s9763_s17, 3 }
   0x4   : > { %p338_p2 = pnand %p7381_p0, %p337_p1 }
   0x6   : > { %341 = sbr.rel (%p338_p2) target bundleno = 1855 (0x73f), region = 64 }
   0xb   : > { %v539_v0 = vld [vmem:[%s14713_s2] sm:$0xff]  ;;  %p377_p3 = scmp.lt.s32.totalorder %s7377_s18, 1  ;;  %v9765_v1 = vmov 0   ;;  %v541_v3 = vld [vmem:[%s14713_s2 + $0x10] sm:$0xff]  ;;  %v540_v4 = vld [vmem:[%s14713_s2 + $0x8] sm:$0xff]  ;;  %vm442_vm0 = vcmask 130048  }
   0xc   : > { %9753 = vset.pattern.permute.xlu0 %v9765_v1  ;;  %9754 = vset.pattern.permute.xlu1 %v9765_v1  ;;  %v543_v2 = vmax.f32 %v539_v0, 0.0  ;;  %v544_v10 = vmax.f32 %v540_v4, 0.0  ;;  %v9280_v12 = vld [vmem:[%s14712_s1] sm:$0xff]  ;;  %v542_v13 = vld [vmem:[%s14713_s2 + $0x18] sm:$0xff]  ;;  %v545_v17 = vmax.f32 %v541_v3, 0.0  ;;  %v2228_v20 = vld [vmem:[%s14714_s3 + $0x8] sm:$0xff] }
   0xd   : > { %549 = vperm.xlu0 %9753, %v539_v0   ;;  %s14806_s18 = smov (!%p377_p3, %s7377_s18), 1  ;;  %9755 = vset.pattern.permute.xlu2 %v9765_v1  ;;  %v9357_v14 = vld [vmem:[%s14716_s5 + $0x23c] sm:$0xf]  ;;  %v7721_v15 = vld [vmem:[%s14716_s5 + $0x260] sm:$0xf0]  ;;  %v546_v18 = vmax.f32 %v542_v13, 0.0 }
   0xe   : > { %585 = vperm.xlu1 %9754, %v543_v2   ;;  %559 = vperm.xlu2 %9755, %v541_v3   ;;  %s9277_s23 = sshll.u32 %s14806_s18, 4  ;;  %v7724_v16 = vor.u32 %v9357_v14, %v7721_v15  ;;  %v2227_v19 = vld [vmem:[%s14714_s3] sm:$0xff]  ;;  %v2229_v21 = vld [vmem:[%s14714_s3 + $0x10] sm:$0xff]  ;;  %v9281_v22 = vld [vmem:[%s14712_s1 + $0x8] sm:$0xff]  ;;  %s9766_s26 = smov 127   ;;  %vm3675_vm1 = vcmask 752640  }
   0xf   : > { %s381_s28 = scalar_lea.vmem %s14711_s0, %s9277_s23  ;;  %v2230_v23 = vld [vmem:[%s14714_s3 + $0x18] sm:$0xff]  ;;  %v9347_v24 = vld [vmem:[%s14716_s5 + $0x1ec] sm:$0xf]  ;;  %v7681_v25 = vld [vmem:[%s14716_s5 + $0x210] sm:$0xf0]  ;;  %s9767_s27 = smov 126  }
  0x10   : > { %v7411_v5 = vld [vmem:[%s381_s28] sm:$0xf]  ;;  %v9279_v6 = vld [vmem:[%s381_s28 + $0x4] sm:$0xf0]  ;;  %v9278_v7 = vld [vmem:[%s381_s28 + $0x4] sm:$0xf]  ;;  %v7684_v27 = vor.u32 %v9347_v24, %v7681_v25 }
  0x11   : > { %v7412_v8 = vor.u32 %v9279_v6, %v7411_v5  ;;  %v7413_v9 = vld [vmem:[%s381_s28 + $0x8] sm:$0xf0]  ;;  %v9284_v26 = vld [vmem:[%s14712_s1 + $0x20] sm:$0xff]  ;;  %v2233_v30 = vld [vmem:[%s14714_s3 + $0x30] sm:$0xff]  ;;  %s9768_s16 = smov 92   ;;  %s9769_s23 = smov 91  }
  0x12   : > { %v7416_v11 = vor.u32 %v9278_v7, %v7413_v9  ;;  %v2231_v28 = vld [vmem:[%s14714_s3 + $0x20] sm:$0xff]  ;;  %v2232_v29 = vld [vmem:[%s14714_s3 + $0x28] sm:$0xff]  ;;  %v2234_v31 = vld [vmem:[%s14714_s3 + $0x38] sm:$0xff]  ;;  %s14725_s13 = smov 90   ;;  %s14723_s28 = smov 56   ;;  %vm3662_vm2 = vcmask 1031168  }
  0x13   : > { %468 = vmatpush.bf16.msra.mxu0 %v7412_v8  ;;  %v9282_v32 = vld [vmem:[%s14712_s1 + $0x10] sm:$0xff]  ;;  %v9283_v33 = vld [vmem:[%s14712_s1 + $0x18] sm:$0xff]  ;;  %v7641_v35 = vld [vmem:[%s14716_s5 + $0x1c0] sm:$0xf0]  ;;  %s9772_s29 = smov 55   ;;  %s9735_s30 = smul.u32 576, %s14806_s18 }
  0x14   : > { %507 = vmatpush.bf16.msra.mxu1 %v7416_v11  ;;  %9734 = vmatpush.bf16.msra.mxu2 %v7416_v11  ;;  %v9337_v34 = vld [vmem:[%s14716_s5 + $0x19c] sm:$0xf]  ;;  %v7711_v36 = vld [vmem:[%s14716_s5 + $0x230] sm:$0xf]  ;;  %v9361_v38 = vld [vmem:[%s14716_s5 + $0x254] sm:$0xf0] }
  0x15   : > { %554 = vperm.xlu0 %9753, %v540_v4   ;;  %v7644_v37 = vor.u32 %v9337_v34, %v7641_v35  ;;  %v8031_v39 = vld [vmem:[%s14716_s5 + $0x4b0] sm:$0xf]  ;;  %v9441_v40 = vld [vmem:[%s14716_s5 + $0x4d4] sm:$0xf0]  ;;  %v7712_v41 = vor.u32 %v9361_v38, %v7711_v36  ;;  %v9437_v43 = vld [vmem:[%s14716_s5 + $0x4bc] sm:$0xf] }
  0x16   : > { %590 = vperm.xlu1 %9754, %v544_v10   ;;  %564 = vperm.xlu2 %9755, %v542_v13   ;;  %v8032_v42 = vor.u32 %v9441_v40, %v8031_v39  ;;  %v8041_v44 = vld [vmem:[%s14716_s5 + $0x4e0] sm:$0xf0]  ;;  %v7671_v46 = vld [vmem:[%s14716_s5 + $0x1e0] sm:$0xf]  ;;  %v9351_v47 = vld [vmem:[%s14716_s5 + $0x204] sm:$0xf0] }
  0x17   : > { %7417 = vmatmul.msk.bf16.vlgmr.msra.gmra.mxu0 %vm442_vm0, %v9280_v12  ;;  %7423 = vmatmul.msk.bf16.vlgmr.msra.gmra.mxu1 %vm442_vm0, %v9280_v12  ;;  %v8044_v45 = vor.u32 %v9437_v43, %v8041_v44  ;;  %v7991_v48 = vld [vmem:[%s14716_s5 + $0x460] sm:$0xf]  ;;  %v7672_v49 = vor.u32 %v9351_v47, %v7671_v46  ;;  %v9431_v50 = vld [vmem:[%s14716_s5 + $0x484] sm:$0xf0]  ;;  %v9427_v51 = vld [vmem:[%s14716_s5 + $0x46c] sm:$0xf] }
  0x18   : > { %1753 = vmatpush.bf16.msrb.mxu0 %v7724_v16  ;;  %7427 = vmatmul.msk.bf16.vlgmr.msra.gmra.mxu2 %vm442_vm0, %v9284_v26  ;;  %v8001_v52 = vld [vmem:[%s14716_s5 + $0x490] sm:$0xf0]  ;;  %v7992_v53 = vor.u32 %v9431_v50, %v7991_v48  ;;  %v9285_v55 = vld [vmem:[%s14712_s1 + $0x28] sm:$0xff]  ;;  %v7631_v56 = vld [vmem:[%s14716_s5 + $0x190] sm:$0xf]  ;;  %s9773_s15 = smov 54  }
  0x19   : > { %1639 = vmatpush.bf16.msrb.mxu2 %v7712_v41  ;;  %1658 = vmatpush.bf16.msra.mxu3 %v8032_v42  ;;  %v8004_v54 = vor.u32 %v9427_v51, %v8001_v52  ;;  %v9341_v57 = vld [vmem:[%s14716_s5 + $0x1b4] sm:$0xf0]  ;;  %v7951_v59 = vld [vmem:[%s14716_s5 + $0x410] sm:$0xf]  ;;  %v9327_v61 = vld [vmem:[%s14716_s5 + $0x14c] sm:$0xf] }
  0x1a   : > { %1772 = vmatpush.bf16.msrb.mxu1 %v8044_v45  ;;  %v7632_v58 = vor.u32 %v9341_v57, %v7631_v56  ;;  %v9421_v60 = vld [vmem:[%s14716_s5 + $0x434] sm:$0xf0]  ;;  %v7601_v63 = vld [vmem:[%s14716_s5 + $0x170] sm:$0xf0]  ;;  %v9417_v0 = vld [vmem:[%s14716_s5 + $0x41c] sm:$0xf] }
  0x1b   : > { %v7952_v62 = vor.u32 %v9421_v60, %v7951_v59  ;;  %v7961_v1 = vld [vmem:[%s14716_s5 + $0x440] sm:$0xf0]  ;;  %v7604_v2 = vor.u32 %v9327_v61, %v7601_v63  ;;  %v7591_v4 = vld [vmem:[%s14716_s5 + $0x140] sm:$0xf]  ;;  %v9331_v5 = vld [vmem:[%s14716_s5 + $0x164] sm:$0xf0] }
  0x1c   : > { %1754 = vmatpush.bf16.msrb.mxu0 %v7684_v27  ;;  %v7964_v3 = vor.u32 %v9417_v0, %v7961_v1  ;;  %v7911_v6 = vld [vmem:[%s14716_s5 + $0x3c0] sm:$0xf]  ;;  %v7592_v7 = vor.u32 %v9331_v5, %v7591_v4  ;;  %v9411_v8 = vld [vmem:[%s14716_s5 + $0x3e4] sm:$0xf0]  ;;  %v9407_v9 = vld [vmem:[%s14716_s5 + $0x3cc] sm:$0xf] }
  0x1d   : > { %595 = vperm.xlu0 %9753, %v545_v17   ;;  %1640 = vmatpush.bf16.msrb.mxu2 %v7672_v49  ;;  %v7921_v10 = vld [vmem:[%s14716_s5 + $0x3f0] sm:$0xf0]  ;;  %v7912_v11 = vor.u32 %v9411_v8, %v7911_v6  ;;  %v7551_v13 = vld [vmem:[%s14716_s5 + $0xf0] sm:$0xf]  ;;  %v9321_v14 = vld [vmem:[%s14716_s5 + $0x114] sm:$0xf0] }
  0x1e   : > { %600 = vperm.xlu1 %9754, %v546_v18   ;;  %2237 = vperm.xlu2 %9755, %v2227_v19   ;;  %v7924_v12 = vor.u32 %v9407_v9, %v7921_v10  ;;  %v7871_v15 = vld [vmem:[%s14716_s5 + $0x370] sm:$0xf]  ;;  %v7552_v16 = vor.u32 %v9321_v14, %v7551_v13  ;;  %v9401_v17 = vld [vmem:[%s14716_s5 + $0x394] sm:$0xf0]  ;;  %v9317_v18 = vld [vmem:[%s14716_s5 + $0xfc] sm:$0xf] }
  0x1f   : > { %1659 = vmatpush.bf16.msra.mxu3 %v7992_v53  ;;  %1773 = vmatpush.bf16.msrb.mxu1 %v8004_v54  ;;  %v7561_v19 = vld [vmem:[%s14716_s5 + $0x120] sm:$0xf0]  ;;  %v7511_v25 = vld [vmem:[%s14716_s5 + $0xa0] sm:$0xf]  ;;  %v9387_v34 = vld [vmem:[%s14716_s5 + $0x32c] sm:$0xf] }
  0x20   : > { %1755 = vmatpush.bf16.msrb.mxu0 %v7644_v37  ;;  %v7831_v27 = vld [vmem:[%s14716_s5 + $0x320] sm:$0xf]  ;;  %v7841_v35 = vld [vmem:[%s14716_s5 + $0x350] sm:$0xf0]  ;;  %v7471_v37 = vld [vmem:[%s14716_s5 + $0x50] sm:$0xf] }
  0x21   : > { %1641 = vmatpush.bf16.msrb.mxu2 %v7632_v58  ;;  %v7844_v36 = vor.u32 %v9387_v34, %v7841_v35  ;;  %v9301_v38 = vld [vmem:[%s14716_s5 + $0x74] sm:$0xf0]  ;;  %v7791_v39 = vld [vmem:[%s14716_s5 + $0x2d0] sm:$0xf]  ;;  %v9297_v42 = vld [vmem:[%s14716_s5 + $0x5c] sm:$0xf] }
  0x22   : > { %v7472_v40 = vor.u32 %v9301_v38, %v7471_v37  ;;  %v9381_v41 = vld [vmem:[%s14716_s5 + $0x2f4] sm:$0xf0]  ;;  %v7481_v43 = vld [vmem:[%s14716_s5 + $0x80] sm:$0xf0]  ;;  %v9377_v46 = vld [vmem:[%s14716_s5 + $0x2dc] sm:$0xf] }
  0x23   : > { %1660 = vmatpush.bf16.msra.mxu3 %v7952_v62  ;;  %1774 = vmatpush.bf16.msrb.mxu1 %v7964_v3  ;;  %v7792_v44 = vor.u32 %v9381_v41, %v7791_v39  ;;  %v7484_v45 = vor.u32 %v9297_v42, %v7481_v43  ;;  %v7801_v47 = vld [vmem:[%s14716_s5 + $0x300] sm:$0xf0]  ;;  %v7431_v49 = vld [vmem:[%s14716_s5] sm:$0xf]  ;;  %v9291_v50 = vld [vmem:[%s14716_s5 + $0x24] sm:$0xf0] }
  0x24   : > { %1756 = vmatpush.bf16.msrb.mxu0 %v7604_v2  ;;  %v7804_v48 = vor.u32 %v9377_v46, %v7801_v47  ;;  %v7751_v51 = vld [vmem:[%s14716_s5 + $0x280] sm:$0xf]  ;;  %v7432_v52 = vor.u32 %v9291_v50, %v7431_v49  ;;  %v9371_v53 = vld [vmem:[%s14716_s5 + $0x2a4] sm:$0xf0]  ;;  %v9287_v54 = vld [vmem:[%s14716_s5 + $0xc] sm:$0xf] }
  0x25   : > { %2242 = vperm.xlu0 %9753, %v2228_v20   ;;  %1642 = vmatpush.bf16.msrb.mxu2 %v7592_v7  ;;  %v7872_v20 = vor.u32 %v9401_v17, %v7871_v15  ;;  %v7752_v56 = vor.u32 %v9371_v53, %v7751_v51  ;;  %v9367_v58 = vld [vmem:[%s14716_s5 + $0x28c] sm:$0xf]  ;;  %v7761_v59 = vld [vmem:[%s14716_s5 + $0x2b0] sm:$0xf0]  ;;  %v7713_v62 = vld [vmem:[%s14716_s5 + $0x258] sm:$0xf0] }
  0x26   : > { %2247 = vperm.xlu1 %9754, %v2229_v21   ;;  %2252 = vperm.xlu2 %9755, %v2230_v23   ;;  %v7564_v21 = vor.u32 %v9317_v18, %v7561_v19  ;;  %v7881_v23 = vld [vmem:[%s14716_s5 + $0x3a0] sm:$0xf0]  ;;  %v7764_v60 = vor.u32 %v9367_v58, %v7761_v59  ;;  %v9356_v61 = vld [vmem:[%s14716_s5 + $0x234] sm:$0xf]  ;;  %v8033_v1 = vld [vmem:[%s14716_s5 + $0x4d8] sm:$0xf0] }
  0x27   : > { %7418 = vmatmul.msk.bf16.gmra.mxu0 %vm442_vm0, %v9281_v22  ;;  %7424 = vmatmul.msk.bf16.gmra.mxu1 %vm442_vm0, %v9281_v22  ;;  %v9397_v22 = vld [vmem:[%s14716_s5 + $0x37c] sm:$0xf]  ;;  %v9436_v63 = vld [vmem:[%s14716_s5 + $0x4b4] sm:$0xf]  ;;  %v7716_v0 = vor.u32 %v9356_v61, %v7713_v62  ;;  %v9358_v2 = vld [vmem:[%s14716_s5 + $0x244] sm:$0xf] }
  0x28   : > { %7428 = vmatmul.msk.bf16.gmra.mxu2 %vm442_vm0, %v9285_v55  ;;  %1661 = vmatpush.bf16.msra.mxu3 %v7912_v11  ;;  %v7884_v24 = vor.u32 %v9397_v22, %v7881_v23  ;;  %v7729_v3 = vld [vmem:[%s14716_s5 + $0x268] sm:$0xf0]  ;;  %v8036_v4 = vor.u32 %v9436_v63, %v8033_v1  ;;  %v9438_v6 = vld [vmem:[%s14716_s5 + $0x4c4] sm:$0xf]  ;;  %v9348_v14 = vld [vmem:[%s14716_s5 + $0x1f4] sm:$0xf] }
  0x29   : > { %1775 = vmatpush.bf16.msrb.mxu1 %v7924_v12  ;;  %1643 = vmatpush.bf16.msrb.mxu2 %v7552_v16  ;;  %v7732_v5 = vor.u32 %v9358_v2, %v7729_v3  ;;  %v8049_v7 = vld [vmem:[%s14716_s5 + $0x4e8] sm:$0xf0]  ;;  %v9346_v9 = vld [vmem:[%s14716_s5 + $0x1e4] sm:$0xf]  ;;  %v7689_v15 = vld [vmem:[%s14716_s5 + $0x218] sm:$0xf0] }
  0x2a   : > { %1757 = vmatpush.bf16.msrb.mxu0 %v7564_v21  ;;  %v8052_v8 = vor.u32 %v9438_v6, %v8049_v7  ;;  %v7673_v10 = vld [vmem:[%s14716_s5 + $0x208] sm:$0xf0]  ;;  %v9426_v11 = vld [vmem:[%s14716_s5 + $0x464] sm:$0xf]  ;;  %v7692_v17 = vor.u32 %v9348_v14, %v7689_v15  ;;  %v9428_v18 = vld [vmem:[%s14716_s5 + $0x474] sm:$0xf] }
  0x2b   : > { %v7676_v12 = vor.u32 %v9346_v9, %v7673_v10  ;;  %v7993_v13 = vld [vmem:[%s14716_s5 + $0x488] sm:$0xf0]  ;;  %v8009_v19 = vld [vmem:[%s14716_s5 + $0x498] sm:$0xf0]  ;;  %v9336_v21 = vld [vmem:[%s14716_s5 + $0x194] sm:$0xf] }
  0x2c   : > { %1662 = vmatpush.bf16.msra.mxu3 %v7872_v20  ;;  %v7996_v16 = vor.u32 %v9426_v11, %v7993_v13  ;;  %v8012_v20 = vor.u32 %v9428_v18, %v8009_v19  ;;  %v7633_v22 = vld [vmem:[%s14716_s5 + $0x1b8] sm:$0xf0]  ;;  %v9416_v23 = vld [vmem:[%s14716_s5 + $0x414] sm:$0xf]  ;;  %v7593_v34 = vld [vmem:[%s14716_s5 + $0x168] sm:$0xf0] }
  0x2d   : > { %2257 = vperm.xlu0 %9753, %v2231_v28   ;;  %1776 = vmatpush.bf16.msrb.mxu1 %v7884_v24  ;;  %v7636_v24 = vor.u32 %v9336_v21, %v7633_v22  ;;  %v9406_v35 = vld [vmem:[%s14716_s5 + $0x3c4] sm:$0xf]  ;;  %v7913_v37 = vld [vmem:[%s14716_s5 + $0x3e8] sm:$0xf0]  ;;  %v9328_v38 = vld [vmem:[%s14716_s5 + $0x154] sm:$0xf] }
  0x2e   : > { %2262 = vperm.xlu1 %9754, %v2232_v29   ;;  %2267 = vperm.xlu2 %9755, %v2233_v30   ;;  %v9391_v29 = vld [vmem:[%s14716_s5 + $0x344] sm:$0xf0]  ;;  %v9307_v30 = vld [vmem:[%s14716_s5 + $0xac] sm:$0xf]  ;;  %v7609_v39 = vld [vmem:[%s14716_s5 + $0x178] sm:$0xf0]  ;;  %v7916_v41 = vor.u32 %v9406_v35, %v7913_v37 }
  0x2f   : > { %v7612_v42 = vor.u32 %v9328_v38, %v7609_v39  ;;  %v9408_v43 = vld [vmem:[%s14716_s5 + $0x3d4] sm:$0xf]  ;;  %v7873_v53 = vld [vmem:[%s14716_s5 + $0x398] sm:$0xf0]  ;;  %v9398_v59 = vld [vmem:[%s14716_s5 + $0x384] sm:$0xf] }
  0x30   : > { %v9316_v47 = vld [vmem:[%s14716_s5 + $0xf4] sm:$0xf]  ;;  %v9306_v61 = vld [vmem:[%s14716_s5 + $0xa4] sm:$0xf]  ;;  %v7513_v63 = vld [vmem:[%s14716_s5 + $0xc8] sm:$0xf0] }
  0x31   : > { %1777 = vmatpush.bf16.msrb.mxu1 %v7844_v36  ;;  %v9396_v49 = vld [vmem:[%s14716_s5 + $0x374] sm:$0xf]  ;;  %v7516_v2 = vor.u32 %v9306_v61, %v7513_v63  ;;  %v7833_v3 = vld [vmem:[%s14716_s5 + $0x348] sm:$0xf0]  ;;  %v7529_v6 = vld [vmem:[%s14716_s5 + $0xd8] sm:$0xf0] }
  0x32   : > { %v9388_v7 = vld [vmem:[%s14716_s5 + $0x334] sm:$0xf]  ;;  %v7473_v13 = vld [vmem:[%s14716_s5 + $0x78] sm:$0xf0]  ;;  %v7489_v18 = vld [vmem:[%s14716_s5 + $0x88] sm:$0xf0] }
  0x33   : > { %v9376_v14 = vld [vmem:[%s14716_s5 + $0x2d4] sm:$0xf]  ;;  %v7449_v35 = vld [vmem:[%s14716_s5 + $0x38] sm:$0xf0]  ;;  %v9359_v61 = vld [vmem:[%s14716_s5 + $0x24c] sm:$0xf] }
  0x34   : > { %s14737_s20 = smov 56   ;;  %vm3649_vm3 = vcmask 1039360   ;;  %vm3727_vm4 = vcmask 449536   ;;  %vm3714_vm5 = vcmask 457728   ;;  %vm3740_vm6 = vcmask 441344   ;;  %s14748_s22 = smov 90  }
  0x35   : > { %2272 = vperm.xlu0 %9753, %v2234_v31   ;;  %v7521_v31 = vld [vmem:[%s14716_s5 + $0xd0] sm:$0xf0]  ;;  %1778 = vmatpush.bf16.msrb.mxu1 %v7804_v48  ;;  %v7553_v48 = vld [vmem:[%s14716_s5 + $0x118] sm:$0xf0]  ;;  %vm3701_vm7 = vcmask 736256   ;;  %vm3688_vm8 = vcmask 744448  }
  0x36   : > { %vm3807_vm9 = vcmask 261120  }
  0x37   : > { %7419 = vmatmul.msk.bf16.gmra.mxu0 %vm442_vm0, %v9282_v32  ;;  %7425 = vmatmul.msk.bf16.gmra.mxu1 %vm442_vm0, %v9282_v32  ;;  %v7832_v32 = vor.u32 %v9391_v29, %v7831_v27  ;;  %v7649_v27 = vld [vmem:[%s14716_s5 + $0x1c8] sm:$0xf0] }
  0x39   : > { %1663 = vmatpush.bf16.msra.mxu3 %v7832_v32  ;;  %1779 = vmatpush.bf16.msrb.mxu1 %v7764_v60  ;;  %v7889_v60 = vld [vmem:[%s14716_s5 + $0x3a8] sm:$0xf0] }
  0x3a   : > { %v7892_v62 = vor.u32 %v9398_v59, %v7889_v60  ;;  %v9442_v60 = vld [vmem:[%s14716_s5 + $0x4dc] sm:$0xf0] }
  0x3d   : > { %1664 = vmatpush.bf16.msra.mxu3 %v7792_v44  ;;  %1848 = vmatpush.bf16.msra.mxu1 %v8052_v8  ;;  %v7929_v44 = vld [vmem:[%s14716_s5 + $0x3f8] sm:$0xf0] }
  0x3e   : > { %v7849_v8 = vld [vmem:[%s14716_s5 + $0x358] sm:$0xf0] }
  0x3f   : > { %v7852_v11 = vor.u32 %v9388_v7, %v7849_v8 }
  0x41   : > { %1665 = vmatpush.bf16.msra.mxu3 %v7752_v56  ;;  %1849 = vmatpush.bf16.msra.mxu1 %v8012_v20 }
  0x45   : > { %1696 = vmatpush.bf16.msrb.mxu3 %v8036_v4  ;;  %v9308_v4 = vld [vmem:[%s14716_s5 + $0xb4] sm:$0xf] }
  0x46   : > { %v7532_v10 = vor.u32 %v9308_v4, %v7529_v6  ;;  %v7999_v6 = vld [vmem:[%s14716_s5 + $0x468] sm:$0xf] }
  0x47   : > { %7420 = vmatmul.msk.bf16.gmra.mxu0 %vm442_vm0, %v9283_v33  ;;  %7426 = vmatmul.msk.bf16.gmra.mxu1 %vm442_vm0, %v9283_v33  ;;  %v7524_v33 = vor.u32 %v9307_v30, %v7521_v31  ;;  %v9418_v30 = vld [vmem:[%s14716_s5 + $0x424] sm:$0xf]  ;;  %v7969_v31 = vld [vmem:[%s14716_s5 + $0x448] sm:$0xf0] }
  0x48   : > { %v7972_v32 = vor.u32 %v9418_v30, %v7969_v31  ;;  %v9366_v30 = vld [vmem:[%s14716_s5 + $0x284] sm:$0xf]  ;;  %v7753_v31 = vld [vmem:[%s14716_s5 + $0x2a8] sm:$0xf0] }
  0x49   : > { %1758 = vmatpush.bf16.msrb.mxu0 %v7524_v33  ;;  %1697 = vmatpush.bf16.msrb.mxu3 %v7996_v16  ;;  %v9326_v33 = vld [vmem:[%s14716_s5 + $0x144] sm:$0xf]  ;;  %v7793_v16 = vld [vmem:[%s14716_s5 + $0x2f8] sm:$0xf0] }
  0x4a   : > { %1850 = vmatpush.bf16.msra.mxu1 %v7972_v32  ;;  %v7596_v36 = vor.u32 %v9326_v33, %v7593_v34  ;;  %v7796_v21 = vor.u32 %v9376_v14, %v7793_v16  ;;  %v9288_v34 = vld [vmem:[%s14716_s5 + $0x14] sm:$0xf]  ;;  %v8017_v14 = vld [vmem:[%s14716_s5 + $0x4a0] sm:$0xf0] }
  0x4d   : > { %1759 = vmatpush.bf16.msrb.mxu0 %v7484_v45  ;;  %v7932_v45 = vor.u32 %v9408_v43, %v7929_v44  ;;  %v7769_v43 = vld [vmem:[%s14716_s5 + $0x2b8] sm:$0xf0] }
  0x4f   : > { %1851 = vmatpush.bf16.msra.mxu1 %v7932_v45 }
  0x53   : > { %1852 = vmatpush.bf16.msra.mxu1 %v7892_v62  ;;  %v7737_v62 = vld [vmem:[%s14716_s5 + $0x270] sm:$0xf0] }
  0x57   : > { %7421 = vmatmul.msk.bf16.gmra.mxu0 %vm442_vm0, %v9284_v26  ;;  %v9311_v26 = vld [vmem:[%s14716_s5 + $0xc4] sm:$0xf0]  ;;  %1853 = vmatpush.bf16.msra.mxu1 %v7852_v11 }
  0x58   : > { %v7512_v28 = vor.u32 %v9311_v26, %v7511_v25  ;;  %v7953_v25 = vld [vmem:[%s14716_s5 + $0x438] sm:$0xf0]  ;;  %v9338_v26 = vld [vmem:[%s14716_s5 + $0x1a4] sm:$0xf] }
  0x59   : > { %v7652_v29 = vor.u32 %v9338_v26, %v7649_v27 }
  0x5a   : > { %1644 = vmatpush.bf16.msrb.mxu2 %v7512_v28  ;;  %v7956_v28 = vor.u32 %v9416_v23, %v7953_v25  ;;  %v9378_v23 = vld [vmem:[%s14716_s5 + $0x2e4] sm:$0xf] }
  0x5b   : > { %v9286_v25 = vld [vmem:[%s14716_s5 + $0x4] sm:$0xf] }
  0x5c   : > { %1698 = vmatpush.bf16.msrb.mxu3 %v7956_v28 }
  0x5e   : > { %1645 = vmatpush.bf16.msrb.mxu2 %v7472_v40 }
  0x60   : > { %1699 = vmatpush.bf16.msrb.mxu3 %v7916_v41  ;;  %v7452_v41 = vor.u32 %v9288_v34, %v7449_v35  ;;  %v9332_v35 = vld [vmem:[%s14716_s5 + $0x16c] sm:$0xf0] }
  0x62   : > { %1646 = vmatpush.bf16.msrb.mxu2 %v7432_v52  ;;  %v7556_v52 = vor.u32 %v9316_v47, %v7553_v48 }
  0x66   : > { %1677 = vmatpush.bf16.msra.mxu2 %v7716_v0  ;;  %v9386_v0 = vld [vmem:[%s14716_s5 + $0x324] sm:$0xf] }
  0x67   : > { %7422 = vmatmul.msk.bf16.gmra.mxu0 %vm442_vm0, %v9285_v55  ;;  %v7441_v55 = vld [vmem:[%s14716_s5 + $0x30] sm:$0xf0] }
  0x68   : > { %v7444_v57 = vor.u32 %v9287_v54, %v7441_v55  ;;  %v9318_v54 = vld [vmem:[%s14716_s5 + $0x104] sm:$0xf]  ;;  %v7569_v55 = vld [vmem:[%s14716_s5 + $0x128] sm:$0xf0] }
  0x69   : > { %v7572_v58 = vor.u32 %v9318_v54, %v7569_v55  ;;  %v9362_v54 = vld [vmem:[%s14716_s5 + $0x25c] sm:$0xf0]  ;;  %v8039_v55 = vld [vmem:[%s14716_s5 + $0x4b8] sm:$0xf] }
  0x6a   : > { %1760 = vmatpush.bf16.msrb.mxu0 %v7444_v57  ;;  %1678 = vmatpush.bf16.msra.mxu2 %v7676_v12  ;;  %v7876_v57 = vor.u32 %v9396_v49, %v7873_v53  ;;  %v9296_v12 = vld [vmem:[%s14716_s5 + $0x54] sm:$0xf]  ;;  %v7719_v53 = vld [vmem:[%s14716_s5 + $0x238] sm:$0xf]  ;;  %v8040_v63 = vor.u32 %v9442_v60, %v8039_v55 }
  0x6b   : > { %v7476_v15 = vor.u32 %v9296_v12, %v7473_v13  ;;  %v7720_v59 = vor.u32 %v9362_v54, %v7719_v53  ;;  %v7697_v12 = vld [vmem:[%s14716_s5 + $0x220] sm:$0xf0]  ;;  %v9429_v13 = vld [vmem:[%s14716_s5 + $0x47c] sm:$0xf] }
  0x6c   : > { %1700 = vmatpush.bf16.msrb.mxu3 %v7876_v57  ;;  %v7937_v53 = vld [vmem:[%s14716_s5 + $0x400] sm:$0xf0] }
  0x6e   : > { %1829 = vmatpush.bf16.msra.mxu0 %v7732_v5  ;;  %1679 = vmatpush.bf16.msra.mxu2 %v7636_v24  ;;  %v7836_v5 = vor.u32 %v9386_v0, %v7833_v3  ;;  %v7809_v24 = vld [vmem:[%s14716_s5 + $0x308] sm:$0xf0]  ;;  %v7740_v0 = vor.u32 %v9359_v61, %v7737_v62  ;;  %v7679_v3 = vld [vmem:[%s14716_s5 + $0x1e8] sm:$0xf]  ;;  %v7559_v62 = vld [vmem:[%s14716_s5 + $0xf8] sm:$0xf] }
  0x6f   : > { %v7812_v28 = vor.u32 %v9378_v23, %v7809_v24  ;;  %v9339_v23 = vld [vmem:[%s14716_s5 + $0x1ac] sm:$0xf]  ;;  %v7657_v24 = vld [vmem:[%s14716_s5 + $0x1d0] sm:$0xf0] }
  0x70   : > { %1701 = vmatpush.bf16.msrb.mxu3 %v7836_v5  ;;  %v9352_v5 = vld [vmem:[%s14716_s5 + $0x20c] sm:$0xf0] }
  0x71   : > { %1854 = vmatpush.bf16.msra.mxu1 %v7812_v28  ;;  %v7680_v8 = vor.u32 %v9352_v5, %v7679_v3  ;;  %v7660_v28 = vor.u32 %v9339_v23, %v7657_v24  ;;  %v9319_v3 = vld [vmem:[%s14716_s5 + $0x10c] sm:$0xf]  ;;  %v7799_v23 = vld [vmem:[%s14716_s5 + $0x2d8] sm:$0xf]  ;;  %v9382_v24 = vld [vmem:[%s14716_s5 + $0x2fc] sm:$0xf0] }
  0x72   : > { %1830 = vmatpush.bf16.msra.mxu0 %v7692_v17  ;;  %1680 = vmatpush.bf16.msra.mxu2 %v7596_v36  ;;  %v9298_v17 = vld [vmem:[%s14716_s5 + $0x64] sm:$0xf] }
  0x73   : > { %v7492_v22 = vor.u32 %v9298_v17, %v7489_v18  ;;  %v8020_v17 = vor.u32 %v9429_v13, %v8017_v14  ;;  %v7639_v18 = vld [vmem:[%s14716_s5 + $0x198] sm:$0xf]  ;;  %v9392_v13 = vld [vmem:[%s14716_s5 + $0x34c] sm:$0xf0] }
  0x74   : > { %1702 = vmatpush.bf16.msrb.mxu3 %v7796_v21 }
  0x76   : > { %1831 = vmatpush.bf16.msra.mxu0 %v7652_v29  ;;  %1681 = vmatpush.bf16.msra.mxu2 %v7556_v52  ;;  %v7433_v29 = vld [vmem:[%s14716_s5 + $0x28] sm:$0xf0] }
  0x77   : > { %v7436_v37 = vor.u32 %v9286_v25, %v7433_v29  ;;  %v9419_v29 = vld [vmem:[%s14716_s5 + $0x42c] sm:$0xf] }
  0x7a   : > { %1832 = vmatpush.bf16.msra.mxu0 %v7612_v42  ;;  %1682 = vmatpush.bf16.msra.mxu2 %v7516_v2  ;;  %v9368_v42 = vld [vmem:[%s14716_s5 + $0x294] sm:$0xf] }
  0x7b   : > { %v8057_v2 = vld [vmem:[%s14716_s5 + $0x4f0] sm:$0xf0] }
  0x7e   : > { %1833 = vmatpush.bf16.msra.mxu0 %v7572_v58  ;;  %1683 = vmatpush.bf16.msra.mxu2 %v7476_v15 }
  0x7f   : > { %v550_v40 = vpop.permute.xlu0 %549 }
  0x80   : > { %v10222_v56 = vpop.permute.xlu1 %585 }
  0x82   : > { %1834 = vmatpush.bf16.msra.mxu0 %v7532_v10  ;;  %1684 = vmatpush.bf16.msra.mxu2 %v7436_v37  ;;  %v9349_v10 = vld [vmem:[%s14716_s5 + $0x1fc] sm:$0xf]  ;;  %v9412_v37 = vld [vmem:[%s14716_s5 + $0x3ec] sm:$0xf0] }
  0x83   : > { %v7700_v16 = vor.u32 %v9349_v10, %v7697_v12  ;;  %v7839_v12 = vld [vmem:[%s14716_s5 + $0x328] sm:$0xf] }
  0x86   : > { %1835 = vmatpush.bf16.msra.mxu0 %v7492_v22  ;;  %v9422_v22 = vld [vmem:[%s14716_s5 + $0x43c] sm:$0xf0] }
  0x87   : > { %v555_v19 = vpop.permute.xlu0 %554 }
  0x88   : > { %v10297_v38 = vpop.permute.xlu1 %590 }
  0x8a   : > { %1836 = vmatpush.bf16.msra.mxu0 %v7452_v41  ;;  %v9329_v41 = vld [vmem:[%s14716_s5 + $0x15c] sm:$0xf] }
  0x94   : > { %v470_v46 = vpop.f32.mrf.mxu0  ;;  %v509_v51 = vpop.f32.mrf.mxu1 }
  0x95   : > { %v10211_v50 = vadd.f32 %v550_v40, %v470_v46  ;;  %v568_v9 = vadd.f32 %v550_v40, %v509_v51  ;;  %v7756_v40 = vor.u32 %v9366_v30, %v7753_v31  ;;  %v560_v46 = vpop.permute.xlu2 %559  ;;  %v7977_v30 = vld [vmem:[%s14716_s5 + $0x450] sm:$0xf0]  ;;  %v7599_v31 = vld [vmem:[%s14716_s5 + $0x148] sm:$0xf] }
  0x96   : > { %v7980_v34 = vor.u32 %v9419_v29, %v7977_v30  ;;  %v9379_v29 = vld [vmem:[%s14716_s5 + $0x2ec] sm:$0xf]  ;;  %v7817_v30 = vld [vmem:[%s14716_s5 + $0x310] sm:$0xf0] }
  0x97   : > { %v575_v1 = vmax.f32 %v10211_v50, 0.0  ;;  %v576_v32 = vmax.f32 %v568_v9, 0.0  ;;  %v7772_v50 = vor.u32 %v9368_v42, %v7769_v43  ;;  %1703 = vmatpush.bf16.msrb.mxu3 %v7756_v40  ;;  %v9432_v9 = vld [vmem:[%s14716_s5 + $0x48c] sm:$0xf0]  ;;  %v7617_v42 = vld [vmem:[%s14716_s5 + $0x180] sm:$0xf0] }
  0x98   : > { %v8000_v11 = vor.u32 %v9432_v9, %v7999_v6  ;;  %v7519_v9 = vld [vmem:[%s14716_s5 + $0xa8] sm:$0xf] }
  0x99   : > { %v603_v44 = vsub.f32 %v575_v1, %v10222_v56  ;;  %v604_v47 = vsub.f32 %v576_v32, %v10222_v56  ;;  %v9439_v1 = vld [vmem:[%s14716_s5 + $0x4cc] sm:$0xf]  ;;  %1855 = vmatpush.bf16.msra.mxu1 %v7772_v50  ;;  %v7620_v50 = vor.u32 %v9329_v41, %v7617_v42 }
  0x9a   : > { %v8060_v4 = vor.u32 %v9439_v1, %v8057_v2  ;;  %v9402_v2 = vld [vmem:[%s14716_s5 + $0x39c] sm:$0xf0] }
  0x9c   : > { %v472_v20 = vpop.f32.mrf.mxu0  ;;  %v511_v27 = vpop.f32.mrf.mxu1 }
  0x9d   : > { %v569_v26 = vadd.f32 %v555_v19, %v472_v20  ;;  %v570_v33 = vadd.f32 %v555_v19, %v511_v27  ;;  %v9342_v19 = vld [vmem:[%s14716_s5 + $0x1bc] sm:$0xf0]  ;;  %v7959_v20 = vld [vmem:[%s14716_s5 + $0x418] sm:$0xf]  ;;  %v565_v25 = vpop.permute.xlu2 %564 }
  0x9e   : > { %v7640_v21 = vor.u32 %v9342_v19, %v7639_v18  ;;  %v7960_v27 = vor.u32 %v9422_v22, %v7959_v20  ;;  %v9389_v18 = vld [vmem:[%s14716_s5 + $0x33c] sm:$0xf]  ;;  %v7857_v20 = vld [vmem:[%s14716_s5 + $0x360] sm:$0xf0]  ;;  %v9302_v22 = vld [vmem:[%s14716_s5 + $0x7c] sm:$0xf0] }
  0x9f   : > { %v577_v36 = vmax.f32 %v569_v26, 0.0  ;;  %v578_v39 = vmax.f32 %v570_v33, 0.0 }
  0xa1   : > { %v605_v45 = vsub.f32 %v577_v36, %v10297_v38  ;;  %v606_v48 = vsub.f32 %v578_v39, %v10297_v38  ;;  %v7919_v36 = vld [vmem:[%s14716_s5 + $0x3c8] sm:$0xf] }
  0xa3   : > { %v10309_v49 = vpack.c.bf16 %v605_v45, %v603_v44  ;;  %v10311_v51 = vpack.c.bf16 %v606_v48, %v604_v47  ;;  %v7600_v44 = vor.u32 %v9332_v35, %v7599_v31  ;;  %v10410_v45 = vpop.permute.xlu0 %595  ;;  %v7920_v48 = vor.u32 %v9412_v37, %v7919_v36  ;;  %v7759_v35 = vld [vmem:[%s14716_s5 + $0x288] sm:$0xf]  ;;  %v9372_v36 = vld [vmem:[%s14716_s5 + $0x2ac] sm:$0xf0]  ;;  %v9289_v37 = vld [vmem:[%s14716_s5 + $0x1c] sm:$0xf] }
  0xa4   : > { %v475_v52 = vpop.f32.mrf.mxu0  ;;  %v514_v58 = vpop.f32.mrf.mxu1  ;;  %v7800_v31 = vor.u32 %v9382_v24, %v7799_v23  ;;  %v7760_v42 = vor.u32 %v9372_v36, %v7759_v35  ;;  %v9410_v35 = vld [vmem:[%s14716_s5 + $0x3e4] sm:$0xf]  ;;  %v7945_v36 = vld [vmem:[%s14716_s5 + $0x408] sm:$0xf0] }
  0xa5   : > { %v10322_v57 = vadd.f32 %v560_v46, %v475_v52  ;;  %1647 = vmatmul.bf16.vlgmr.msrb.gmra.mxu2 %v10309_v49  ;;  %1761 = vmatmul.bf16.vlgmr.msrb.gmra.mxu0 %v10309_v49  ;;  %v572_v15 = vadd.f32 %v560_v46, %v514_v58  ;;  %v10412_v46 = vpop.permute.xlu1 %600  ;;  %v9409_v52 = vld [vmem:[%s14716_s5 + $0x3dc] sm:$0xf] }
  0xa6   : > { %1666 = vmatmul.bf16.vlgmr.msra.gmra.mxu3 %v10311_v51  ;;  %1780 = vmatmul.bf16.vlgmr.msrb.gmra.mxu1 %v10311_v51  ;;  %v7940_v60 = vor.u32 %v9409_v52, %v7937_v53  ;;  %v9363_v52 = vld [vmem:[%s14716_s5 + $0x264] sm:$0xf0]  ;;  %v8047_v53 = vld [vmem:[%s14716_s5 + $0x4c0] sm:$0xf] }
  0xa7   : > { %1715 = vmatpush.bf16.msrb.mxu2 %v7720_v59  ;;  %v579_v7 = vmax.f32 %v10322_v57, 0.0  ;;  %1734 = vmatpush.bf16.msra.mxu3 %v8040_v63  ;;  %v580_v39 = vmax.f32 %v572_v15, 0.0  ;;  %v9322_v63 = vld [vmem:[%s14716_s5 + $0x11c] sm:$0xf0]  ;;  %v7840_v15 = vor.u32 %v9392_v13, %v7839_v12  ;;  %v8025_v12 = vld [vmem:[%s14716_s5 + $0x4a8] sm:$0xf0] }
  0xa8   : > { %1905 = vmatpush.bf16.msrb.mxu0 %v7740_v0  ;;  %1924 = vmatpush.bf16.msrb.mxu1 %v8060_v4  ;;  %v7879_v0 = vld [vmem:[%s14716_s5 + $0x378] sm:$0xf]  ;;  %v7560_v1 = vor.u32 %v9322_v63, %v7559_v62  ;;  %v7577_v4 = vld [vmem:[%s14716_s5 + $0x130] sm:$0xf0]  ;;  %v7647_v13 = vld [vmem:[%s14716_s5 + $0x1a0] sm:$0xf] }
  0xa9   : > { %v607_v54 = vsub.f32 %v579_v7, %v10410_v45  ;;  %v608_v57 = vsub.f32 %v580_v39, %v10410_v45  ;;  %v7880_v5 = vor.u32 %v9402_v2, %v7879_v0  ;;  %v7580_v6 = vor.u32 %v9319_v3, %v7577_v4  ;;  %v9399_v7 = vld [vmem:[%s14716_s5 + $0x38c] sm:$0xf]  ;;  %v7457_v39 = vld [vmem:[%s14716_s5 + $0x40] sm:$0xf0]  ;;  %v9440_v63 = vld [vmem:[%s14716_s5 + $0x4d4] sm:$0xf] }
  0xaa   : > { %v8065_v0 = vld [vmem:[%s14716_s5 + $0x4f8] sm:$0xf0]  ;;  %v9353_v3 = vld [vmem:[%s14716_s5 + $0x214] sm:$0xf0]  ;;  %v8007_v4 = vld [vmem:[%s14716_s5 + $0x470] sm:$0xf] }
  0xab   : > { %1716 = vmatpush.bf16.msrb.mxu2 %v7680_v8  ;;  %1735 = vmatpush.bf16.msra.mxu3 %v8000_v11  ;;  %v7897_v8 = vld [vmem:[%s14716_s5 + $0x3b0] sm:$0xf0]  ;;  %v9312_v11 = vld [vmem:[%s14716_s5 + $0xcc] sm:$0xf0]  ;;  %v8068_v2 = vor.u32 %v9440_v63, %v8065_v0 }
  0xac   : > { %v477_v26 = vpop.f32.mrf.mxu0  ;;  %1906 = vmatpush.bf16.msrb.mxu0 %v7700_v16  ;;  %v516_v33 = vpop.f32.mrf.mxu1  ;;  %1925 = vmatpush.bf16.msrb.mxu1 %v8020_v17  ;;  %v7900_v10 = vor.u32 %v9399_v7, %v7897_v8  ;;  %v7520_v14 = vor.u32 %v9312_v11, %v7519_v9  ;;  %v9309_v16 = vld [vmem:[%s14716_s5 + $0xbc] sm:$0xf]  ;;  %v7537_v17 = vld [vmem:[%s14716_s5 + $0xe0] sm:$0xf0]  ;;  %v7705_v9 = vld [vmem:[%s14716_s5 + $0x228] sm:$0xf0] }
  0xad   : > { %v573_v32 = vadd.f32 %v565_v25, %v477_v26  ;;  %v574_v40 = vadd.f32 %v565_v25, %v516_v33  ;;  %v7540_v19 = vor.u32 %v9309_v16, %v7537_v17  ;;  %v9299_v25 = vld [vmem:[%s14716_s5 + $0x6c] sm:$0xf]  ;;  %v7860_v26 = vor.u32 %v9389_v18, %v7857_v20  ;;  %v7439_v33 = vld [vmem:[%s14716_s5 + $0x8] sm:$0xf]  ;;  %v9350_v8 = vld [vmem:[%s14716_s5 + $0x204] sm:$0xf] }
  0xae   : > { %v7708_v11 = vor.u32 %v9350_v8, %v7705_v9  ;;  %v7967_v16 = vld [vmem:[%s14716_s5 + $0x420] sm:$0xf]  ;;  %v9423_v17 = vld [vmem:[%s14716_s5 + $0x444] sm:$0xf0]  ;;  %v9340_v18 = vld [vmem:[%s14716_s5 + $0x1b4] sm:$0xf] }
  0xaf   : > { %v581_v43 = vmax.f32 %v573_v32, 0.0  ;;  %1717 = vmatpush.bf16.msrb.mxu2 %v7640_v21  ;;  %v582_v47 = vmax.f32 %v574_v40, 0.0  ;;  %1736 = vmatpush.bf16.msra.mxu3 %v7960_v27  ;;  %v7479_v21 = vld [vmem:[%s14716_s5 + $0x58] sm:$0xf]  ;;  %v7820_v40 = vor.u32 %v9379_v29, %v7817_v30  ;;  %v7665_v20 = vld [vmem:[%s14716_s5 + $0x1d8] sm:$0xf0]  ;;  %v7968_v23 = vor.u32 %v9423_v17, %v7967_v16 }
  0xb0   : > { %1907 = vmatpush.bf16.msrb.mxu0 %v7660_v28  ;;  %1926 = vmatpush.bf16.msrb.mxu1 %v7980_v34  ;;  %v7480_v27 = vor.u32 %v9302_v22, %v7479_v21  ;;  %v7497_v28 = vld [vmem:[%s14716_s5 + $0x90] sm:$0xf0]  ;;  %v9292_v34 = vld [vmem:[%s14716_s5 + $0x2c] sm:$0xf0]  ;;  %v7985_v22 = vld [vmem:[%s14716_s5 + $0x458] sm:$0xf0]  ;;  %v7668_v24 = vor.u32 %v9340_v18, %v7665_v20 }
  0xb1   : > { %v609_v55 = vsub.f32 %v581_v43, %v10412_v46  ;;  %v610_v58 = vsub.f32 %v582_v47, %v10412_v46  ;;  %v7500_v32 = vor.u32 %v9299_v25, %v7497_v28  ;;  %v7440_v41 = vor.u32 %v9292_v34, %v7439_v33  ;;  %v7777_v47 = vld [vmem:[%s14716_s5 + $0x2c0] sm:$0xf0]  ;;  %v9420_v21 = vld [vmem:[%s14716_s5 + $0x434] sm:$0xf]  ;;  %v7607_v25 = vld [vmem:[%s14716_s5 + $0x150] sm:$0xf] }
  0xb2   : > { %v7460_v43 = vor.u32 %v9289_v37, %v7457_v39  ;;  %v7988_v28 = vor.u32 %v9420_v21, %v7985_v22  ;;  %v9413_v29 = vld [vmem:[%s14716_s5 + $0x3f4] sm:$0xf0]  ;;  %v9330_v30 = vld [vmem:[%s14716_s5 + $0x164] sm:$0xf]  ;;  %v7948_v37 = vor.u32 %v9410_v35, %v7945_v36  ;;  %v7807_v8 = vld [vmem:[%s14716_s5 + $0x2e0] sm:$0xf] }
  0xb3   : > { %v10424_v59 = vpack.c.bf16 %v609_v55, %v607_v54  ;;  %1718 = vmatpush.bf16.msrb.mxu2 %v7600_v44  ;;  %v10426_v61 = vpack.c.bf16 %v610_v58, %v608_v57  ;;  %1737 = vmatpush.bf16.msra.mxu3 %v7920_v48  ;;  %v9369_v44 = vld [vmem:[%s14716_s5 + $0x29c] sm:$0xf]  ;;  %v9443_v55 = vld [vmem:[%s14716_s5 + $0x4e4] sm:$0xf0]  ;;  %v9360_v57 = vld [vmem:[%s14716_s5 + $0x254] sm:$0xf] }
  0xb4   : > { %1908 = vmatpush.bf16.msrb.mxu0 %v7620_v50  ;;  %1927 = vmatpush.bf16.msrb.mxu1 %v7940_v60  ;;  %v7780_v48 = vor.u32 %v9369_v44, %v7777_v47  ;;  %v7727_v50 = vld [vmem:[%s14716_s5 + $0x240] sm:$0xf]  ;;  %v7745_v58 = vld [vmem:[%s14716_s5 + $0x278] sm:$0xf0]  ;;  %v8048_v60 = vor.u32 %v9443_v55, %v8047_v53  ;;  %v10628_v39 = vpop.f32.mrf.mxu0  ;;  %v9403_v44 = vld [vmem:[%s14716_s5 + $0x3a4] sm:$0xf0] }
  0xb5   : > { %1652 = vmatmul.bf16.gmra.mxu2 %v10424_v59  ;;  %1766 = vmatmul.bf16.gmra.mxu0 %v10424_v59  ;;  %v7728_v54 = vor.u32 %v9363_v52, %v7727_v50  ;;  %v7748_v62 = vor.u32 %v9360_v57, %v7745_v58  ;;  %v9320_v47 = vld [vmem:[%s14716_s5 + $0x114] sm:$0xf]  ;;  %v7527_v55 = vld [vmem:[%s14716_s5 + $0xb0] sm:$0xf]  ;;  %v9313_v58 = vld [vmem:[%s14716_s5 + $0xd4] sm:$0xf0] }
  0xb6   : > { %1671 = vmatmul.bf16.gmra.mxu3 %v10426_v61  ;;  %1785 = vmatmul.bf16.gmra.mxu1 %v10426_v61  ;;  %v9400_v53 = vld [vmem:[%s14716_s5 + $0x394] sm:$0xf]  ;;  %v7528_v63 = vor.u32 %v9313_v58, %v7527_v55  ;;  %v9383_v9 = vld [vmem:[%s14716_s5 + $0x304] sm:$0xf0]  ;;  %v7447_v18 = vld [vmem:[%s14716_s5 + $0x10] sm:$0xf] }
  0xb7   : > { %1719 = vmatpush.bf16.msrb.mxu2 %v7560_v1  ;;  %1738 = vmatpush.bf16.msra.mxu3 %v7880_v5  ;;  %v7687_v1 = vld [vmem:[%s14716_s5 + $0x1f0] sm:$0xf]  ;;  %v9433_v5 = vld [vmem:[%s14716_s5 + $0x494] sm:$0xf0]  ;;  %v7808_v16 = vor.u32 %v9383_v9, %v7807_v8  ;;  %v9290_v22 = vld [vmem:[%s14716_s5 + $0x24] sm:$0xf] }
  0xb8   : > { %1909 = vmatpush.bf16.msrb.mxu0 %v7580_v6  ;;  %1928 = vmatpush.bf16.msrb.mxu1 %v7900_v10  ;;  %v7688_v6 = vor.u32 %v9353_v3, %v7687_v1  ;;  %v8008_v7 = vor.u32 %v9433_v5, %v8007_v4  ;;  %v9430_v10 = vld [vmem:[%s14716_s5 + $0x484] sm:$0xf]  ;;  %v7865_v5 = vld [vmem:[%s14716_s5 + $0x368] sm:$0xf0]  ;;  %v7767_v20 = vld [vmem:[%s14716_s5 + $0x290] sm:$0xf] }
  0xb9   : > { %v9310_v1 = vld [vmem:[%s14716_s5 + $0xc4] sm:$0xf]  ;;  %v9373_v21 = vld [vmem:[%s14716_s5 + $0x2b4] sm:$0xf0]  ;;  %v9444_v36 = vld [vmem:[%s14716_s5 + $0x4ec] sm:$0xf0] }
  0xba   : > { %v9390_v3 = vld [vmem:[%s14716_s5 + $0x344] sm:$0xf]  ;;  %v9500_v58 = vld [vmem:[%s14717_s6 + $0x1b4] sm:$0xf]  ;;  %v8253_v8 = vld [vmem:[%s14717_s6 + $0x18c] sm:$0xf0] }
  0xbb   : > { %1720 = vmatpush.bf16.msrb.mxu2 %v7520_v14  ;;  %1739 = vmatpush.bf16.msra.mxu3 %v7840_v15  ;;  %v9343_v14 = vld [vmem:[%s14716_s5 + $0x1c4] sm:$0xf0]  ;;  %v8028_v15 = vor.u32 %v9430_v10, %v8025_v12  ;;  %v9300_v10 = vld [vmem:[%s14716_s5 + $0x74] sm:$0xf]  ;;  %v9563_v9 = vld [vmem:[%s14717_s6 + $0x3ac] sm:$0xf] }
  0xbc   : > { %1910 = vmatpush.bf16.msrb.mxu0 %v7540_v19  ;;  %1929 = vmatpush.bf16.msrb.mxu1 %v7860_v26  ;;  %v7648_v19 = vor.u32 %v9343_v14, %v7647_v13  ;;  %v9333_v26 = vld [vmem:[%s14716_s5 + $0x174] sm:$0xf0]  ;;  %v7505_v13 = vld [vmem:[%s14716_s5 + $0x98] sm:$0xf0]  ;;  %v9380_v14 = vld [vmem:[%s14716_s5 + $0x2f4] sm:$0xf] }
  0xbd   : > { %v7508_v17 = vor.u32 %v9300_v10, %v7505_v13  ;;  %v8541_v10 = vld [vmem:[%s14717_s6 + $0x3cc] sm:$0xf0]  ;;  %v7615_v13 = vld [vmem:[%s14716_s5 + $0x158] sm:$0xf] }
  0xbf   : > { %1721 = vmatpush.bf16.msrb.mxu2 %v7480_v27  ;;  %1740 = vmatpush.bf16.msra.mxu3 %v7800_v31  ;;  %v7927_v27 = vld [vmem:[%s14716_s5 + $0x3d0] sm:$0xf]  ;;  %v7625_v31 = vld [vmem:[%s14716_s5 + $0x188] sm:$0xf0] }
  0xc0   : > { %1911 = vmatpush.bf16.msrb.mxu0 %v7500_v32  ;;  %1930 = vmatpush.bf16.msrb.mxu1 %v7820_v40  ;;  %v7608_v32 = vor.u32 %v9333_v26, %v7607_v25  ;;  %v7928_v33 = vor.u32 %v9413_v29, %v7927_v27  ;;  %v7628_v34 = vor.u32 %v9330_v30, %v7625_v31  ;;  %v7567_v40 = vld [vmem:[%s14716_s5 + $0x100] sm:$0xf]  ;;  %v9370_v29 = vld [vmem:[%s14716_s5 + $0x2a4] sm:$0xf]  ;;  %v7785_v30 = vld [vmem:[%s14716_s5 + $0x2c8] sm:$0xf0] }
  0xc1   : > { %v7768_v27 = vor.u32 %v9373_v21, %v7767_v20  ;;  %v7788_v31 = vor.u32 %v9370_v29, %v7785_v30  ;;  %v9324_v29 = vld [vmem:[%s14716_s5 + $0x12c] sm:$0xf0]  ;;  %v7895_v30 = vld [vmem:[%s14716_s5 + $0x388] sm:$0xf] }
  0xc3   : > { %1722 = vmatpush.bf16.msrb.mxu2 %v7440_v41  ;;  %1741 = vmatpush.bf16.msra.mxu3 %v7760_v42  ;;  %v9323_v41 = vld [vmem:[%s14716_s5 + $0x124] sm:$0xf0]  ;;  %v7887_v42 = vld [vmem:[%s14716_s5 + $0x380] sm:$0xf] }
  0xc4   : > { %1912 = vmatpush.bf16.msrb.mxu0 %v7460_v43  ;;  %1931 = vmatpush.bf16.msrb.mxu1 %v7780_v48  ;;  %v7568_v43 = vor.u32 %v9323_v41, %v7567_v40  ;;  %v7585_v48 = vld [vmem:[%s14716_s5 + $0x138] sm:$0xf0]  ;;  %v7888_v50 = vor.u32 %v9403_v44, %v7887_v42  ;;  %v8325_v40 = vld [vmem:[%s14717_s6 + $0x21c] sm:$0xf0] }
  0xc5   : > { %1685 = vmatmul.bf16.vlgmr.msra.gmra.mxu2 %v10309_v49  ;;  %1837 = vmatmul.bf16.vlgmr.msra.gmra.mxu0 %v10309_v49  ;;  %v7588_v52 = vor.u32 %v9320_v47, %v7585_v48  ;;  %v8613_v44 = vld [vmem:[%s14717_s6 + $0x45c] sm:$0xf0]  ;;  %v7695_v47 = vld [vmem:[%s14716_s5 + $0x1f8] sm:$0xf] }
  0xc6   : > { %1704 = vmatmul.bf16.vlgmr.msrb.gmra.mxu3 %v10311_v51  ;;  %1856 = vmatmul.bf16.vlgmr.msra.gmra.mxu1 %v10311_v51 }
  0xc7   : > { %1791 = vmatpush.bf16.msra.mxu2 %v7728_v54  ;;  %1810 = vmatpush.bf16.msrb.mxu3 %v8048_v60  ;;  %v7905_v54 = vld [vmem:[%s14716_s5 + $0x3b8] sm:$0xf0]  ;;  %v7847_v60 = vld [vmem:[%s14716_s5 + $0x330] sm:$0xf] }
  0xc8   : > { %1981 = vmatpush.bf16.msra.mxu0 %v7748_v62  ;;  %2000 = vmatpush.bf16.msra.mxu1 %v8068_v2  ;;  %v7908_v57 = vor.u32 %v9400_v53, %v7905_v54  ;;  %v9393_v62 = vld [vmem:[%s14716_s5 + $0x354] sm:$0xf0]  ;;  %v7545_v2 = vld [vmem:[%s14716_s5 + $0xe8] sm:$0xf0]  ;;  %v9434_v53 = vld [vmem:[%s14716_s5 + $0x49c] sm:$0xf0] }
  0xc9   : > { %v7848_v0 = vor.u32 %v9393_v62, %v7847_v60  ;;  %v7548_v4 = vor.u32 %v9310_v1, %v7545_v2  ;;  %v8289_v60 = vld [vmem:[%s14717_s6 + $0x1d4] sm:$0xf0]  ;;  %v9572_v62 = vld [vmem:[%s14717_s6 + $0x3f4] sm:$0xf]  ;;  %v7655_v1 = vld [vmem:[%s14716_s5 + $0x1a8] sm:$0xf] }
  0xca   : > { %v9344_v2 = vld [vmem:[%s14716_s5 + $0x1cc] sm:$0xf0] }
  0xcb   : > { %1792 = vmatpush.bf16.msra.mxu2 %v7688_v6  ;;  %1811 = vmatpush.bf16.msrb.mxu3 %v8008_v7  ;;  %v7487_v6 = vld [vmem:[%s14716_s5 + $0x60] sm:$0xf]  ;;  %v9303_v7 = vld [vmem:[%s14716_s5 + $0x84] sm:$0xf0] }
  0xcc   : > { %1982 = vmatpush.bf16.msra.mxu0 %v7708_v11  ;;  %2001 = vmatpush.bf16.msra.mxu1 %v8028_v15  ;;  %v7868_v11 = vor.u32 %v9390_v3, %v7865_v5  ;;  %v7488_v12 = vor.u32 %v9303_v7, %v7487_v6  ;;  %v7825_v15 = vld [vmem:[%s14716_s5 + $0x318] sm:$0xf0]  ;;  %v9424_v5 = vld [vmem:[%s14716_s5 + $0x44c] sm:$0xf0]  ;;  %v9491_v6 = vld [vmem:[%s14717_s6 + $0x16c] sm:$0xf]  ;;  %v7656_v7 = vor.u32 %v9344_v2, %v7655_v1  ;;  %v10903_v2 = vpop.f32.mrf.mxu1 }
  0xcd   : > { %v7828_v25 = vor.u32 %v9380_v14, %v7825_v15  ;;  %v9334_v14 = vld [vmem:[%s14716_s5 + $0x17c] sm:$0xf0]  ;;  %v7935_v15 = vld [vmem:[%s14716_s5 + $0x3d8] sm:$0xf]  ;;  %v9455_v1 = vld [vmem:[%s14717_s6 + $0x4c] sm:$0xf] }
  0xce   : > { %v7616_v20 = vor.u32 %v9334_v14, %v7615_v13  ;;  %v7455_v13 = vld [vmem:[%s14716_s5 + $0x18] sm:$0xf]  ;;  %v9294_v14 = vld [vmem:[%s14716_s5 + $0x3c] sm:$0xf0] }
  0xcf   : > { %1793 = vmatpush.bf16.msra.mxu2 %v7648_v19  ;;  %1812 = vmatpush.bf16.msrb.mxu3 %v7968_v23  ;;  %v9293_v19 = vld [vmem:[%s14716_s5 + $0x34] sm:$0xf0]  ;;  %v7465_v23 = vld [vmem:[%s14716_s5 + $0x48] sm:$0xf0] }
  0xd0   : > { %1983 = vmatpush.bf16.msra.mxu0 %v7668_v24  ;;  %2002 = vmatpush.bf16.msra.mxu1 %v7988_v28  ;;  %v10724_v24 = vpop.f32.mrf.mxu0  ;;  %v7448_v26 = vor.u32 %v9293_v19, %v7447_v18  ;;  %v7468_v28 = vor.u32 %v9290_v22, %v7465_v23  ;;  %v9482_v18 = vld [vmem:[%s14717_s6 + $0x124] sm:$0xf]  ;;  %v8217_v19 = vld [vmem:[%s14717_s6 + $0x144] sm:$0xf0] }
  0xd1   : > { %v8220_v22 = vor.u32 %v9482_v18, %v8217_v19  ;;  %v9554_v23 = vld [vmem:[%s14717_s6 + $0x364] sm:$0xf]  ;;  %v8073_v19 = vld [vmem:[%s14717_s6 + $0x24] sm:$0xf0] }
  0xd2   : > { %v9446_v18 = vld [vmem:[%s14717_s6 + $0x4] sm:$0xf] }
  0xd3   : > { %1794 = vmatpush.bf16.msra.mxu2 %v7608_v32  ;;  %1813 = vmatpush.bf16.msrb.mxu3 %v7928_v33  ;;  %v7735_v32 = vld [vmem:[%s14716_s5 + $0x248] sm:$0xf]  ;;  %v9364_v33 = vld [vmem:[%s14716_s5 + $0x26c] sm:$0xf0] }
  0xd4   : > { %1984 = vmatpush.bf16.msra.mxu0 %v7628_v34  ;;  %2003 = vmatpush.bf16.msra.mxu1 %v7948_v37  ;;  %v8055_v34 = vld [vmem:[%s14716_s5 + $0x4c8] sm:$0xf]  ;;  %v7736_v35 = vor.u32 %v9364_v33, %v7735_v32  ;;  %v9509_v37 = vld [vmem:[%s14717_s6 + $0x1fc] sm:$0xf]  ;;  %v9404_v32 = vld [vmem:[%s14716_s5 + $0x3ac] sm:$0xf0] }
  0xd5   : > { %1690 = vmatmul.bf16.gmra.mxu2 %v10424_v59  ;;  %1842 = vmatmul.bf16.gmra.mxu0 %v10424_v59  ;;  %v8056_v41 = vor.u32 %v9444_v36, %v8055_v34  ;;  %v8328_v42 = vor.u32 %v9509_v37, %v8325_v40  ;;  %v9473_v33 = vld [vmem:[%s14717_s6 + $0xdc] sm:$0xf]  ;;  %v8181_v34 = vld [vmem:[%s14717_s6 + $0xfc] sm:$0xf0] }
  0xd6   : > { %1709 = vmatmul.bf16.gmra.mxu3 %v10426_v61  ;;  %1861 = vmatmul.bf16.gmra.mxu1 %v10426_v61  ;;  %v8184_v36 = vor.u32 %v9473_v33, %v8181_v34  ;;  %v9545_v37 = vld [vmem:[%s14717_s6 + $0x31c] sm:$0xf]  ;;  %v8469_v40 = vld [vmem:[%s14717_s6 + $0x33c] sm:$0xf0] }
  0xd7   : > { %1795 = vmatpush.bf16.msra.mxu2 %v7568_v43  ;;  %1814 = vmatpush.bf16.msrb.mxu3 %v7888_v50  ;;  %v9581_v43 = vld [vmem:[%s14717_s6 + $0x43c] sm:$0xf]  ;;  %v9354_v50 = vld [vmem:[%s14716_s5 + $0x21c] sm:$0xf0] }
  0xd8   : > { %1985 = vmatpush.bf16.msra.mxu0 %v7588_v52  ;;  %2004 = vmatpush.bf16.msra.mxu1 %v7908_v57  ;;  %v8616_v48 = vor.u32 %v9581_v43, %v8613_v44  ;;  %v8015_v52 = vld [vmem:[%s14716_s5 + $0x478] sm:$0xf]  ;;  %v10772_v54 = vpop.f32.mrf.mxu0  ;;  %v7696_v55 = vor.u32 %v9354_v50, %v7695_v47  ;;  %v9314_v43 = vld [vmem:[%s14716_s5 + $0xdc] sm:$0xf0] }
  0xd9   : > { %v8016_v57 = vor.u32 %v9434_v53, %v8015_v52  ;;  %v7855_v44 = vld [vmem:[%s14716_s5 + $0x338] sm:$0xf]  ;;  %v9394_v47 = vld [vmem:[%s14716_s5 + $0x35c] sm:$0xf0]  ;;  %v9464_v52 = vld [vmem:[%s14717_s6 + $0x94] sm:$0xf] }
  0xda   : > { %v7856_v50 = vor.u32 %v9394_v47, %v7855_v44  ;;  %v8145_v53 = vld [vmem:[%s14717_s6 + $0xb4] sm:$0xf0]  ;;  %v7663_v44 = vld [vmem:[%s14716_s5 + $0x1b0] sm:$0xf] }
  0xdb   : > { %1796 = vmatpush.bf16.msra.mxu2 %v7528_v63  ;;  %1815 = vmatpush.bf16.msrb.mxu3 %v7848_v0  ;;  %v8292_v63 = vor.u32 %v9500_v58, %v8289_v60  ;;  %v8577_v0 = vld [vmem:[%s14717_s6 + $0x414] sm:$0xf0]  ;;  %v7495_v60 = vld [vmem:[%s14716_s5 + $0x68] sm:$0xf] }
  0xdc   : > { %1986 = vmatpush.bf16.msra.mxu0 %v7548_v4  ;;  %2005 = vmatpush.bf16.msra.mxu1 %v7868_v11  ;;  %v8580_v3 = vor.u32 %v9572_v62, %v8577_v0  ;;  %v7975_v4 = vld [vmem:[%s14716_s5 + $0x428] sm:$0xf]  ;;  %v8433_v58 = vld [vmem:[%s14717_s6 + $0x2f4] sm:$0xf0]  ;;  %v9304_v62 = vld [vmem:[%s14716_s5 + $0x8c] sm:$0xf0] }
  0xdd   : > { %v7976_v11 = vor.u32 %v9424_v5, %v7975_v4  ;;  %v9384_v0 = vld [vmem:[%s14716_s5 + $0x30c] sm:$0xf0]  ;;  %v7496_v4 = vor.u32 %v9304_v62, %v7495_v60  ;;  %v9345_v47 = vld [vmem:[%s14716_s5 + $0x1d4] sm:$0xf0]  ;;  %v9335_v60 = vld [vmem:[%s14716_s5 + $0x184] sm:$0xf0] }
  0xde   : > { %v8109_v5 = vld [vmem:[%s14717_s6 + $0x6c] sm:$0xf0]  ;;  %v7943_v62 = vld [vmem:[%s14716_s5 + $0x3e0] sm:$0xf] }
  0xdf   : > { %1797 = vmatpush.bf16.msra.mxu2 %v7488_v12  ;;  %1816 = vmatpush.bf16.msrb.mxu3 %v7808_v16  ;;  %v8256_v12 = vor.u32 %v9491_v6, %v8253_v8  ;;  %v8544_v16 = vor.u32 %v9563_v9, %v8541_v10  ;;  %v8112_v8 = vor.u32 %v9455_v1, %v8109_v5  ;;  %v9527_v9 = vld [vmem:[%s14717_s6 + $0x28c] sm:$0xf]  ;;  %v8397_v10 = vld [vmem:[%s14717_s6 + $0x2ac] sm:$0xf0]  ;;  %v9325_v5 = vld [vmem:[%s14716_s5 + $0x134] sm:$0xf0] }
  0xe0   : > { %1987 = vmatpush.bf16.msra.mxu0 %v7508_v17  ;;  %2006 = vmatpush.bf16.msra.mxu1 %v7828_v25  ;;  %v9414_v17 = vld [vmem:[%s14716_s5 + $0x3fc] sm:$0xf0]  ;;  %v8505_v25 = vld [vmem:[%s14717_s6 + $0x384] sm:$0xf0] }
  0xe1   : > { %v7936_v21 = vor.u32 %v9414_v17, %v7935_v15  ;;  %v7775_v15 = vld [vmem:[%s14716_s5 + $0x298] sm:$0xf]  ;;  %v9374_v17 = vld [vmem:[%s14716_s5 + $0x2bc] sm:$0xf0] }
  0xe3   : > { %1798 = vmatpush.bf16.msra.mxu2 %v7448_v26  ;;  %1817 = vmatpush.bf16.msrb.mxu3 %v7768_v27  ;;  %v10834_v26 = vpop.f32.mrf.mxu0  ;;  %v8508_v27 = vor.u32 %v9554_v23, %v8505_v25  ;;  %v8361_v23 = vld [vmem:[%s14717_s6 + $0x264] sm:$0xf0] }
  0xe4   : > { %1988 = vmatpush.bf16.msra.mxu0 %v7468_v28  ;;  %2007 = vmatpush.bf16.msra.mxu1 %v7788_v31  ;;  %v7575_v28 = vld [vmem:[%s14716_s5 + $0x108] sm:$0xf] }
  0xe5   : > { %1723 = vmatmul.bf16.vlgmr.msrb.gmra.mxu2 %v10309_v49  ;;  %1913 = vmatmul.bf16.vlgmr.msrb.gmra.mxu0 %v10309_v49  ;;  %v7576_v31 = vor.u32 %v9324_v29, %v7575_v28  ;;  %v9365_v28 = vld [vmem:[%s14716_s5 + $0x274] sm:$0xf0]  ;;  %v8063_v29 = vld [vmem:[%s14716_s5 + $0x4d0] sm:$0xf] }
  0xe6   : > { %1742 = vmatmul.bf16.vlgmr.msra.gmra.mxu3 %v10311_v51  ;;  %1932 = vmatmul.bf16.vlgmr.msrb.gmra.mxu1 %v10311_v51 }
  0xe7   : > { %1867 = vmatpush.bf16.msrb.mxu2 %v7736_v35  ;;  %1886 = vmatpush.bf16.msra.mxu3 %v8056_v41  ;;  %v7896_v35 = vor.u32 %v9404_v32, %v7895_v30  ;;  %v7535_v41 = vld [vmem:[%s14716_s5 + $0xb8] sm:$0xf]  ;;  %v10953_v30 = vpop.f32.mrf.mxu1 }
  0xe8   : > { %3069 = vmatpush.bf16.msrb.mxu0 %v8328_v42  ;;  %3098 = vmatpush.bf16.msrb.mxu1 %v8616_v48  ;;  %v8472_v42 = vor.u32 %v9545_v37, %v8469_v40  ;;  %v7536_v48 = vor.u32 %v9314_v43, %v7535_v41  ;;  %v9445_v32 = vld [vmem:[%s14716_s5 + $0x4f4] sm:$0xf0]  ;;  %v8023_v37 = vld [vmem:[%s14716_s5 + $0x480] sm:$0xf]  ;;  %v9435_v41 = vld [vmem:[%s14716_s5 + $0x4a4] sm:$0xf0] }
  0xe9   : > { %v8064_v34 = vor.u32 %v9445_v32, %v8063_v29  ;;  %v8024_v43 = vor.u32 %v9435_v41, %v8023_v37  ;;  %v7463_v32 = vld [vmem:[%s14716_s5 + $0x20] sm:$0xf] }
  0xeb   : > { %1868 = vmatpush.bf16.msrb.mxu2 %v7696_v55  ;;  %1887 = vmatpush.bf16.msra.mxu3 %v8016_v57  ;;  %v9536_v55 = vld [vmem:[%s14717_s6 + $0x2d4] sm:$0xf]  ;;  %v8148_v57 = vor.u32 %v9464_v52, %v8145_v53  ;;  %v10908_v6 = vpop.f32.mrf.mxu0  ;;  %v9425_v52 = vld [vmem:[%s14716_s5 + $0x454] sm:$0xf0] }
  0xec   : > { %3070 = vmatpush.bf16.msrb.mxu0 %v8292_v63  ;;  %3099 = vmatpush.bf16.msrb.mxu1 %v8580_v3  ;;  %v7815_v63 = vld [vmem:[%s14716_s5 + $0x2e8] sm:$0xf]  ;;  %v8436_v3 = vor.u32 %v9536_v55, %v8433_v58  ;;  %v7623_v58 = vld [vmem:[%s14716_s5 + $0x160] sm:$0xf] }
  0xef   : > { %1869 = vmatpush.bf16.msrb.mxu2 %v7656_v7  ;;  %1888 = vmatpush.bf16.msra.mxu3 %v7976_v11  ;;  %v7816_v7 = vor.u32 %v9384_v0, %v7815_v63  ;;  %v8400_v11 = vor.u32 %v9527_v9, %v8397_v10  ;;  %v10988_v55 = vpop.f32.mrf.mxu1  ;;  %v7624_v63 = vor.u32 %v9335_v60, %v7623_v58  ;;  %v9415_v0 = vld [vmem:[%s14716_s5 + $0x404] sm:$0xf0]  ;;  %v9405_v9 = vld [vmem:[%s14716_s5 + $0x3b4] sm:$0xf0]  ;;  %v9510_v58 = vld [vmem:[%s14717_s6 + $0x204] sm:$0xf] }
  0xf0   : > { %3071 = vmatpush.bf16.msrb.mxu0 %v8256_v12  ;;  %3100 = vmatpush.bf16.msrb.mxu1 %v8544_v16  ;;  %v10916_v12 = vpop.f32.mrf.mxu2  ;;  %v7456_v16 = vor.u32 %v9294_v14, %v7455_v13  ;;  %v7944_v1 = vor.u32 %v9415_v0, %v7943_v62  ;;  %v9315_v13 = vld [vmem:[%s14716_s5 + $0xe4] sm:$0xf0]  ;;  %v7863_v14 = vld [vmem:[%s14716_s5 + $0x340] sm:$0xf]  ;;  %v9582_v0 = vld [vmem:[%s14717_s6 + $0x444] sm:$0xf] }
  0xf1   : > { %v8333_v60 = vld [vmem:[%s14717_s6 + $0x224] sm:$0xf0] }
  0xf3   : > { %1870 = vmatpush.bf16.msrb.mxu2 %v7616_v20  ;;  %1889 = vmatpush.bf16.msra.mxu3 %v7936_v21  ;;  %v7776_v20 = vor.u32 %v9374_v17, %v7775_v15  ;;  %v8076_v21 = vor.u32 %v9446_v18, %v8073_v19  ;;  %v10960_v33 = vpop.f32.mrf.mxu0  ;;  %v9395_v17 = vld [vmem:[%s14716_s5 + $0x364] sm:$0xf0] }
  0xf4   : > { %3072 = vmatpush.bf16.msrb.mxu0 %v8220_v22  ;;  %3101 = vmatpush.bf16.msrb.mxu1 %v8508_v27  ;;  %v9518_v22 = vld [vmem:[%s14717_s6 + $0x244] sm:$0xf]  ;;  %v7743_v27 = vld [vmem:[%s14716_s5 + $0x250] sm:$0xf]  ;;  %v7864_v19 = vor.u32 %v9395_v17, %v7863_v14  ;;  %v9576_v14 = vld [vmem:[%s14717_s6 + $0x410] sm:$0xf0] }
  0xf5   : > { %1728 = vmatmul.bf16.gmra.mxu2 %v10424_v59  ;;  %1918 = vmatmul.bf16.gmra.mxu0 %v10424_v59  ;;  %v8364_v25 = vor.u32 %v9518_v22, %v8361_v23  ;;  %v9305_v22 = vld [vmem:[%s14716_s5 + $0x94] sm:$0xf0]  ;;  %v7823_v23 = vld [vmem:[%s14716_s5 + $0x2f0] sm:$0xf]  ;;  %v8297_v17 = vld [vmem:[%s14717_s6 + $0x1dc] sm:$0xf0] }
  0xf6   : > { %1747 = vmatmul.bf16.gmra.mxu3 %v10426_v61  ;;  %1937 = vmatmul.bf16.gmra.mxu1 %v10426_v61 }
  0xf7   : > { %1871 = vmatpush.bf16.msrb.mxu2 %v7576_v31  ;;  %1890 = vmatpush.bf16.msra.mxu3 %v7896_v35  ;;  %v7744_v31 = vor.u32 %v9365_v28, %v7743_v27  ;;  %v7703_v35 = vld [vmem:[%s14716_s5 + $0x200] sm:$0xf]  ;;  %v11031_v15 = vpop.f32.mrf.mxu1  ;;  %v9385_v27 = vld [vmem:[%s14716_s5 + $0x314] sm:$0xf0] }
  0xf8   : > { %3073 = vmatpush.bf16.msrb.mxu0 %v8184_v36  ;;  %3102 = vmatpush.bf16.msrb.mxu1 %v8472_v42  ;;  %v9355_v36 = vld [vmem:[%s14716_s5 + $0x224] sm:$0xf0]  ;;  %v10974_v42 = vpop.f32.mrf.mxu2  ;;  %v7824_v29 = vor.u32 %v9385_v27, %v7823_v23  ;;  %v9573_v23 = vld [vmem:[%s14717_s6 + $0x3fc] sm:$0xf] }
  0xf9   : > { %v7704_v40 = vor.u32 %v9355_v36, %v7703_v35  ;;  %v7783_v35 = vld [vmem:[%s14716_s5 + $0x2a0] sm:$0xf] }
  0xfb   : > { %1872 = vmatpush.bf16.msrb.mxu2 %v7536_v48  ;;  %1891 = vmatpush.bf16.msra.mxu3 %v7856_v50  ;;  %v7983_v48 = vld [vmem:[%s14716_s5 + $0x430] sm:$0xf]  ;;  %v7664_v50 = vor.u32 %v9345_v47, %v7663_v44  ;;  %v11076_v44 = vpack.c.bf16 %v10724_v24, %v10628_v39  ;;  %v8611_v39 = vld [vmem:[%s14717_s6 + $0x438] sm:$0xf] }
  0xfc   : > { %3074 = vmatpush.bf16.msrb.mxu0 %v8148_v57  ;;  %3103 = vmatpush.bf16.msrb.mxu1 %v8436_v3  ;;  %v7984_v53 = vor.u32 %v9425_v52, %v7983_v48  ;;  %v10990_v57 = vpop.f32.mrf.mxu0  ;;  %v8323_v52 = vld [vmem:[%s14717_s6 + $0x1f8] sm:$0xf] }
  0xff   : > { %1873 = vmatpush.bf16.msrb.mxu2 %v7496_v4  ;;  %1892 = vmatpush.bf16.msra.mxu3 %v7816_v7  ;;  %v7583_v4 = vld [vmem:[%s14716_s5 + $0x110] sm:$0xf] }
 0x100   : > { %3075 = vmatpush.bf16.msrb.mxu0 %v8112_v8  ;;  %3104 = vmatpush.bf16.msrb.mxu1 %v8400_v11  ;;  %v11004_v3 = vpop.f32.mrf.mxu2  ;;  %v7903_v7 = vld [vmem:[%s14716_s5 + $0x390] sm:$0xf]  ;;  %v7584_v8 = vor.u32 %v9325_v5, %v7583_v4  ;;  %v7543_v11 = vld [vmem:[%s14716_s5 + $0xc0] sm:$0xf] }
 0x101   : > { %v7904_v10 = vor.u32 %v9405_v9, %v7903_v7  ;;  %v8287_v7 = vld [vmem:[%s14717_s6 + $0x1b0] sm:$0xf] }
 0x102   : > { %v8575_v9 = vld [vmem:[%s14717_s6 + $0x3f0] sm:$0xf] }
 0x103   : > { %1874 = vmatpush.bf16.msrb.mxu2 %v7456_v16  ;;  %1893 = vmatpush.bf16.msra.mxu3 %v7776_v20  ;;  %v7544_v16 = vor.u32 %v9315_v13, %v7543_v11  ;;  %v11041_v20 = vld [vmem:[%s14715_s4] sm:$0xff] }
 0x104   : > { %3076 = vmatpush.bf16.msrb.mxu0 %v8076_v21  ;;  %3105 = vmatpush.bf16.msrb.mxu1 %v8364_v25  ;;  %v11036_v18 = vpop.f32.mrf.mxu0  ;;  %v7503_v21 = vld [vmem:[%s14716_s5 + $0x70] sm:$0xf] }
 0x105   : > { %1799 = vmatmul.bf16.vlgmr.msra.gmra.mxu2 %v10309_v49  ;;  %1989 = vmatmul.bf16.vlgmr.msra.gmra.mxu0 %v10309_v49  ;;  %v7504_v25 = vor.u32 %v9305_v22, %v7503_v21  ;;  %v8576_v21 = vor.u32 %v9576_v14, %v8575_v9  ;;  %v9555_v14 = vld [vmem:[%s14717_s6 + $0x36c] sm:$0xf] }
 0x106   : > { %1818 = vmatmul.bf16.vlgmr.msrb.gmra.mxu3 %v10311_v51  ;;  %2008 = vmatmul.bf16.vlgmr.msra.gmra.mxu1 %v10311_v51 }
 0x107   : > { %1943 = vmatpush.bf16.msra.mxu2 %v7744_v31  ;;  %1962 = vmatpush.bf16.msrb.mxu3 %v8064_v34  ;;  %v11058_v31 = vperm.slane %v11041_v20, 3  ;;  %v9295_v34 = vld [vmem:[%s14716_s5 + $0x44] sm:$0xf0] }
 0x108   : > { %v11055_v28 = vpop.f32.mrf.mxu2  ;;  %v7464_v37 = vor.u32 %v9295_v34, %v7463_v32  ;;  %v8251_v34 = vld [vmem:[%s14717_s6 + $0x168] sm:$0xf] }
 0x109   : > { %v802_v36 = vmul.f32 %v11058_v31, %v10222_v56  ;;  %v812_v11 = vmul.f32 %v11058_v31, %v10297_v38 }
 0x10b   : > { %1944 = vmatpush.bf16.msra.mxu2 %v7704_v40  ;;  %1963 = vmatpush.bf16.msrb.mxu3 %v8024_v43  ;;  %v9375_v40 = vld [vmem:[%s14716_s5 + $0x2c4] sm:$0xf0] }
 0x10c   : > { %v7784_v43 = vor.u32 %v9375_v40, %v7783_v35  ;;  %v9495_v35 = vld [vmem:[%s14717_s6 + $0x188] sm:$0xf0] }
 0x10d   : > { %v8252_v40 = vor.u32 %v9495_v35, %v8251_v34 }
 0x10f   : > { %1945 = vmatpush.bf16.msra.mxu2 %v7664_v50  ;;  %1964 = vmatpush.bf16.msrb.mxu3 %v7984_v53  ;;  %v11080_v50 = vpack.c.bf16 %v10953_v30, %v10903_v2  ;;  %v9513_v53 = vld [vmem:[%s14717_s6 + $0x218] sm:$0xf0] }
 0x110   : > { %v8324_v2 = vor.u32 %v9513_v53, %v8323_v52  ;;  %v9585_v30 = vld [vmem:[%s14717_s6 + $0x458] sm:$0xf0]  ;;  %v9564_v53 = vld [vmem:[%s14717_s6 + $0x3b4] sm:$0xf] }
 0x111   : > { %v8612_v62 = vor.u32 %v9585_v30, %v8611_v39  ;;  %v8549_v39 = vld [vmem:[%s14717_s6 + $0x3d4] sm:$0xf0] }
 0x113   : > { %1946 = vmatpush.bf16.msra.mxu2 %v7624_v63  ;;  %1965 = vmatpush.bf16.msrb.mxu3 %v7944_v1  ;;  %v8336_v63 = vor.u32 %v9510_v58, %v8333_v60  ;;  %v8621_v1 = vld [vmem:[%s14717_s6 + $0x464] sm:$0xf0]  ;;  %v8215_v58 = vld [vmem:[%s14717_s6 + $0x120] sm:$0xf]  ;;  %v9486_v60 = vld [vmem:[%s14717_s6 + $0x140] sm:$0xf0] }
 0x114   : > { %v8624_v4 = vor.u32 %v9582_v0, %v8621_v1  ;;  %v822_v0 = vmul.f32 %v11058_v31, %v10410_v45  ;;  %v8216_v1 = vor.u32 %v9486_v60, %v8215_v58  ;;  %v9540_v58 = vld [vmem:[%s14717_s6 + $0x2f0] sm:$0xf0]  ;;  %v9465_v60 = vld [vmem:[%s14717_s6 + $0x9c] sm:$0xf] }
 0x115   : > { %1804 = vmatmul.bf16.gmra.mxu2 %v10424_v59  ;;  %1994 = vmatmul.bf16.gmra.mxu0 %v10424_v59 }
 0x116   : > { %1823 = vmatmul.bf16.gmra.mxu3 %v10426_v61  ;;  %2013 = vmatmul.bf16.gmra.mxu1 %v10426_v61 }
 0x117   : > { %1947 = vmatpush.bf16.msra.mxu2 %v7584_v8  ;;  %1966 = vmatpush.bf16.msrb.mxu3 %v7904_v10  ;;  %v9504_v8 = vld [vmem:[%s14717_s6 + $0x1d0] sm:$0xf0] }
 0x118   : > { %3185 = vmatpush.bf16.msra.mxu0 %v8336_v63  ;;  %3214 = vmatpush.bf16.msra.mxu1 %v8624_v4  ;;  %v8288_v13 = vor.u32 %v9504_v8, %v8287_v7  ;;  %v9558_v4 = vld [vmem:[%s14717_s6 + $0x380] sm:$0xf0]  ;;  %v9483_v7 = vld [vmem:[%s14717_s6 + $0x12c] sm:$0xf]  ;;  %v8225_v8 = vld [vmem:[%s14717_s6 + $0x14c] sm:$0xf0] }
 0x11b   : > { %1948 = vmatpush.bf16.msra.mxu2 %v7544_v16  ;;  %1967 = vmatpush.bf16.msrb.mxu3 %v7864_v19  ;;  %v9501_v16 = vld [vmem:[%s14717_s6 + $0x1bc] sm:$0xf] }
 0x11c   : > { %v8300_v22 = vor.u32 %v9501_v16, %v8297_v17  ;;  %v8513_v16 = vld [vmem:[%s14717_s6 + $0x38c] sm:$0xf0]  ;;  %v11200_v17 = vpack.c.bf16 %v10834_v26, %v10772_v54  ;;  %v8467_v54 = vld [vmem:[%s14717_s6 + $0x318] sm:$0xf] }
 0x11e   : > { %3186 = vmatpush.bf16.msra.mxu0 %v8300_v22  ;;  %v8516_v22 = vor.u32 %v9555_v14, %v8513_v16  ;;  %v9459_v14 = vld [vmem:[%s14717_s6 + $0x68] sm:$0xf0]  ;;  %v8395_v16 = vld [vmem:[%s14717_s6 + $0x288] sm:$0xf] }
 0x11f   : > { %1949 = vmatpush.bf16.msra.mxu2 %v7504_v25  ;;  %1968 = vmatpush.bf16.msrb.mxu3 %v7824_v29  ;;  %v8585_v25 = vld [vmem:[%s14717_s6 + $0x41c] sm:$0xf0] }
 0x120   : > { %v8588_v32 = vor.u32 %v9573_v23, %v8585_v25  ;;  %v11204_v23 = vpack.c.bf16 %v11031_v15, %v10988_v55  ;;  %v8179_v25 = vld [vmem:[%s14717_s6 + $0xd8] sm:$0xf]  ;;  %v9549_v15 = vld [vmem:[%s14717_s6 + $0x338] sm:$0xf0] }
 0x121   : > { %v8468_v34 = vor.u32 %v9549_v15, %v8467_v54  ;;  %v9528_v15 = vld [vmem:[%s14717_s6 + $0x294] sm:$0xf] }
 0x122   : > { %v1762_v41 = vpop.f32.mrf.mxu0  ;;  %3215 = vmatpush.bf16.msra.mxu1 %v8588_v32  ;;  %v8189_v32 = vld [vmem:[%s14717_s6 + $0x104] sm:$0xf0] }
 0x123   : > { %v1763_v47 = vadd.f32 %v1762_v41, %v802_v36  ;;  %v1781_v48 = vpop.f32.mrf.mxu1  ;;  %1950 = vmatpush.bf16.msra.mxu2 %v7464_v37  ;;  %1969 = vmatpush.bf16.msrb.mxu3 %v7784_v43  ;;  %v8539_v36 = vld [vmem:[%s14717_s6 + $0x3a8] sm:$0xf]  ;;  %v9567_v41 = vld [vmem:[%s14717_s6 + $0x3c8] sm:$0xf0]  ;;  %v9492_v43 = vld [vmem:[%s14717_s6 + $0x174] sm:$0xf] }
 0x125   : > { %v11091_v24 = vadd.f32 %v1781_v48, %v1763_v47  ;;  %1875 = vmatmul.bf16.vlgmr.msrb.gmra.mxu2 %v10309_v49  ;;  %3077 = vmatmul.bf16.vlgmr.msrb.gmra.mxu0 %v11076_v44  ;;  %v8261_v47 = vld [vmem:[%s14717_s6 + $0x194] sm:$0xf0]  ;;  %v8540_v48 = vor.u32 %v9567_v41, %v8539_v36  ;;  %v9546_v36 = vld [vmem:[%s14717_s6 + $0x324] sm:$0xf] }
 0x126   : > { %1894 = vmatmul.bf16.vlgmr.msra.gmra.mxu3 %v10311_v51  ;;  %3106 = vmatmul.bf16.vlgmr.msrb.gmra.mxu1 %v11080_v50  ;;  %v8264_v52 = vor.u32 %v9492_v43, %v8261_v47  ;;  %v8143_v47 = vld [vmem:[%s14717_s6 + $0x90] sm:$0xf] }
 0x127   : > { %3011 = vmatpush.bf16.msrb.mxu2 %v8324_v2  ;;  %3040 = vmatpush.bf16.msra.mxu3 %v8612_v62  ;;  %v8552_v2 = vor.u32 %v9564_v53, %v8549_v39  ;;  %v8503_v62 = vld [vmem:[%s14717_s6 + $0x360] sm:$0xf]  ;;  %v832_v39 = vmul.f32 %v11058_v31, %v10412_v46  ;;  %v9537_v31 = vld [vmem:[%s14717_s6 + $0x2dc] sm:$0xf] }
 0x128   : > { %v11112_v5 = vpop.f32.mrf.mxu2  ;;  %3187 = vmatpush.bf16.msra.mxu0 %v8264_v52  ;;  %v8431_v52 = vld [vmem:[%s14717_s6 + $0x2d0] sm:$0xf] }
 0x129   : > { %v11123_v10 = vpop.f32.mrf.mxu3  ;;  %3216 = vmatpush.bf16.msra.mxu1 %v8552_v2 }
 0x12a   : > { %v1764_v19 = vpop.f32.mrf.mxu0 }
 0x12b   : > { %v1765_v27 = vadd.f32 %v1764_v19, %v812_v11  ;;  %v1783_v29 = vpop.f32.mrf.mxu1  ;;  %3012 = vmatpush.bf16.msrb.mxu2 %v8288_v13  ;;  %3041 = vmatpush.bf16.msra.mxu3 %v8576_v21  ;;  %v8504_v11 = vor.u32 %v9558_v4, %v8503_v62  ;;  %v8228_v13 = vor.u32 %v9483_v7, %v8225_v8  ;;  %v8153_v62 = vld [vmem:[%s14717_s6 + $0xbc] sm:$0xf0] }
 0x12c   : > { %v8156_v4 = vor.u32 %v9465_v60, %v8153_v62  ;;  %v8441_v7 = vld [vmem:[%s14717_s6 + $0x2fc] sm:$0xf0] }
 0x12d   : > { %v11151_v37 = vadd.f32 %v1783_v29, %v1765_v27  ;;  %3188 = vmatpush.bf16.msra.mxu0 %v8228_v13  ;;  %v9477_v27 = vld [vmem:[%s14717_s6 + $0xf8] sm:$0xf0]  ;;  %v9474_v29 = vld [vmem:[%s14717_s6 + $0xe4] sm:$0xf]  ;;  %3217 = vmatpush.bf16.msra.mxu1 %v8516_v22  ;;  %v8107_v13 = vld [vmem:[%s14717_s6 + $0x48] sm:$0xf] }
 0x12e   : > { %v8180_v55 = vor.u32 %v9477_v27, %v8179_v25  ;;  %v8192_v35 = vor.u32 %v9474_v29, %v8189_v32  ;;  %v9531_v22 = vld [vmem:[%s14717_s6 + $0x2a8] sm:$0xf0]  ;;  %v9456_v25 = vld [vmem:[%s14717_s6 + $0x54] sm:$0xf]  ;;  %v8117_v27 = vld [vmem:[%s14717_s6 + $0x74] sm:$0xf0] }
 0x12f   : > { %3013 = vmatpush.bf16.msrb.mxu2 %v8252_v40  ;;  %3042 = vmatpush.bf16.msra.mxu3 %v8540_v48  ;;  %v8477_v40 = vld [vmem:[%s14717_s6 + $0x344] sm:$0xf0]  ;;  %v9468_v48 = vld [vmem:[%s14717_s6 + $0xb0] sm:$0xf0]  ;;  %v8396_v54 = vor.u32 %v9531_v22, %v8395_v16  ;;  %v8405_v29 = vld [vmem:[%s14717_s6 + $0x2b4] sm:$0xf0] }
 0x130   : > { %v11168_v30 = vpop.f32.mrf.mxu2  ;;  %v8480_v41 = vor.u32 %v9546_v36, %v8477_v40  ;;  %v8144_v2 = vor.u32 %v9468_v48, %v8143_v47  ;;  %v11293_v32 = vperm.slane %v11041_v20, 5  ;;  %v8071_v36 = vld [vmem:[%s14717_s6] sm:$0xf]  ;;  %v9450_v40 = vld [vmem:[%s14717_s6 + $0x20] sm:$0xf0] }
 0x131   : > { %v11179_v63 = vpop.f32.mrf.mxu3  ;;  %3189 = vmatpush.bf16.msra.mxu0 %v8192_v35 }
 0x132   : > { %v1767_v9 = vpop.f32.mrf.mxu0  ;;  %3218 = vmatpush.bf16.msra.mxu1 %v8480_v41  ;;  %v8359_v41 = vld [vmem:[%s14717_s6 + $0x240] sm:$0xf]  ;;  %v804_v48 = vmul.f32 %v11293_v32, %v10222_v56 }
 0x133   : > { %v1768_v19 = vadd.f32 %v1767_v9, %v822_v0  ;;  %v1786_v21 = vpop.f32.mrf.mxu1  ;;  %3014 = vmatpush.bf16.msrb.mxu2 %v8216_v1  ;;  %3043 = vmatpush.bf16.msra.mxu3 %v8504_v11  ;;  %v8432_v1 = vor.u32 %v9540_v58, %v8431_v52  ;;  %v8444_v11 = vor.u32 %v9537_v31, %v8441_v7  ;;  %v8081_v58 = vld [vmem:[%s14717_s6 + $0x2c] sm:$0xf0]  ;;  %v11330_v7 = vperm.slane %v11041_v20, 0 }
 0x134   : > { %v8072_v52 = vor.u32 %v9450_v40, %v8071_v36  ;;  %v11327_v31 = vpack.c.bf16 %v10960_v33, %v10908_v6  ;;  %v780_v6 = vperm.slane %v11041_v20, 1 }
 0x135   : > { %v11215_v26 = vadd.f32 %v1786_v21, %v1768_v19  ;;  %1880 = vmatmul.bf16.gmra.mxu2 %v10424_v59  ;;  %3082 = vmatmul.bf16.gmra.mxu0 %v11200_v17  ;;  %v8108_v21 = vor.u32 %v9459_v14, %v8107_v13  ;;  %v11334_v13 = vpack.c.bf16 %v10974_v42, %v10916_v12 }
 0x136   : > { %1899 = vmatmul.bf16.gmra.mxu3 %v10426_v61  ;;  %3111 = vmatmul.bf16.gmra.mxu1 %v11204_v23  ;;  %v799_v14 = vmul.f32 %v11330_v7, %v10222_v56  ;;  %v800_v33 = vmul.f32 %v780_v6, %v10222_v56  ;;  %v810_v36 = vmul.f32 %v780_v6, %v10297_v38 }
 0x137   : > { %3015 = vmatpush.bf16.msrb.mxu2 %v8180_v55  ;;  %3044 = vmatpush.bf16.msra.mxu3 %v8468_v34  ;;  %v8120_v55 = vor.u32 %v9456_v25, %v8117_v27  ;;  %v8408_v34 = vor.u32 %v9528_v15, %v8405_v29  ;;  %v814_v25 = vmul.f32 %v11293_v32, %v10297_v38 }
 0x138   : > { %v11236_v43 = vpop.f32.mrf.mxu2  ;;  %3190 = vmatpush.bf16.msra.mxu0 %v8156_v4  ;;  %3219 = vmatpush.bf16.msra.mxu1 %v8444_v11  ;;  %v8369_v4 = vld [vmem:[%s14717_s6 + $0x26c] sm:$0xf0]  ;;  %v1649_v12 = vadd.f32 %v11112_v5, %v799_v14 }
 0x139   : > { %v11247_v53 = vpop.f32.mrf.mxu3 }
 0x13a   : > { %v1769_v0 = vpop.f32.mrf.mxu0  ;;  %v1668_v27 = vadd.f32 %v11123_v10, %v1649_v12  ;;  %v824_v10 = vmul.f32 %v11293_v32, %v10410_v45 }
 0x13b   : > { %v1770_v8 = vadd.f32 %v1769_v0, %v832_v39  ;;  %v1788_v9 = vpop.f32.mrf.mxu1  ;;  %3016 = vmatpush.bf16.msrb.mxu2 %v8144_v2  ;;  %3045 = vmatpush.bf16.msra.mxu3 %v8432_v1  ;;  %v9522_v39 = vld [vmem:[%s14717_s6 + $0x260] sm:$0xf0]  ;;  %v9447_v2 = vld [vmem:[%s14717_s6 + $0xc] sm:$0xf] }
 0x13c   : > { %3191 = vmatpush.bf16.msra.mxu0 %v8120_v55  ;;  %v8360_v62 = vor.u32 %v9522_v39, %v8359_v41  ;;  %v8084_v0 = vor.u32 %v9447_v2, %v8081_v58  ;;  %v9519_v1 = vld [vmem:[%s14717_s6 + $0x24c] sm:$0xf]  ;;  %3220 = vmatpush.bf16.msra.mxu1 %v8408_v34  ;;  %v11360_v39 = vpack.c.bf16 %v11036_v18, %v10990_v57 }
 0x13d   : > { %v11275_v19 = vadd.f32 %v1788_v9, %v1770_v8  ;;  %v8372_v11 = vor.u32 %v9519_v1, %v8369_v4 }
 0x13f   : > { %3017 = vmatpush.bf16.msrb.mxu2 %v8108_v21  ;;  %3046 = vmatpush.bf16.msra.mxu3 %v8396_v54 }
 0x140   : > { %v11295_v35 = vpop.f32.mrf.mxu2  ;;  %3192 = vmatpush.bf16.msra.mxu0 %v8084_v0  ;;  %3221 = vmatpush.bf16.msra.mxu1 %v8372_v11  ;;  %v819_v0 = vmul.f32 %v11330_v7, %v10410_v45 }
 0x141   : > { %v11306_v47 = vpop.f32.mrf.mxu3 }
 0x142   : > { %v1838_v60 = vpop.f32.mrf.mxu0  ;;  %v1654_v57 = vadd.f32 %v11236_v43, %v819_v0 }
 0x143   : > { %v1839_v8 = vadd.f32 %v1838_v60, %v804_v48  ;;  %v1857_v9 = vpop.f32.mrf.mxu1  ;;  %3018 = vmatpush.bf16.msrb.mxu2 %v8072_v52  ;;  %3047 = vmatpush.bf16.msra.mxu3 %v8360_v62 }
 0x145   : > { %v11338_v16 = vadd.f32 %v1857_v9, %v1839_v8  ;;  %1951 = vmatmul.bf16.vlgmr.msra.gmra.mxu2 %v10309_v49  ;;  %3087 = vmatmul.bf16.gmra.mxu0 %v11327_v31  ;;  %v834_v8 = vmul.f32 %v11293_v32, %v10412_v46 }
 0x146   : > { %1970 = vmatmul.bf16.vlgmr.msrb.gmra.mxu3 %v10311_v51  ;;  %3116 = vmatmul.bf16.gmra.mxu1 %v11334_v13  ;;  %v809_v51 = vmul.f32 %v11330_v7, %v10297_v38 }
 0x148   : > { %v1686_v42 = vpop.f32.mrf.mxu2  ;;  %v1651_v34 = vadd.f32 %v11168_v30, %v809_v51  ;;  %v11365_v30 = vpack.c.bf16 %v11055_v28, %v11004_v3  ;;  %v820_v3 = vmul.f32 %v780_v6, %v10410_v45 }
 0x149   : > { %v1687_v21 = vadd.f32 %v1686_v42, %v800_v33  ;;  %v1705_v22 = vpop.f32.mrf.mxu3 }
 0x14a   : > { %v1840_v49 = vpop.f32.mrf.mxu0  ;;  %v1670_v2 = vadd.f32 %v11179_v63, %v1651_v34 }
 0x14b   : > { %v1706_v54 = vadd.f32 %v1705_v22, %v1687_v21  ;;  %v1841_v55 = vadd.f32 %v1840_v49, %v814_v25  ;;  %v1859_v15 = vpop.f32.mrf.mxu1  ;;  %v11385_v21 = vperm.slane %v11041_v20, 7 }
 0x14d   : > { %v2019_v29 = vpack.c.bf16 %v1706_v54, %v1668_v27  ;;  %v11352_v5 = vadd.f32 %v1859_v15, %v1841_v55 }
 0x14f   : > { %2039 = vst [vmem:[#allocation2] sm:$0xff] %v2019_v29 }
 0x150   : > { %v1688_v40 = vpop.f32.mrf.mxu2 }
 0x151   : > { %v1689_v41 = vadd.f32 %v1688_v40, %v810_v36  ;;  %v1707_v48 = vpop.f32.mrf.mxu3  ;;  %v11403_v40 = vperm.slane %v11041_v20, 2 }
 0x152   : > { %v1843_v52 = vpop.f32.mrf.mxu0 }
 0x153   : > { %v1708_v58 = vadd.f32 %v1707_v48, %v1689_v41  ;;  %v1844_v60 = vadd.f32 %v1843_v52, %v824_v10  ;;  %v1862_v62 = vpop.f32.mrf.mxu1  ;;  %v8331_v41 = vld [vmem:[%s14717_s6 + $0x200] sm:$0xf]  ;;  %v9514_v48 = vld [vmem:[%s14717_s6 + $0x220] sm:$0xf0] }
 0x154   : > { %v8619_v10 = vld [vmem:[%s14717_s6 + $0x440] sm:$0xf] }
 0x155   : > { %v2024_v1 = vpack.c.bf16 %v1708_v58, %v1670_v2  ;;  %v11369_v4 = vadd.f32 %v1862_v62, %v1844_v60  ;;  %1956 = vmatmul.bf16.gmra.mxu2 %v10424_v59  ;;  %3092 = vmatmul.bf16.gmra.mxu0 %v11360_v39  ;;  %v1673_v59 = vadd.f32 %v11247_v53, %v1654_v57  ;;  %v9586_v58 = vld [vmem:[%s14717_s6 + $0x460] sm:$0xf0]  ;;  %v9511_v60 = vld [vmem:[%s14717_s6 + $0x20c] sm:$0xf]  ;;  %v8341_v62 = vld [vmem:[%s14717_s6 + $0x22c] sm:$0xf0] }
 0x156   : > { %1975 = vmatmul.bf16.gmra.mxu3 %v10426_v61  ;;  %3121 = vmatmul.bf16.gmra.mxu1 %v11365_v30  ;;  %v829_v61 = vmul.f32 %v11330_v7, %v10412_v46  ;;  %v8655_v42 = vld [vmem:[#allocation2] sm:$0xf]  ;;  %v9592_v25 = vld [vmem:[#allocation2 + $0x4] sm:$0xf]  ;;  %v830_v53 = vmul.f32 %v780_v6, %v10412_v46  ;;  %v8332_v2 = vor.u32 %v9514_v48, %v8331_v41  ;;  %v9583_v57 = vld [vmem:[%s14717_s6 + $0x44c] sm:$0xf] }
 0x157   : > { %2044 = vst [vmem:[#allocation2 + $0x28] sm:$0xff] %v2024_v1  ;;  %v8620_v0 = vor.u32 %v9586_v58, %v8619_v10  ;;  %v8344_v1 = vor.u32 %v9511_v60, %v8341_v62  ;;  %v9568_v10 = vld [vmem:[%s14717_s6 + $0x3d0] sm:$0xf0] }
 0x158   : > { %v1691_v18 = vpop.f32.mrf.mxu2  ;;  %v1656_v32 = vadd.f32 %v11295_v35, %v829_v61  ;;  %v806_v35 = vmul.f32 %v11385_v21, %v10222_v56  ;;  %3127 = vmatpush.bf16.msra.mxu2 %v8332_v2  ;;  %v8269_v2 = vld [vmem:[%s14717_s6 + $0x19c] sm:$0xf0] }
 0x159   : > { %v1692_v28 = vadd.f32 %v1691_v18, %v820_v3  ;;  %v1710_v63 = vpop.f32.mrf.mxu3  ;;  %v801_v3 = vmul.f32 %v11403_v40, %v10222_v56  ;;  %v8629_v18 = vld [vmem:[%s14717_s6 + $0x46c] sm:$0xf0]  ;;  %3156 = vmatpush.bf16.msrb.mxu3 %v8620_v0  ;;  %3301 = vmatpush.bf16.msrb.mxu0 %v8344_v1  ;;  %v9565_v0 = vld [vmem:[%s14717_s6 + $0x3bc] sm:$0xf]  ;;  %v811_v1 = vmul.f32 %v11403_v40, %v10297_v38 }
 0x15a   : > { %v1845_v9 = vpop.f32.mrf.mxu0  ;;  %v1675_v51 = vadd.f32 %v11306_v47, %v1656_v32  ;;  %v9574_v32 = vld [vmem:[%s14717_s6 + $0x404] sm:$0xf] }
 0x15b   : > { %v1711_v11 = vadd.f32 %v1710_v63, %v1692_v28  ;;  %v1846_v14 = vadd.f32 %v1845_v9, %v834_v8  ;;  %v1864_v12 = vpop.f32.mrf.mxu1  ;;  %v8632_v63 = vor.u32 %v9583_v57, %v8629_v18  ;;  %v8295_v8 = vld [vmem:[%s14717_s6 + $0x1b8] sm:$0xf]  ;;  %v9505_v9 = vld [vmem:[%s14717_s6 + $0x1d8] sm:$0xf0] }
 0x15c   : > { %v8296_v61 = vor.u32 %v9505_v9, %v8295_v8  ;;  %v9487_v8 = vld [vmem:[%s14717_s6 + $0x148] sm:$0xf0]  ;;  %v8511_v9 = vld [vmem:[%s14717_s6 + $0x368] sm:$0xf] }
 0x15d   : > { %v2029_v33 = vpack.c.bf16 %v1711_v11, %v1673_v59  ;;  %v11382_v43 = vadd.f32 %v1864_v12, %v1846_v14  ;;  %v8583_v59 = vld [vmem:[%s14717_s6 + $0x3f8] sm:$0xf]  ;;  %v816_v12 = vmul.f32 %v11385_v21, %v10297_v38  ;;  %3330 = vmatpush.bf16.msrb.mxu1 %v8632_v63  ;;  %v8223_v63 = vld [vmem:[%s14717_s6 + $0x128] sm:$0xf] }
 0x15e   : > { %v9593_v22 = vld [vmem:[#allocation2 + $0x24] sm:$0xf0]  ;;  %v8657_v49 = vld [vmem:[#allocation2 + $0x28] sm:$0xf0]  ;;  %3128 = vmatpush.bf16.msra.mxu2 %v8296_v61 }
 0x15f   : > { %2049 = vst [vmem:[#allocation2 + $0x50] sm:$0xff] %v2029_v33  ;;  %v11389_v27 = vor.u32 %v9593_v22, %v8655_v42  ;;  %v11391_v54 = vor.u32 %v9592_v25, %v8657_v49  ;;  %v9577_v33 = vld [vmem:[%s14717_s6 + $0x418] sm:$0xf0]  ;;  %v9502_v42 = vld [vmem:[%s14717_s6 + $0x1c4] sm:$0xf] }
 0x160   : > { %v1693_v7 = vpop.f32.mrf.mxu2  ;;  %v8584_v25 = vor.u32 %v9577_v33, %v8583_v59  ;;  %v8305_v49 = vld [vmem:[%s14717_s6 + $0x1e4] sm:$0xf0]  ;;  %v9559_v61 = vld [vmem:[%s14717_s6 + $0x388] sm:$0xf0]  ;;  %v9484_v33 = vld [vmem:[%s14717_s6 + $0x134] sm:$0xf] }
 0x161   : > { %v1694_v55 = vadd.f32 %v1693_v7, %v830_v53  ;;  %v1712_v15 = vpop.f32.mrf.mxu3  ;;  %3641 = vrot.lane.b32.xlu1 %v11389_v27, %s9766_s26  ;;  %3656 = vrot.lane.b32.xlu0 %v11391_v54, %s9767_s27  ;;  %v8593_v53 = vld [vmem:[%s14717_s6 + $0x424] sm:$0xf0] }
 0x162   : > { %3643 = vrot.lane.b32.xlu2 %v11391_v54, %s9766_s26  ;;  %v1914_v6 = vpop.f32.mrf.mxu0  ;;  %3157 = vmatpush.bf16.msrb.mxu3 %v8584_v25  ;;  %v8233_v25 = vld [vmem:[%s14717_s6 + $0x154] sm:$0xf0] }
 0x163   : > { %v1713_v29 = vadd.f32 %v1712_v15, %v1694_v55  ;;  %v1915_v34 = vadd.f32 %v1914_v6, %v806_v35  ;;  %v1933_v36 = vpop.f32.mrf.mxu1  ;;  %v8308_v35 = vor.u32 %v9502_v42, %v8305_v49  ;;  %v8596_v6 = vor.u32 %v9574_v32, %v8593_v53  ;;  %v9556_v49 = vld [vmem:[%s14717_s6 + $0x374] sm:$0xf]  ;;  %v8521_v32 = vld [vmem:[%s14717_s6 + $0x394] sm:$0xf0] }
 0x165   : > { %v2034_v52 = vpack.c.bf16 %v1713_v29, %v1675_v51  ;;  %v11414_v47 = vadd.f32 %v1933_v36, %v1915_v34  ;;  %3019 = vmatmul.bf16.vlgmr.msrb.gmra.mxu2 %v11076_v44  ;;  %3193 = vmatmul.bf16.vlgmr.msra.gmra.mxu0 %v11076_v44  ;;  %v8259_v51 = vld [vmem:[%s14717_s6 + $0x170] sm:$0xf]  ;;  %v9496_v29 = vld [vmem:[%s14717_s6 + $0x190] sm:$0xf0] }
 0x166   : > { %3048 = vmatmul.bf16.vlgmr.msra.gmra.mxu3 %v11080_v50  ;;  %3222 = vmatmul.bf16.vlgmr.msra.gmra.mxu1 %v11080_v50  ;;  %v8547_v34 = vld [vmem:[%s14717_s6 + $0x3b0] sm:$0xf]  ;;  %v8260_v48 = vor.u32 %v9496_v29, %v8259_v51  ;;  %v8187_v51 = vld [vmem:[%s14717_s6 + $0xe0] sm:$0xf]  ;;  %v9478_v29 = vld [vmem:[%s14717_s6 + $0x100] sm:$0xf0] }
 0x167   : > { %2054 = vst [vmem:[#allocation2 + $0x78] sm:$0xff] %v2034_v52  ;;  %3302 = vmatpush.bf16.msrb.mxu0 %v8308_v35  ;;  %v9493_v52 = vld [vmem:[%s14717_s6 + $0x17c] sm:$0xf]  ;;  %v8663_v58 = vld [vmem:[#allocation2 + $0x50] sm:$0xf]  ;;  %3331 = vmatpush.bf16.msrb.mxu1 %v8596_v6  ;;  %v8236_v35 = vor.u32 %v9484_v33, %v8233_v25  ;;  %v8524_v6 = vor.u32 %v9556_v49, %v8521_v32 }
 0x168   : > { %v1724_v28 = vpop.f32.mrf.mxu2  ;;  %v8272_v62 = vor.u32 %v9493_v52, %v8269_v2  ;;  %3129 = vmatpush.bf16.msra.mxu2 %v8260_v48  ;;  %v9550_v52 = vld [vmem:[%s14717_s6 + $0x340] sm:$0xf0]  ;;  %v9475_v2 = vld [vmem:[%s14717_s6 + $0xec] sm:$0xf]  ;;  %v8161_v25 = vld [vmem:[%s14717_s6 + $0xc4] sm:$0xf0] }
 0x169   : > { %v1725_v11 = vadd.f32 %v1724_v28, %v801_v3  ;;  %v1743_v14 = vpop.f32.mrf.mxu3  ;;  %3669 = vrot.lane.b32.xlu1 %v11391_v54, %s9768_s16  ;;  %3667 = vrot.lane.b32.xlu0 %v11389_v27, %s9768_s16  ;;  %v8557_v3 = vld [vmem:[%s14717_s6 + $0x3dc] sm:$0xf0]  ;;  %v9466_v33 = vld [vmem:[%s14717_s6 + $0xa4] sm:$0xf] }
 0x16a   : > { %3654 = vrot.lane.b32.xlu2 %v11389_v27, %s9767_s27  ;;  %v1916_v22 = vpop.f32.mrf.mxu0  ;;  %v8560_v28 = vor.u32 %v9565_v0, %v8557_v3  ;;  %v8485_v0 = vld [vmem:[%s14717_s6 + $0x34c] sm:$0xf0]  ;;  %v8449_v49 = vld [vmem:[%s14717_s6 + $0x304] sm:$0xf0] }
 0x16b   : > { %v1744_v7 = vadd.f32 %v1743_v14, %v1725_v11  ;;  %v1917_v55 = vadd.f32 %v1916_v22, %v816_v12  ;;  %v1935_v15 = vpop.f32.mrf.mxu1  ;;  %v826_v14 = vmul.f32 %v11385_v21, %v10410_v45  ;;  %v8224_v12 = vor.u32 %v9487_v8, %v8223_v63  ;;  %3303 = vmatpush.bf16.msrb.mxu0 %v8272_v62  ;;  %v9547_v62 = vld [vmem:[%s14717_s6 + $0x32c] sm:$0xf]  ;;  %v8151_v63 = vld [vmem:[%s14717_s6 + $0x98] sm:$0xf]  ;;  %v9469_v8 = vld [vmem:[%s14717_s6 + $0xb8] sm:$0xf0] }
 0x16c   : > { %v8512_v22 = vor.u32 %v9559_v61, %v8511_v9  ;;  %3332 = vmatpush.bf16.msrb.mxu1 %v8560_v28  ;;  %v8439_v9 = vld [vmem:[%s14717_s6 + $0x2d8] sm:$0xf]  ;;  %v9541_v61 = vld [vmem:[%s14717_s6 + $0x2f8] sm:$0xf0] }
 0x16d   : > { %v2020_v36 = vpack.c.bf16 %v11091_v24, %v1744_v7  ;;  %v11479_v41 = vadd.f32 %v1935_v15, %v1917_v55  ;;  %v8548_v24 = vor.u32 %v9568_v10, %v8547_v34  ;;  %3130 = vmatpush.bf16.msra.mxu2 %v8224_v12  ;;  %v8475_v34 = vld [vmem:[%s14717_s6 + $0x320] sm:$0xf]  ;;  %v8188_v10 = vor.u32 %v9478_v29, %v8187_v51  ;;  %v9460_v51 = vld [vmem:[%s14717_s6 + $0x70] sm:$0xf0]  ;;  %v8403_v29 = vld [vmem:[%s14717_s6 + $0x290] sm:$0xf] }
 0x16e   : > { %v9595_v60 = vld [vmem:[#allocation2 + $0x74] sm:$0xf0]  ;;  %v8665_v15 = vld [vmem:[#allocation2 + $0x78] sm:$0xf0]  ;;  %v8152_v12 = vor.u32 %v9469_v8, %v8151_v63  ;;  %v9451_v63 = vld [vmem:[%s14717_s6 + $0x28] sm:$0xf0] }
 0x16f   : > { %2040 = vst [vmem:[#allocation2 + $0x8] sm:$0xff] %v2020_v36  ;;  %v11495_v57 = vor.u32 %v9595_v60, %v8663_v58  ;;  %3158 = vmatpush.bf16.msrb.mxu3 %v8548_v24  ;;  %v8197_v58 = vld [vmem:[%s14717_s6 + $0x10c] sm:$0xf0]  ;;  %v9594_v60 = vld [vmem:[#allocation2 + $0x54] sm:$0xf]  ;;  %v8476_v24 = vor.u32 %v9550_v52, %v8475_v34  ;;  %3304 = vmatpush.bf16.msrb.mxu0 %v8236_v35 }
 0x170   : > { %v1726_v18 = vpop.f32.mrf.mxu2  ;;  %3333 = vmatpush.bf16.msrb.mxu1 %v8524_v6  ;;  %v8200_v3 = vor.u32 %v9475_v2, %v8197_v58  ;;  %v8115_v6 = vld [vmem:[%s14717_s6 + $0x50] sm:$0xf]  ;;  %v9532_v52 = vld [vmem:[%s14717_s6 + $0x2b0] sm:$0xf0]  ;;  %v9457_v2 = vld [vmem:[%s14717_s6 + $0x5c] sm:$0xf] }
 0x171   : > { %v1727_v59 = vadd.f32 %v1726_v18, %v811_v1  ;;  %v1745_v11 = vpop.f32.mrf.mxu3  ;;  %3680 = vrot.lane.b32.xlu1 %v11389_v27, %s9769_s23  ;;  %3645 = vrot.lane.b32.xlu0 %v11495_v57, %s9766_s26  ;;  %v11565_v1 = vor.u32 %v9594_v60, %v8665_v15  ;;  %v8488_v18 = vor.u32 %v9547_v62, %v8485_v0  ;;  %v8125_v58 = vld [vmem:[%s14717_s6 + $0x7c] sm:$0xf0]  ;;  %v8367_v8 = vld [vmem:[%s14717_s6 + $0x248] sm:$0xf] }
 0x172   : > { %3682 = vrot.lane.b32.xlu2 %v11391_v54, %s9769_s23  ;;  %v1919_v42 = vpop.f32.mrf.mxu0  ;;  %3131 = vmatpush.bf16.msra.mxu2 %v8188_v10  ;;  %v8164_v15 = vor.u32 %v9466_v33, %v8161_v25  ;;  %v8116_v10 = vor.u32 %v9460_v51, %v8115_v6  ;;  %v8404_v60 = vor.u32 %v9532_v52, %v8403_v29  ;;  %v8377_v25 = vld [vmem:[%s14717_s6 + $0x274] sm:$0xf0]  ;;  %v783_v6 = vperm.slane %v11041_v20, 4 }
 0x173   : > { %v1746_v53 = vadd.f32 %v1745_v11, %v1727_v59  ;;  %v1920_v7 = vadd.f32 %v1919_v42, %v826_v14  ;;  %v1938_v55 = vpop.f32.mrf.mxu1  ;;  %3159 = vmatpush.bf16.msrb.mxu3 %v8512_v22  ;;  %v836_v14 = vmul.f32 %v11385_v21, %v10412_v46  ;;  %v8440_v22 = vor.u32 %v9541_v61, %v8439_v9  ;;  %v9538_v21 = vld [vmem:[%s14717_s6 + $0x2e4] sm:$0xf] }
 0x174   : > { %3305 = vmatpush.bf16.msrb.mxu0 %v8200_v3  ;;  %3334 = vmatpush.bf16.msrb.mxu1 %v8488_v18  ;;  %v8452_v35 = vor.u32 %v9538_v21, %v8449_v49  ;;  %v831_v62 = vmul.f32 %v11403_v40, %v10412_v46  ;;  %v8128_v0 = vor.u32 %v9457_v2, %v8125_v58 }
 0x175   : > { %v2025_v36 = vpack.c.bf16 %v11151_v37, %v1746_v53  ;;  %v11542_v48 = vadd.f32 %v1938_v55, %v1920_v7  ;;  %3024 = vmatmul.bf16.gmra.mxu2 %v11200_v17  ;;  %3198 = vmatmul.bf16.gmra.mxu0 %v11200_v17  ;;  %v821_v37 = vmul.f32 %v11403_v40, %v10410_v45  ;;  %v11602_v55 = vld [vmem:[%s14715_s4 + $0x8] sm:$0x3] }
 0x176   : > { %3053 = vmatmul.bf16.gmra.mxu3 %v11204_v23  ;;  %3227 = vmatmul.bf16.gmra.mxu1 %v11204_v23  ;;  %v803_v51 = vmul.f32 %v783_v6, %v10222_v56 }
 0x177   : > { %2045 = vst [vmem:[#allocation2 + $0x30] sm:$0xff] %v2025_v36  ;;  %3160 = vmatpush.bf16.msrb.mxu3 %v8476_v24  ;;  %3132 = vmatpush.bf16.msra.mxu2 %v8152_v12  ;;  %v8413_v24 = vld [vmem:[%s14717_s6 + $0x2bc] sm:$0xf0]  ;;  %v9448_v12 = vld [vmem:[%s14717_s6 + $0x14] sm:$0xf] }
 0x178   : > { %v1729_v28 = vpop.f32.mrf.mxu2  ;;  %3306 = vmatpush.bf16.msrb.mxu0 %v8164_v15  ;;  %3335 = vmatpush.bf16.msrb.mxu1 %v8452_v35 }
 0x179   : > { %v1730_v59 = vadd.f32 %v1729_v28, %v821_v37  ;;  %v1748_v11 = vpop.f32.mrf.mxu3  ;;  %3695 = vrot.lane.b32.xlu0 %v11391_v54, %s14725_s13  ;;  %3647 = vrot.lane.b32.xlu1 %v11565_v1, %s9766_s26  ;;  %v11626_v37 = vperm.slane %v11602_v55, 1  ;;  %v8079_v28 = vld [vmem:[%s14717_s6 + $0x8] sm:$0xf] }
 0x17a   : > { %3660 = vrot.lane.b32.xlu2 %v11565_v1, %s9767_s27  ;;  %v1921_v42 = vpop.f32.mrf.mxu0 }
 0x17b   : > { %v1749_v32 = vadd.f32 %v1748_v11, %v1730_v59  ;;  %v1922_v53 = vadd.f32 %v1921_v42, %v836_v14  ;;  %v1940_v7 = vpop.f32.mrf.mxu1  ;;  %3161 = vmatpush.bf16.msrb.mxu3 %v8440_v22  ;;  %3133 = vmatpush.bf16.msra.mxu2 %v8116_v10  ;;  %v808_v59 = vmul.f32 %v11626_v37, %v10222_v56  ;;  %v9523_v14 = vld [vmem:[%s14717_s6 + $0x268] sm:$0xf0]  ;;  %v8089_v42 = vld [vmem:[%s14717_s6 + $0x34] sm:$0xf0]  ;;  %v9520_v22 = vld [vmem:[%s14717_s6 + $0x254] sm:$0xf] }
 0x17c   : > { %v8080_v11 = vor.u32 %v9451_v63, %v8079_v28  ;;  %v8368_v33 = vor.u32 %v9523_v14, %v8367_v8  ;;  %3307 = vmatpush.bf16.msrb.mxu0 %v8128_v0  ;;  %v818_v20 = vmul.f32 %v11626_v37, %v10297_v38 }
 0x17d   : > { %v2030_v34 = vpack.c.bf16 %v11215_v26, %v1749_v32  ;;  %v11614_v36 = vadd.f32 %v1940_v7, %v1922_v53  ;;  %v9529_v26 = vld [vmem:[%s14717_s6 + $0x29c] sm:$0xf]  ;;  %v8092_v53 = vor.u32 %v9448_v12, %v8089_v42  ;;  %v8380_v7 = vor.u32 %v9520_v22, %v8377_v25 }
 0x17e   : > { %v8416_v3 = vor.u32 %v9529_v26, %v8413_v24  ;;  %v813_v24 = vmul.f32 %v783_v6, %v10297_v38 }
 0x17f   : > { %2050 = vst [vmem:[#allocation2 + $0x58] sm:$0xff] %v2030_v34  ;;  %3162 = vmatpush.bf16.msrb.mxu3 %v8404_v60  ;;  %3134 = vmatpush.bf16.msra.mxu2 %v8080_v11 }
 0x180   : > { %v1731_v18 = vpop.f32.mrf.mxu2  ;;  %3336 = vmatpush.bf16.msrb.mxu1 %v8416_v3  ;;  %3308 = vmatpush.bf16.msrb.mxu0 %v8092_v53 }
 0x181   : > { %v1732_v40 = vadd.f32 %v1731_v18, %v831_v62  ;;  %v1750_v9 = vpop.f32.mrf.mxu3  ;;  %3673 = vrot.lane.b32.xlu0 %v11565_v1, %s9768_s16  ;;  %3658 = vrot.lane.b32.xlu1 %v11495_v57, %s9767_s27  ;;  %v828_v18 = vmul.f32 %v11626_v37, %v10410_v45 }
 0x182   : > { %3671 = vrot.lane.b32.xlu2 %v11495_v57, %s9768_s16  ;;  %v1990_v61 = vpop.f32.mrf.mxu0 }
 0x183   : > { %v1751_v21 = vadd.f32 %v1750_v9, %v1732_v40  ;;  %v1991_v49 = vadd.f32 %v1990_v61, %v808_v59  ;;  %v2009_v32 = vpop.f32.mrf.mxu1  ;;  %3163 = vmatpush.bf16.msrb.mxu3 %v8368_v33  ;;  %v823_v59 = vmul.f32 %v783_v6, %v10410_v45 }
 0x184   : > { %3337 = vmatpush.bf16.msrb.mxu1 %v8380_v7 }
 0x185   : > { %v2035_v15 = vpack.c.bf16 %v11275_v19, %v1751_v21  ;;  %v11669_v35 = vadd.f32 %v2009_v32, %v1991_v49  ;;  %3029 = vmatmul.bf16.gmra.mxu2 %v11327_v31  ;;  %3203 = vmatmul.bf16.gmra.mxu0 %v11327_v31  ;;  %v11716_v49 = vpop.permute.xlu2 %2237  ;;  %v833_v32 = vmul.f32 %v783_v6, %v10412_v46  ;;  %v9756_v6 = vld [vmem:[%s14715_s4] sm:$0xff] }
 0x186   : > { %3058 = vmatmul.bf16.gmra.mxu3 %v11334_v13  ;;  %3232 = vmatmul.bf16.gmra.mxu1 %v11334_v13 }
 0x187   : > { %2055 = vst [vmem:[#allocation2 + $0x80] sm:$0xff] %v2035_v15 }
 0x188   : > { %v1800_v29 = vpop.f32.mrf.mxu2 }
 0x189   : > { %v1801_v34 = vadd.f32 %v1800_v29, %v803_v51  ;;  %v1819_v19 = vpop.f32.mrf.mxu3  ;;  %3706 = vrot.lane.b32.xlu0 %v11389_v27, %s14723_s28  ;;  %3708 = vrot.lane.b32.xlu1 %v11391_v54, %s14723_s28 }
 0x18a   : > { %3693 = vrot.lane.b32.xlu2 %v11389_v27, %s14725_s13  ;;  %v1992_v10 = vpop.f32.mrf.mxu0 }
 0x18b   : > { %v1820_v52 = vadd.f32 %v1819_v19, %v1801_v34  ;;  %v1993_v2 = vadd.f32 %v1992_v10, %v818_v20  ;;  %v2011_v58 = vpop.f32.mrf.mxu1  ;;  %v11730_v34 = vperm.slane %v9756_v6, 6  ;;  %v8339_v19 = vld [vmem:[%s14717_s6 + $0x208] sm:$0xf]  ;;  %v9515_v20 = vld [vmem:[%s14717_s6 + $0x228] sm:$0xf0] }
 0x18c   : > { %v8627_v10 = vld [vmem:[%s14717_s6 + $0x448] sm:$0xf]  ;;  %v9497_v6 = vld [vmem:[%s14717_s6 + $0x198] sm:$0xf0] }
 0x18d   : > { %v2021_v60 = vpack.c.bf16 %v11338_v16, %v1820_v52  ;;  %v11686_v26 = vadd.f32 %v2011_v58, %v1993_v2  ;;  %v8340_v58 = vor.u32 %v9515_v20, %v8339_v19 }
 0x18f   : > { %2041 = vst [vmem:[#allocation2 + $0x10] sm:$0xff] %v2021_v60  ;;  %v9587_v60 = vld [vmem:[%s14717_s6 + $0x468] sm:$0xf0]  ;;  %3243 = vmatpush.bf16.msrb.mxu2 %v8340_v58  ;;  %v9569_v58 = vld [vmem:[%s14717_s6 + $0x3d8] sm:$0xf0] }
 0x190   : > { %v1802_v62 = vpop.f32.mrf.mxu2 }
 0x191   : > { %v1803_v0 = vadd.f32 %v1802_v62, %v813_v24  ;;  %v1821_v3 = vpop.f32.mrf.mxu3  ;;  %3684 = vrot.lane.b32.xlu0 %v11495_v57, %s9769_s23  ;;  %3719 = vrot.lane.b32.xlu1 %v11389_v27, %s9772_s29  ;;  %v9512_v24 = vld [vmem:[%s14717_s6 + $0x214] sm:$0xf]  ;;  %v8349_v62 = vld [vmem:[%s14717_s6 + $0x234] sm:$0xf0] }
 0x192   : > { %3721 = vrot.lane.b32.xlu2 %v11391_v54, %s9772_s29  ;;  %v1995_v16 = vpop.f32.mrf.mxu0 }
 0x193   : > { %v1822_v28 = vadd.f32 %v1821_v3, %v1803_v0  ;;  %v1996_v63 = vadd.f32 %v1995_v16, %v828_v18  ;;  %v2014_v8 = vpop.f32.mrf.mxu1  ;;  %v8352_v0 = vor.u32 %v9512_v24, %v8349_v62  ;;  %v9584_v3 = vld [vmem:[%s14717_s6 + $0x454] sm:$0xf]  ;;  %v8637_v18 = vld [vmem:[%s14717_s6 + $0x474] sm:$0xf0]  ;;  %v805_v16 = vmul.f32 %v11730_v34, %v10222_v56  ;;  %v9566_v62 = vld [vmem:[%s14717_s6 + $0x3c4] sm:$0xf] }
 0x195   : > { %v2026_v40 = vpack.c.bf16 %v11352_v5, %v1822_v28  ;;  %v11698_v9 = vadd.f32 %v2014_v8, %v1996_v63  ;;  %3034 = vmatmul.bf16.gmra.mxu2 %v11360_v39  ;;  %3208 = vmatmul.bf16.gmra.mxu0 %v11360_v39  ;;  %v838_v5 = vmul.f32 %v11626_v37, %v10412_v46  ;;  %v8303_v8 = vld [vmem:[%s14717_s6 + $0x1c0] sm:$0xf] }
 0x196   : > { %3063 = vmatmul.bf16.gmra.mxu3 %v11365_v30  ;;  %3237 = vmatmul.bf16.gmra.mxu1 %v11365_v30  ;;  %v8640_v28 = vor.u32 %v9584_v3, %v8637_v18  ;;  %v11844_v3 = vld [vmem:[%s14719_s8 + $0x10] sm:$0xff] }
 0x197   : > { %2046 = vst [vmem:[#allocation2 + $0x38] sm:$0xff] %v2026_v40  ;;  %3417 = vmatpush.bf16.msra.mxu0 %v8352_v0  ;;  %v9506_v40 = vld [vmem:[%s14717_s6 + $0x1e0] sm:$0xf0]  ;;  %v815_v0 = vmul.f32 %v11730_v34, %v10297_v38 }
 0x198   : > { %v1805_v11 = vpop.f32.mrf.mxu2  ;;  %3446 = vmatpush.bf16.msra.mxu1 %v8640_v28 }
 0x199   : > { %v1806_v14 = vadd.f32 %v1805_v11, %v823_v59  ;;  %v1824_v12 = vpop.f32.mrf.mxu3  ;;  %3712 = vrot.lane.b32.xlu0 %v11565_v1, %s14723_s28  ;;  %3686 = vrot.lane.b32.xlu1 %v11565_v1, %s9769_s23  ;;  %v11775_v59 = vpop.permute.xlu2 %2252 }
 0x19a   : > { %3699 = vrot.lane.b32.xlu2 %v11565_v1, %s14725_s13  ;;  %v1997_v61 = vpop.f32.mrf.mxu0 }
 0x19b   : > { %v1825_v33 = vadd.f32 %v1824_v12, %v1806_v14  ;;  %v1998_v42 = vadd.f32 %v1997_v61, %v838_v5  ;;  %v2016_v22 = vpop.f32.mrf.mxu1  ;;  %v8304_v12 = vor.u32 %v9506_v40, %v8303_v8  ;;  %v11781_v5 = vpop.permute.xlu0 %2242  ;;  %v9488_v8 = vld [vmem:[%s14717_s6 + $0x150] sm:$0xf0] }
 0x19d   : > { %v2031_v25 = vpack.c.bf16 %v11369_v4, %v1825_v33  ;;  %v11714_v21 = vadd.f32 %v2016_v22, %v1998_v42  ;;  %v8591_v33 = vld [vmem:[%s14717_s6 + $0x400] sm:$0xf]  ;;  %v9578_v42 = vld [vmem:[%s14717_s6 + $0x420] sm:$0xf0]  ;;  %3244 = vmatpush.bf16.msrb.mxu2 %v8304_v12  ;;  %v8519_v12 = vld [vmem:[%s14717_s6 + $0x370] sm:$0xf] }
 0x19f   : > { %2051 = vst [vmem:[#allocation2 + $0x60] sm:$0xff] %v2031_v25 }
 0x1a0   : > { %v1807_v53 = vpop.f32.mrf.mxu2 }
 0x1a1   : > { %v1808_v7 = vadd.f32 %v1807_v53, %v833_v32  ;;  %v1826_v37 = vpop.f32.mrf.mxu3  ;;  %3723 = vrot.lane.b32.xlu0 %v11495_v57, %s9772_s29  ;;  %3697 = vrot.lane.b32.xlu1 %v11495_v57, %s14725_s13  ;;  %v8592_v32 = vor.u32 %v9578_v42, %v8591_v33  ;;  %v8313_v53 = vld [vmem:[%s14717_s6 + $0x1ec] sm:$0xf0]  ;;  %v9560_v42 = vld [vmem:[%s14717_s6 + $0x390] sm:$0xf0] }
 0x1a2   : > { %3710 = vrot.lane.b32.xlu2 %v11495_v57, %s14723_s28  ;;  %v3078_v4 = vpop.f32.mrf.mxu0  ;;  %s11744_s28 = scalar_lea.vmem %s14722_s11, %s9735_s30 }
 0x1a3   : > { %v1827_v15 = vadd.f32 %v1826_v37, %v1808_v7  ;;  %v3079_v51 = vadd.f32 %v3078_v4, %v11716_v49  ;;  %v3107_v29 = vpop.f32.mrf.mxu1  ;;  %v9575_v7 = vld [vmem:[%s14717_s6 + $0x40c] sm:$0xf]  ;;  %v11804_v37 = vld [vmem:[%s14719_s8] sm:$0xff] }
 0x1a4   : > { %v11809_v4 = vld [vmem:[%s14719_s8 + $0x8] sm:$0xff] }
 0x1a5   : > { %v2036_v52 = vpack.c.bf16 %v11382_v43, %v1827_v15  ;;  %v3108_v2 = vadd.f32 %v3107_v29, %v3079_v51  ;;  %3135 = vmatmul.bf16.vlgmr.msra.gmra.mxu2 %v11076_v44  ;;  %3309 = vmatmul.bf16.vlgmr.msrb.gmra.mxu0 %v11076_v44  ;;  %v8628_v43 = vor.u32 %v9587_v60, %v8627_v10  ;;  %v8601_v51 = vld [vmem:[%s14717_s6 + $0x42c] sm:$0xf0]  ;;  %v8267_v29 = vld [vmem:[%s14717_s6 + $0x178] sm:$0xf]  ;;  %v9494_v60 = vld [vmem:[%s14717_s6 + $0x184] sm:$0xf] }
 0x1a6   : > { %3164 = vmatmul.bf16.vlgmr.msrb.gmra.mxu3 %v11080_v50  ;;  %3338 = vmatmul.bf16.vlgmr.msrb.gmra.mxu1 %v11080_v50  ;;  %v8604_v10 = vor.u32 %v9575_v7, %v8601_v51  ;;  %v9557_v7 = vld [vmem:[%s14717_s6 + $0x37c] sm:$0xf]  ;;  %v11877_v51 = vpop.permute.xlu2 %2267 }
 0x1a7   : > { %2056 = vst [vmem:[#allocation2 + $0x88] sm:$0xff] %v2036_v52  ;;  %3272 = vmatpush.bf16.msra.mxu3 %v8628_v43  ;;  %v8268_v52 = vor.u32 %v9497_v6, %v8267_v29  ;;  %v8565_v43 = vld [vmem:[%s14717_s6 + $0x3e4] sm:$0xf0] }
 0x1a8   : > { %3534 = vst [vmem:[%s11744_s28 + $0x8] sm:$0xff] %v3108_v2  ;;  %v1876_v63 = vpop.f32.mrf.mxu2  ;;  %v8555_v2 = vld [vmem:[%s14717_s6 + $0x3b8] sm:$0xf]  ;;  %3447 = vmatpush.bf16.msra.mxu1 %v8604_v10  ;;  %v8483_v10 = vld [vmem:[%s14717_s6 + $0x328] sm:$0xf] }
 0x1a9   : > { %v1877_v11 = vadd.f32 %v1876_v63, %v805_v16  ;;  %v1895_v14 = vpop.f32.mrf.mxu3  ;;  %3734 = vrot.lane.b32.xlu0 %v11391_v54, %s9773_s15  ;;  %3725 = vrot.lane.b32.xlu1 %v11565_v1, %s9772_s29  ;;  %v8556_v24 = vor.u32 %v9569_v58, %v8555_v2  ;;  %v8568_v16 = vor.u32 %v9566_v62, %v8565_v43  ;;  %v8231_v63 = vld [vmem:[%s14717_s6 + $0x130] sm:$0xf]  ;;  %v9548_v62 = vld [vmem:[%s14717_s6 + $0x334] sm:$0xf] }
 0x1aa   : > { %3732 = vrot.lane.b32.xlu2 %v11389_v27, %s9773_s15  ;;  %v3080_v61 = vpop.f32.mrf.mxu0  ;;  %v9503_v27 = vld [vmem:[%s14717_s6 + $0x1cc] sm:$0xf]  ;;  %3245 = vmatpush.bf16.msrb.mxu2 %v8268_v52  ;;  %v8493_v43 = vld [vmem:[%s14717_s6 + $0x354] sm:$0xf0] }
 0x1ab   : > { %v1896_v54 = vadd.f32 %v1895_v14, %v1877_v11  ;;  %v3081_v22 = vadd.f32 %v3080_v61, %v11781_v5  ;;  %v3109_v25 = vpop.f32.mrf.mxu1  ;;  %v8316_v15 = vor.u32 %v9503_v27, %v8313_v53  ;;  %3273 = vmatpush.bf16.msra.mxu3 %v8592_v32  ;;  %v8232_v14 = vor.u32 %v9488_v8, %v8231_v63  ;;  %v11858_v61 = vpop.permute.xlu1 %2247 }
 0x1ac   : > { %3448 = vmatpush.bf16.msra.mxu1 %v8568_v16  ;;  %v8520_v53 = vor.u32 %v9560_v42, %v8519_v12  ;;  %v8496_v63 = vor.u32 %v9548_v62, %v8493_v43  ;;  %v8447_v12 = vld [vmem:[%s14717_s6 + $0x2e0] sm:$0xf]  ;;  %v8133_v62 = vld [vmem:[%s14717_s6 + $0x84] sm:$0xf0]  ;;  %v835_v43 = vmul.f32 %v11730_v34, %v10412_v46 }
 0x1ad   : > { %v2022_v19 = vpack.c.bf16 %v11414_v47, %v1896_v54  ;;  %v3110_v20 = vadd.f32 %v3109_v25, %v3081_v22  ;;  %3418 = vmatpush.bf16.msra.mxu0 %v8316_v15  ;;  %v8277_v47 = vld [vmem:[%s14717_s6 + $0x1a4] sm:$0xf0]  ;;  %v9485_v54 = vld [vmem:[%s14717_s6 + $0x13c] sm:$0xf]  ;;  %v8241_v22 = vld [vmem:[%s14717_s6 + $0x15c] sm:$0xf0] }
 0x1ae   : > { %v8280_v18 = vor.u32 %v9494_v60, %v8277_v47  ;;  %v8529_v15 = vld [vmem:[%s14717_s6 + $0x39c] sm:$0xf0]  ;;  %3246 = vmatpush.bf16.msrb.mxu2 %v8232_v14  ;;  %v8244_v29 = vor.u32 %v9485_v54, %v8241_v22  ;;  %v9551_v60 = vld [vmem:[%s14717_s6 + $0x348] sm:$0xf0]  ;;  %v8205_v47 = vld [vmem:[%s14717_s6 + $0x114] sm:$0xf0] }
 0x1af   : > { %2042 = vst [vmem:[#allocation2 + $0x18] sm:$0xff] %v2022_v19  ;;  %3274 = vmatpush.bf16.msra.mxu3 %v8556_v24  ;;  %v8532_v6 = vor.u32 %v9557_v7, %v8529_v15  ;;  %v8195_v19 = vld [vmem:[%s14717_s6 + $0xe8] sm:$0xf]  ;;  %v9476_v24 = vld [vmem:[%s14717_s6 + $0xf4] sm:$0xf] }
 0x1b0   : > { %3543 = vst [vmem:[%s11744_s28 + $0x50] sm:$0xff] %v3110_v20  ;;  %v1878_v28 = vpop.f32.mrf.mxu2  ;;  %v9479_v20 = vld [vmem:[%s14717_s6 + $0x108] sm:$0xf0]  ;;  %v8208_v16 = vor.u32 %v9476_v24, %v8205_v47  ;;  %v9470_v14 = vld [vmem:[%s14717_s6 + $0xc0] sm:$0xf0] }
 0x1b1   : > { %v1879_v40 = vadd.f32 %v1878_v28, %v815_v0  ;;  %v1897_v11 = vpop.f32.mrf.mxu3  ;;  %3759 = vperm.xlu0 %9753, %v11804_v37   ;;  %3764 = vperm.xlu1 %9754, %v11809_v4   ;;  %v8196_v58 = vor.u32 %v9479_v20, %v8195_v19  ;;  %v825_v0 = vmul.f32 %v11730_v34, %v10410_v45  ;;  %v9467_v54 = vld [vmem:[%s14717_s6 + $0xac] sm:$0xf]  ;;  %v8169_v22 = vld [vmem:[%s14717_s6 + $0xcc] sm:$0xf0]  ;;  %v9533_v47 = vld [vmem:[%s14717_s6 + $0x2b8] sm:$0xf0] }
 0x1b2   : > { %3769 = vperm.xlu2 %9755, %v11844_v3   ;;  %v3083_v33 = vpop.f32.mrf.mxu0  ;;  %3419 = vmatpush.bf16.msra.mxu0 %v8280_v18  ;;  %v8484_v18 = vor.u32 %v9551_v60, %v8483_v10  ;;  %v8457_v7 = vld [vmem:[%s14717_s6 + $0x30c] sm:$0xf0]  ;;  %v8172_v19 = vor.u32 %v9467_v54, %v8169_v22  ;;  %v8411_v60 = vld [vmem:[%s14717_s6 + $0x298] sm:$0xf]  ;;  %v9524_v22 = vld [vmem:[%s14717_s6 + $0x270] sm:$0xf0] }
 0x1b3   : > { %v1898_v25 = vadd.f32 %v1897_v11, %v1879_v40  ;;  %v3084_v32 = vadd.f32 %v3083_v33, %v11858_v61  ;;  %v3112_v27 = vpop.f32.mrf.mxu1  ;;  %3275 = vmatpush.bf16.msra.mxu3 %v8520_v53  ;;  %3449 = vmatpush.bf16.msra.mxu1 %v8532_v6  ;;  %v8159_v11 = vld [vmem:[%s14717_s6 + $0xa0] sm:$0xf]  ;;  %v9539_v53 = vld [vmem:[%s14717_s6 + $0x2ec] sm:$0xf] }
 0x1b4   : > { %3247 = vmatpush.bf16.msrb.mxu2 %v8196_v58  ;;  %v8160_v42 = vor.u32 %v9470_v14, %v8159_v11  ;;  %v11956_v6 = vld [vmem:[%s14721_s10] sm:$0xff]  ;;  %v8460_v20 = vor.u32 %v9539_v53, %v8457_v7  ;;  %v9461_v58 = vld [vmem:[%s14717_s6 + $0x78] sm:$0xf0]  ;;  %v8087_v14 = vld [vmem:[%s14717_s6 + $0x10] sm:$0xf] }
 0x1b5   : > { %v2027_v52 = vpack.c.bf16 %v11479_v41, %v1898_v25  ;;  %v3113_v2 = vadd.f32 %v3112_v27, %v3084_v32  ;;  %3140 = vmatmul.bf16.gmra.mxu2 %v11200_v17  ;;  %3314 = vmatmul.bf16.gmra.mxu0 %v11200_v17  ;;  %v11905_v41 = vld [vmem:[%s14719_s8 + $0x18] sm:$0xff] }
 0x1b6   : > { %3169 = vmatmul.bf16.gmra.mxu3 %v11204_v23  ;;  %3343 = vmatmul.bf16.gmra.mxu1 %v11204_v23 }
 0x1b7   : > { %2047 = vst [vmem:[#allocation2 + $0x40] sm:$0xff] %v2027_v52  ;;  %3420 = vmatpush.bf16.msra.mxu0 %v8244_v29  ;;  %3276 = vmatpush.bf16.msra.mxu3 %v8484_v18  ;;  %v11951_v29 = vld [vmem:[%s14721_s10 + $0x10] sm:$0xff]  ;;  %v8412_v18 = vor.u32 %v9533_v47, %v8411_v60  ;;  %v12034_v47 = vld [vmem:[%s14721_s10 + $0x28] sm:$0xff] }
 0x1b8   : > { %3552 = vst [vmem:[%s11744_s28 + $0x98] sm:$0xff] %v3113_v2  ;;  %v1881_v28 = vpop.f32.mrf.mxu2  ;;  %3450 = vmatpush.bf16.msra.mxu1 %v8496_v63  ;;  %3248 = vmatpush.bf16.msrb.mxu2 %v8160_v42  ;;  %v8123_v2 = vld [vmem:[%s14717_s6 + $0x58] sm:$0xf]  ;;  %v8421_v63 = vld [vmem:[%s14717_s6 + $0x2c4] sm:$0xf0]  ;;  %v12002_v42 = vpop.permute.xlu0 %2257 }
 0x1b9   : > { %v1882_v8 = vadd.f32 %v1881_v28, %v825_v0  ;;  %v1900_v40 = vpop.f32.mrf.mxu3  ;;  %3774 = vperm.xlu0 %9753, %v11905_v41   ;;  %3736 = vrot.lane.b32.xlu1 %v11495_v57, %s9773_s15  ;;  %v9542_v57 = vld [vmem:[%s14717_s6 + $0x300] sm:$0xf0]  ;;  %v8124_v24 = vor.u32 %v9461_v58, %v8123_v2  ;;  %v11982_v0 = vld [vmem:[%s14721_s10 + $0x8] sm:$0xff] }
 0x1ba   : > { %3738 = vrot.lane.b32.xlu2 %v11565_v1, %s9773_s15  ;;  %v3085_v33 = vpop.f32.mrf.mxu0  ;;  %v8448_v1 = vor.u32 %v9542_v57, %v8447_v12  ;;  %v9530_v28 = vld [vmem:[%s14717_s6 + $0x2a4] sm:$0xf]  ;;  %v9452_v12 = vld [vmem:[%s14717_s6 + $0x30] sm:$0xf0] }
 0x1bb   : > { %v1901_v25 = vadd.f32 %v1900_v40, %v1882_v8  ;;  %v3086_v32 = vadd.f32 %v3085_v33, %v11775_v59  ;;  %v3114_v27 = vpop.f32.mrf.mxu1  ;;  %3421 = vmatpush.bf16.msra.mxu0 %v8208_v16  ;;  %v8424_v34 = vor.u32 %v9530_v28, %v8421_v63  ;;  %v8375_v33 = vld [vmem:[%s14717_s6 + $0x250] sm:$0xf]  ;;  %v8088_v54 = vor.u32 %v9452_v12, %v8087_v14 }
 0x1bc   : > { %v11946_v15 = vpop.permute.xlu2 %3643  ;;  %3277 = vmatpush.bf16.msra.mxu3 %v8448_v1  ;;  %3451 = vmatpush.bf16.msra.mxu1 %v8460_v20  ;;  %v8376_v7 = vor.u32 %v9524_v22, %v8375_v33  ;;  %v8385_v20 = vld [vmem:[%s14717_s6 + $0x27c] sm:$0xf0]  ;;  %v8725_v33 = vld [vmem:[#allocation2 + $0x4] sm:$0xf] }
 0x1bd   : > { %v2032_v10 = vpack.c.bf16 %v11542_v48, %v1901_v25  ;;  %v3115_v52 = vadd.f32 %v3114_v27, %v3086_v32  ;;  %v9458_v48 = vld [vmem:[%s14717_s6 + $0x64] sm:$0xf]  ;;  %3249 = vmatpush.bf16.msrb.mxu2 %v8124_v24  ;;  %v9449_v25 = vld [vmem:[%s14717_s6 + $0x1c] sm:$0xf]  ;;  %v8097_v32 = vld [vmem:[%s14717_s6 + $0x3c] sm:$0xf0] }
 0x1be   : > { %v8136_v16 = vor.u32 %v9458_v48, %v8133_v62  ;;  %v12027_v24 = vperm.slane %v11602_v55, 0  ;;  %v12046_v55 = vld [vmem:[%s14721_s10 + $0x20] sm:$0xff] }
 0x1bf   : > { %2052 = vst [vmem:[#allocation2 + $0x68] sm:$0xff] %v2032_v10  ;;  %3422 = vmatpush.bf16.msra.mxu0 %v8172_v19  ;;  %v9521_v19 = vld [vmem:[%s14717_s6 + $0x25c] sm:$0xf] }
 0x1c0   : > { %3561 = vst [vmem:[%s11744_s28 + $0xe0] sm:$0xff] %v3115_v52  ;;  %v1883_v8 = vpop.f32.mrf.mxu2  ;;  %3278 = vmatpush.bf16.msra.mxu3 %v8412_v18  ;;  %3452 = vmatpush.bf16.msra.mxu1 %v8424_v34  ;;  %v8100_v52 = vor.u32 %v9449_v25, %v8097_v32  ;;  %v8388_v2 = vor.u32 %v9521_v19, %v8385_v20  ;;  %v12055_v34 = vpop.permute.xlu0 %2272  ;;  %v12072_v25 = vld [vmem:[%s14721_s10 + $0x38] sm:$0xff] }
 0x1c1   : > { %v1884_v40 = vadd.f32 %v1883_v8, %v835_v43  ;;  %v1902_v11 = vpop.f32.mrf.mxu3  ;;  %3905 = vperm.xlu0 %9753, %v11951_v29   ;;  %3895 = vperm.xlu1 %9754, %v11956_v6   ;;  %v807_v48 = vmul.f32 %v12027_v24, %v10222_v56 }
 0x1c2   : > { %3900 = vperm.xlu2 %9755, %v11982_v0   ;;  %v3088_v57 = vpop.f32.mrf.mxu0  ;;  %3250 = vmatpush.bf16.msrb.mxu2 %v8088_v54  ;;  %v817_v54 = vmul.f32 %v12027_v24, %v10297_v38 }
 0x1c3   : > { %v1903_v27 = vadd.f32 %v1902_v11, %v1884_v40  ;;  %v3089_v1 = vadd.f32 %v3088_v57, %v12002_v42  ;;  %v3117_v53 = vpop.f32.mrf.mxu1  ;;  %3423 = vmatpush.bf16.msra.mxu0 %v8136_v16  ;;  %v12051_v16 = vpop.permute.xlu1 %2262  ;;  %v9609_v11 = vld [vmem:[#allocation2 + $0x28] sm:$0xf0]  ;;  %v12063_v57 = vld [vmem:[%s14721_s10 + $0x30] sm:$0xff] }
 0x1c4   : > { %v12021_v10 = vpop.permute.xlu2 %3654  ;;  %3279 = vmatpush.bf16.msra.mxu3 %v8376_v7  ;;  %3453 = vmatpush.bf16.msra.mxu1 %v8388_v2  ;;  %v12067_v22 = vor.u32 %v9609_v11, %v8725_v33 }
 0x1c5   : > { %v2037_v58 = vpack.c.bf16 %v11614_v36, %v1903_v27  ;;  %v3118_v60 = vadd.f32 %v3117_v53, %v3089_v1  ;;  %3145 = vmatmul.bf16.gmra.mxu2 %v11327_v31  ;;  %3319 = vmatmul.bf16.gmra.mxu0 %v11327_v31  ;;  %v12039_v36 = vld [vmem:[%s14721_s10 + $0x18] sm:$0xff] }
 0x1c6   : > { %3174 = vmatmul.bf16.gmra.mxu3 %v11334_v13  ;;  %3348 = vmatmul.bf16.gmra.mxu1 %v11334_v13 }
 0x1c7   : > { %2057 = vst [vmem:[#allocation2 + $0x90] sm:$0xff] %v2037_v58  ;;  %3424 = vmatpush.bf16.msra.mxu0 %v8100_v52 }
 0x1c8   : > { %3570 = vst [vmem:[%s11744_s28 + $0x128] sm:$0xff] %v3118_v60  ;;  %v1952_v62 = vpop.f32.mrf.mxu2  ;;  %v827_v60 = vmul.f32 %v12027_v24, %v10410_v45 }
 0x1c9   : > { %v1953_v43 = vadd.f32 %v1952_v62, %v807_v48  ;;  %v1971_v18 = vpop.f32.mrf.mxu3  ;;  %3920 = vperm.xlu0 %9753, %v12034_v47   ;;  %3910 = vperm.xlu1 %9754, %v12039_v36  }
 0x1ca   : > { %3915 = vperm.xlu2 %9755, %v12046_v55   ;;  %v3090_v56 = vpop.f32.mrf.mxu0 }
 0x1cb   : > { %v1972_v28 = vadd.f32 %v1971_v18, %v1953_v43  ;;  %v3091_v63 = vadd.f32 %v3090_v56, %v12051_v16  ;;  %v3119_v8 = vpop.f32.mrf.mxu1 }
 0x1cc   : > { %v12057_v40 = vpop.permute.xlu2 %3682 }
 0x1cd   : > { %v2023_v14 = vpack.c.bf16 %v11669_v35, %v1972_v28  ;;  %v3120_v12 = vadd.f32 %v3119_v8, %v3091_v63 }
 0x1cf   : > { %2043 = vst [vmem:[#allocation2 + $0x20] sm:$0xff] %v2023_v14 }
 0x1d0   : > { %3579 = vst [vmem:[%s11744_s28 + $0x170] sm:$0xff] %v3120_v12  ;;  %v1954_v35 = vpop.f32.mrf.mxu2  ;;  %v837_v12 = vmul.f32 %v12027_v24, %v10412_v46 }
 0x1d1   : > { %v1955_v32 = vadd.f32 %v1954_v35, %v817_v54  ;;  %v1973_v27 = vpop.f32.mrf.mxu3  ;;  %4062 = vrot.lane.b32.xlu0 %v12067_v22, %s9766_s26  ;;  %3925 = vperm.xlu1 %9754, %v12063_v57  }
 0x1d2   : > { %3930 = vperm.xlu2 %9755, %v12072_v25   ;;  %v3093_v38 = vpop.f32.mrf.mxu0 }
 0x1d3   : > { %v1974_v1 = vadd.f32 %v1973_v27, %v1955_v32  ;;  %v3094_v53 = vadd.f32 %v3093_v38, %v11877_v51  ;;  %v3122_v7 = vpop.f32.mrf.mxu1  ;;  %v12080_v19 = vpop.permute.xlu1 %3641 }
 0x1d4   : > { %v12082_v20 = vpop.permute.xlu0 %3656  ;;  %v12084_v52 = vpop.permute.xlu2 %3660 }
 0x1d5   : > { %v2028_v2 = vpack.c.bf16 %v11686_v26, %v1974_v1  ;;  %v3123_v58 = vadd.f32 %v3122_v7, %v3094_v53  ;;  %3150 = vmatmul.bf16.gmra.mxu2 %v11360_v39  ;;  %3324 = vmatmul.bf16.gmra.mxu0 %v11360_v39 }
 0x1d6   : > { %3179 = vmatmul.bf16.gmra.mxu3 %v11365_v30  ;;  %3353 = vmatmul.bf16.gmra.mxu1 %v11365_v30 }
 0x1d7   : > { %2048 = vst [vmem:[#allocation2 + $0x48] sm:$0xff] %v2028_v2  ;;  %v8347_v2 = vld [vmem:[%s14717_s6 + $0x210] sm:$0xf] }
 0x1d8   : > { %3588 = vst [vmem:[%s11744_s28 + $0x1b8] sm:$0xff] %v3123_v58  ;;  %v1957_v48 = vpop.f32.mrf.mxu2  ;;  %v9516_v58 = vld [vmem:[%s14717_s6 + $0x230] sm:$0xf0] }
 0x1d9   : > { %v1958_v62 = vadd.f32 %v1957_v48, %v827_v60  ;;  %v1976_v43 = vpop.f32.mrf.mxu3  ;;  %4098 = vrot.lane.b32.xlu0 %v12067_v22, %s9769_s23  ;;  %4074 = vrot.lane.b32.xlu1 %v12067_v22, %s9767_s27  ;;  %v8635_v60 = vld [vmem:[%s14717_s6 + $0x450] sm:$0xf]  ;;  %v9588_v48 = vld [vmem:[%s14717_s6 + $0x470] sm:$0xf0] }
 0x1da   : > { %4086 = vrot.lane.b32.xlu2 %v12067_v22, %s9768_s16  ;;  %v3095_v26 = vpop.f32.mrf.mxu0 }
 0x1db   : > { %v1977_v18 = vadd.f32 %v1976_v43, %v1958_v62  ;;  %v3096_v56 = vadd.f32 %v3095_v26, %v12055_v34  ;;  %v3124_v28 = vpop.f32.mrf.mxu1  ;;  %v12101_v45 = vpop.permute.xlu1 %3669  ;;  %v8636_v62 = vor.u32 %v9588_v48, %v8635_v60 }
 0x1dc   : > { %v12103_v63 = vpop.permute.xlu0 %3667  ;;  %v12105_v8 = vpop.permute.xlu2 %3671 }
 0x1dd   : > { %v2033_v11 = vpack.c.bf16 %v11698_v9, %v1977_v18  ;;  %v3125_v14 = vadd.f32 %v3124_v28, %v3096_v56  ;;  %v8311_v56 = vld [vmem:[%s14717_s6 + $0x1c8] sm:$0xf]  ;;  %v9507_v28 = vld [vmem:[%s14717_s6 + $0x1e8] sm:$0xf0]  ;;  %3388 = vmatpush.bf16.msrb.mxu3 %v8636_v62 }
 0x1df   : > { %2053 = vst [vmem:[#allocation2 + $0x70] sm:$0xff] %v2033_v11  ;;  %v8599_v11 = vld [vmem:[%s14717_s6 + $0x408] sm:$0xf] }
 0x1e0   : > { %3597 = vst [vmem:[%s11744_s28 + $0x200] sm:$0xff] %v3125_v14  ;;  %v1959_v33 = vpop.f32.mrf.mxu2 }
 0x1e1   : > { %v1960_v54 = vadd.f32 %v1959_v33, %v837_v12  ;;  %v1978_v35 = vpop.f32.mrf.mxu3  ;;  %4134 = vrot.lane.b32.xlu0 %v12067_v22, %s9772_s29  ;;  %4110 = vrot.lane.b32.xlu1 %v12067_v22, %s14725_s13 }
 0x1e2   : > { %4122 = vrot.lane.b32.xlu2 %v12067_v22, %s14737_s20  ;;  %v3194_v32 = vpop.f32.mrf.mxu0 }
 0x1e3   : > { %v1979_v9 = vadd.f32 %v1978_v35, %v1960_v54  ;;  %v3195_v27 = vadd.f32 %v3194_v32, %v11716_v49  ;;  %v3223_v38 = vpop.f32.mrf.mxu1  ;;  %v12118_v1 = vpop.permute.xlu1 %3680 }
 0x1e4   : > { %v12120_v46 = vpop.permute.xlu0 %3645  ;;  %v12122_v24 = vpop.permute.xlu2 %3693 }
 0x1e5   : > { %v2038_v53 = vpack.c.bf16 %v11714_v21, %v1979_v9  ;;  %v3224_v7 = vadd.f32 %v3223_v38, %v3195_v27  ;;  %3251 = vmatmul.bf16.vlgmr.msrb.gmra.mxu2 %v11076_v44  ;;  %3425 = vmatmul.bf16.vlgmr.msra.gmra.mxu0 %v11076_v44  ;;  %v8348_v21 = vor.u32 %v9516_v58, %v8347_v2  ;;  %v8275_v38 = vld [vmem:[%s14717_s6 + $0x180] sm:$0xf]  ;;  %v9570_v58 = vld [vmem:[%s14717_s6 + $0x3e0] sm:$0xf0] }
 0x1e6   : > { %3280 = vmatmul.bf16.vlgmr.msra.gmra.mxu3 %v11080_v50  ;;  %3454 = vmatmul.bf16.vlgmr.msra.gmra.mxu1 %v11080_v50 }
 0x1e7   : > { %2058 = vst [vmem:[#allocation2 + $0x98] sm:$0xff] %v2038_v53  ;;  %3359 = vmatpush.bf16.msra.mxu2 %v8348_v21  ;;  %v9498_v53 = vld [vmem:[%s14717_s6 + $0x1a0] sm:$0xf0] }
 0x1e8   : > { %3536 = vst [vmem:[%s11744_s28 + $0x18] sm:$0xff] %v3224_v7  ;;  %v3020_v43 = vpop.f32.mrf.mxu2  ;;  %v8563_v7 = vld [vmem:[%s14717_s6 + $0x3c0] sm:$0xf]  ;;  %v8276_v2 = vor.u32 %v9498_v53, %v8275_v38  ;;  %v9552_v53 = vld [vmem:[%s14717_s6 + $0x350] sm:$0xf0] }
 0x1e9   : > { %v3021_v26 = vadd.f32 %v3020_v43, %v11716_v49  ;;  %v3049_v18 = vpop.f32.mrf.mxu3  ;;  %4177 = vperm.xlu0 %9753, %v11809_v4   ;;  %4146 = vrot.lane.b32.xlu1 %v12067_v22, %s9773_s15  ;;  %v8312_v4 = vor.u32 %v9507_v28, %v8311_v56  ;;  %v9579_v22 = vld [vmem:[%s14717_s6 + $0x428] sm:$0xf0]  ;;  %v8564_v21 = vor.u32 %v9570_v58, %v8563_v7  ;;  %v8527_v56 = vld [vmem:[%s14717_s6 + $0x378] sm:$0xf] }
 0x1ea   : > { %4172 = vperm.xlu2 %9755, %v11804_v37   ;;  %v3196_v14 = vpop.f32.mrf.mxu0  ;;  %v8600_v32 = vor.u32 %v9579_v22, %v8599_v11 }
 0x1eb   : > { %v3050_v12 = vadd.f32 %v3049_v18, %v3021_v26  ;;  %v3197_v33 = vadd.f32 %v3196_v14, %v11781_v5  ;;  %v3225_v54 = vpop.f32.mrf.mxu1  ;;  %v12160_v35 = vpop.permute.xlu1 %3647  ;;  %3360 = vmatpush.bf16.msra.mxu2 %v8312_v4  ;;  %v8239_v26 = vld [vmem:[%s14717_s6 + $0x138] sm:$0xf]  ;;  %v9489_v18 = vld [vmem:[%s14717_s6 + $0x158] sm:$0xf0] }
 0x1ec   : > { %v12162_v9 = vpop.permute.xlu0 %3695  ;;  %v12164_v27 = vpop.permute.xlu2 %3721  ;;  %3389 = vmatpush.bf16.msrb.mxu3 %v8600_v32  ;;  %v8240_v11 = vor.u32 %v9489_v18, %v8239_v26  ;;  %v9561_v14 = vld [vmem:[%s14717_s6 + $0x398] sm:$0xf0]  ;;  %v8203_v32 = vld [vmem:[%s14717_s6 + $0xf0] sm:$0xf]  ;;  %v9543_v18 = vld [vmem:[%s14717_s6 + $0x308] sm:$0xf0] }
 0x1ed   : > { %3533 = vst [vmem:[%s11744_s28] sm:$0xff] %v3050_v12  ;;  %v3226_v37 = vadd.f32 %v3225_v54, %v3197_v33  ;;  %v8528_v12 = vor.u32 %v9561_v14, %v8527_v56  ;;  %v8131_v14 = vld [vmem:[%s14717_s6 + $0x60] sm:$0xf] }
 0x1ef   : > { %3545 = vst [vmem:[%s11744_s28 + $0x60] sm:$0xff] %v3226_v37  ;;  %3361 = vmatpush.bf16.msra.mxu2 %v8276_v2  ;;  %v9480_v37 = vld [vmem:[%s14717_s6 + $0x110] sm:$0xf0] }
 0x1f0   : > { %v3022_v60 = vpop.f32.mrf.mxu2  ;;  %3390 = vmatpush.bf16.msrb.mxu3 %v8564_v21  ;;  %v8204_v38 = vor.u32 %v9480_v37, %v8203_v32  ;;  %v3676_v21 = vsel %vm3675_vm1, %v12103_v63, %v12101_v45 }
 0x1f1   : > { %v3023_v48 = vadd.f32 %v3022_v60, %v11781_v5  ;;  %v3051_v62 = vpop.f32.mrf.mxu3  ;;  %4307 = vperm.xlu0 %9753, %v11956_v6   ;;  %4182 = vperm.xlu1 %9754, %v11844_v3  }
 0x1f2   : > { %4187 = vperm.xlu2 %9755, %v11905_v41   ;;  %v3199_v43 = vpop.f32.mrf.mxu0 }
 0x1f3   : > { %v3052_v6 = vadd.f32 %v3051_v62, %v3023_v48  ;;  %v3200_v3 = vadd.f32 %v3199_v43, %v11858_v61  ;;  %v3228_v28 = vpop.f32.mrf.mxu1  ;;  %v3659_v41 = vpop.permute.xlu1 %3658  ;;  %3362 = vmatpush.bf16.msra.mxu2 %v8240_v11  ;;  %v8167_v62 = vld [vmem:[%s14717_s6 + $0xa8] sm:$0xf]  ;;  %v9471_v43 = vld [vmem:[%s14717_s6 + $0xc8] sm:$0xf0] }
 0x1f4   : > { %v3674_v4 = vpop.permute.xlu0 %3673  ;;  %v12197_v22 = vpop.permute.xlu2 %3699  ;;  %3391 = vmatpush.bf16.msrb.mxu3 %v8528_v12  ;;  %v8168_v63 = vor.u32 %v9471_v43, %v8167_v62  ;;  %v3664_v11 = vsel %vm3662_vm2, %v3659_v41, %v12084_v52  ;;  %v8419_v12 = vld [vmem:[%s14717_s6 + $0x2a0] sm:$0xf]  ;;  %v9534_v52 = vld [vmem:[%s14717_s6 + $0x2c0] sm:$0xf0] }
 0x1f5   : > { %3542 = vst [vmem:[%s11744_s28 + $0x48] sm:$0xff] %v3052_v6  ;;  %v3229_v33 = vadd.f32 %v3228_v28, %v3200_v3  ;;  %v3677_v54 = vsel %vm3675_vm1, %v12105_v8, %v3674_v4  ;;  %3256 = vmatmul.bf16.gmra.mxu2 %v11200_v17  ;;  %3430 = vmatmul.bf16.gmra.mxu0 %v11200_v17  ;;  %v8491_v8 = vld [vmem:[%s14717_s6 + $0x330] sm:$0xf]  ;;  %v9462_v4 = vld [vmem:[%s14717_s6 + $0x80] sm:$0xf0] }
 0x1f6   : > { %3285 = vmatmul.bf16.gmra.mxu3 %v11204_v23  ;;  %3459 = vmatmul.bf16.gmra.mxu1 %v11204_v23  ;;  %v8492_v2 = vor.u32 %v9552_v53, %v8491_v8  ;;  %v3663_v8 = vsel %vm3662_vm2, %v12021_v10, %v12082_v20  ;;  %v8095_v53 = vld [vmem:[%s14717_s6 + $0x18] sm:$0xf] }
 0x1f7   : > { %3554 = vst [vmem:[%s11744_s28 + $0xa8] sm:$0xff] %v3229_v33  ;;  %3814 = vmatpush.bf16.msrb.mxu0 %v3677_v54  ;;  %3363 = vmatpush.bf16.msra.mxu2 %v8204_v38  ;;  %v8132_v33 = vor.u32 %v9462_v4, %v8131_v14  ;;  %v8420_v54 = vor.u32 %v9534_v52, %v8419_v12 }
 0x1f8   : > { %v3025_v7 = vpop.f32.mrf.mxu2  ;;  %3392 = vmatpush.bf16.msrb.mxu3 %v8492_v2 }
 0x1f9   : > { %v3026_v58 = vadd.f32 %v3025_v7, %v11858_v61  ;;  %v3054_v60 = vpop.f32.mrf.mxu3  ;;  %4322 = vperm.xlu0 %9753, %v12039_v36   ;;  %4312 = vperm.xlu1 %9754, %v11982_v0   ;;  %v8455_v0 = vld [vmem:[%s14717_s6 + $0x2e8] sm:$0xf]  ;;  %v9453_v7 = vld [vmem:[%s14717_s6 + $0x38] sm:$0xf0] }
 0x1fa   : > { %4317 = vperm.xlu2 %9755, %v11951_v29   ;;  %v3201_v48 = vpop.f32.mrf.mxu0  ;;  %v8456_v3 = vor.u32 %v9543_v18, %v8455_v0  ;;  %v8096_v20 = vor.u32 %v9453_v7, %v8095_v53  ;;  %v3651_v0 = vsel %vm3649_vm3, %v12120_v46, %v12160_v35  ;;  %v3650_v46 = vsel %vm3649_vm3, %v12080_v19, %v11946_v15  ;;  %v8647_v19 = vld [vmem:[#allocation2] sm:$0xf] }
 0x1fb   : > { %v3055_v36 = vadd.f32 %v3054_v60, %v3026_v58  ;;  %3815 = vmatpush.bf16.msrb.mxu0 %v3676_v21  ;;  %v3202_v29 = vadd.f32 %v3201_v48, %v11775_v59  ;;  %v3230_v26 = vpop.f32.mrf.mxu1  ;;  %v12236_v45 = vpop.permute.xlu1 %3708  ;;  %3364 = vmatpush.bf16.msra.mxu2 %v8168_v63  ;;  %v9525_v58 = vld [vmem:[%s14717_s6 + $0x278] sm:$0xf0] }
 0x1fc   : > { %v12241_v56 = vpop.permute.xlu0 %3706  ;;  %v12243_v6 = vpop.permute.xlu2 %3710  ;;  %3393 = vmatpush.bf16.msrb.mxu3 %v8456_v3  ;;  %v9611_v48 = vld [vmem:[#allocation2 + $0x78] sm:$0xf0]  ;;  %v9591_v3 = vld [vmem:[#allocation2 + $0x74] sm:$0xf0] }
 0x1fd   : > { %3551 = vst [vmem:[%s11744_s28 + $0x90] sm:$0xff] %v3055_v36  ;;  %v3231_v28 = vadd.f32 %v3230_v26, %v3202_v29  ;;  %v8733_v36 = vld [vmem:[#allocation2 + $0x54] sm:$0xf] }
 0x1fe   : > { %v8734_v29 = vor.u32 %v9611_v48, %v8733_v36 }
 0x1ff   : > { %3563 = vst [vmem:[%s11744_s28 + $0xf0] sm:$0xff] %v3231_v28  ;;  %3816 = vmatpush.bf16.msrb.mxu0 %v3664_v11  ;;  %3365 = vmatpush.bf16.msra.mxu2 %v8132_v33 }
 0x200   : > { %v3027_v41 = vpop.f32.mrf.mxu2  ;;  %3394 = vmatpush.bf16.msrb.mxu3 %v8420_v54  ;;  %v9590_v54 = vld [vmem:[#allocation2 + $0x24] sm:$0xf0] }
 0x201   : > { %v3028_v32 = vadd.f32 %v3027_v41, %v11775_v59  ;;  %v3056_v37 = vpop.f32.mrf.mxu3  ;;  %4337 = vperm.xlu0 %9753, %v12063_v57   ;;  %4327 = vperm.xlu1 %9754, %v12046_v55   ;;  %v8383_v55 = vld [vmem:[%s14717_s6 + $0x258] sm:$0xf] }
 0x202   : > { %4332 = vperm.xlu2 %9755, %v12034_v47   ;;  %v3204_v38 = vpop.f32.mrf.mxu0  ;;  %v8384_v62 = vor.u32 %v9525_v58, %v8383_v55 }
 0x203   : > { %v3057_v57 = vadd.f32 %v3056_v37, %v3028_v32  ;;  %3817 = vmatpush.bf16.msrb.mxu0 %v3663_v8  ;;  %v3205_v47 = vadd.f32 %v3204_v38, %v12002_v42  ;;  %v3233_v2 = vpop.f32.mrf.mxu1  ;;  %v12278_v10 = vpop.permute.xlu1 %3719  ;;  %3366 = vmatpush.bf16.msra.mxu2 %v8096_v20  ;;  %v8648_v8 = vor.u32 %v9590_v54, %v8647_v19 }
 0x204   : > { %v12283_v60 = vpop.permute.xlu0 %3684  ;;  %v12285_v21 = vpop.permute.xlu2 %3732  ;;  %3395 = vmatpush.bf16.msrb.mxu3 %v8384_v62 }
 0x205   : > { %3560 = vst [vmem:[%s11744_s28 + $0xd8] sm:$0xff] %v3057_v57  ;;  %v3234_v43 = vadd.f32 %v3233_v2, %v3205_v47  ;;  %3261 = vmatmul.bf16.gmra.mxu2 %v11327_v31  ;;  %3435 = vmatmul.bf16.gmra.mxu0 %v11327_v31 }
 0x206   : > { %3290 = vmatmul.bf16.gmra.mxu3 %v11334_v13  ;;  %3464 = vmatmul.bf16.gmra.mxu1 %v11334_v13 }
 0x207   : > { %3572 = vst [vmem:[%s11744_s28 + $0x138] sm:$0xff] %v3234_v43  ;;  %3818 = vmatpush.bf16.msrb.mxu0 %v3651_v0 }
 0x208   : > { %v3030_v26 = vpop.f32.mrf.mxu2 }
 0x209   : > { %v3031_v63 = vadd.f32 %v3030_v26, %v12002_v42  ;;  %v3059_v18 = vpop.f32.mrf.mxu3  ;;  %4078 = vrot.lane.b32.xlu0 %v8734_v29, %s9767_s27  ;;  %4342 = vperm.xlu1 %9754, %v12072_v25   ;;  %v8651_v25 = vld [vmem:[#allocation2 + $0x50] sm:$0xf] }
 0x20a   : > { %4066 = vrot.lane.b32.xlu2 %v8734_v29, %s9766_s26  ;;  %v3206_v35 = vpop.f32.mrf.mxu0  ;;  %v8652_v41 = vor.u32 %v9591_v3, %v8651_v25  ;;  %v8727_v3 = vld [vmem:[#allocation2 + $0x2c] sm:$0xf0] }
 0x20b   : > { %v3060_v28 = vadd.f32 %v3059_v18, %v3031_v63  ;;  %3819 = vmatpush.bf16.msrb.mxu0 %v3650_v46  ;;  %v3207_v11 = vadd.f32 %v3206_v35, %v12051_v16  ;;  %v3235_v14 = vpop.f32.mrf.mxu1  ;;  %v12304_v4 = vpop.permute.xlu1 %3686 }
 0x20c   : > { %v12306_v12 = vpop.permute.xlu0 %3712  ;;  %v12308_v33 = vpop.permute.xlu2 %3769 }
 0x20d   : > { %3569 = vst [vmem:[%s11744_s28 + $0x120] sm:$0xff] %v3060_v28  ;;  %v3236_v52 = vadd.f32 %v3235_v14, %v3207_v11  ;;  %v9608_v11 = vld [vmem:[#allocation2 + $0x8] sm:$0xf]  ;;  %v9597_v14 = vld [vmem:[%s14718_s7 + $0x8] sm:$0xf0] }
 0x20e   : > { %v12345_v25 = vor.u32 %v9608_v11, %v8727_v3 }
 0x20f   : > { %3581 = vst [vmem:[%s11744_s28 + $0x180] sm:$0xff] %v3236_v52  ;;  %3820 = vmatpush.bf16.msrb.mxu0 %v8652_v41  ;;  %v3728_v41 = vsel %vm3727_vm4, %v12278_v10, %v12164_v27 }
 0x210   : > { %v3032_v15 = vpop.f32.mrf.mxu2 }
 0x211   : > { %v3033_v32 = vadd.f32 %v3032_v15, %v12051_v16  ;;  %v3061_v37 = vpop.f32.mrf.mxu3  ;;  %4114 = vrot.lane.b32.xlu0 %v8734_v29, %s14725_s13  ;;  %4090 = vrot.lane.b32.xlu1 %v8734_v29, %s9768_s16 }
 0x212   : > { %4102 = vrot.lane.b32.xlu2 %v8734_v29, %s9769_s23  ;;  %v3209_v38 = vpop.f32.mrf.mxu0 }
 0x213   : > { %v3062_v53 = vadd.f32 %v3061_v37, %v3033_v32  ;;  %3821 = vmatpush.bf16.msrb.mxu0 %v8648_v8  ;;  %v3210_v7 = vadd.f32 %v3209_v38, %v11877_v51  ;;  %v3238_v55 = vpop.f32.mrf.mxu1  ;;  %v12317_v57 = vpop.permute.xlu1 %3697 }
 0x214   : > { %v3724_v47 = vpop.permute.xlu0 %3723  ;;  %v12319_v2 = vpop.permute.xlu2 %3738 }
 0x215   : > { %3578 = vst [vmem:[%s11744_s28 + $0x168] sm:$0xff] %v3062_v53  ;;  %v3239_v20 = vadd.f32 %v3238_v55, %v3210_v7  ;;  %3266 = vmatmul.bf16.gmra.mxu2 %v11360_v39  ;;  %3440 = vmatmul.bf16.gmra.mxu0 %v11360_v39  ;;  %v3716_v55 = vsel %vm3714_vm5, %v12243_v6, %v12306_v12  ;;  %v9589_v6 = vld [vmem:[%s14717_s6 + $0x478] sm:$0xf0] }
 0x216   : > { %3295 = vmatmul.bf16.gmra.mxu3 %v11365_v30  ;;  %3469 = vmatmul.bf16.gmra.mxu1 %v11365_v30 }
 0x217   : > { %3590 = vst [vmem:[%s11744_s28 + $0x1c8] sm:$0xff] %v3239_v20  ;;  %v9517_v20 = vld [vmem:[%s14717_s6 + $0x238] sm:$0xf0] }
 0x218   : > { %v3035_v58 = vpop.f32.mrf.mxu2 }
 0x219   : > { %v3036_v48 = vadd.f32 %v3035_v58, %v11877_v51  ;;  %v3064_v62 = vpop.f32.mrf.mxu3  ;;  %4150 = vrot.lane.b32.xlu0 %v8734_v29, %s9773_s15  ;;  %4126 = vrot.lane.b32.xlu1 %v8734_v29, %s14737_s20  ;;  %v8643_v58 = vld [vmem:[%s14717_s6 + $0x458] sm:$0xf] }
 0x21a   : > { %4138 = vrot.lane.b32.xlu2 %v8734_v29, %s9772_s29  ;;  %v3211_v43 = vpop.f32.mrf.mxu0  ;;  %v8671_v29 = vld [vmem:[%s14718_s7] sm:$0xf] }
 0x21b   : > { %v3065_v0 = vadd.f32 %v3064_v62, %v3036_v48  ;;  %v3212_v36 = vadd.f32 %v3211_v43, %v12055_v34  ;;  %v3240_v26 = vpop.f32.mrf.mxu1  ;;  %v3726_v63 = vpop.permute.xlu1 %3725  ;;  %v8672_v19 = vor.u32 %v9597_v14, %v8671_v29  ;;  %v8644_v62 = vor.u32 %v9589_v6, %v8643_v58  ;;  %v9580_v14 = vld [vmem:[%s14717_s6 + $0x430] sm:$0xf0] }
 0x21c   : > { %v12332_v18 = vpop.permute.xlu0 %3734  ;;  %v12334_v46 = vpop.permute.xlu2 %3900  ;;  %v3729_v35 = vsel %vm3727_vm4, %v3724_v47, %v3726_v63  ;;  %v8355_v47 = vld [vmem:[%s14717_s6 + $0x218] sm:$0xf]  ;;  %v8319_v63 = vld [vmem:[%s14717_s6 + $0x1d0] sm:$0xf] }
 0x21d   : > { %14738 = vst [vmem:[#allocation3_spill] sm:$0xff] %v12334_v46  ;;  %v3241_v28 = vadd.f32 %v3240_v26, %v3212_v36  ;;  %3833 = vmatpush.bf16.msrb.mxu1 %v3729_v35  ;;  %v8356_v48 = vor.u32 %v9517_v20, %v8355_v47  ;;  %v3715_v36 = vsel %vm3714_vm5, %v12241_v56, %v12236_v45  ;;  %v9508_v35 = vld [vmem:[%s14717_s6 + $0x1f0] sm:$0xf0]  ;;  %v8607_v45 = vld [vmem:[%s14717_s6 + $0x410] sm:$0xf] }
 0x21e   : > { %3587 = vst [vmem:[%s11744_s28 + $0x1b0] sm:$0xff] %v3065_v0  ;;  %3504 = vmatpush.bf16.msra.mxu3 %v8644_v62  ;;  %v8320_v29 = vor.u32 %v9508_v35, %v8319_v63  ;;  %v9571_v20 = vld [vmem:[%s14717_s6 + $0x3e8] sm:$0xf0]  ;;  %v9641_v46 = vld [vmem:[#allocation2 + $0x30] sm:$0xf0] }
 0x21f   : > { %3599 = vst [vmem:[%s11744_s28 + $0x210] sm:$0xff] %v3241_v28  ;;  %3475 = vmatpush.bf16.msrb.mxu2 %v8356_v48  ;;  %v3741_v48 = vsel %vm3740_vm6, %v12285_v21, %v12332_v18  ;;  %v8247_v21 = vld [vmem:[%s14717_s6 + $0x140] sm:$0xf]  ;;  %v9490_v18 = vld [vmem:[%s14717_s6 + $0x160] sm:$0xf0] }
 0x220   : > { %v3037_v52 = vpop.f32.mrf.mxu2 }
 0x221   : > { %v3038_v54 = vadd.f32 %v3037_v52, %v12055_v34  ;;  %v3066_v15 = vpop.f32.mrf.mxu3  ;;  %3834 = vmatpush.bf16.msrb.mxu1 %v3728_v41  ;;  %4088 = vrot.lane.b32.xlu0 %v12345_v25, %s9768_s16 }
 0x222   : > { %4076 = vrot.lane.b32.xlu2 %v12345_v25, %s9767_s27  ;;  %4064 = vrot.lane.b32.xlu1 %v12345_v25, %s9766_s26  ;;  %v3310_v32 = vpop.f32.mrf.mxu0 }
 0x223   : > { %v3067_v37 = vadd.f32 %v3066_v15, %v3038_v54  ;;  %v3311_v8 = vadd.f32 %v3310_v32, %v11716_v49  ;;  %v3339_v27 = vpop.f32.mrf.mxu1  ;;  %v12358_v10 = vpop.permute.xlu1 %3764  ;;  %v9624_v15 = vld [vmem:[#allocation2 + $0xc] sm:$0xf]  ;;  %v8608_v32 = vor.u32 %v9580_v14, %v8607_v45  ;;  %3476 = vmatpush.bf16.msrb.mxu2 %v8320_v29  ;;  %v8248_v45 = vor.u32 %v9490_v18, %v8247_v21  ;;  %v9625_v29 = vld [vmem:[#allocation2 + $0x2c] sm:$0xf0] }
 0x224   : > { %v12360_v38 = vpop.permute.xlu0 %3759  ;;  %v12362_v53 = vpop.permute.xlu2 %3915 }
 0x225   : > { %14739 = vst [vmem:[#allocation4_spill] sm:$0xff] %v12362_v53  ;;  %v3340_v7 = vadd.f32 %v3339_v27, %v3311_v8  ;;  %3367 = vmatmul.bf16.vlgmr.msra.gmra.mxu2 %v11076_v44  ;;  %3822 = vmatmul.bf16.vlgmr.msrb.gmra.mxu0 %v8672_v19  ;;  %v8797_v19 = vld [vmem:[#allocation2 + $0x30] sm:$0xf0]  ;;  %v3703_v8 = vsel %vm3701_vm7, %v12317_v57, %v12197_v22  ;;  %v8683_v27 = vld [vmem:[%s14718_s7 + $0x18] sm:$0xf] }
 0x226   : > { %3596 = vst [vmem:[%s11744_s28 + $0x1f8] sm:$0xff] %v3067_v37  ;;  %3396 = vmatmul.bf16.vlgmr.msrb.gmra.mxu3 %v11080_v50  ;;  %3835 = vmatpush.bf16.msrb.mxu1 %v3716_v55  ;;  %v9499_v55 = vld [vmem:[%s14717_s6 + $0x1a8] sm:$0xf0]  ;;  %v8571_v22 = vld [vmem:[%s14717_s6 + $0x3c8] sm:$0xf]  ;;  %v12432_v57 = vor.u32 %v9624_v15, %v8797_v19 }
 0x227   : > { %3538 = vst [vmem:[%s11744_s28 + $0x28] sm:$0xff] %v3340_v7  ;;  %v8283_v7 = vld [vmem:[%s14717_s6 + $0x188] sm:$0xf]  ;;  %3505 = vmatpush.bf16.msra.mxu3 %v8608_v32  ;;  %v8572_v6 = vor.u32 %v9571_v20, %v8571_v22  ;;  %v9596_v15 = vld [vmem:[%s14718_s7 + $0x4] sm:$0xf] }
 0x228   : > { %v3136_v12 = vpop.f32.mrf.mxu2  ;;  %v8284_v47 = vor.u32 %v9499_v55, %v8283_v7  ;;  %v8673_v19 = vld [vmem:[%s14718_s7 + $0xc] sm:$0xf0]  ;;  %v8211_v32 = vld [vmem:[%s14717_s6 + $0xf8] sm:$0xf] }
 0x229   : > { %v3137_v43 = vadd.f32 %v3136_v12, %v11716_v49  ;;  %v3165_v0 = vpop.f32.mrf.mxu3  ;;  %4124 = vrot.lane.b32.xlu0 %v12345_v25, %s14737_s20  ;;  %v8676_v20 = vor.u32 %v9596_v15, %v8673_v19 }
 0x22a   : > { %3836 = vmatpush.bf16.msrb.mxu1 %v3715_v36  ;;  %4112 = vrot.lane.b32.xlu2 %v12345_v25, %s14725_s13  ;;  %v3312_v26 = vpop.f32.mrf.mxu0 }
 0x22b   : > { %v3166_v56 = vadd.f32 %v3165_v0, %v3137_v43  ;;  %4100 = vrot.lane.b32.xlu1 %v12345_v25, %s9769_s23  ;;  %v3313_v3 = vadd.f32 %v3312_v26, %v11781_v5  ;;  %v3341_v28 = vpop.f32.mrf.mxu1  ;;  %v3737_v11 = vpop.permute.xlu1 %3736  ;;  %v3702_v43 = vsel %vm3701_vm7, %v12122_v24, %v12162_v9  ;;  %v8535_v24 = vld [vmem:[%s14717_s6 + $0x380] sm:$0xf]  ;;  %3477 = vmatpush.bf16.msrb.mxu2 %v8284_v47 }
 0x22c   : > { %v12406_v52 = vpop.permute.xlu0 %3774  ;;  %v12408_v41 = vpop.permute.xlu2 %3930  ;;  %v3742_v54 = vsel %vm3740_vm6, %v3737_v11, %v12319_v2  ;;  %v9600_v2 = vld [vmem:[%s14718_s7 + $0x20] sm:$0xf0]  ;;  %v8795_v11 = vld [vmem:[#allocation2 + $0x8] sm:$0xf]  ;;  %3506 = vmatpush.bf16.msra.mxu3 %v8572_v6  ;;  %v3689_v47 = vsel %vm3688_vm8, %v12118_v1, %v12057_v40  ;;  %v9472_v6 = vld [vmem:[%s14717_s6 + $0xd0] sm:$0xf0] }
 0x22d   : > { %14740 = vst [vmem:[#allocation5_spill] sm:$0xff] %v12408_v41  ;;  %v3342_v37 = vadd.f32 %v3341_v28, %v3313_v3  ;;  %3858 = vmatpush.bf16.msra.mxu0 %v3742_v54  ;;  %v8684_v0 = vor.u32 %v9600_v2, %v8683_v27  ;;  %v3690_v54 = vsel %vm3688_vm8, %v12283_v60, %v12304_v4  ;;  %v8499_v60 = vld [vmem:[%s14717_s6 + $0x338] sm:$0xf]  ;;  %v9553_v27 = vld [vmem:[%s14717_s6 + $0x358] sm:$0xf0] }
 0x22e   : > { %3535 = vst [vmem:[%s11744_s28 + $0x10] sm:$0xff] %v3166_v56  ;;  %3837 = vmatpush.bf16.msrb.mxu1 %v3703_v8  ;;  %v9562_v56 = vld [vmem:[%s14717_s6 + $0x3a0] sm:$0xf0]  ;;  %v12491_v4 = vor.u32 %v9625_v29, %v8795_v11  ;;  %v8500_v7 = vor.u32 %v9553_v27, %v8499_v60  ;;  %v8463_v40 = vld [vmem:[%s14717_s6 + $0x2f0] sm:$0xf] }
 0x22f   : > { %3547 = vst [vmem:[%s11744_s28 + $0x70] sm:$0xff] %v3342_v37  ;;  %v9481_v37 = vld [vmem:[%s14717_s6 + $0x118] sm:$0xf0]  ;;  %3478 = vmatpush.bf16.msrb.mxu2 %v8248_v45  ;;  %v8139_v45 = vld [vmem:[%s14717_s6 + $0x68] sm:$0xf] }
 0x230   : > { %v3138_v58 = vpop.f32.mrf.mxu2  ;;  %v8212_v8 = vor.u32 %v9481_v37, %v8211_v32  ;;  %v8427_v11 = vld [vmem:[%s14717_s6 + $0x2a8] sm:$0xf]  ;;  %v8103_v60 = vld [vmem:[%s14717_s6 + $0x20] sm:$0xf] }
 0x231   : > { %v3139_v12 = vadd.f32 %v3138_v58, %v11781_v5  ;;  %v3167_v62 = vpop.f32.mrf.mxu3  ;;  %3859 = vmatpush.bf16.msra.mxu0 %v3741_v48  ;;  %4476 = vrot.lane.b32.xlu0 %v12432_v57, %s9766_s26  ;;  %v8175_v48 = vld [vmem:[%s14717_s6 + $0xb0] sm:$0xf]  ;;  %v8391_v27 = vld [vmem:[%s14717_s6 + $0x260] sm:$0xf] }
 0x232   : > { %3838 = vmatpush.bf16.msrb.mxu1 %v3702_v43  ;;  %4148 = vrot.lane.b32.xlu2 %v12345_v25, %s9773_s15  ;;  %v3315_v36 = vpop.f32.mrf.mxu0 }
 0x233   : > { %v3168_v9 = vadd.f32 %v3167_v62, %v3139_v12  ;;  %4136 = vrot.lane.b32.xlu1 %v12345_v25, %s9772_s29  ;;  %v3316_v26 = vadd.f32 %v3315_v36, %v11858_v61  ;;  %v3344_v63 = vpop.f32.mrf.mxu1  ;;  %v12460_v35 = vpop.permute.xlu1 %3895  ;;  %v8536_v25 = vor.u32 %v9562_v56, %v8535_v24  ;;  %3479 = vmatpush.bf16.msrb.mxu2 %v8212_v8  ;;  %v9544_v36 = vld [vmem:[%s14717_s6 + $0x310] sm:$0xf0]  ;;  %v9463_v56 = vld [vmem:[%s14717_s6 + $0x88] sm:$0xf0]  ;;  %v9454_v8 = vld [vmem:[%s14717_s6 + $0x40] sm:$0xf0] }
 0x234   : > { %14741 = vst [vmem:[#allocation6_spill] sm:$0xff] %v12460_v35  ;;  %v12465_v3 = vpop.permute.xlu0 %3905  ;;  %v12467_v28 = vpop.permute.xlu2 %4086  ;;  %v8464_v24 = vor.u32 %v9544_v36, %v8463_v40  ;;  %v8140_v29 = vor.u32 %v9463_v56, %v8139_v45 }
 0x235   : > { %14742 = vst [vmem:[#allocation7_spill] sm:$0xff] %v12465_v3  ;;  %v3345_v14 = vadd.f32 %v3344_v63, %v3316_v26  ;;  %3372 = vmatmul.bf16.gmra.mxu2 %v11200_v17  ;;  %3827 = vmatmul.bf16.gmra.mxu0 %v8684_v0  ;;  %v8176_v0 = vor.u32 %v9472_v6, %v8175_v48  ;;  %v8679_v26 = vld [vmem:[%s14718_s7 + $0x8] sm:$0xf]  ;;  %v9598_v63 = vld [vmem:[%s14718_s7 + $0x10] sm:$0xf0] }
 0x236   : > { %3544 = vst [vmem:[%s11744_s28 + $0x58] sm:$0xff] %v3168_v9  ;;  %3401 = vmatmul.bf16.gmra.mxu3 %v11204_v23  ;;  %3839 = vmatpush.bf16.msrb.mxu1 %v3690_v54  ;;  %v8680_v32 = vor.u32 %v9598_v63, %v8679_v26  ;;  %v8735_v6 = vld [vmem:[#allocation2 + $0x7c] sm:$0xf0]  ;;  %v9643_v3 = vld [vmem:[#allocation2 + $0x80] sm:$0xf0] }
 0x237   : > { %3556 = vst [vmem:[%s11744_s28 + $0xb8] sm:$0xff] %v3345_v14  ;;  %3507 = vmatpush.bf16.msra.mxu3 %v8536_v25  ;;  %3480 = vmatpush.bf16.msrb.mxu2 %v8176_v0  ;;  %v9535_v25 = vld [vmem:[%s14717_s6 + $0x2c8] sm:$0xf0]  ;;  %v8685_v0 = vld [vmem:[%s14718_s7 + $0x24] sm:$0xf0] }
 0x238   : > { %v3141_v2 = vpop.f32.mrf.mxu2  ;;  %v8428_v54 = vor.u32 %v9535_v25, %v8427_v11 }
 0x239   : > { %v3142_v55 = vadd.f32 %v3141_v2, %v11858_v61  ;;  %v3170_v22 = vpop.f32.mrf.mxu3  ;;  %4486 = vrot.lane.b32.xlu0 %v12491_v4, %s9767_s27 }
 0x23a   : > { %3840 = vmatpush.bf16.msrb.mxu1 %v3689_v47  ;;  %4474 = vrot.lane.b32.xlu2 %v12491_v4, %s9766_s26  ;;  %v3317_v58 = vpop.f32.mrf.mxu0  ;;  %v8104_v47 = vor.u32 %v9454_v8, %v8103_v60 }
 0x23b   : > { %v3171_v1 = vadd.f32 %v3170_v22, %v3142_v55  ;;  %4488 = vrot.lane.b32.xlu1 %v12432_v57, %s9767_s27  ;;  %v3318_v12 = vadd.f32 %v3317_v58, %v11775_v59  ;;  %v3346_v62 = vpop.f32.mrf.mxu1  ;;  %v12516_v43 = vpop.permute.xlu1 %3910  ;;  %3508 = vmatpush.bf16.msra.mxu3 %v8500_v7 }
 0x23c   : > { %14743 = vst [vmem:[#allocation8_spill] sm:$0xff] %v12516_v43  ;;  %v12521_v21 = vpop.permute.xlu0 %3920  ;;  %v12523_v18 = vpop.permute.xlu2 %4122  ;;  %3481 = vmatpush.bf16.msrb.mxu2 %v8140_v29 }
 0x23d   : > { %14744 = vst [vmem:[#allocation9_spill] sm:$0xff] %v12521_v21  ;;  %v3347_v9 = vadd.f32 %v3346_v62, %v3318_v12  ;;  %3841 = vmatmul.bf16.vlgmr.msrb.gmra.mxu1 %v8676_v20  ;;  %v9526_v20 = vld [vmem:[%s14717_s6 + $0x280] sm:$0xf0]  ;;  %v9610_v12 = vld [vmem:[#allocation2 + $0x58] sm:$0xf] }
 0x23e   : > { %3553 = vst [vmem:[%s11744_s28 + $0xa0] sm:$0xff] %v3171_v1  ;;  %v8392_v40 = vor.u32 %v9526_v20, %v8391_v27  ;;  %v9599_v62 = vld [vmem:[%s14718_s7 + $0x1c] sm:$0xf]  ;;  %v12582_v36 = vor.u32 %v9610_v12, %v8735_v6 }
 0x23f   : > { %3565 = vst [vmem:[%s11744_s28 + $0x100] sm:$0xff] %v3347_v9  ;;  %3509 = vmatpush.bf16.msra.mxu3 %v8464_v24  ;;  %v8688_v63 = vor.u32 %v9599_v62, %v8685_v0 }
 0x240   : > { %v3143_v14 = vpop.f32.mrf.mxu2  ;;  %3482 = vmatpush.bf16.msrb.mxu2 %v8104_v47 }
 0x241   : > { %v3144_v15 = vadd.f32 %v3143_v14, %v11775_v59  ;;  %v3172_v19 = vpop.f32.mrf.mxu3  ;;  %4512 = vrot.lane.b32.xlu0 %v12432_v57, %s9769_s23 }
 0x242   : > { %4500 = vrot.lane.b32.xlu2 %v12432_v57, %s9768_s16  ;;  %v3320_v37 = vpop.f32.mrf.mxu0 }
 0x243   : > { %v3173_v2 = vadd.f32 %v3172_v19, %v3144_v15  ;;  %4498 = vrot.lane.b32.xlu1 %v12491_v4, %s9768_s16  ;;  %v3321_v7 = vadd.f32 %v3320_v37, %v12002_v42  ;;  %v3349_v55 = vpop.f32.mrf.mxu1  ;;  %v12562_v22 = vpop.permute.xlu1 %3925  ;;  %3510 = vmatpush.bf16.msra.mxu3 %v8428_v54  ;;  %v8691_v19 = vld [vmem:[%s14718_s7 + $0x20] sm:$0xf] }
 0x244   : > { %14745 = vst [vmem:[#allocation10_spill] sm:$0xff] %v12562_v22  ;;  %v12567_v58 = vpop.permute.xlu0 %4062  ;;  %v12569_v48 = vpop.permute.xlu2 %4172 }
 0x245   : > { %14746 = vst [vmem:[#allocation11_spill] sm:$0xff] %v12569_v48  ;;  %v3350_v1 = vadd.f32 %v3349_v55, %v3321_v7  ;;  %3377 = vmatmul.bf16.gmra.mxu2 %v11327_v31  ;;  %8693 = vmatmul.msk.bf16.vlgmr.msra.gmra.mxu0 %vm3807_vm9, %v8680_v32  ;;  %v9601_v32 = vld [vmem:[%s14718_s7 + $0x28] sm:$0xf0] }
 0x246   : > { %3562 = vst [vmem:[%s11744_s28 + $0xe8] sm:$0xff] %v3173_v2  ;;  %3406 = vmatmul.bf16.gmra.mxu3 %v11334_v13  ;;  %v8692_v27 = vor.u32 %v9601_v32, %v8691_v19  ;;  %v9626_v19 = vld [vmem:[#allocation2 + $0x5c] sm:$0xf] }
 0x247   : > { %3574 = vst [vmem:[%s11744_s28 + $0x148] sm:$0xff] %v3350_v1  ;;  %3511 = vmatpush.bf16.msra.mxu3 %v8392_v40 }
 0x248   : > { %v3146_v24 = vpop.f32.mrf.mxu2 }
 0x249   : > { %v3147_v9 = vadd.f32 %v3146_v24, %v12002_v42  ;;  %v3175_v26 = vpop.f32.mrf.mxu3  ;;  %4068 = vrot.lane.b32.xlu0 %v12582_v36, %s9766_s26 }
 0x24a   : > { %4510 = vrot.lane.b32.xlu2 %v12491_v4, %s9769_s23  ;;  %v3322_v45 = vpop.f32.mrf.mxu0 }
 0x24b   : > { %v3176_v56 = vadd.f32 %v3175_v26, %v3147_v9  ;;  %4080 = vrot.lane.b32.xlu1 %v12582_v36, %s9767_s27  ;;  %v3323_v11 = vadd.f32 %v3322_v45, %v12051_v16  ;;  %v3351_v29 = vpop.f32.mrf.mxu1  ;;  %v12592_v25 = vpop.permute.xlu1 %4074 }
 0x24c   : > { %v12594_v14 = vpop.permute.xlu0 %4098  ;;  %v12596_v54 = vpop.permute.xlu2 %4187 }
 0x24d   : > { %14747 = vst [vmem:[#allocation12_spill] sm:$0xff] %v12596_v54  ;;  %v3352_v15 = vadd.f32 %v3351_v29, %v3323_v11  ;;  %3846 = vmatmul.bf16.gmra.mxu1 %v8688_v63 }
 0x24e   : > { %3571 = vst [vmem:[%s11744_s28 + $0x130] sm:$0xff] %v3176_v56 }
 0x24f   : > { %3583 = vst [vmem:[%s11744_s28 + $0x190] sm:$0xff] %v3352_v15  ;;  %v8805_v15 = vld [vmem:[#allocation2 + $0x80] sm:$0xf0] }
 0x250   : > { %v3148_v37 = vpop.f32.mrf.mxu2 }
 0x251   : > { %v3149_v60 = vadd.f32 %v3148_v37, %v12051_v16  ;;  %v3177_v8 = vpop.f32.mrf.mxu3  ;;  %4104 = vrot.lane.b32.xlu0 %v12582_v36, %s9769_s23  ;;  %v12641_v37 = vor.u32 %v9626_v19, %v8805_v15 }
 0x252   : > { %4092 = vrot.lane.b32.xlu2 %v12582_v36, %s9768_s16  ;;  %v3325_v2 = vpop.f32.mrf.mxu0 }
 0x253   : > { %v3178_v7 = vadd.f32 %v3177_v8, %v3149_v60  ;;  %4116 = vrot.lane.b32.xlu1 %v12582_v36, %s14748_s22  ;;  %v3326_v55 = vadd.f32 %v3325_v2, %v11877_v51  ;;  %v3354_v47 = vpop.f32.mrf.mxu1  ;;  %v12614_v20 = vpop.permute.xlu1 %4110 }
 0x254   : > { %v12616_v6 = vpop.permute.xlu0 %4134  ;;  %v12618_v40 = vpop.permute.xlu2 %4317 }
 0x255   : > { %14749 = vst [vmem:[#allocation13_spill] sm:$0xff] %v12618_v40  ;;  %v3355_v1 = vadd.f32 %v3354_v47, %v3326_v55  ;;  %3382 = vmatmul.bf16.gmra.mxu2 %v11360_v39  ;;  %8694 = vmatmul.msk.bf16.gmra.mxu0 %vm3807_vm9, %v8692_v27 }
 0x256   : > { %3580 = vst [vmem:[%s11744_s28 + $0x178] sm:$0xff] %v3178_v7  ;;  %3411 = vmatmul.bf16.gmra.mxu3 %v11365_v30 }
 0x257   : > { %3592 = vst [vmem:[%s11744_s28 + $0x1d8] sm:$0xff] %v3355_v1 }
 0x258   : > { %v3151_v12 = vpop.f32.mrf.mxu2 }
 0x259   : > { %v3152_v62 = vadd.f32 %v3151_v12, %v11877_v51  ;;  %v3180_v0 = vpop.f32.mrf.mxu3  ;;  %4140 = vrot.lane.b32.xlu0 %v12582_v36, %s9772_s29 }
 0x25a   : > { %4128 = vrot.lane.b32.xlu2 %v12582_v36, %s14737_s20  ;;  %v3327_v24 = vpop.f32.mrf.mxu0 }
 0x25b   : > { %v3181_v9 = vadd.f32 %v3180_v0, %v3152_v62  ;;  %4524 = vrot.lane.b32.xlu1 %v12432_v57, %s14748_s22  ;;  %v3328_v26 = vadd.f32 %v3327_v24, %v12055_v34  ;;  %v3356_v63 = vpop.f32.mrf.mxu1  ;;  %v12633_v45 = vpop.permute.xlu1 %4146  ;;  %v9627_v0 = vld [vmem:[#allocation2 + $0x7c] sm:$0xf0]  ;;  %v8803_v24 = vld [vmem:[#allocation2 + $0x58] sm:$0xf] }
 0x25c   : > { %v12635_v56 = vpop.permute.xlu0 %4177  ;;  %v12637_v11 = vpop.permute.xlu2 %4332 }
 0x25d   : > { %14750 = vst [vmem:[#allocation14_spill] sm:$0xff] %v12635_v56  ;;  %v3357_v29 = vadd.f32 %v3356_v63, %v3328_v26 }
 0x25e   : > { %14751 = vst [vmem:[#allocation15_spill] sm:$0xff] %v12637_v11 }
 0x25f   : > { %3589 = vst [vmem:[%s11744_s28 + $0x1c0] sm:$0xff] %v3181_v9  ;;  %v12661_v9 = vor.u32 %v9627_v0, %v8803_v24 }
 0x260   : > { %3601 = vst [vmem:[%s11744_s28 + $0x220] sm:$0xff] %v3357_v29  ;;  %v3153_v32 = vpop.f32.mrf.mxu2 }
 0x261   : > { %v3154_v60 = vadd.f32 %v3153_v32, %v12055_v34  ;;  %v3182_v8 = vpop.f32.mrf.mxu3  ;;  %4522 = vrot.lane.b32.xlu0 %v12491_v4, %s14748_s22 }
 0x262   : > { %4480 = vrot.lane.b32.xlu2 %v12641_v37, %s9766_s26  ;;  %v3426_v27 = vpop.f32.mrf.mxu0 }
 0x263   : > { %v3183_v2 = vadd.f32 %v3182_v8, %v3154_v60  ;;  %4152 = vrot.lane.b32.xlu1 %v12582_v36, %s9773_s15  ;;  %v3427_v7 = vadd.f32 %v3426_v27, %v11716_v49  ;;  %v3455_v55 = vpop.f32.mrf.mxu1  ;;  %v12651_v47 = vpop.permute.xlu1 %4182 }
 0x264   : > { %14752 = vst [vmem:[#allocation16_spill] sm:$0xff] %v12651_v47  ;;  %v12653_v1 = vpop.permute.xlu0 %4307  ;;  %v12655_v12 = vpop.permute.xlu2 %4066 }
 0x265   : > { %14753 = vst [vmem:[#allocation17_spill] sm:$0xff] %v12653_v1  ;;  %v3456_v62 = vadd.f32 %v3455_v55, %v3427_v7  ;;  %3483 = vmatmul.bf16.vlgmr.msrb.gmra.mxu2 %v11076_v44 }
 0x266   : > { %3598 = vst [vmem:[%s11744_s28 + $0x208] sm:$0xff] %v3183_v2  ;;  %3512 = vmatmul.bf16.vlgmr.msra.gmra.mxu3 %v11080_v50 }
 0x267   : > { %3540 = vst [vmem:[%s11744_s28 + $0x38] sm:$0xff] %v3456_v62 }
 0x268   : > { %v3252_v36 = vpop.f32.mrf.mxu2 }
 0x269   : > { %v3253_v26 = vadd.f32 %v3252_v36, %v11716_v49  ;;  %v3281_v63 = vpop.f32.mrf.mxu3  ;;  %4546 = vrot.lane.b32.xlu0 %v12491_v4, %s9772_s29 }
 0x26a   : > { %4490 = vrot.lane.b32.xlu2 %v12661_v9, %s9767_s27  ;;  %v3428_v44 = vpop.f32.mrf.mxu0 }
 0x26b   : > { %v3282_v29 = vadd.f32 %v3281_v63, %v3253_v26  ;;  %4478 = vrot.lane.b32.xlu1 %v12661_v9, %s9766_s26  ;;  %v3429_v50 = vadd.f32 %v3428_v44, %v11781_v5  ;;  %v3457_v15 = vpop.f32.mrf.mxu1  ;;  %v12671_v19 = vpop.permute.xlu1 %4312 }
 0x26c   : > { %14754 = vst [vmem:[#allocation18_spill] sm:$0xff] %v12671_v19  ;;  %v12673_v32 = vpop.permute.xlu0 %4322  ;;  %v12675_v60 = vpop.permute.xlu2 %4102 }
 0x26d   : > { %14755 = vst [vmem:[#allocation19_spill] sm:$0xff] %v12673_v32  ;;  %v3458_v8 = vadd.f32 %v3457_v15, %v3429_v50  ;;  %v12817_v32 = vld [vmem:[%s14721_s10] sm:$0xff] }
 0x26e   : > { %3537 = vst [vmem:[%s11744_s28 + $0x20] sm:$0xff] %v3282_v29 }
 0x26f   : > { %3549 = vst [vmem:[%s11744_s28 + $0x80] sm:$0xff] %v3458_v8 }
 0x270   : > { %v3254_v27 = vpop.f32.mrf.mxu2  ;;  %14763 = vst [vmem:[#allocation27_spill] sm:$0xff] %v12817_v32 }
 0x271   : > { %v3255_v2 = vadd.f32 %v3254_v27, %v11781_v5  ;;  %v3283_v7 = vpop.f32.mrf.mxu3  ;;  %4492 = vrot.lane.b32.xlu0 %v12641_v37, %s9767_s27 }
 0x272   : > { %4516 = vrot.lane.b32.xlu2 %v12641_v37, %s9769_s23  ;;  %v3431_v55 = vpop.f32.mrf.mxu0 }
 0x273   : > { %v3284_v62 = vadd.f32 %v3283_v7, %v3255_v2  ;;  %4504 = vrot.lane.b32.xlu1 %v12641_v37, %s9768_s16  ;;  %v3432_v0 = vadd.f32 %v3431_v55, %v11858_v61  ;;  %v3460_v24 = vpop.f32.mrf.mxu1  ;;  %v12687_v36 = vpop.permute.xlu1 %4327 }
 0x274   : > { %14756 = vst [vmem:[#allocation20_spill] sm:$0xff] %v12687_v36  ;;  %v12689_v26 = vpop.permute.xlu0 %4337  ;;  %v12691_v63 = vpop.permute.xlu2 %4138 }
 0x275   : > { %14757 = vst [vmem:[#allocation21_spill] sm:$0xff] %v12689_v26  ;;  %v3461_v44 = vadd.f32 %v3460_v24, %v3432_v0  ;;  %3488 = vmatmul.bf16.gmra.mxu2 %v11200_v17 }
 0x276   : > { %3546 = vst [vmem:[%s11744_s28 + $0x68] sm:$0xff] %v3284_v62  ;;  %3517 = vmatmul.bf16.gmra.mxu3 %v11204_v23 }
 0x277   : > { %3558 = vst [vmem:[%s11744_s28 + $0xc8] sm:$0xff] %v3461_v44 }
 0x278   : > { %v3257_v29 = vpop.f32.mrf.mxu2 }
 0x279   : > { %v3258_v50 = vadd.f32 %v3257_v29, %v11858_v61  ;;  %v3286_v15 = vpop.f32.mrf.mxu3  ;;  %4502 = vrot.lane.b32.xlu0 %v12661_v9, %s9768_s16 }
 0x27a   : > { %4526 = vrot.lane.b32.xlu2 %v12661_v9, %s14748_s22  ;;  %v3433_v8 = vpop.f32.mrf.mxu0 }
 0x27b   : > { %v3287_v27 = vadd.f32 %v3286_v15, %v3258_v50  ;;  %4514 = vrot.lane.b32.xlu1 %v12661_v9, %s9769_s23  ;;  %v3434_v17 = vadd.f32 %v3433_v8, %v11775_v59  ;;  %v3462_v23 = vpop.f32.mrf.mxu1  ;;  %v12705_v2 = vpop.permute.xlu1 %4342 }
 0x27c   : > { %14758 = vst [vmem:[#allocation22_spill] sm:$0xff] %v12705_v2  ;;  %v12707_v7 = vpop.permute.xlu0 %4078  ;;  %v12709_v55 = vpop.permute.xlu2 %4076 }
 0x27d   : > { %3555 = vst [vmem:[%s11744_s28 + $0xb0] sm:$0xff] %v3287_v27  ;;  %v3463_v62 = vadd.f32 %v3462_v23, %v3434_v17 }
 0x27f   : > { %3567 = vst [vmem:[%s11744_s28 + $0x110] sm:$0xff] %v3463_v62 }
 0x280   : > { %v3259_v0 = vpop.f32.mrf.mxu2 }
 0x281   : > { %v3260_v24 = vadd.f32 %v3259_v0, %v11775_v59  ;;  %v3288_v44 = vpop.f32.mrf.mxu3  ;;  %4528 = vrot.lane.b32.xlu0 %v12641_v37, %s14748_s22 }
 0x282   : > { %4552 = vrot.lane.b32.xlu2 %v12641_v37, %s9772_s29  ;;  %v3436_v29 = vpop.f32.mrf.mxu0 }
 0x283   : > { %v3289_v50 = vadd.f32 %v3288_v44, %v3260_v24  ;;  %4550 = vrot.lane.b32.xlu1 %v12661_v9, %s9772_s29  ;;  %v3437_v15 = vadd.f32 %v3436_v29, %v12002_v42  ;;  %v3465_v8 = vpop.f32.mrf.mxu1  ;;  %v12721_v27 = vpop.permute.xlu1 %4090 }
 0x284   : > { %v12723_v17 = vpop.permute.xlu0 %4114  ;;  %v12725_v23 = vpop.permute.xlu2 %4112 }
 0x285   : > { %3564 = vst [vmem:[%s11744_s28 + $0xf8] sm:$0xff] %v3289_v50  ;;  %v3466_v62 = vadd.f32 %v3465_v8, %v3437_v15  ;;  %3493 = vmatmul.bf16.gmra.mxu2 %v11327_v31 }
 0x286   : > { %3522 = vmatmul.bf16.gmra.mxu3 %v11334_v13 }
 0x287   : > { %3576 = vst [vmem:[%s11744_s28 + $0x158] sm:$0xff] %v3466_v62 }
 0x288   : > { %v3262_v0 = vpop.f32.mrf.mxu2 }
 0x289   : > { %v3263_v24 = vadd.f32 %v3262_v0, %v12002_v42  ;;  %v3291_v44 = vpop.f32.mrf.mxu3  ;;  %4540 = vrot.lane.b32.xlu0 %v12641_v37, %s14737_s20 }
 0x28a   : > { %4538 = vrot.lane.b32.xlu2 %v12661_v9, %s14737_s20  ;;  %v3438_v29 = vpop.f32.mrf.mxu0 }
 0x28b   : > { %v3292_v50 = vadd.f32 %v3291_v44, %v3263_v24  ;;  %4548 = vrot.lane.b32.xlu1 %v12432_v57, %s9772_s29  ;;  %v3439_v31 = vadd.f32 %v3438_v29, %v12051_v16  ;;  %v3467_v13 = vpop.f32.mrf.mxu1  ;;  %v12739_v15 = vpop.permute.xlu1 %4126 }
 0x28c   : > { %v12741_v8 = vpop.permute.xlu0 %4150  ;;  %v12743_v62 = vpop.permute.xlu2 %4148 }
 0x28d   : > { %3573 = vst [vmem:[%s11744_s28 + $0x140] sm:$0xff] %v3292_v50  ;;  %v3468_v0 = vadd.f32 %v3467_v13, %v3439_v31 }
 0x28f   : > { %3585 = vst [vmem:[%s11744_s28 + $0x1a0] sm:$0xff] %v3468_v0 }
 0x290   : > { %v3264_v2 = vpop.f32.mrf.mxu2 }
 0x291   : > { %v3265_v26 = vadd.f32 %v3264_v2, %v12051_v16  ;;  %v3293_v24 = vpop.f32.mrf.mxu3  ;;  %4558 = vrot.lane.b32.xlu0 %v12491_v4, %s9773_s15 }
 0x292   : > { %4536 = vrot.lane.b32.xlu2 %v12432_v57, %s14737_s20  ;;  %v3441_v44 = vpop.f32.mrf.mxu0 }
 0x293   : > { %v3294_v29 = vadd.f32 %v3293_v24, %v3265_v26  ;;  %4534 = vrot.lane.b32.xlu1 %v12491_v4, %s14737_s20  ;;  %v3442_v50 = vadd.f32 %v3441_v44, %v11877_v51  ;;  %v3470_v31 = vpop.f32.mrf.mxu1 }
 0x294   : > { %v12755_v13 = vpop.permute.xlu0 %4088  ;;  %v12757_v0 = vpop.permute.xlu2 %4474 }
 0x295   : > { %3582 = vst [vmem:[%s11744_s28 + $0x188] sm:$0xff] %v3294_v29  ;;  %v3471_v2 = vadd.f32 %v3470_v31, %v3442_v50  ;;  %v12760_v11 = vpop.permute.xlu1 %4064  ;;  %3498 = vmatmul.bf16.gmra.mxu2 %v11360_v39 }
 0x296   : > { %3527 = vmatmul.bf16.gmra.mxu3 %v11365_v30 }
 0x297   : > { %3594 = vst [vmem:[%s11744_s28 + $0x1e8] sm:$0xff] %v3471_v2 }
 0x298   : > { %v3267_v26 = vpop.f32.mrf.mxu2 }
 0x299   : > { %v3268_v4 = vadd.f32 %v3267_v26, %v11877_v51  ;;  %v3296_v24 = vpop.f32.mrf.mxu3  ;;  %4560 = vrot.lane.b32.xlu0 %v12432_v57, %s9773_s15  ;;  %v12783_v57 = vld [vmem:[%s14719_s8 + $0x10] sm:$0xff] }
 0x29a   : > { %4564 = vrot.lane.b32.xlu2 %v12641_v37, %s9773_s15  ;;  %v3443_v44 = vpop.f32.mrf.mxu0  ;;  %14759 = vst [vmem:[#allocation23_spill] sm:$0xff] %v12783_v57  ;;  %v12789_v37 = vld [vmem:[%s14719_s8 + $0x8] sm:$0xff] }
 0x29b   : > { %v3297_v29 = vadd.f32 %v3296_v24, %v3268_v4  ;;  %4562 = vrot.lane.b32.xlu1 %v12661_v9, %s9773_s15  ;;  %v3444_v39 = vadd.f32 %v3443_v44, %v12055_v34  ;;  %v3472_v30 = vpop.f32.mrf.mxu1  ;;  %14760 = vst [vmem:[#allocation24_spill] sm:$0xff] %v12789_v37  ;;  %v12794_v4 = vld [vmem:[%s14719_s8] sm:$0xff] }
 0x29c   : > { %v12773_v50 = vpop.permute.xlu0 %4124  ;;  %v12775_v31 = vpop.permute.xlu2 %4500 }
 0x29d   : > { %3591 = vst [vmem:[%s11744_s28 + $0x1d0] sm:$0xff] %v3297_v29  ;;  %v3473_v2 = vadd.f32 %v3472_v30, %v3444_v39  ;;  %v12778_v26 = vpop.permute.xlu1 %4100 }
 0x29f   : > { %3603 = vst [vmem:[%s11744_s28 + $0x230] sm:$0xff] %v3473_v2 }
 0x2a0   : > { %v3269_v9 = vpop.f32.mrf.mxu2 }
 0x2a1   : > { %v3270_v24 = vadd.f32 %v3269_v9, %v12055_v34  ;;  %v3298_v44 = vpop.f32.mrf.mxu3  ;;  %4594 = vperm.xlu0 %9753, %v12783_v57   ;;  %v12812_v9 = vld [vmem:[%s14721_s10 + $0x8] sm:$0xff]  ;;  %v9640_v57 = vld [vmem:[#allocation2 + $0x10] sm:$0xf] }
 0x2a2   : > { %4589 = vperm.xlu2 %9755, %v12789_v37   ;;  %v12799_v29 = vpop.f32.mrf.mxu0  ;;  %14762 = vst [vmem:[#allocation26_spill] sm:$0xff] %v12812_v9 }
 0x2a3   : > { %v3299_v39 = vadd.f32 %v3298_v44, %v3270_v24  ;;  %4584 = vperm.xlu1 %9754, %v12794_v4   ;;  %v12822_v44 = vld [vmem:[%s14719_s8 + $0x18] sm:$0xff] }
 0x2a4   : > { %v12802_v30 = vpop.permute.xlu0 %4476  ;;  %v12804_v2 = vpop.permute.xlu2 %4510  ;;  %14764 = vst [vmem:[#allocation28_spill] sm:$0xff] %v12822_v44 }
 0x2a5   : > { %14761 = vst [vmem:[#allocation25_spill] sm:$0xff] %v12804_v2  ;;  %v12807_v36 = vpop.permute.xlu1 %4136 }
 0x2a6   : > { %3600 = vst [vmem:[%s11744_s28 + $0x218] sm:$0xff] %v3299_v39 }
 0x2a8   : > { %v3368_v24 = vpop.f32.mrf.mxu2 }
 0x2a9   : > { %v3369_v39 = vadd.f32 %v3368_v24, %v11716_v49  ;;  %v3397_v40 = vpop.f32.mrf.mxu3  ;;  %4724 = vperm.xlu0 %9753, %v12812_v9   ;;  %v12840_v24 = vld [vmem:[%s14721_s10 + $0x20] sm:$0xff] }
 0x2aa   : > { %4719 = vperm.xlu2 %9755, %v12817_v32   ;;  %v12827_v19 = vpop.f32.mrf.mxu0  ;;  %14765 = vst [vmem:[#allocation29_spill] sm:$0xff] %v12840_v24 }
 0x2ab   : > { %v3398_v1 = vadd.f32 %v3397_v40, %v3369_v39  ;;  %4599 = vperm.xlu1 %9754, %v12822_v44   ;;  %v12845_v40 = vld [vmem:[%s14721_s10 + $0x18] sm:$0xff] }
 0x2ac   : > { %v12830_v41 = vpop.permute.xlu0 %4486  ;;  %v4093_v22 = vpop.permute.xlu2 %4092  ;;  %14766 = vst [vmem:[#allocation30_spill] sm:$0xff] %v12845_v40 }
 0x2ad   : > { %3539 = vst [vmem:[%s11744_s28 + $0x30] sm:$0xff] %v3398_v1  ;;  %v4095_v21 = vsel %vm3675_vm1, %v12721_v27, %v4093_v22  ;;  %v12835_v54 = vpop.permute.xlu1 %4488  ;;  %v12850_v1 = vld [vmem:[%s14721_s10 + $0x10] sm:$0xff]  ;;  %v4094_v27 = vsel %vm3675_vm1, %v12467_v28, %v12755_v13  ;;  %v4716_v28 = vld [vmem:[%s14721_s10 + $0x38] sm:$0xff] }
 0x2ae   : > { %4226 = vmatpush.bf16.msra.mxu2 %v4095_v21  ;;  %14767 = vst [vmem:[#allocation31_spill] sm:$0xff] %v12850_v1  ;;  %v12874_v13 = vld [vmem:[%s14721_s10 + $0x30] sm:$0xff] }
 0x2af   : > { %14769 = vst [vmem:[#allocation33_spill] sm:$0xff] %v12874_v13 }
 0x2b0   : > { %v3370_v39 = vpop.f32.mrf.mxu2 }
 0x2b1   : > { %v3371_v22 = vadd.f32 %v3370_v39, %v11781_v5  ;;  %v3399_v21 = vpop.f32.mrf.mxu3  ;;  %4739 = vperm.xlu0 %9753, %v12840_v24  }
 0x2b2   : > { %4734 = vperm.xlu2 %9755, %v12845_v40   ;;  %4227 = vmatpush.bf16.msra.mxu2 %v4094_v27  ;;  %v12858_v48 = vpop.f32.mrf.mxu0 }
 0x2b3   : > { %v3400_v53 = vadd.f32 %v3399_v21, %v3371_v22  ;;  %4729 = vperm.xlu1 %9754, %v12850_v1   ;;  %v12879_v21 = vld [vmem:[%s14721_s10 + $0x28] sm:$0xff] }
 0x2b4   : > { %v12861_v56 = vpop.permute.xlu0 %4512  ;;  %v12863_v47 = vpop.permute.xlu2 %4128  ;;  %14770 = vst [vmem:[#allocation34_spill] sm:$0xff] %v12879_v21 }
 0x2b5   : > { %14768 = vst [vmem:[#allocation32_spill] sm:$0xff] %v12861_v56  ;;  %v12866_v39 = vpop.permute.xlu1 %4498  ;;  %v8717_v56 = vld [vmem:[#allocation2 + $0x4] sm:$0xf] }
 0x2b6   : > { %3548 = vst [vmem:[%s11744_s28 + $0x78] sm:$0xff] %v3400_v53 }
 0x2b8   : > { %v3373_v22 = vpop.f32.mrf.mxu2 }
 0x2b9   : > { %v3374_v53 = vadd.f32 %v3373_v22, %v11858_v61  ;;  %v3402_v27 = vpop.f32.mrf.mxu3  ;;  %4754 = vperm.xlu0 %9753, %v4716_v28   ;;  %v8873_v28 = vld [vmem:[#allocation2 + $0x5c] sm:$0xf] }
 0x2ba   : > { %v12882_v24 = vpop.f32.mrf.mxu1  ;;  %4749 = vperm.xlu2 %9755, %v12874_v13   ;;  %v12885_v43 = vpop.f32.mrf.mxu0  ;;  %v12893_v35 = vor.u32 %v9643_v3, %v8873_v28  ;;  %v8865_v13 = vld [vmem:[#allocation2 + $0xc] sm:$0xf]  ;;  %v4082_v3 = vsel %vm3662_vm2, %v12592_v25, %v12709_v55 }
 0x2bb   : > { %v3403_v9 = vadd.f32 %v3402_v27, %v3374_v53  ;;  %4744 = vperm.xlu1 %9754, %v12879_v21   ;;  %v12895_v53 = vor.u32 %v9641_v46, %v8865_v13  ;;  %v8867_v13 = vld [vmem:[#allocation2 + $0x34] sm:$0xf0] }
 0x2bc   : > { %v4069_v1 = vpop.permute.xlu0 %4068  ;;  %v12888_v40 = vpop.permute.xlu2 %4480  ;;  %v12920_v25 = vor.u32 %v9640_v57, %v8867_v13 }
 0x2bd   : > { %3557 = vst [vmem:[%s11744_s28 + $0xc0] sm:$0xff] %v3403_v9  ;;  %v4081_v32 = vpop.permute.xlu1 %4080  ;;  %v4071_v28 = vsel %vm3649_vm3, %v12655_v12, %v4069_v1  ;;  %v9607_v1 = vld [vmem:[#allocation2 + $0x78] sm:$0xf0] }
 0x2be   : > { %v4083_v22 = vsel %vm3662_vm2, %v12707_v7, %v4081_v32 }
 0x2bf   : > { %4228 = vmatpush.bf16.msra.mxu2 %v4083_v22 }
 0x2c0   : > { %v3375_v37 = vpop.f32.mrf.mxu2 }
 0x2c1   : > { %v3376_v27 = vadd.f32 %v3375_v37, %v11775_v59  ;;  %v3404_v21 = vpop.f32.mrf.mxu3  ;;  %4890 = vrot.lane.b32.xlu0 %v12893_v35, %s9766_s26 }
 0x2c2   : > { %v12900_v9 = vpop.f32.mrf.mxu1  ;;  %4898 = vrot.lane.b32.xlu2 %v12895_v53, %s9767_s27  ;;  %v12907_v32 = vpop.f32.mrf.mxu0 }
 0x2c3   : > { %v3405_v7 = vadd.f32 %v3404_v21, %v3376_v27  ;;  %4886 = vrot.lane.b32.xlu1 %v12895_v53, %s9766_s26  ;;  %4229 = vmatpush.bf16.msra.mxu2 %v4082_v3  ;;  %v4070_v3 = vsel %vm3649_vm3, %v12567_v58, %v12760_v11  ;;  %v9606_v11 = vld [vmem:[#allocation2 + $0x28] sm:$0xf0] }
 0x2c4   : > { %v12911_v46 = vpop.permute.xlu0 %4104  ;;  %v12913_v37 = vpop.permute.xlu2 %4490 }
 0x2c5   : > { %3566 = vst [vmem:[%s11744_s28 + $0x108] sm:$0xff] %v3405_v7  ;;  %v12916_v22 = vpop.permute.xlu1 %4116 }
 0x2c7   : > { %4230 = vmatpush.bf16.msra.mxu2 %v4071_v28 }
 0x2c8   : > { %v3378_v55 = vpop.f32.mrf.mxu2 }
 0x2c9   : > { %v3379_v21 = vadd.f32 %v3378_v55, %v12002_v42  ;;  %v3407_v27 = vpop.f32.mrf.mxu3  ;;  %4900 = vrot.lane.b32.xlu0 %v12920_v25, %s9767_s27  ;;  %v8721_v55 = vld [vmem:[#allocation2 + $0x54] sm:$0xf] }
 0x2ca   : > { %4888 = vrot.lane.b32.xlu2 %v12920_v25, %s9766_s26  ;;  %v12930_v12 = vpop.f32.mrf.mxu0  ;;  %v3847_v7 = vpop.f32.mrf.mxu1  ;;  %v8722_v58 = vor.u32 %v9607_v1, %v8721_v55  ;;  %v4142_v1 = vsel %vm3727_vm4, %v12616_v6, %v12807_v36  ;;  %v4131_v36 = vsel %vm3714_vm5, %v12739_v15, %v12863_v47  ;;  %v8749_v47 = vld [vmem:[%s14718_s7 + $0x8] sm:$0xf]  ;;  %v9614_v15 = vld [vmem:[%s14718_s7 + $0x10] sm:$0xf0] }
 0x2cb   : > { %v3408_v57 = vadd.f32 %v3407_v27, %v3379_v21  ;;  %4902 = vrot.lane.b32.xlu1 %v12893_v35, %s9767_s27  ;;  %4231 = vmatpush.bf16.msra.mxu2 %v4070_v3  ;;  %v8741_v21 = vld [vmem:[%s14718_s7] sm:$0xf]  ;;  %v9613_v27 = vld [vmem:[%s14718_s7 + $0x8] sm:$0xf0] }
 0x2cc   : > { %v4141_v13 = vpop.permute.xlu0 %4140  ;;  %v12934_v28 = vpop.permute.xlu2 %4516  ;;  %v8742_v55 = vor.u32 %v9613_v27, %v8741_v21 }
 0x2cd   : > { %14771 = vst [vmem:[#allocation35_spill] sm:$0xff] %v12934_v28  ;;  %v4143_v44 = vsel %vm3727_vm4, %v12691_v63, %v4141_v13  ;;  %v12939_v2 = vpop.permute.xlu1 %4524 }
 0x2ce   : > { %3575 = vst [vmem:[%s11744_s28 + $0x150] sm:$0xff] %v3408_v57  ;;  %4245 = vmatpush.bf16.msrb.mxu3 %v4143_v44  ;;  %v8718_v44 = vor.u32 %v9606_v11, %v8717_v56  ;;  %v8875_v56 = vld [vmem:[#allocation2 + $0x84] sm:$0xf0]  ;;  %v3829_v11 = vadd.f32 %v12858_v48, %v12308_v33 }
 0x2cf   : > { %4232 = vmatpush.bf16.msra.mxu2 %v8722_v58 }
 0x2d0   : > { %v3380_v3 = vpop.f32.mrf.mxu2  ;;  %v3848_v33 = vadd.f32 %v3847_v7, %v3829_v11 }
 0x2d1   : > { %v3381_v57 = vadd.f32 %v3380_v3, %v12051_v16  ;;  %v3409_v63 = vpop.f32.mrf.mxu3  ;;  %4910 = vrot.lane.b32.xlu0 %v12895_v53, %s9768_s16 }
 0x2d2   : > { %4914 = vrot.lane.b32.xlu2 %v12893_v35, %s9768_s16  ;;  %4246 = vmatpush.bf16.msrb.mxu3 %v4142_v1  ;;  %v3866_v13 = vpop.f32.mrf.mxu0  ;;  %v3849_v21 = vpop.f32.mrf.mxu1 }
 0x2d3   : > { %v3410_v58 = vadd.f32 %v3409_v63, %v3381_v57  ;;  %4912 = vrot.lane.b32.xlu1 %v12920_v25, %s9768_s16  ;;  %4233 = vmatpush.bf16.msra.mxu2 %v8718_v44  ;;  %v9642_v57 = vld [vmem:[#allocation2 + $0x60] sm:$0xf]  ;;  %v3826_v63 = vadd.f32 %v12827_v19, %v12358_v10  ;;  %v3831_v44 = vadd.f32 %v12885_v43, %v12406_v52 }
 0x2d4   : > { %v12957_v3 = vpop.permute.xlu0 %4522  ;;  %v12959_v28 = vpop.permute.xlu2 %4526  ;;  %v12973_v48 = vor.u32 %v9642_v57, %v8875_v56  ;;  %v4130_v10 = vsel %vm3714_vm5, %v12523_v18, %v12773_v50  ;;  %v3867_v19 = vadd.f32 %v3866_v13, %v3848_v33  ;;  %v8750_v50 = vor.u32 %v9614_v15, %v8749_v47 }
 0x2d5   : > { %3584 = vst [vmem:[%s11744_s28 + $0x198] sm:$0xff] %v3410_v58  ;;  %v4153_v6 = vpop.permute.xlu1 %4152  ;;  %v3845_v52 = vadd.f32 %v12900_v9, %v3826_v63  ;;  %v3850_v43 = vadd.f32 %v3849_v21, %v3831_v44 }
 0x2d6   : > { %v4155_v27 = vsel %vm3740_vm6, %v12741_v8, %v4153_v6  ;;  %4234 = vmatmul.bf16.vlgmr.msra.gmra.mxu2 %v8742_v55  ;;  %4247 = vmatpush.bf16.msrb.mxu3 %v4131_v36  ;;  %v3824_v8 = vadd.f32 %v12799_v29, %v12360_v38  ;;  %v4154_v38 = vsel %vm3740_vm6, %v12633_v45, %v12743_v62  ;;  %v3873_v6 = vmax.f32 %v3867_v19, 0.0  ;;  %v8761_v19 = vld [vmem:[%s14718_s7 + $0x20] sm:$0xf] }
 0x2d7   : > { %4270 = vmatpush.bf16.msrb.mxu0 %v4155_v27  ;;  %v3864_v29 = vadd.f32 %v12930_v12, %v3845_v52  ;;  %v4119_v62 = vsel %vm3701_vm7, %v12723_v17, %v12916_v22  ;;  %v8753_v27 = vld [vmem:[%s14718_s7 + $0x18] sm:$0xf]  ;;  %v4118_v17 = vsel %vm3701_vm7, %v12614_v20, %v12725_v23  ;;  %v4107_v20 = vsel %vm3688_vm8, %v12675_v60, %v12911_v46  ;;  %v9612_v23 = vld [vmem:[%s14718_s7 + $0x4] sm:$0xf] }
 0x2d8   : > { %v3383_v1 = vpop.f32.mrf.mxu2  ;;  %v3843_v58 = vadd.f32 %v12882_v24, %v3824_v8 }
 0x2d9   : > { %v3384_v7 = vadd.f32 %v3383_v1, %v11877_v51  ;;  %v3412_v55 = vpop.f32.mrf.mxu3  ;;  %4916 = vrot.lane.b32.xlu0 %v12973_v48, %s9768_s16  ;;  %v3872_v12 = vmax.f32 %v3864_v29, 0.0 }
 0x2da   : > { %4904 = vrot.lane.b32.xlu2 %v12973_v48, %s9767_s27  ;;  %4248 = vmatpush.bf16.msrb.mxu3 %v4130_v10  ;;  %v3868_v18 = vpop.f32.mrf.mxu0  ;;  %v3862_v11 = vadd.f32 %v12907_v32, %v3843_v58  ;;  %v9616_v32 = vld [vmem:[%s14718_s7 + $0x20] sm:$0xf0]  ;;  %v4106_v58 = vsel %vm3688_vm8, %v12594_v14, %v12778_v26 }
 0x2db   : > { %v3413_v9 = vadd.f32 %v3412_v55, %v3384_v7  ;;  %4892 = vrot.lane.b32.xlu1 %v12973_v48, %s9766_s26  ;;  %4271 = vmatpush.bf16.msrb.mxu0 %v4154_v38  ;;  %v3869_v13 = vadd.f32 %v3868_v18, %v3850_v43  ;;  %v8754_v22 = vor.u32 %v9616_v32, %v8753_v27  ;;  %v9602_v10 = vld [vmem:[%s14720_s9] sm:$0xff]  ;;  %v8743_v43 = vld [vmem:[%s14718_s7 + $0xc] sm:$0xf0]  ;;  %v9617_v7 = vld [vmem:[%s14718_s7 + $0x28] sm:$0xf0] }
 0x2dc   : > { %v12999_v56 = vpop.permute.xlu0 %4546  ;;  %v13001_v24 = vpop.permute.xlu2 %4552  ;;  %v3871_v63 = vmax.f32 %v3862_v11, 0.0  ;;  %v8746_v38 = vor.u32 %v9612_v23, %v8743_v43  ;;  %v8762_v18 = vor.u32 %v9617_v7, %v8761_v19  ;;  %v9615_v27 = vld [vmem:[%s14718_s7 + $0x1c] sm:$0xf]  ;;  %v8755_v32 = vld [vmem:[%s14718_s7 + $0x24] sm:$0xf0] }
 0x2dd   : > { %3593 = vst [vmem:[%s11744_s28 + $0x1e0] sm:$0xff] %v3413_v9  ;;  %v3874_v36 = vmax.f32 %v3869_v13, 0.0  ;;  %v13005_v45 = vpop.permute.xlu1 %4478  ;;  %v9622_v43 = vld [vmem:[#allocation2 + $0x2c] sm:$0xf0]  ;;  %v8811_v19 = vld [vmem:[%s14718_s7] sm:$0xf] }
 0x2de   : > { %4249 = vmatpush.bf16.msrb.mxu3 %v4119_v62  ;;  %8763 = vmatmul.msk.bf16.vlgmr.msrb.gmra.mxu0 %vm3807_vm9, %v8750_v50  ;;  %v3883_v15 = vpack.c.bf16 %v3872_v12, %v3871_v63  ;;  %v9629_v7 = vld [vmem:[%s14718_s7 + $0x8] sm:$0xf0] }
 0x2df   : > { %v3884_v21 = vpack.c.bf16 %v3874_v36, %v3873_v6  ;;  %v4506_v6 = vsel %vm3675_vm1, %v12866_v39, %v12775_v31 }
 0x2e0   : > { %v3385_v57 = vpop.f32.mrf.mxu2 }
 0x2e1   : > { %v3386_v44 = vadd.f32 %v3385_v57, %v12055_v34  ;;  %v3414_v33 = vpop.f32.mrf.mxu3  ;;  %3971 = vmatpush.bf16.msra.mxu1 %v3884_v21  ;;  %4926 = vrot.lane.b32.xlu0 %v12893_v35, %s9769_s23 }
 0x2e2   : > { %4924 = vrot.lane.b32.xlu2 %v12920_v25, %s9769_s23  ;;  %4250 = vmatpush.bf16.msrb.mxu3 %v4118_v17 }
 0x2e3   : > { %v3415_v47 = vadd.f32 %v3414_v33, %v3386_v44  ;;  %4922 = vrot.lane.b32.xlu1 %v12895_v53, %s9769_s23  ;;  %v8758_v44 = vor.u32 %v9615_v27, %v8755_v32 }
 0x2e4   : > { %v4493_v8 = vpop.permute.xlu0 %4492  ;;  %v13027_v1 = vpop.permute.xlu2 %4538 }
 0x2e5   : > { %3602 = vst [vmem:[%s11744_s28 + $0x228] sm:$0xff] %v3415_v47  ;;  %v4505_v52 = vpop.permute.xlu1 %4504  ;;  %3972 = vmatpush.bf16.msra.mxu1 %v3883_v15  ;;  %v4495_v31 = vsel %vm3662_vm2, %v12913_v37, %v4493_v8  ;;  %v4483_v47 = vsel %vm3649_vm3, %v13005_v45, %v12888_v40 }
 0x2e6   : > { %4239 = vmatmul.bf16.gmra.mxu2 %v8754_v22  ;;  %4251 = vmatpush.bf16.msrb.mxu3 %v4107_v20 }
 0x2e8   : > { %v3484_v60 = vpop.f32.mrf.mxu2  ;;  %8711 = vmatmul.msk.bf16.vlgmr.msra.gmra.mxu1 %vm3807_vm9, %v9602_v10  ;;  %v4482_v10 = vsel %vm3649_vm3, %v12757_v0, %v12802_v30  ;;  %v9604_v0 = vld [vmem:[%s14720_s9 + $0x10] sm:$0xff] }
 0x2e9   : > { %v3485_v46 = vadd.f32 %v3484_v60, %v11716_v49  ;;  %v3513_v55 = vpop.f32.mrf.mxu3  ;;  %4936 = vrot.lane.b32.xlu0 %v12920_v25, %s14748_s22  ;;  %v8787_v60 = vld [vmem:[#allocation2 + $0x8] sm:$0xf] }
 0x2ea   : > { %4934 = vrot.lane.b32.xlu2 %v12895_v53, %s14748_s22  ;;  %4252 = vmatpush.bf16.msrb.mxu3 %v4106_v58 }
 0x2eb   : > { %v3514_v50 = vadd.f32 %v3513_v55, %v3485_v46  ;;  %4928 = vrot.lane.b32.xlu1 %v12973_v48, %s9769_s23  ;;  %v8788_v55 = vor.u32 %v9622_v43, %v8787_v60  ;;  %v9657_v60 = vld [vmem:[#allocation2 + $0x34] sm:$0xf0] }
 0x2ec   : > { %v4503_v29 = vpop.permute.xlu0 %4502  ;;  %v13059_v49 = vpop.permute.xlu2 %4536 }
 0x2ed   : > { %3541 = vst [vmem:[%s11744_s28 + $0x40] sm:$0xff] %v3514_v50  ;;  %v4507_v9 = vsel %vm3675_vm1, %v4503_v29, %v4505_v52  ;;  %v13063_v13 = vpop.permute.xlu1 %4514  ;;  %4253 = vmatmul.bf16.vlgmr.msrb.gmra.mxu3 %v8746_v38  ;;  %v9623_v52 = vld [vmem:[#allocation2 + $0x7c] sm:$0xf0] }
 0x2ee   : > { %4638 = vmatpush.bf16.msra.mxu3 %v4507_v9  ;;  %8764 = vmatmul.msk.bf16.gmra.mxu0 %vm3807_vm9, %v8762_v18  ;;  %v8812_v18 = vor.u32 %v9629_v7, %v8811_v19  ;;  %v8937_v19 = vld [vmem:[#allocation2 + $0x38] sm:$0xf0] }
 0x2f0   : > { %v3486_v14 = vpop.f32.mrf.mxu2 }
 0x2f1   : > { %v3487_v26 = vadd.f32 %v3486_v14, %v11781_v5  ;;  %v3515_v11 = vpop.f32.mrf.mxu3  ;;  %4946 = vrot.lane.b32.xlu0 %v12895_v53, %s14737_s20  ;;  %v9603_v5 = vld [vmem:[%s14720_s9 + $0x8] sm:$0xff] }
 0x2f2   : > { %4940 = vrot.lane.b32.xlu2 %v12973_v48, %s14748_s22  ;;  %4639 = vmatpush.bf16.msra.mxu3 %v4506_v6 }
 0x2f3   : > { %v3516_v36 = vadd.f32 %v3515_v11, %v3487_v26  ;;  %4938 = vrot.lane.b32.xlu1 %v12893_v35, %s14748_s22  ;;  %v14772_v11 = vld [vmem:[#allocation35_spill] sm:$0xff] }
 0x2f4   : > { %v13076_v62 = vpop.permute.xlu0 %4528  ;;  %v13078_v12 = vpop.permute.xlu2 %4564  ;;  %v4519_v6 = vsel %vm3688_vm8, %v13063_v13, %v14772_v11 }
 0x2f5   : > { %3550 = vst [vmem:[%s11744_s28 + $0x88] sm:$0xff] %v3516_v36  ;;  %v4551_v21 = vpop.permute.xlu1 %4550  ;;  %v4531_v50 = vsel %vm3701_vm7, %v12959_v28, %v13076_v62  ;;  %v14773_v62 = vld [vmem:[#allocation32_spill] sm:$0xff] }
 0x2f6   : > { %v4555_v39 = vsel %vm3727_vm4, %v4551_v21, %v13001_v24  ;;  %4640 = vmatpush.bf16.msra.mxu3 %v4495_v31  ;;  %v4494_v24 = vsel %vm3662_vm2, %v12830_v41, %v12835_v54  ;;  %v8823_v31 = vld [vmem:[%s14718_s7 + $0x18] sm:$0xf] }
 0x2f7   : > { %4657 = vmatpush.bf16.msra.mxu0 %v4555_v39  ;;  %v9632_v39 = vld [vmem:[%s14718_s7 + $0x20] sm:$0xf0] }
 0x2f8   : > { %v3489_v57 = vpop.f32.mrf.mxu2  ;;  %8712 = vmatmul.msk.bf16.gmra.mxu1 %vm3807_vm9, %v9603_v5 }
 0x2f9   : > { %v3490_v63 = vadd.f32 %v3489_v57, %v11858_v61  ;;  %v3518_v37 = vpop.f32.mrf.mxu3  ;;  %4952 = vrot.lane.b32.xlu0 %v12973_v48, %s14737_s20 }
 0x2fa   : > { %4950 = vrot.lane.b32.xlu2 %v12893_v35, %s14737_s20  ;;  %4641 = vmatpush.bf16.msra.mxu3 %v4494_v24  ;;  %v14776_v24 = vld [vmem:[#allocation23_spill] sm:$0xff] }
 0x2fb   : > { %v3519_v33 = vadd.f32 %v3518_v37, %v3490_v63  ;;  %4948 = vrot.lane.b32.xlu1 %v12920_v25, %s14737_s20  ;;  %v14775_v63 = vld [vmem:[#allocation28_spill] sm:$0xff]  ;;  %v8824_v37 = vor.u32 %v9632_v39, %v8823_v31 }
 0x2fc   : > { %v4541_v17 = vpop.permute.xlu0 %4540  ;;  %v13105_v22 = vpop.permute.xlu2 %4589 }
 0x2fd   : > { %3559 = vst [vmem:[%s11744_s28 + $0xd0] sm:$0xff] %v3519_v33  ;;  %v4549_v61 = vpop.permute.xlu1 %4548  ;;  %4258 = vmatmul.bf16.gmra.mxu3 %v8758_v44  ;;  %v4543_v40 = vsel %vm3714_vm5, %v13027_v1, %v4541_v17  ;;  %v14777_v33 = vld [vmem:[#allocation24_spill] sm:$0xff] }
 0x2fe   : > { %4642 = vmatpush.bf16.msra.mxu3 %v4483_v47  ;;  %v4554_v41 = vsel %vm3727_vm4, %v12999_v56, %v4549_v61  ;;  %v9659_v47 = vld [vmem:[#allocation2 + $0x84] sm:$0xf0] }
 0x2ff   : > { %4658 = vmatpush.bf16.msra.mxu0 %v4554_v41 }
 0x300   : > { %v3491_v54 = vpop.f32.mrf.mxu2 }
 0x301   : > { %v3492_v15 = vadd.f32 %v3491_v54, %v11775_v59  ;;  %v3520_v8 = vpop.f32.mrf.mxu3  ;;  %4962 = vrot.lane.b32.xlu0 %v12893_v35, %s9772_s29  ;;  %v8791_v59 = vld [vmem:[#allocation2 + $0x58] sm:$0xf]  ;;  %v8943_v54 = vld [vmem:[#allocation2 + $0x60] sm:$0xf] }
 0x302   : > { %4960 = vrot.lane.b32.xlu2 %v12920_v25, %s9772_s29  ;;  %4643 = vmatpush.bf16.msra.mxu3 %v4482_v10  ;;  %v8792_v23 = vor.u32 %v9623_v52, %v8791_v59  ;;  %v9630_v59 = vld [vmem:[%s14718_s7 + $0x10] sm:$0xf0] }
 0x303   : > { %v3521_v56 = vadd.f32 %v3520_v8, %v3492_v15  ;;  %4958 = vrot.lane.b32.xlu1 %v12895_v53, %s9772_s29  ;;  %4659 = vmatpush.bf16.msra.mxu0 %v4543_v40  ;;  %v13205_v15 = vor.u32 %v9659_v47, %v8943_v54  ;;  %v9658_v8 = vld [vmem:[#allocation2 + $0x64] sm:$0xf] }
 0x304   : > { %v4559_v45 = vpop.permute.xlu0 %4558  ;;  %v13125_v20 = vpop.permute.xlu2 %4719 }
 0x305   : > { %3568 = vst [vmem:[%s11744_s28 + $0x118] sm:$0xff] %v3521_v56  ;;  %v4535_v30 = vpop.permute.xlu1 %4534  ;;  %v8819_v56 = vld [vmem:[%s14718_s7 + $0x8] sm:$0xf] }
 0x306   : > { %4644 = vmatpush.bf16.msra.mxu3 %v8792_v23  ;;  %v4542_v1 = vsel %vm3714_vm5, %v4535_v30, %v13059_v49 }
 0x307   : > { %4660 = vmatpush.bf16.msra.mxu0 %v4542_v1  ;;  %v8820_v1 = vor.u32 %v9630_v59, %v8819_v56  ;;  %v9638_v59 = vld [vmem:[#allocation2 + $0x30] sm:$0xf0] }
 0x308   : > { %v3494_v46 = vpop.f32.mrf.mxu2  ;;  %8713 = vmatmul.msk.bf16.gmra.mxu1 %vm3807_vm9, %v9604_v0  ;;  %v8825_v0 = vld [vmem:[%s14718_s7 + $0x24] sm:$0xf0] }
 0x309   : > { %v3495_v58 = vadd.f32 %v3494_v46, %v12002_v42  ;;  %v3523_v38 = vpop.f32.mrf.mxu3  ;;  %4972 = vrot.lane.b32.xlu0 %v12920_v25, %s9773_s15 }
 0x30a   : > { %4970 = vrot.lane.b32.xlu2 %v12895_v53, %s9773_s15  ;;  %4645 = vmatpush.bf16.msra.mxu3 %v8788_v55  ;;  %v4530_v53 = vsel %vm3701_vm7, %v12957_v3, %v12939_v2  ;;  %v9656_v55 = vld [vmem:[#allocation2 + $0x14] sm:$0xf] }
 0x30b   : > { %v3524_v29 = vadd.f32 %v3523_v38, %v3495_v58  ;;  %4964 = vrot.lane.b32.xlu1 %v12973_v48, %s9772_s29  ;;  %4661 = vmatpush.bf16.msra.mxu0 %v4531_v50  ;;  %v13235_v58 = vor.u32 %v9656_v55, %v8937_v19  ;;  %v8935_v38 = vld [vmem:[#allocation2 + $0x10] sm:$0xf]  ;;  %v4002_v19 = vld [vmem:[%s11744_s28] sm:$0xff] }
 0x30c   : > { %v4561_v49 = vpop.permute.xlu0 %4560  ;;  %v13150_v42 = vpop.permute.xlu2 %4734 }
 0x30d   : > { %3577 = vst [vmem:[%s11744_s28 + $0x160] sm:$0xff] %v3524_v29  ;;  %v4563_v9 = vpop.permute.xlu1 %4562  ;;  %4646 = vmatmul.bf16.vlgmr.msra.gmra.mxu3 %v8812_v18  ;;  %v4566_v2 = vsel %vm3740_vm6, %v4559_v45, %v4561_v49  ;;  %v13238_v18 = vor.u32 %v9657_v60, %v8935_v38 }
 0x30e   : > { %v4567_v25 = vsel %vm3740_vm6, %v4563_v9, %v13078_v12  ;;  %v14774_v12 = vld [vmem:[#allocation25_spill] sm:$0xff]  ;;  %v8831_v9 = vld [vmem:[%s14718_s7 + $0x20] sm:$0xf] }
 0x30f   : > { %4662 = vmatpush.bf16.msra.mxu0 %v4530_v53  ;;  %4682 = vmatpush.bf16.msrb.mxu1 %v4567_v25  ;;  %v4518_v5 = vsel %vm3688_vm8, %v14774_v12, %v14773_v62  ;;  %v9633_v25 = vld [vmem:[%s14718_s7 + $0x28] sm:$0xf0] }
 0x310   : > { %v3496_v28 = vpop.f32.mrf.mxu2 }
 0x311   : > { %v3497_v14 = vadd.f32 %v3496_v28, %v12051_v16  ;;  %v3525_v26 = vpop.f32.mrf.mxu3  ;;  %4996 = vperm.xlu0 %9753, %v12794_v4   ;;  %v9628_v16 = vld [vmem:[%s14718_s7 + $0x4] sm:$0xf]  ;;  %v8813_v4 = vld [vmem:[%s14718_s7 + $0xc] sm:$0xf0] }
 0x312   : > { %4976 = vrot.lane.b32.xlu2 %v12973_v48, %s9773_s15  ;;  %v8816_v21 = vor.u32 %v9628_v16, %v8813_v4 }
 0x313   : > { %v3526_v36 = vadd.f32 %v3525_v26, %v3497_v14  ;;  %4974 = vrot.lane.b32.xlu1 %v12893_v35, %s9773_s15  ;;  %4663 = vmatpush.bf16.msra.mxu0 %v4519_v6  ;;  %v9605_v35 = vld [vmem:[%s14720_s9 + $0x18] sm:$0xff]  ;;  %v8832_v14 = vor.u32 %v9633_v25, %v8831_v9 }
 0x314   : > { %4683 = vmatpush.bf16.msrb.mxu1 %v4566_v2  ;;  %v13174_v3 = vpop.permute.xlu0 %4594  ;;  %v13176_v48 = vpop.permute.xlu2 %4749 }
 0x315   : > { %3586 = vst [vmem:[%s11744_s28 + $0x1a8] sm:$0xff] %v3526_v36  ;;  %v13182_v13 = vpop.permute.xlu1 %4584 }
 0x317   : > { %4664 = vmatpush.bf16.msra.mxu0 %v4518_v5 }
 0x318   : > { %v3499_v27 = vpop.f32.mrf.mxu2  ;;  %8714 = vmatmul.msk.bf16.gmra.mxu1 %vm3807_vm9, %v9605_v35 }
 0x319   : > { %v3500_v32 = vadd.f32 %v3499_v27, %v11877_v51  ;;  %v3528_v57 = vpop.f32.mrf.mxu3  ;;  %5011 = vperm.xlu0 %9753, %v14775_v63   ;;  %v8945_v51 = vld [vmem:[#allocation2 + $0x88] sm:$0xf0] }
 0x31a   : > { %4665 = vmatmul.bf16.vlgmr.msra.gmra.mxu0 %v8816_v21  ;;  %5006 = vperm.xlu2 %9755, %v14776_v24   ;;  %v13207_v52 = vor.u32 %v9658_v8, %v8945_v51  ;;  %v8861_v51 = vld [vmem:[#allocation2 + $0x5c] sm:$0xf] }
 0x31b   : > { %v3529_v44 = vadd.f32 %v3528_v57, %v3500_v32  ;;  %5001 = vperm.xlu1 %9754, %v14777_v33  }
 0x31c   : > { %v13198_v17 = vpop.permute.xlu0 %4724  ;;  %v13200_v61 = vpop.permute.xlu2 %4898 }
 0x31d   : > { %3595 = vst [vmem:[%s11744_s28 + $0x1f0] sm:$0xff] %v3529_v44  ;;  %v13203_v41 = vpop.permute.xlu1 %4599  ;;  %4651 = vmatmul.bf16.gmra.mxu3 %v8824_v37 }
 0x320   : > { %v3501_v10 = vpop.f32.mrf.mxu2 }
 0x321   : > { %v3502_v40 = vadd.f32 %v3501_v10, %v12055_v34  ;;  %5326 = vrot.lane.b32.xlu0 %v13205_v15, %s9768_s16  ;;  %v3530_v45 = vpop.f32.mrf.mxu3  ;;  %v9631_v34 = vld [vmem:[%s14718_s7 + $0x1c] sm:$0xf] }
 0x322   : > { %5376 = vrot.lane.b32.xlu2 %v13207_v52, %s9772_s29  ;;  %v8828_v46 = vor.u32 %v9631_v34, %v8825_v0  ;;  %v8881_v34 = vld [vmem:[%s14718_s7] sm:$0xf]  ;;  %v8857_v0 = vld [vmem:[#allocation2 + $0xc] sm:$0xf] }
 0x323   : > { %v3531_v23 = vadd.f32 %v3530_v45, %v3502_v40  ;;  %5374 = vrot.lane.b32.xlu1 %v13205_v15, %s9772_s29  ;;  %v14778_v45 = vld [vmem:[#allocation6_spill] sm:$0xff] }
 0x324   : > { %v13228_v30 = vpop.permute.xlu0 %4739  ;;  %v13230_v43 = vpop.permute.xlu2 %4888 }
 0x325   : > { %3604 = vst [vmem:[%s11744_s28 + $0x238] sm:$0xff] %v3531_v23  ;;  %v13233_v7 = vpop.permute.xlu1 %4729 }
 0x328   : > { %8833 = vmatmul.msk.bf16.vlgmr.msrb.gmra.mxu1 %vm3807_vm9, %v8820_v1  ;;  %v8858_v1 = vor.u32 %v9638_v59, %v8857_v0 }
 0x329   : > { %5372 = vrot.lane.b32.xlu0 %v13235_v58, %s9772_s29 }
 0x32a   : > { %4670 = vmatmul.bf16.gmra.mxu0 %v8828_v46  ;;  %5370 = vrot.lane.b32.xlu2 %v13238_v18, %s9772_s29 }
 0x32b   : > { %5328 = vrot.lane.b32.xlu1 %v13207_v52, %s9768_s16 }
 0x32c   : > { %v13246_v50 = vpop.permute.xlu0 %4754  ;;  %v4915_v29 = vpop.permute.xlu2 %4914 }
 0x32d   : > { %v13248_v49 = vpop.permute.xlu1 %4744 }
 0x331   : > { %5362 = vrot.lane.b32.xlu0 %v13205_v15, %s14737_s20 }
 0x332   : > { %5324 = vrot.lane.b32.xlu2 %v13235_v58, %s9768_s16 }
 0x333   : > { %5322 = vrot.lane.b32.xlu1 %v13238_v18, %s9768_s16 }
 0x334   : > { %v4891_v53 = vpop.permute.xlu0 %4890  ;;  %v4905_v28 = vpop.permute.xlu2 %4904 }
 0x335   : > { %v4887_v26 = vpop.permute.xlu1 %4886 }
 0x336   : > { %v4894_v33 = vsel %vm3649_vm3, %v4887_v26, %v13230_v43 }
 0x338   : > { %8834 = vmatmul.msk.bf16.gmra.mxu1 %vm3807_vm9, %v8832_v14 }
 0x339   : > { %5316 = vrot.lane.b32.xlu0 %v13207_v52, %s9767_s27 }
 0x33a   : > { %5314 = vrot.lane.b32.xlu2 %v13205_v15, %s9767_s27 }
 0x33b   : > { %5364 = vrot.lane.b32.xlu1 %v13207_v52, %s14737_s20 }
 0x33c   : > { %v4901_v11 = vpop.permute.xlu0 %4900  ;;  %v13269_v6 = vpop.permute.xlu2 %4924 }
 0x33d   : > { %v4903_v36 = vpop.permute.xlu1 %4902  ;;  %v4906_v57 = vsel %vm3662_vm2, %v13200_v61, %v4901_v11  ;;  %v9639_v61 = vld [vmem:[#allocation2 + $0x80] sm:$0xf0] }
 0x33e   : > { %v4907_v32 = vsel %vm3662_vm2, %v4903_v36, %v4905_v28  ;;  %v8862_v10 = vor.u32 %v9639_v61, %v8861_v51  ;;  %v4003_v36 = vld [vmem:[%s11744_s28 + $0x48] sm:$0xff]  ;;  %v4004_v51 = vld [vmem:[%s11744_s28 + $0x90] sm:$0xff] }
 0x341   : > { %5310 = vrot.lane.b32.xlu0 %v13238_v18, %s9767_s27 }
 0x342   : > { %5360 = vrot.lane.b32.xlu2 %v13235_v58, %s14737_s20 }
 0x343   : > { %5358 = vrot.lane.b32.xlu1 %v13238_v18, %s14737_s20 }
 0x344   : > { %v4911_v2 = vpop.permute.xlu0 %4910  ;;  %v13277_v16 = vpop.permute.xlu2 %4934 }
 0x345   : > { %v4913_v4 = vpop.permute.xlu1 %4912 }
 0x346   : > { %v4918_v21 = vsel %vm3675_vm1, %v4911_v2, %v4913_v4  ;;  %v14780_v2 = vld [vmem:[#allocation27_spill] sm:$0xff] }
 0x349   : > { %5352 = vrot.lane.b32.xlu0 %v13207_v52, %s14748_s22 }
 0x34a   : > { %5350 = vrot.lane.b32.xlu2 %v13205_v15, %s14748_s22 }
 0x34b   : > { %5312 = vrot.lane.b32.xlu1 %v13235_v58, %s9767_s27 }
 0x34c   : > { %v4917_v35 = vpop.permute.xlu0 %4916  ;;  %v13285_v62 = vpop.permute.xlu2 %4940 }
 0x34d   : > { %v4919_v12 = vsel %vm3675_vm1, %v4915_v29, %v4917_v35  ;;  %v4893_v5 = vpop.permute.xlu1 %4892 }
 0x34e   : > { %5050 = vmatpush.bf16.msrb.mxu0 %v4919_v12  ;;  %v4895_v44 = vsel %vm3649_vm3, %v4891_v53, %v4893_v5  ;;  %v14779_v53 = vld [vmem:[#allocation3_spill] sm:$0xff] }
 0x351   : > { %5346 = vrot.lane.b32.xlu0 %v13238_v18, %s14748_s22 }
 0x352   : > { %5304 = vrot.lane.b32.xlu2 %v13207_v52, %s9766_s26  ;;  %5051 = vmatpush.bf16.msrb.mxu0 %v4918_v21 }
 0x353   : > { %5302 = vrot.lane.b32.xlu1 %v13205_v15, %s9766_s26 }
 0x354   : > { %v13295_v31 = vpop.permute.xlu0 %4926  ;;  %v13297_v39 = vpop.permute.xlu2 %4950 }
 0x355   : > { %v13299_v27 = vpop.permute.xlu1 %4922 }
 0x356   : > { %5052 = vmatpush.bf16.msrb.mxu0 %v4907_v32  ;;  %v14781_v32 = vld [vmem:[#allocation7_spill] sm:$0xff] }
 0x359   : > { %5300 = vrot.lane.b32.xlu0 %v13235_v58, %s9766_s26  ;;  %v13323_v47 = vpop.f32.mrf.mxu2 }
 0x35a   : > { %5298 = vrot.lane.b32.xlu2 %v13238_v18, %s9766_s26  ;;  %5053 = vmatpush.bf16.msrb.mxu0 %v4906_v57 }
 0x35b   : > { %5348 = vrot.lane.b32.xlu1 %v13235_v58, %s14748_s22  ;;  %v13343_v46 = vpop.f32.mrf.mxu0 }
 0x35c   : > { %v13310_v63 = vpop.permute.xlu0 %4936  ;;  %v13312_v37 = vpop.permute.xlu2 %4960 }
 0x35d   : > { %v13314_v24 = vpop.permute.xlu1 %4928 }
 0x35e   : > { %5054 = vmatpush.bf16.msrb.mxu0 %v4895_v44  ;;  %v8893_v44 = vld [vmem:[%s14718_s7 + $0x18] sm:$0xf] }
 0x361   : > { %5386 = vrot.lane.b32.xlu0 %v13205_v15, %s9773_s15  ;;  %v4237_v14 = vpop.f32.mrf.mxu2 }
 0x362   : > { %5340 = vrot.lane.b32.xlu2 %v13207_v52, %s9769_s23  ;;  %5055 = vmatpush.bf16.msrb.mxu0 %v4894_v33 }
 0x363   : > { %5338 = vrot.lane.b32.xlu1 %v13205_v15, %s9769_s23  ;;  %v9645_v15 = vld [vmem:[%s14718_s7 + $0x8] sm:$0xf0]  ;;  %v13363_v4 = vpop.f32.mrf.mxu0 }
 0x364   : > { %v13327_v54 = vpop.permute.xlu0 %4946  ;;  %v13329_v8 = vpop.permute.xlu2 %4970  ;;  %v8882_v60 = vor.u32 %v9645_v15, %v8881_v34 }
 0x365   : > { %v13331_v40 = vpop.permute.xlu1 %4938  ;;  %v3974_v56 = vpop.f32.mrf.mxu1 }
 0x366   : > { %v3975_v23 = vadd.f32 %v3974_v56, %v14778_v45  ;;  %5056 = vmatpush.bf16.msrb.mxu0 %v8862_v10  ;;  %v14782_v10 = vld [vmem:[#allocation30_spill] sm:$0xff]  ;;  %v14783_v45 = vld [vmem:[#allocation31_spill] sm:$0xff] }
 0x368   : > { %v3994_v43 = vmax.f32 %v3975_v23, 0.0  ;;  %v14784_v23 = vld [vmem:[#allocation26_spill] sm:$0xff] }
 0x369   : > { %5336 = vrot.lane.b32.xlu0 %v13235_v58, %s9769_s23  ;;  %v4240_v61 = vpop.f32.mrf.mxu2 }
 0x36a   : > { %v4010_v55 = vadd.f32 %v4002_v19, %v3994_v43  ;;  %5334 = vrot.lane.b32.xlu2 %v13238_v18, %s9769_s23  ;;  %5057 = vmatpush.bf16.msrb.mxu0 %v8858_v1  ;;  %v14785_v19 = vld [vmem:[#allocation8_spill] sm:$0xff] }
 0x36b   : > { %5388 = vrot.lane.b32.xlu1 %v13207_v52, %s9773_s15 }
 0x36c   : > { %4018 = vst [vmem:[%s11744_s28] sm:$0xff] %v4010_v55  ;;  %v4953_v38 = vpop.permute.xlu0 %4952  ;;  %v13350_v29 = vpop.permute.xlu2 %4976 }
 0x36d   : > { %v13352_v9 = vpop.permute.xlu1 %4948  ;;  %5058 = vmatmul.bf16.vlgmr.msrb.gmra.mxu0 %v8882_v60  ;;  %v3976_v25 = vpop.f32.mrf.mxu1 }
 0x36e   : > { %v3977_v28 = vadd.f32 %v3976_v25, %v14779_v53  ;;  %v4278_v55 = vpop.f32.mrf.mxu0 }
 0x370   : > { %v3995_v26 = vmax.f32 %v3977_v28, 0.0  ;;  %v13355_v11 = vpop.f32.mrf.mxu3  ;;  %v4005_v28 = vld [vmem:[%s11744_s28 + $0xd8] sm:$0xff] }
 0x371   : > { %5131 = vperm.xlu0 %9753, %v14780_v2   ;;  %v14787_v2 = vld [vmem:[#allocation34_spill] sm:$0xff] }
 0x372   : > { %v4011_v52 = vadd.f32 %v4003_v36, %v3995_v26  ;;  %5384 = vrot.lane.b32.xlu2 %v13235_v58, %s9773_s15  ;;  %v9648_v58 = vld [vmem:[%s14718_s7 + $0x20] sm:$0xf0]  ;;  %v14786_v26 = vld [vmem:[#allocation33_spill] sm:$0xff] }
 0x373   : > { %5382 = vrot.lane.b32.xlu1 %v13238_v18, %s9773_s15  ;;  %v8894_v56 = vor.u32 %v9648_v58, %v8893_v44  ;;  %v14789_v44 = vld [vmem:[#allocation29_spill] sm:$0xff] }
 0x374   : > { %4019 = vst [vmem:[%s11744_s28 + $0x48] sm:$0xff] %v4011_v52  ;;  %v4963_v35 = vpop.permute.xlu0 %4962  ;;  %v13366_v12 = vpop.permute.xlu2 %5006 }
 0x375   : > { %v4959_v5 = vpop.permute.xlu1 %4958  ;;  %v3979_v21 = vpop.f32.mrf.mxu1 }
 0x376   : > { %v3980_v57 = vadd.f32 %v3979_v21, %v14781_v32  ;;  %v4966_v52 = vsel %vm3727_vm4, %v4959_v5, %v13312_v37  ;;  %v14788_v21 = vld [vmem:[#allocation16_spill] sm:$0xff]  ;;  %v4955_v37 = vsel %vm3714_vm5, %v13297_v39, %v4953_v38  ;;  %v5128_v38 = vld [vmem:[%s14721_s10 + $0x38] sm:$0xff] }
 0x377   : > { %v4241_v32 = vadd.f32 %v4240_v61, %v14788_v21  ;;  %v13405_v5 = vld [vmem:[%s14719_s8 + $0x8] sm:$0xff]  ;;  %v14792_v61 = vld [vmem:[#allocation11_spill] sm:$0xff] }
 0x378   : > { %v3996_v18 = vmax.f32 %v3980_v57, 0.0  ;;  %v4256_v33 = vpop.f32.mrf.mxu3  ;;  %v4242_v57 = vpop.f32.mrf.mxu2 }
 0x379   : > { %5146 = vperm.xlu0 %9753, %v14782_v10  }
 0x37a   : > { %v4012_v59 = vadd.f32 %v4004_v51, %v3996_v18  ;;  %5141 = vperm.xlu2 %9755, %v14783_v45   ;;  %v14790_v18 = vld [vmem:[#allocation14_spill] sm:$0xff]  ;;  %v14791_v45 = vld [vmem:[#allocation4_spill] sm:$0xff] }
 0x37b   : > { %5136 = vperm.xlu1 %9754, %v14784_v23   ;;  %v4238_v51 = vadd.f32 %v4237_v14, %v14790_v18 }
 0x37c   : > { %4020 = vst [vmem:[%s11744_s28 + $0x90] sm:$0xff] %v4012_v59  ;;  %v13380_v34 = vpop.permute.xlu0 %4972  ;;  %v13382_v15 = vpop.permute.xlu2 %5376 }
 0x37d   : > { %v4965_v0 = vpop.permute.xlu1 %4964  ;;  %5063 = vmatmul.bf16.gmra.mxu0 %v8894_v56  ;;  %v3981_v43 = vpop.f32.mrf.mxu1  ;;  %v4257_v14 = vadd.f32 %v4256_v33, %v4238_v51  ;;  %v14794_v51 = vld [vmem:[#allocation9_spill] sm:$0xff] }
 0x37e   : > { %v4967_v1 = vsel %vm3727_vm4, %v4963_v35, %v4965_v0  ;;  %v3982_v60 = vadd.f32 %v3981_v43, %v14785_v19  ;;  %v4236_v0 = vadd.f32 %v13323_v47, %v14792_v61  ;;  %v14793_v43 = vld [vmem:[#allocation12_spill] sm:$0xff]  ;;  %v13413_v19 = vld [vmem:[%s14719_s8] sm:$0xff]  ;;  %v4942_v61 = vsel %vm3701_vm7, %v13277_v16, %v13310_v63  ;;  %v14795_v16 = vld [vmem:[#allocation10_spill] sm:$0xff] }
 0x37f   : > { %5069 = vmatpush.bf16.msra.mxu1 %v4967_v1  ;;  %v4243_v1 = vadd.f32 %v4242_v57, %v14793_v43 }
 0x380   : > { %v3997_v25 = vmax.f32 %v3982_v60, 0.0  ;;  %v4259_v53 = vpop.f32.mrf.mxu3 }
 0x381   : > { %5161 = vperm.xlu0 %9753, %v14786_v26   ;;  %v4260_v10 = vadd.f32 %v4259_v53, %v4241_v32  ;;  %v4255_v53 = vadd.f32 %v13355_v11, %v4236_v0 }
 0x382   : > { %v4013_v36 = vadd.f32 %v4005_v28, %v3997_v25  ;;  %5156 = vperm.xlu2 %9755, %v14787_v2   ;;  %v4280_v25 = vpop.f32.mrf.mxu0  ;;  %v4006_v28 = vld [vmem:[%s11744_s28 + $0x120] sm:$0xff]  ;;  %v4276_v2 = vadd.f32 %v13363_v4, %v4257_v14 }
 0x383   : > { %5151 = vperm.xlu1 %9754, %v14789_v44   ;;  %5070 = vmatpush.bf16.msra.mxu1 %v4966_v52  ;;  %v4279_v47 = vadd.f32 %v4278_v55, %v4260_v10  ;;  %v4274_v55 = vadd.f32 %v13343_v46, %v4255_v53  ;;  %v5533_v4 = vld [vmem:[%s14721_s10] sm:$0xff]  ;;  %v13444_v46 = vld [vmem:[%s14719_s8 + $0x18] sm:$0xff] }
 0x384   : > { %4021 = vst [vmem:[%s11744_s28 + $0xd8] sm:$0xff] %v4013_v36  ;;  %v13394_v35 = vpop.permute.xlu0 %4996  ;;  %v13396_v58 = vpop.permute.xlu2 %5370  ;;  %v4954_v36 = vsel %vm3714_vm5, %v13327_v54, %v13352_v9  ;;  %v4943_v9 = vsel %vm3701_vm7, %v13331_v40, %v13285_v62  ;;  %v4284_v10 = vmax.f32 %v4276_v2, 0.0  ;;  %v4007_v40 = vld [vmem:[%s11744_s28 + $0x168] sm:$0xff]  ;;  %v9618_v14 = vld [vmem:[%s14720_s9] sm:$0xff]  ;;  %v5536_v53 = vld [vmem:[%s14721_s10 + $0x18] sm:$0xff] }
 0x385   : > { %v4975_v56 = vpop.permute.xlu1 %4974  ;;  %v3984_v59 = vpop.f32.mrf.mxu1  ;;  %v4285_v32 = vmax.f32 %v4279_v47, 0.0  ;;  %v4283_v62 = vmax.f32 %v4274_v55, 0.0 }
 0x386   : > { %v3985_v23 = vadd.f32 %v3984_v59, %v14791_v45 }
 0x387   : > { %5071 = vmatpush.bf16.msra.mxu1 %v4955_v37  ;;  %v4295_v0 = vpack.c.bf16 %v4284_v10, %v4283_v62 }
 0x388   : > { %v3998_v60 = vmax.f32 %v3985_v23, 0.0  ;;  %v4261_v39 = vpop.f32.mrf.mxu3  ;;  %v13449_v23 = vld [vmem:[%s14719_s8 + $0x10] sm:$0xff] }
 0x389   : > { %v4262_v26 = vadd.f32 %v4261_v39, %v4243_v1  ;;  %5413 = vperm.xlu0 %9753, %v13405_v5  }
 0x38a   : > { %v4014_v33 = vadd.f32 %v4006_v28, %v3998_v60  ;;  %5408 = vperm.xlu2 %9755, %v13413_v19   ;;  %v4979_v60 = vsel %vm3740_vm6, %v4975_v56, %v13350_v29  ;;  %v5535_v29 = vld [vmem:[%s14721_s10 + $0x10] sm:$0xff]  ;;  %v9644_v56 = vld [vmem:[%s14718_s7 + $0x4] sm:$0xf]  ;;  %v5534_v28 = vld [vmem:[%s14721_s10 + $0x8] sm:$0xff] }
 0x38b   : > { %5166 = vperm.xlu1 %9754, %v5128_v38   ;;  %v4281_v52 = vadd.f32 %v4280_v25, %v4262_v26  ;;  %5072 = vmatpush.bf16.msra.mxu1 %v4954_v36  ;;  %v4931_v25 = vsel %vm3688_vm8, %v13295_v31, %v13314_v24  ;;  %v8883_v31 = vld [vmem:[%s14718_s7 + $0xc] sm:$0xf0]  ;;  %v4978_v36 = vsel %vm3740_vm6, %v13329_v8, %v13380_v34 }
 0x38c   : > { %4022 = vst [vmem:[%s11744_s28 + $0x120] sm:$0xff] %v4014_v33  ;;  %v13427_v21 = vpop.permute.xlu0 %5011  ;;  %v13429_v11 = vpop.permute.xlu2 %5324  ;;  %v4008_v26 = vld [vmem:[%s11744_s28 + $0x1b0] sm:$0xff]  ;;  %v8886_v55 = vor.u32 %v9644_v56, %v8883_v31  ;;  %v9647_v56 = vld [vmem:[%s14718_s7 + $0x1c] sm:$0xf]  ;;  %v8895_v31 = vld [vmem:[%s14718_s7 + $0x24] sm:$0xf0] }
 0x38d   : > { %v4286_v57 = vmax.f32 %v4281_v52, 0.0  ;;  %v13432_v44 = vpop.permute.xlu1 %5001  ;;  %v3986_v18 = vpop.f32.mrf.mxu1  ;;  %v4930_v52 = vsel %vm3688_vm8, %v13299_v27, %v13269_v6  ;;  %v9015_v6 = vld [vmem:[#allocation2 + $0x8c] sm:$0xf0] }
 0x38e   : > { %v3987_v54 = vadd.f32 %v3986_v18, %v14794_v51  ;;  %v9675_v51 = vld [vmem:[#allocation2 + $0x88] sm:$0xf0] }
 0x38f   : > { %v4296_v59 = vpack.c.bf16 %v4286_v57, %v4285_v32  ;;  %5073 = vmatpush.bf16.msra.mxu1 %v4943_v9  ;;  %v14796_v9 = vld [vmem:[#allocation5_spill] sm:$0xff] }
 0x390   : > { %v3999_v45 = vmax.f32 %v3987_v54, 0.0  ;;  %v13472_v47 = vpop.f32.mrf.mxu3 }
 0x391   : > { %4383 = vmatpush.bf16.msrb.mxu2 %v4296_v59  ;;  %5543 = vperm.xlu0 %9753, %v5533_v4   ;;  %v9013_v4 = vld [vmem:[#allocation2 + $0x64] sm:$0xf]  ;;  %v9674_v59 = vld [vmem:[#allocation2 + $0x68] sm:$0xf] }
 0x392   : > { %v4015_v37 = vadd.f32 %v4007_v40, %v3999_v45  ;;  %5423 = vperm.xlu2 %9755, %v13444_v46   ;;  %v13505_v10 = vor.u32 %v9675_v51, %v9013_v4  ;;  %v13507_v62 = vor.u32 %v9674_v59, %v9015_v6 }
 0x393   : > { %5418 = vperm.xlu1 %9754, %v13449_v23   ;;  %5074 = vmatpush.bf16.msra.mxu1 %v4942_v61 }
 0x394   : > { %4023 = vst [vmem:[%s11744_s28 + $0x168] sm:$0xff] %v4015_v37  ;;  %v5327_v43 = vpop.permute.xlu0 %5326  ;;  %v13458_v1 = vpop.permute.xlu2 %5314  ;;  %v4009_v37 = vld [vmem:[%s11744_s28 + $0x1f8] sm:$0xff] }
 0x395   : > { %v5375_v39 = vpop.permute.xlu1 %5374  ;;  %4384 = vmatpush.bf16.msrb.mxu2 %v4295_v0  ;;  %v3989_v38 = vpop.f32.mrf.mxu1 }
 0x396   : > { %v3990_v63 = vadd.f32 %v3989_v38, %v14795_v16  ;;  %v5379_v32 = vsel %vm3727_vm4, %v5375_v39, %v13382_v15  ;;  %v9673_v16 = vld [vmem:[#allocation2 + $0x38] sm:$0xf0] }
 0x397   : > { %5075 = vmatpush.bf16.msra.mxu1 %v4931_v25  ;;  %v13488_v33 = vpop.f32.mrf.mxu0  ;;  %v9672_v25 = vld [vmem:[#allocation2 + $0x18] sm:$0xf] }
 0x398   : > { %v4000_v24 = vmax.f32 %v3990_v63, 0.0  ;;  %8781 = vmatmul.msk.bf16.vlgmr.msrb.gmra.mxu2 %vm3807_vm9, %v9618_v14  ;;  %v4649_v40 = vpop.f32.mrf.mxu3  ;;  %v9619_v14 = vld [vmem:[%s14720_s9 + $0x8] sm:$0xff] }
 0x399   : > { %5094 = vmatpush.bf16.msra.mxu2 %v4979_v60  ;;  %5558 = vperm.xlu0 %9753, %v5536_v53   ;;  %v9007_v60 = vld [vmem:[#allocation2 + $0x3c] sm:$0xf0]  ;;  %v4650_v4 = vadd.f32 %v4649_v40, %v13105_v22 }
 0x39a   : > { %v4016_v2 = vadd.f32 %v4008_v26, %v4000_v24  ;;  %5553 = vperm.xlu2 %9755, %v5535_v29   ;;  %v13522_v53 = vor.u32 %v9672_v25, %v9007_v60  ;;  %v9005_v29 = vld [vmem:[#allocation2 + $0x14] sm:$0xf] }
 0x39b   : > { %5548 = vperm.xlu1 %9754, %v5534_v28   ;;  %5076 = vmatpush.bf16.msra.mxu1 %v4930_v52  ;;  %v13531_v24 = vor.u32 %v9673_v16, %v9005_v29 }
 0x39c   : > { %4024 = vst [vmem:[%s11744_s28 + $0x1b0] sm:$0xff] %v4016_v2  ;;  %v5373_v57 = vpop.permute.xlu0 %5372  ;;  %v13499_v18 = vpop.permute.xlu2 %5360 }
 0x39d   : > { %5095 = vmatpush.bf16.msra.mxu2 %v4978_v36  ;;  %v5329_v8 = vpop.permute.xlu1 %5328  ;;  %v3991_v34 = vpop.f32.mrf.mxu1  ;;  %v5378_v54 = vsel %vm3727_vm4, %v13396_v58, %v5373_v57 }
 0x39e   : > { %v5331_v27 = vsel %vm3675_vm1, %v5327_v43, %v5329_v8  ;;  %5077 = vmatmul.bf16.vlgmr.msra.gmra.mxu1 %v8886_v55  ;;  %v3992_v15 = vadd.f32 %v3991_v34, %v14796_v9 }
 0x39f   : > { %5462 = vmatpush.bf16.msrb.mxu1 %v5331_v27  ;;  %v4668_v61 = vpop.f32.mrf.mxu0 }
 0x3a0   : > { %v4001_v45 = vmax.f32 %v3992_v15, 0.0  ;;  %v4652_v28 = vpop.f32.mrf.mxu3 }
 0x3a1   : > { %5481 = vmatpush.bf16.msrb.mxu2 %v5379_v32  ;;  %5786 = vrot.lane.b32.xlu0 %v13505_v10, %s9772_s29  ;;  %v4653_v9 = vadd.f32 %v4652_v28, %v13174_v3  ;;  %v4648_v3 = vadd.f32 %v13472_v47, %v13182_v13 }
 0x3a2   : > { %v4017_v58 = vadd.f32 %v4009_v37, %v4001_v45  ;;  %5740 = vrot.lane.b32.xlu2 %v13507_v62, %s9768_s16 }
 0x3a3   : > { %5738 = vrot.lane.b32.xlu1 %v13505_v10, %s9768_s16 }
 0x3a4   : > { %4025 = vst [vmem:[%s11744_s28 + $0x1f8] sm:$0xff] %v4017_v58  ;;  %v5363_v0 = vpop.permute.xlu0 %5362  ;;  %v5351_v43 = vpop.permute.xlu2 %5350 }
 0x3a5   : > { %5482 = vmatpush.bf16.msrb.mxu2 %v5378_v54  ;;  %v5323_v39 = vpop.permute.xlu1 %5322  ;;  %v4685_v38 = vpop.f32.mrf.mxu1 }
 0x3a6   : > { %v5330_v63 = vsel %vm3675_vm1, %v5323_v39, %v13429_v11  ;;  %v8898_v11 = vor.u32 %v9647_v56, %v8895_v31 }
 0x3a7   : > { %5463 = vmatpush.bf16.msrb.mxu1 %v5330_v63  ;;  %v4671_v57 = vpop.f32.mrf.mxu0 }
 0x3a8   : > { %8782 = vmatmul.msk.bf16.gmra.mxu2 %vm3807_vm9, %v9619_v14  ;;  %v4654_v27 = vpop.f32.mrf.mxu3  ;;  %v4672_v59 = vadd.f32 %v4671_v57, %v4653_v9  ;;  %v8927_v9 = vld [vmem:[#allocation2 + $0x10] sm:$0xf] }
 0x3a9   : > { %5736 = vrot.lane.b32.xlu0 %v13522_v53, %s9768_s16  ;;  %v4655_v45 = vadd.f32 %v4654_v27, %v13203_v41  ;;  %v4667_v41 = vadd.f32 %v13488_v33, %v4648_v3  ;;  %v9661_v27 = vld [vmem:[%s14718_s7 + $0x8] sm:$0xf0] }
 0x3aa   : > { %5734 = vrot.lane.b32.xlu2 %v13531_v24, %s9768_s16 }
 0x3ab   : > { %5788 = vrot.lane.b32.xlu1 %v13507_v62, %s9772_s29  ;;  %v4686_v25 = vadd.f32 %v4685_v38, %v4667_v41  ;;  %v9621_v38 = vld [vmem:[%s14720_s9 + $0x18] sm:$0xff]  ;;  %v8901_v41 = vld [vmem:[%s14718_s7 + $0x20] sm:$0xf] }
 0x3ac   : > { %v5317_v26 = vpop.permute.xlu0 %5316  ;;  %v5305_v36 = vpop.permute.xlu2 %5304 }
 0x3ad   : > { %v5365_v2 = vpop.permute.xlu1 %5364  ;;  %v4687_v52 = vpop.f32.mrf.mxu1  ;;  %v5319_v55 = vsel %vm3662_vm2, %v13458_v1, %v5317_v26  ;;  %v9620_v1 = vld [vmem:[%s14720_s9 + $0x10] sm:$0xff]  ;;  %v4695_v33 = vmax.f32 %v4686_v25, 0.0  ;;  %v9634_v26 = vld [vmem:[%s14720_s9] sm:$0xff] }
 0x3ae   : > { %5082 = vmatmul.bf16.gmra.mxu1 %v8898_v11  ;;  %v5367_v32 = vsel %vm3714_vm5, %v5363_v0, %v5365_v2 }
 0x3af   : > { %5464 = vmatpush.bf16.msrb.mxu1 %v5319_v55  ;;  %5483 = vmatpush.bf16.msrb.mxu2 %v5367_v32  ;;  %v4673_v15 = vpop.f32.mrf.mxu0  ;;  %v9655_v32 = vld [vmem:[#allocation2 + $0x84] sm:$0xf0] }
 0x3b0   : > { %v4674_v37 = vadd.f32 %v4673_v15, %v4655_v45 }
 0x3b1   : > { %5726 = vrot.lane.b32.xlu0 %v13505_v10, %s9767_s27 }
 0x3b2   : > { %5784 = vrot.lane.b32.xlu2 %v13522_v53, %s9772_s29 }
 0x3b3   : > { %5782 = vrot.lane.b32.xlu1 %v13531_v24, %s9772_s29 }
 0x3b4   : > { %v5311_v51 = vpop.permute.xlu0 %5310  ;;  %v5299_v8 = vpop.permute.xlu2 %5298 }
 0x3b5   : > { %v5359_v34 = vpop.permute.xlu1 %5358  ;;  %v4690_v54 = vpop.f32.mrf.mxu1 }
 0x3b6   : > { %v5366_v6 = vsel %vm3714_vm5, %v5359_v34, %v13499_v18  ;;  %v4669_v18 = vadd.f32 %v4668_v61, %v4650_v4  ;;  %v4691_v58 = vadd.f32 %v4690_v54, %v4672_v59  ;;  %v9654_v34 = vld [vmem:[#allocation2 + $0x34] sm:$0xf0]  ;;  %v8889_v54 = vld [vmem:[%s14718_s7 + $0x8] sm:$0xf] }
 0x3b7   : > { %5484 = vmatpush.bf16.msrb.mxu2 %v5366_v6  ;;  %v9646_v6 = vld [vmem:[%s14718_s7 + $0x10] sm:$0xf0]  ;;  %v8928_v59 = vor.u32 %v9654_v34, %v8927_v9  ;;  %v9688_v34 = vld [vmem:[#allocation2 + $0x1c] sm:$0xf] }
 0x3b8   : > { %8783 = vmatmul.msk.bf16.gmra.mxu2 %vm3807_vm9, %v9620_v1  ;;  %v4688_v40 = vadd.f32 %v4687_v52, %v4669_v18  ;;  %v4697_v29 = vmax.f32 %v4691_v58, 0.0  ;;  %v8890_v45 = vor.u32 %v9646_v6, %v8889_v54  ;;  %v9635_v58 = vld [vmem:[%s14720_s9 + $0x8] sm:$0xff]  ;;  %v9075_v6 = vld [vmem:[#allocation2 + $0x18] sm:$0xf] }
 0x3b9   : > { %5776 = vrot.lane.b32.xlu0 %v13507_v62, %s14737_s20 }
 0x3ba   : > { %5774 = vrot.lane.b32.xlu2 %v13505_v10, %s14737_s20  ;;  %v4696_v47 = vmax.f32 %v4688_v40, 0.0  ;;  %v9649_v40 = vld [vmem:[%s14718_s7 + $0x28] sm:$0xf0] }
 0x3bb   : > { %5728 = vrot.lane.b32.xlu1 %v13507_v62, %s9767_s27 }
 0x3bc   : > { %v5353_v0 = vpop.permute.xlu0 %5352  ;;  %v5341_v14 = vpop.permute.xlu2 %5340  ;;  %v4707_v28 = vpack.c.bf16 %v4696_v47, %v4695_v33 }
 0x3bd   : > { %v5313_v60 = vpop.permute.xlu1 %5312  ;;  %v4692_v39 = vpop.f32.mrf.mxu1  ;;  %v5355_v22 = vsel %vm3701_vm7, %v5351_v43, %v5353_v0 }
 0x3be   : > { %v4693_v16 = vadd.f32 %v4692_v39, %v4674_v37  ;;  %v5318_v63 = vsel %vm3662_vm2, %v5311_v51, %v5313_v60  ;;  %5485 = vmatpush.bf16.msrb.mxu2 %v5355_v22  ;;  %v8931_v51 = vld [vmem:[#allocation2 + $0x60] sm:$0xf] }
 0x3bf   : > { %5465 = vmatpush.bf16.msrb.mxu1 %v5318_v63  ;;  %v8932_v1 = vor.u32 %v9655_v32, %v8931_v51  ;;  %v9664_v63 = vld [vmem:[%s14718_s7 + $0x20] sm:$0xf0] }
 0x3c0   : > { %v4698_v13 = vmax.f32 %v4693_v16, 0.0  ;;  %v8963_v16 = vld [vmem:[%s14718_s7 + $0x18] sm:$0xf] }
 0x3c1   : > { %5770 = vrot.lane.b32.xlu0 %v13531_v24, %s14737_s20 }
 0x3c2   : > { %v4708_v61 = vpack.c.bf16 %v4698_v13, %v4697_v29  ;;  %5724 = vrot.lane.b32.xlu2 %v13522_v53, %s9767_s27  ;;  %v8902_v13 = vor.u32 %v9649_v40, %v8901_v41 }
 0x3c3   : > { %5722 = vrot.lane.b32.xlu1 %v13531_v24, %s9767_s27 }
 0x3c4   : > { %v5347_v43 = vpop.permute.xlu0 %5346  ;;  %v5335_v56 = vpop.permute.xlu2 %5334  ;;  %4795 = vmatpush.bf16.msrb.mxu3 %v4708_v61  ;;  %v8964_v61 = vor.u32 %v9664_v63, %v8963_v16 }
 0x3c5   : > { %v5303_v31 = vpop.permute.xlu1 %5302 }
 0x3c6   : > { %v5307_v11 = vsel %vm3649_vm3, %v5303_v31, %v5305_v36 }
 0x3c7   : > { %5466 = vmatpush.bf16.msrb.mxu1 %v5307_v11  ;;  %v9085_v11 = vld [vmem:[#allocation2 + $0x90] sm:$0xf0] }
 0x3c8   : > { %8784 = vmatmul.msk.bf16.gmra.mxu2 %vm3807_vm9, %v9621_v38  ;;  %4796 = vmatpush.bf16.msrb.mxu3 %v4707_v28  ;;  %v9691_v28 = vld [vmem:[#allocation2 + $0x8c] sm:$0xf0] }
 0x3c9   : > { %5716 = vrot.lane.b32.xlu0 %v13507_v62, %s9766_s26 }
 0x3ca   : > { %5714 = vrot.lane.b32.xlu2 %v13505_v10, %s9766_s26 }
 0x3cb   : > { %5772 = vrot.lane.b32.xlu1 %v13522_v53, %s14737_s20  ;;  %8851 = vmatmul.msk.bf16.vlgmr.msrb.gmra.mxu3 %vm3807_vm9, %v9634_v26  ;;  %v9690_v26 = vld [vmem:[#allocation2 + $0x6c] sm:$0xf] }
 0x3cc   : > { %v5301_v36 = vpop.permute.xlu0 %5300  ;;  %v5385_v2 = vpop.permute.xlu2 %5384 }
 0x3cd   : > { %v5349_v52 = vpop.permute.xlu1 %5348  ;;  %v5306_v55 = vsel %vm3649_vm3, %v5299_v8, %v5301_v36  ;;  %v8951_v8 = vld [vmem:[%s14718_s7] sm:$0xf]  ;;  %v13667_v36 = vor.u32 %v9690_v26, %v9085_v11 }
 0x3ce   : > { %5467 = vmatpush.bf16.msrb.mxu1 %v5306_v55  ;;  %v5354_v57 = vsel %vm3701_vm7, %v5347_v43, %v5349_v52  ;;  %v8952_v18 = vor.u32 %v9661_v27, %v8951_v8  ;;  %v9636_v43 = vld [vmem:[%s14720_s9 + $0x10] sm:$0xff]  ;;  %v9637_v8 = vld [vmem:[%s14720_s9 + $0x18] sm:$0xff] }
 0x3cf   : > { %5486 = vmatpush.bf16.msrb.mxu2 %v5354_v57  ;;  %v8953_v52 = vld [vmem:[%s14718_s7 + $0xc] sm:$0xf0]  ;;  %v9077_v57 = vld [vmem:[#allocation2 + $0x40] sm:$0xf0] }
 0x3d0   : > { %v13689_v54 = vor.u32 %v9688_v34, %v9077_v57  ;;  %v4414_v34 = vld [vmem:[%s11744_s28 + $0x8] sm:$0xff] }
 0x3d1   : > { %5710 = vrot.lane.b32.xlu0 %v13531_v24, %s9766_s26 }
 0x3d2   : > { %5764 = vrot.lane.b32.xlu2 %v13507_v62, %s14748_s22  ;;  %5468 = vmatpush.bf16.msrb.mxu1 %v8932_v1  ;;  %v9689_v1 = vld [vmem:[#allocation2 + $0x3c] sm:$0xf0] }
 0x3d3   : > { %5762 = vrot.lane.b32.xlu1 %v13505_v10, %s14748_s22  ;;  %v13694_v27 = vor.u32 %v9689_v1, %v9075_v6 }
 0x3d4   : > { %v5387_v15 = vpop.permute.xlu0 %5386  ;;  %v13609_v4 = vpop.permute.xlu2 %5141 }
 0x3d5   : > { %v5339_v3 = vpop.permute.xlu1 %5338 }
 0x3d6   : > { %5469 = vmatpush.bf16.msrb.mxu1 %v8928_v59  ;;  %v5343_v37 = vsel %vm3688_vm8, %v5339_v3, %v5341_v14  ;;  %v8965_v3 = vld [vmem:[%s14718_s7 + $0x24] sm:$0xf0] }
 0x3d7   : > { %5487 = vmatpush.bf16.msrb.mxu2 %v5343_v37 }
 0x3d8   : > { %8903 = vmatmul.msk.bf16.vlgmr.msra.gmra.mxu2 %vm3807_vm9, %v8890_v45  ;;  %v9663_v45 = vld [vmem:[%s14718_s7 + $0x1c] sm:$0xf] }
 0x3d9   : > { %5470 = vmatmul.bf16.vlgmr.msrb.gmra.mxu1 %v8952_v18  ;;  %5760 = vrot.lane.b32.xlu0 %v13522_v53, %s14748_s22  ;;  %v8968_v37 = vor.u32 %v9663_v45, %v8965_v3 }
 0x3da   : > { %5758 = vrot.lane.b32.xlu2 %v13531_v24, %s14748_s22 }
 0x3db   : > { %5712 = vrot.lane.b32.xlu1 %v13522_v53, %s9766_s26  ;;  %8852 = vmatmul.msk.bf16.gmra.mxu3 %vm3807_vm9, %v9635_v58  ;;  %v8959_v58 = vld [vmem:[%s14718_s7 + $0x8] sm:$0xf] }
 0x3dc   : > { %v5337_v0 = vpop.permute.xlu0 %5336  ;;  %v13623_v14 = vpop.permute.xlu2 %5156 }
 0x3dd   : > { %v5389_v60 = vpop.permute.xlu1 %5388  ;;  %v5342_v39 = vsel %vm3688_vm8, %v5335_v56, %v5337_v0  ;;  %v9662_v0 = vld [vmem:[%s14718_s7 + $0x10] sm:$0xf0] }
 0x3de   : > { %v5391_v22 = vsel %vm3740_vm6, %v5387_v15, %v5389_v60  ;;  %5488 = vmatpush.bf16.msrb.mxu2 %v5342_v39  ;;  %v8960_v39 = vor.u32 %v9662_v0, %v8959_v58 }
 0x3df   : > { %5506 = vmatpush.bf16.msra.mxu3 %v5391_v22 }
 0x3e1   : > { %5746 = vrot.lane.b32.xlu0 %v13531_v24, %s9769_s23 }
 0x3e2   : > { %5752 = vrot.lane.b32.xlu2 %v13507_v62, %s9769_s23 }
 0x3e3   : > { %5750 = vrot.lane.b32.xlu1 %v13505_v10, %s9769_s23 }
 0x3e4   : > { %v13645_v25 = vpop.permute.xlu0 %5131  ;;  %v13647_v29 = vpop.permute.xlu2 %5408 }
 0x3e5   : > { %v5383_v47 = vpop.permute.xlu1 %5382 }
 0x3e6   : > { %v5390_v33 = vsel %vm3740_vm6, %v5383_v47, %v5385_v2  ;;  %v9660_v2 = vld [vmem:[%s14718_s7 + $0x4] sm:$0xf]  ;;  %v9665_v47 = vld [vmem:[%s14718_s7 + $0x28] sm:$0xf0] }
 0x3e7   : > { %5507 = vmatpush.bf16.msra.mxu3 %v5390_v33 }
 0x3e8   : > { %8904 = vmatmul.msk.bf16.gmra.mxu2 %vm3807_vm9, %v8902_v13  ;;  %v8971_v13 = vld [vmem:[%s14718_s7 + $0x20] sm:$0xf] }
 0x3e9   : > { %5475 = vmatmul.bf16.gmra.mxu1 %v8964_v61  ;;  %5800 = vrot.lane.b32.xlu0 %v13507_v62, %s9773_s15  ;;  %v9083_v62 = vld [vmem:[#allocation2 + $0x68] sm:$0xf] }
 0x3ea   : > { %5798 = vrot.lane.b32.xlu2 %v13505_v10, %s9773_s15  ;;  %v13671_v10 = vor.u32 %v9691_v28, %v9083_v62  ;;  %v14797_v28 = vld [vmem:[#allocation17_spill] sm:$0xff] }
 0x3eb   : > { %5748 = vrot.lane.b32.xlu1 %v13522_v53, %s9769_s23  ;;  %8853 = vmatmul.msk.bf16.gmra.mxu3 %vm3807_vm9, %v9636_v43  ;;  %v8972_v43 = vor.u32 %v9665_v47, %v8971_v13  ;;  %v14799_v47 = vld [vmem:[#allocation13_spill] sm:$0xff] }
 0x3ec   : > { %v13661_v56 = vpop.permute.xlu0 %5146  ;;  %v13663_v38 = vpop.permute.xlu2 %5423 }
 0x3ed   : > { %v13665_v31 = vpop.permute.xlu1 %5136 }
 0x3f1   : > { %5794 = vrot.lane.b32.xlu0 %v13531_v24, %s9773_s15  ;;  %v8956_v24 = vor.u32 %v9660_v2, %v8953_v52 }
 0x3f2   : > { %6152 = vrot.lane.b32.xlu2 %v13667_v36, %s9768_s16 }
 0x3f3   : > { %6150 = vrot.lane.b32.xlu1 %v13671_v10, %s9768_s16 }
 0x3f4   : > { %v13683_v55 = vpop.permute.xlu0 %5161  ;;  %v13685_v32 = vpop.permute.xlu2 %5553 }
 0x3f5   : > { %v13687_v51 = vpop.permute.xlu1 %5151 }
 0x3f8   : > { %5489 = vmatmul.bf16.vlgmr.msrb.gmra.mxu2 %v8956_v24 }
 0x3f9   : > { %6148 = vrot.lane.b32.xlu0 %v13689_v54, %s9768_s16 }
 0x3fa   : > { %6146 = vrot.lane.b32.xlu2 %v13694_v27, %s9768_s16 }
 0x3fb   : > { %5796 = vrot.lane.b32.xlu1 %v13522_v53, %s9773_s15  ;;  %8854 = vmatmul.msk.bf16.gmra.mxu3 %vm3807_vm9, %v9637_v8 }
 0x3fc   : > { %v13703_v9 = vpop.permute.xlu0 %5413  ;;  %v5741_v15 = vpop.permute.xlu2 %5740 }
 0x3fd   : > { %v13705_v59 = vpop.permute.xlu1 %5166 }
 0x401   : > { %6198 = vrot.lane.b32.xlu0 %v13671_v10, %s9772_s29 }
 0x402   : > { %6140 = vrot.lane.b32.xlu2 %v13667_v36, %s9767_s27 }
 0x403   : > { %6138 = vrot.lane.b32.xlu1 %v13671_v10, %s9767_s27 }
 0x404   : > { %v13719_v53 = vpop.permute.xlu0 %5543  ;;  %v5735_v18 = vpop.permute.xlu2 %5734 }
 0x405   : > { %v13727_v60 = vpop.permute.xlu1 %5418 }
 0x408   : > { %5494 = vmatmul.bf16.gmra.mxu2 %v8968_v37 }
 0x409   : > { %6136 = vrot.lane.b32.xlu0 %v13689_v54, %s9767_s27 }
 0x40a   : > { %6134 = vrot.lane.b32.xlu2 %v13694_v27, %s9767_s27 }
 0x40b   : > { %6200 = vrot.lane.b32.xlu1 %v13667_v36, %s9772_s29  ;;  %8973 = vmatmul.msk.bf16.vlgmr.msra.gmra.mxu3 %vm3807_vm9, %v8960_v39  ;;  %v4415_v39 = vld [vmem:[%s11744_s28 + $0x50] sm:$0xff] }
 0x40c   : > { %v13736_v22 = vpop.permute.xlu0 %5558  ;;  %v5785_v41 = vpop.permute.xlu2 %5784 }
 0x40d   : > { %v13738_v40 = vpop.permute.xlu1 %5548 }
 0x411   : > { %6126 = vrot.lane.b32.xlu0 %v13671_v10, %s9766_s26 }
 0x412   : > { %6196 = vrot.lane.b32.xlu2 %v13689_v54, %s9772_s29 }
 0x413   : > { %6194 = vrot.lane.b32.xlu1 %v13694_v27, %s9772_s29 }
 0x414   : > { %v5787_v16 = vpop.permute.xlu0 %5786  ;;  %v5775_v63 = vpop.permute.xlu2 %5774 }
 0x415   : > { %v5739_v61 = vpop.permute.xlu1 %5738 }
 0x416   : > { %v5743_v33 = vsel %vm3675_vm1, %v5739_v61, %v5741_v15  ;;  %v14798_v15 = vld [vmem:[#allocation18_spill] sm:$0xff] }
 0x417   : > { %5874 = vmatpush.bf16.msra.mxu2 %v5743_v33 }
 0x419   : > { %6188 = vrot.lane.b32.xlu0 %v13667_v36, %s14737_s20 }
 0x41a   : > { %6186 = vrot.lane.b32.xlu2 %v13671_v10, %s14737_s20 }
 0x41b   : > { %6128 = vrot.lane.b32.xlu1 %v13667_v36, %s9766_s26  ;;  %v4386_v11 = vpop.f32.mrf.mxu2  ;;  %8974 = vmatmul.msk.bf16.gmra.mxu3 %vm3807_vm9, %v8972_v43 }
 0x41c   : > { %v4387_v26 = vadd.f32 %v4386_v11, %v14797_v28  ;;  %v5737_v62 = vpop.permute.xlu0 %5736  ;;  %v5725_v2 = vpop.permute.xlu2 %5724 }
 0x41d   : > { %v5789_v52 = vpop.permute.xlu1 %5788  ;;  %v5742_v24 = vsel %vm3675_vm1, %v5735_v18, %v5737_v62  ;;  %v4416_v62 = vld [vmem:[%s11744_s28 + $0x98] sm:$0xff] }
 0x41e   : > { %v4406_v57 = vmax.f32 %v4387_v26, 0.0  ;;  %v5791_v1 = vsel %vm3727_vm4, %v5787_v16, %v5789_v52  ;;  %5875 = vmatpush.bf16.msra.mxu2 %v5742_v24  ;;  %v14800_v24 = vld [vmem:[#allocation19_spill] sm:$0xff] }
 0x41f   : > { %5893 = vmatpush.bf16.msrb.mxu3 %v5791_v1 }
 0x420   : > { %v4422_v6 = vadd.f32 %v4414_v34, %v4406_v57 }
 0x421   : > { %6182 = vrot.lane.b32.xlu0 %v13694_v27, %s14737_s20 }
 0x422   : > { %4430 = vst [vmem:[%s11744_s28 + $0x8] sm:$0xff] %v4422_v6  ;;  %6124 = vrot.lane.b32.xlu2 %v13689_v54, %s9766_s26 }
 0x423   : > { %6122 = vrot.lane.b32.xlu1 %v13694_v27, %s9766_s26  ;;  %v4388_v8 = vpop.f32.mrf.mxu2 }
 0x424   : > { %v4389_v45 = vadd.f32 %v4388_v8, %v14798_v15  ;;  %v5727_v3 = vpop.permute.xlu0 %5726  ;;  %v5715_v18 = vpop.permute.xlu2 %5714 }
 0x425   : > { %v5783_v37 = vpop.permute.xlu1 %5782 }
 0x426   : > { %v4407_v58 = vmax.f32 %v4389_v45, 0.0  ;;  %v5790_v0 = vsel %vm3727_vm4, %v5783_v37, %v5785_v41  ;;  %v4417_v45 = vld [vmem:[%s11744_s28 + $0xe0] sm:$0xff] }
 0x427   : > { %5894 = vmatpush.bf16.msrb.mxu3 %v5790_v0 }
 0x428   : > { %v4423_v16 = vadd.f32 %v4415_v39, %v4407_v58  ;;  %v14801_v58 = vld [vmem:[#allocation20_spill] sm:$0xff] }
 0x429   : > { %6176 = vrot.lane.b32.xlu0 %v13667_v36, %s14748_s22 }
 0x42a   : > { %4431 = vst [vmem:[%s11744_s28 + $0x50] sm:$0xff] %v4423_v16  ;;  %6174 = vrot.lane.b32.xlu2 %v13671_v10, %s14748_s22 }
 0x42b   : > { %6184 = vrot.lane.b32.xlu1 %v13689_v54, %s14737_s20  ;;  %v4391_v13 = vpop.f32.mrf.mxu2 }
 0x42c   : > { %v4392_v61 = vadd.f32 %v4391_v13, %v14799_v47  ;;  %v5777_v33 = vpop.permute.xlu0 %5776  ;;  %v5765_v41 = vpop.permute.xlu2 %5764 }
 0x42d   : > { %v5729_v43 = vpop.permute.xlu1 %5728  ;;  %v5779_v11 = vsel %vm3714_vm5, %v5775_v63, %v5777_v33  ;;  %v4418_v33 = vld [vmem:[%s11744_s28 + $0x128] sm:$0xff] }
 0x42e   : > { %v4408_v28 = vmax.f32 %v4392_v61, 0.0  ;;  %v5731_v26 = vsel %vm3662_vm2, %v5727_v3, %v5729_v43  ;;  %5895 = vmatpush.bf16.msrb.mxu3 %v5779_v11 }
 0x42f   : > { %5876 = vmatpush.bf16.msra.mxu2 %v5731_v26 }
 0x430   : > { %v4424_v52 = vadd.f32 %v4416_v62, %v4408_v28 }
 0x431   : > { %6162 = vrot.lane.b32.xlu0 %v13671_v10, %s9769_s23 }
 0x432   : > { %4432 = vst [vmem:[%s11744_s28 + $0x98] sm:$0xff] %v4424_v52  ;;  %6172 = vrot.lane.b32.xlu2 %v13689_v54, %s14748_s22 }
 0x433   : > { %6170 = vrot.lane.b32.xlu1 %v13694_v27, %s14748_s22  ;;  %v4393_v63 = vpop.f32.mrf.mxu2 }
 0x434   : > { %v4394_v57 = vadd.f32 %v4393_v63, %v14800_v24  ;;  %v5771_v1 = vpop.permute.xlu0 %5770  ;;  %v5759_v34 = vpop.permute.xlu2 %5758  ;;  %v4419_v63 = vld [vmem:[%s11744_s28 + $0x170] sm:$0xff] }
 0x435   : > { %v5723_v6 = vpop.permute.xlu1 %5722 }
 0x436   : > { %v4409_v8 = vmax.f32 %v4394_v57, 0.0  ;;  %v5730_v15 = vsel %vm3662_vm2, %v5723_v6, %v5725_v2  ;;  %v14803_v57 = vld [vmem:[#allocation21_spill] sm:$0xff] }
 0x437   : > { %5877 = vmatpush.bf16.msra.mxu2 %v5730_v15 }
 0x438   : > { %v4425_v3 = vadd.f32 %v4417_v45, %v4409_v8 }
 0x439   : > { %6212 = vrot.lane.b32.xlu0 %v13667_v36, %s9773_s15 }
 0x43a   : > { %4433 = vst [vmem:[%s11744_s28 + $0xe0] sm:$0xff] %v4425_v3  ;;  %6210 = vrot.lane.b32.xlu2 %v13671_v10, %s9773_s15 }
 0x43b   : > { %6164 = vrot.lane.b32.xlu1 %v13667_v36, %s9769_s23  ;;  %v4396_v37 = vpop.f32.mrf.mxu2 }
 0x43c   : > { %v4397_v0 = vadd.f32 %v4396_v37, %v14801_v58  ;;  %v5717_v39 = vpop.permute.xlu0 %5716  ;;  %v13803_v2 = vpop.permute.xlu2 %5752  ;;  %v9671_v58 = vld [vmem:[#allocation2 + $0x88] sm:$0xf0] }
 0x43d   : > { %v5773_v16 = vpop.permute.xlu1 %5772  ;;  %v5719_v13 = vsel %vm3649_vm3, %v5715_v18, %v5717_v39  ;;  %v14802_v18 = vld [vmem:[#allocation15_spill] sm:$0xff]  ;;  %v4420_v39 = vld [vmem:[%s11744_s28 + $0x1b8] sm:$0xff] }
 0x43e   : > { %v4410_v47 = vmax.f32 %v4397_v0, 0.0  ;;  %5878 = vmatpush.bf16.msra.mxu2 %v5719_v13  ;;  %v5778_v61 = vsel %vm3714_vm5, %v5771_v1, %v5773_v16  ;;  %v13833_v0 = vpop.f32.mrf.mxu0 }
 0x43f   : > { %5896 = vmatpush.bf16.msrb.mxu3 %v5778_v61 }
 0x440   : > { %v4426_v10 = vadd.f32 %v4418_v33, %v4410_v47  ;;  %v13837_v47 = vpop.f32.mrf.mxu1 }
 0x441   : > { %6206 = vrot.lane.b32.xlu0 %v13694_v27, %s9773_s15 }
 0x442   : > { %4434 = vst [vmem:[%s11744_s28 + $0x128] sm:$0xff] %v4426_v10  ;;  %6160 = vrot.lane.b32.xlu2 %v13689_v54, %s9769_s23  ;;  %v4826_v10 = vld [vmem:[%s11744_s28 + $0x10] sm:$0xff] }
 0x443   : > { %6158 = vrot.lane.b32.xlu1 %v13694_v27, %s9769_s23  ;;  %v4398_v36 = vpop.f32.mrf.mxu2 }
 0x444   : > { %v4399_v43 = vadd.f32 %v4398_v36, %v14802_v18  ;;  %v5711_v11 = vpop.permute.xlu0 %5710  ;;  %v13816_v28 = vpop.permute.xlu2 %5798  ;;  %v9670_v36 = vld [vmem:[#allocation2 + $0x38] sm:$0xf0] }
 0x445   : > { %v5763_v26 = vpop.permute.xlu1 %5762 }
 0x446   : > { %v4411_v62 = vmax.f32 %v4399_v43, 0.0  ;;  %v5767_v52 = vsel %vm3701_vm7, %v5763_v26, %v5765_v41  ;;  %v14804_v26 = vld [vmem:[#allocation22_spill] sm:$0xff] }
 0x447   : > { %5897 = vmatpush.bf16.msrb.mxu3 %v5767_v52 }
 0x448   : > { %v4427_v24 = vadd.f32 %v4419_v63, %v4411_v62 }
 0x449   : > { %5835 = vperm.xlu0 %9753, %v13444_v46  }
 0x44a   : > { %4435 = vst [vmem:[%s11744_s28 + $0x170] sm:$0xff] %v4427_v24  ;;  %5830 = vperm.xlu2 %9755, %v13449_v23  }
 0x44b   : > { %6208 = vrot.lane.b32.xlu1 %v13689_v54, %s9773_s15  ;;  %v4401_v27 = vpop.f32.mrf.mxu2  ;;  %v5537_v54 = vld [vmem:[%s14721_s10 + $0x20] sm:$0xff] }
 0x44c   : > { %v4402_v1 = vadd.f32 %v4401_v27, %v14803_v57  ;;  %v5761_v6 = vpop.permute.xlu0 %5760  ;;  %v13826_v8 = vpop.permute.xlu2 %6152 }
 0x44d   : > { %v5713_v15 = vpop.permute.xlu1 %5712  ;;  %v5766_v41 = vsel %vm3701_vm7, %v5759_v34, %v5761_v6  ;;  %v9001_v34 = vld [vmem:[#allocation2 + $0x64] sm:$0xf] }
 0x44e   : > { %v4412_v45 = vmax.f32 %v4402_v1, 0.0  ;;  %v5718_v3 = vsel %vm3649_vm3, %v5711_v11, %v5713_v15  ;;  %5898 = vmatpush.bf16.msrb.mxu3 %v5766_v41  ;;  %v4798_v37 = vpop.f32.mrf.mxu3  ;;  %v9002_v33 = vor.u32 %v9671_v58, %v9001_v34  ;;  %v9677_v11 = vld [vmem:[%s14718_s7 + $0x8] sm:$0xf0]  ;;  %v4421_v41 = vld [vmem:[%s11744_s28 + $0x200] sm:$0xff]  ;;  %v4827_v58 = vld [vmem:[%s11744_s28 + $0x58] sm:$0xff] }
 0x44f   : > { %5879 = vmatpush.bf16.msra.mxu2 %v5718_v3  ;;  %v4799_v16 = vadd.f32 %v4798_v37, %v13125_v20  ;;  %v9021_v20 = vld [vmem:[%s14718_s7] sm:$0xf]  ;;  %v13857_v37 = vpop.f32.mrf.mxu0 }
 0x450   : > { %v4428_v13 = vadd.f32 %v4420_v39, %v4412_v45  ;;  %v9022_v15 = vor.u32 %v9677_v11, %v9021_v20  ;;  %v9153_v11 = vld [vmem:[#allocation2 + $0x6c] sm:$0xf] }
 0x451   : > { %v4818_v61 = vmax.f32 %v4799_v16, 0.0  ;;  %5563 = vperm.xlu0 %9753, %v5537_v54  }
 0x452   : > { %4436 = vst [vmem:[%s11744_s28 + $0x1b8] sm:$0xff] %v4428_v13  ;;  %5825 = vperm.xlu2 %9755, %v13405_v5   ;;  %v8997_v5 = vld [vmem:[#allocation2 + $0x14] sm:$0xf] }
 0x453   : > { %v4834_v18 = vadd.f32 %v4826_v10, %v4818_v61  ;;  %5820 = vperm.xlu1 %9754, %v13413_v19   ;;  %5880 = vmatpush.bf16.msra.mxu2 %v9002_v33  ;;  %v4403_v43 = vpop.f32.mrf.mxu2  ;;  %v8998_v27 = vor.u32 %v9670_v36, %v8997_v5  ;;  %v9707_v33 = vld [vmem:[#allocation2 + $0x90] sm:$0xf0] }
 0x454   : > { %v4404_v62 = vadd.f32 %v4403_v43, %v14804_v26  ;;  %v5747_v52 = vpop.permute.xlu0 %5746  ;;  %v13850_v63 = vpop.permute.xlu2 %6146  ;;  %v13883_v26 = vor.u32 %v9707_v33, %v9153_v11  ;;  %v9145_v33 = vld [vmem:[#allocation2 + $0x1c] sm:$0xf] }
 0x455   : > { %4842 = vst [vmem:[%s11744_s28 + $0x10] sm:$0xff] %v4834_v18  ;;  %v5751_v24 = vpop.permute.xlu1 %5750  ;;  %v9706_v18 = vld [vmem:[#allocation2 + $0x70] sm:$0xf] }
 0x456   : > { %v4413_v57 = vmax.f32 %v4404_v62, 0.0  ;;  %v5755_v1 = vsel %vm3688_vm8, %v5751_v24, %v13803_v2  ;;  %v4800_v6 = vpop.f32.mrf.mxu3  ;;  %v13863_v2 = vpop.f32.mrf.mxu1  ;;  %v13888_v62 = vld [vmem:[%s14719_s8 + $0x8] sm:$0xff] }
 0x457   : > { %5881 = vmatpush.bf16.msra.mxu2 %v8998_v27  ;;  %5899 = vmatpush.bf16.msrb.mxu3 %v5755_v1  ;;  %v4801_v45 = vadd.f32 %v4800_v6, %v13198_v17  ;;  %v9676_v17 = vld [vmem:[%s14718_s7 + $0x4] sm:$0xf] }
 0x458   : > { %v4429_v3 = vadd.f32 %v4421_v41, %v4413_v57  ;;  %v9033_v57 = vld [vmem:[%s14718_s7 + $0x18] sm:$0xf]  ;;  %v9680_v1 = vld [vmem:[%s14718_s7 + $0x20] sm:$0xf0] }
 0x459   : > { %v4819_v54 = vmax.f32 %v4801_v45, 0.0  ;;  %6232 = vperm.xlu0 %9753, %v13413_v19   ;;  %v9023_v19 = vld [vmem:[%s14718_s7 + $0xc] sm:$0xf0] }
 0x45a   : > { %4437 = vst [vmem:[%s11744_s28 + $0x200] sm:$0xff] %v4429_v3  ;;  %5882 = vmatmul.bf16.vlgmr.msra.gmra.mxu2 %v9022_v15  ;;  %6247 = vperm.xlu2 %9755, %v13444_v46   ;;  %v9155_v46 = vld [vmem:[#allocation2 + $0x94] sm:$0xf0]  ;;  %v9026_v36 = vor.u32 %v9676_v17, %v9023_v19  ;;  %v9147_v3 = vld [vmem:[#allocation2 + $0x44] sm:$0xf0] }
 0x45b   : > { %v4835_v39 = vadd.f32 %v4827_v58, %v4819_v54  ;;  %6242 = vperm.xlu1 %9754, %v13449_v23   ;;  %v13866_v16 = vpop.f32.mrf.mxu2  ;;  %v13881_v20 = vor.u32 %v9706_v18, %v9155_v46  ;;  %v9705_v17 = vld [vmem:[#allocation2 + $0x40] sm:$0xf0]  ;;  %v9704_v46 = vld [vmem:[#allocation2 + $0x20] sm:$0xf]  ;;  %v9679_v18 = vld [vmem:[%s14718_s7 + $0x1c] sm:$0xf] }
 0x45c   : > { %v13874_v13 = vpop.permute.xlu0 %5800  ;;  %v13876_v34 = vpop.permute.xlu2 %6140 }
 0x45d   : > { %4843 = vst [vmem:[%s11744_s28 + $0x58] sm:$0xff] %v4835_v39  ;;  %v5749_v61 = vpop.permute.xlu1 %5748  ;;  %v9034_v39 = vor.u32 %v9680_v1, %v9033_v57 }
 0x45e   : > { %v5754_v23 = vsel %vm3688_vm8, %v5747_v52, %v5749_v61  ;;  %v4803_v10 = vpop.f32.mrf.mxu3  ;;  %v4828_v52 = vld [vmem:[%s11744_s28 + $0xa0] sm:$0xff]  ;;  %v5083_v41 = vpop.f32.mrf.mxu1  ;;  %v13910_v61 = vor.u32 %v9704_v46, %v9147_v3  ;;  %v5060_v46 = vadd.f32 %v13833_v0, %v13394_v35 }
 0x45f   : > { %5900 = vmatpush.bf16.msrb.mxu3 %v5754_v23  ;;  %v4804_v43 = vadd.f32 %v4803_v10, %v13233_v7  ;;  %v5064_v7 = vpop.f32.mrf.mxu0  ;;  %v13914_v10 = vor.u32 %v9705_v17, %v9145_v33 }
 0x460   : > { %v5065_v1 = vadd.f32 %v5064_v7, %v13366_v12  ;;  %v5079_v35 = vadd.f32 %v13837_v47, %v5060_v46 }
 0x461   : > { %v4820_v5 = vmax.f32 %v4804_v43, 0.0  ;;  %6612 = vrot.lane.b32.xlu0 %v13881_v20, %s9772_s29  ;;  %v9035_v43 = vld [vmem:[%s14718_s7 + $0x24] sm:$0xf0] }
 0x462   : > { %5901 = vmatmul.bf16.vlgmr.msrb.gmra.mxu3 %v9026_v36  ;;  %6610 = vrot.lane.b32.xlu2 %v13883_v26, %s9772_s29  ;;  %v4829_v36 = vld [vmem:[%s11744_s28 + $0xe8] sm:$0xff]  ;;  %v9038_v3 = vor.u32 %v9679_v18, %v9035_v43 }
 0x463   : > { %v4836_v24 = vadd.f32 %v4828_v52, %v4820_v5  ;;  %6237 = vperm.xlu1 %9754, %v13888_v62   ;;  %v5099_v27 = vpop.f32.mrf.mxu2 }
 0x464   : > { %v13902_v6 = vpop.permute.xlu0 %5794  ;;  %v13904_v15 = vpop.permute.xlu2 %6134 }
 0x465   : > { %4844 = vst [vmem:[%s11744_s28 + $0xa0] sm:$0xff] %v4836_v24  ;;  %v6151_v45 = vpop.permute.xlu1 %6150 }
 0x466   : > { %v6155_v54 = vsel %vm3675_vm1, %v6151_v45, %v13826_v8  ;;  %v4805_v58 = vpop.f32.mrf.mxu3 }
 0x467   : > { %6286 = vmatpush.bf16.msra.mxu3 %v6155_v54  ;;  %v4806_v19 = vadd.f32 %v4805_v58, %v13150_v42  ;;  %v5066_v52 = vpop.f32.mrf.mxu0  ;;  %v5085_v54 = vpop.f32.mrf.mxu1 }
 0x468   : > { %v5067_v17 = vadd.f32 %v5066_v52, %v13427_v21 }
 0x469   : > { %v4821_v23 = vmax.f32 %v4806_v19, 0.0  ;;  %6598 = vrot.lane.b32.xlu0 %v13883_v26, %s14737_s20  ;;  %v5084_v19 = vadd.f32 %v5083_v41, %v5065_v1  ;;  %v4831_v1 = vld [vmem:[%s11744_s28 + $0x178] sm:$0xff] }
 0x46a   : > { %5887 = vmatmul.bf16.gmra.mxu2 %v9034_v39  ;;  %6608 = vrot.lane.b32.xlu2 %v13910_v61, %s9772_s29  ;;  %v5062_v39 = vadd.f32 %v13857_v37, %v13432_v44 }
 0x46b   : > { %v4837_v8 = vadd.f32 %v4829_v36, %v4821_v23  ;;  %6606 = vrot.lane.b32.xlu1 %v13914_v10, %s9772_s29  ;;  %v5102_v42 = vpop.f32.mrf.mxu2  ;;  %v4830_v23 = vld [vmem:[%s11744_s28 + $0x130] sm:$0xff]  ;;  %v5098_v36 = vadd.f32 %v13866_v16, %v5079_v35  ;;  %v4833_v35 = vld [vmem:[%s11744_s28 + $0x208] sm:$0xff] }
 0x46c   : > { %v6149_v11 = vpop.permute.xlu0 %6148  ;;  %v13927_v5 = vpop.permute.xlu2 %6196  ;;  %v5081_v12 = vadd.f32 %v13863_v2, %v5062_v39  ;;  %v5103_v7 = vadd.f32 %v5102_v42, %v5084_v19  ;;  %v5803_v39 = vsel %vm3740_vm6, %v13816_v28, %v13874_v13 }
 0x46d   : > { %4845 = vst [vmem:[%s11744_s28 + $0xe8] sm:$0xff] %v4837_v8  ;;  %v13930_v24 = vpop.permute.xlu1 %5796  ;;  %v6154_v57 = vsel %vm3675_vm1, %v13850_v63, %v6149_v11  ;;  %v5086_v63 = vadd.f32 %v5085_v54, %v5067_v17 }
 0x46e   : > { %6287 = vmatpush.bf16.msra.mxu3 %v6154_v57  ;;  %v4808_v45 = vpop.f32.mrf.mxu3  ;;  %v5100_v44 = vadd.f32 %v5099_v27, %v5081_v12  ;;  %v5109_v8 = vmax.f32 %v5103_v7, 0.0  ;;  %v5107_v57 = vmax.f32 %v5098_v36, 0.0  ;;  %v5802_v28 = vsel %vm3740_vm6, %v13902_v6, %v13930_v24  ;;  %v9651_v36 = vld [vmem:[%s14720_s9 + $0x8] sm:$0xff] }
 0x46f   : > { %v4809_v58 = vadd.f32 %v4808_v45, %v13228_v30  ;;  %v13974_v46 = vpop.f32.mrf.mxu1 }
 0x470   : > { %v5108_v27 = vmax.f32 %v5100_v44, 0.0 }
 0x471   : > { %v4822_v33 = vmax.f32 %v4809_v58, 0.0  ;;  %6596 = vrot.lane.b32.xlu0 %v13910_v61, %s14737_s20  ;;  %v9650_v58 = vld [vmem:[%s14720_s9] sm:$0xff] }
 0x472   : > { %5906 = vmatmul.bf16.gmra.mxu3 %v9038_v3  ;;  %6594 = vrot.lane.b32.xlu2 %v13914_v10, %s14737_s20 }
 0x473   : > { %v4838_v30 = vadd.f32 %v4830_v23, %v4822_v33  ;;  %6600 = vrot.lane.b32.xlu1 %v13881_v20, %s14737_s20  ;;  %v5104_v21 = vpop.f32.mrf.mxu2 }
 0x474   : > { %v5105_v0 = vadd.f32 %v5104_v21, %v5086_v63  ;;  %v6199_v37 = vpop.permute.xlu0 %6198  ;;  %v13950_v41 = vpop.permute.xlu2 %6186 }
 0x475   : > { %4846 = vst [vmem:[%s11744_s28 + $0x130] sm:$0xff] %v4838_v30  ;;  %v6139_v2 = vpop.permute.xlu1 %6138 }
 0x476   : > { %v5110_v42 = vmax.f32 %v5105_v0, 0.0  ;;  %v6143_v18 = vsel %vm3662_vm2, %v6139_v2, %v13876_v34  ;;  %v4810_v43 = vpop.f32.mrf.mxu3 }
 0x477   : > { %6288 = vmatpush.bf16.msra.mxu3 %v6143_v18  ;;  %v4811_v47 = vadd.f32 %v4810_v43, %v13248_v49  ;;  %v5119_v49 = vpack.c.bf16 %v5108_v27, %v5107_v57  ;;  %v14001_v44 = vpop.f32.mrf.mxu1  ;;  %v9225_v27 = vld [vmem:[#allocation2 + $0x98] sm:$0xf0] }
 0x478   : > { %v5120_v11 = vpack.c.bf16 %v5110_v42, %v5109_v8 }
 0x479   : > { %v4823_v52 = vmax.f32 %v4811_v47, 0.0  ;;  %6582 = vrot.lane.b32.xlu0 %v13914_v10, %s14748_s22 }
 0x47a   : > { %6588 = vrot.lane.b32.xlu2 %v13881_v20, %s14748_s22  ;;  %5207 = vmatpush.bf16.msra.mxu0 %v5120_v11 }
 0x47b   : > { %v4839_v16 = vadd.f32 %v4831_v1, %v4823_v52  ;;  %6586 = vrot.lane.b32.xlu1 %v13883_v26, %s14748_s22  ;;  %v13985_v13 = vpop.f32.mrf.mxu2  ;;  %v9723_v1 = vld [vmem:[#allocation2 + $0x94] sm:$0xf0] }
 0x47c   : > { %v6137_v34 = vpop.permute.xlu0 %6136  ;;  %v6125_v45 = vpop.permute.xlu2 %6124 }
 0x47d   : > { %4847 = vst [vmem:[%s11744_s28 + $0x178] sm:$0xff] %v4839_v16  ;;  %v6201_v3 = vpop.permute.xlu1 %6200  ;;  %v6142_v54 = vsel %vm3662_vm2, %v13904_v15, %v6137_v34  ;;  %v4832_v15 = vld [vmem:[%s11744_s28 + $0x1c0] sm:$0xff]  ;;  %v9687_v16 = vld [vmem:[#allocation2 + $0x8c] sm:$0xf0]  ;;  %v9722_v34 = vld [vmem:[#allocation2 + $0x74] sm:$0xf] }
 0x47e   : > { %5208 = vmatpush.bf16.msra.mxu0 %v5119_v49  ;;  %6289 = vmatpush.bf16.msra.mxu3 %v6142_v54  ;;  %v4813_v17 = vpop.f32.mrf.mxu3  ;;  %v9223_v54 = vld [vmem:[#allocation2 + $0x70] sm:$0xf] }
 0x47f   : > { %v4814_v19 = vadd.f32 %v4813_v17, %v13176_v48  ;;  %v6203_v48 = vsel %vm3727_vm4, %v6199_v37, %v6201_v3  ;;  %v5476_v11 = vpop.f32.mrf.mxu1  ;;  %v14028_v3 = vor.u32 %v9722_v34, %v9225_v27 }
 0x481   : > { %v4824_v33 = vmax.f32 %v4814_v19, 0.0  ;;  %8921 = vmatmul.msk.bf16.vlgmr.msra.gmra.mxu0 %vm3807_vm9, %v9650_v58  ;;  %6624 = vrot.lane.b32.xlu0 %v13881_v20, %s9773_s15  ;;  %v9071_v58 = vld [vmem:[#allocation2 + $0x68] sm:$0xf]  ;;  %v9091_v19 = vld [vmem:[%s14718_s7] sm:$0xf] }
 0x482   : > { %5918 = vmatpush.bf16.msrb.mxu0 %v5803_v39  ;;  %6622 = vrot.lane.b32.xlu2 %v13883_v26, %s9773_s15  ;;  %v14032_v39 = vor.u32 %v9723_v1, %v9223_v54  ;;  %v9072_v17 = vor.u32 %v9687_v16, %v9071_v58  ;;  %v5472_v1 = vadd.f32 %v13974_v46, %v13647_v29  ;;  %v9215_v54 = vld [vmem:[#allocation2 + $0x20] sm:$0xf] }
 0x483   : > { %v4840_v12 = vadd.f32 %v4832_v15, %v4824_v33  ;;  %6584 = vrot.lane.b32.xlu1 %v13910_v61, %s14748_s22  ;;  %v14013_v8 = vpop.f32.mrf.mxu2  ;;  %v9693_v33 = vld [vmem:[%s14718_s7 + $0x8] sm:$0xf0] }
 0x484   : > { %v6127_v63 = vpop.permute.xlu0 %6126  ;;  %v13990_v7 = vpop.permute.xlu2 %6174 }
 0x485   : > { %4848 = vst [vmem:[%s11744_s28 + $0x1c0] sm:$0xff] %v4840_v12  ;;  %v6195_v23 = vpop.permute.xlu1 %6194 }
 0x486   : > { %5919 = vmatpush.bf16.msrb.mxu0 %v5802_v28  ;;  %v4815_v30 = vpop.f32.mrf.mxu3  ;;  %v6202_v24 = vsel %vm3727_vm4, %v6195_v23, %v13927_v5  ;;  %v9652_v23 = vld [vmem:[%s14720_s9 + $0x10] sm:$0xff] }
 0x487   : > { %v4816_v6 = vadd.f32 %v4815_v30, %v13246_v50 }
 0x489   : > { %v4825_v21 = vmax.f32 %v4816_v6, 0.0  ;;  %6618 = vrot.lane.b32.xlu0 %v13914_v10, %s9773_s15 }
 0x48a   : > { %6305 = vmatpush.bf16.msra.mxu0 %v6203_v48  ;;  %6576 = vrot.lane.b32.xlu2 %v13881_v20, %s9769_s23  ;;  %v9067_v48 = vld [vmem:[#allocation2 + $0x18] sm:$0xf] }
 0x48b   : > { %v4841_v0 = vadd.f32 %v4833_v35, %v4825_v21  ;;  %6574 = vrot.lane.b32.xlu1 %v13883_v26, %s9769_s23  ;;  %v5495_v49 = vpop.f32.mrf.mxu2  ;;  %v5478_v21 = vpop.f32.mrf.mxu1  ;;  %v5477_v35 = vadd.f32 %v5476_v11, %v13727_v60  ;;  %v9217_v11 = vld [vmem:[#allocation2 + $0x48] sm:$0xf0] }
 0x48c   : > { %v6189_v37 = vpop.permute.xlu0 %6188  ;;  %v14005_v50 = vpop.permute.xlu2 %6172 }
 0x48d   : > { %4849 = vst [vmem:[%s11744_s28 + $0x208] sm:$0xff] %v4841_v0  ;;  %v6129_v5 = vpop.permute.xlu1 %6128  ;;  %v6191_v2 = vsel %vm3714_vm5, %v13950_v41, %v6189_v37 }
 0x48e   : > { %6306 = vmatpush.bf16.msra.mxu0 %v6202_v24  ;;  %v6131_v42 = vsel %vm3649_vm3, %v6127_v63, %v6129_v5  ;;  %v14016_v18 = vpop.f32.mrf.mxu3  ;;  %v9092_v24 = vor.u32 %v9693_v33, %v9091_v19  ;;  %v5479_v5 = vadd.f32 %v5478_v21, %v13663_v38 }
 0x48f   : > { %6290 = vmatpush.bf16.msra.mxu3 %v6131_v42  ;;  %v5474_v42 = vadd.f32 %v14001_v44, %v13703_v9  ;;  %v5491_v44 = vadd.f32 %v13985_v13, %v5472_v1  ;;  %v9696_v13 = vld [vmem:[%s14718_s7 + $0x20] sm:$0xf0] }
 0x491   : > { %8922 = vmatmul.msk.bf16.gmra.mxu0 %vm3807_vm9, %v9651_v36  ;;  %6572 = vrot.lane.b32.xlu0 %v13910_v61, %s9769_s23  ;;  %v5493_v16 = vadd.f32 %v14013_v8, %v5474_v42  ;;  %v5510_v29 = vadd.f32 %v14016_v18, %v5491_v44  ;;  %v9653_v18 = vld [vmem:[%s14720_s9 + $0x18] sm:$0xff] }
 0x492   : > { %6307 = vmatpush.bf16.msra.mxu0 %v6191_v2  ;;  %6570 = vrot.lane.b32.xlu2 %v13914_v10, %s9769_s23  ;;  %v5496_v2 = vadd.f32 %v5495_v49, %v5477_v35  ;;  %v9720_v49 = vld [vmem:[#allocation2 + $0x24] sm:$0xf] }
 0x493   : > { %6620 = vrot.lane.b32.xlu1 %v13910_v61, %s9773_s15  ;;  %v5497_v0 = vpop.f32.mrf.mxu2  ;;  %v14070_v58 = vor.u32 %v9720_v49, %v9217_v11  ;;  %v9668_v49 = vld [vmem:[%s14720_s9 + $0x10] sm:$0xff] }
 0x494   : > { %v6183_v41 = vpop.permute.xlu0 %6182  ;;  %v14025_v43 = vpop.permute.xlu2 %6210 }
 0x495   : > { %v6123_v47 = vpop.permute.xlu1 %6122 }
 0x496   : > { %v6130_v52 = vsel %vm3649_vm3, %v6123_v47, %v6125_v45  ;;  %v5511_v57 = vpop.f32.mrf.mxu3  ;;  %v9686_v45 = vld [vmem:[#allocation2 + $0x3c] sm:$0xf0] }
 0x497   : > { %6291 = vmatpush.bf16.msra.mxu3 %v6130_v52  ;;  %v9068_v63 = vor.u32 %v9686_v45, %v9067_v48  ;;  %v9721_v52 = vld [vmem:[#allocation2 + $0x44] sm:$0xf0] }
 0x498   : > { %v14072_v9 = vor.u32 %v9721_v52, %v9215_v54  ;;  %v9041_v52 = vld [vmem:[%s14718_s7 + $0x20] sm:$0xf] }
 0x499   : > { %6562 = vrot.lane.b32.xlu0 %v13883_v26, %s9768_s16 }
 0x49a   : > { %7024 = vrot.lane.b32.xlu2 %v14028_v3, %s9772_s29 }
 0x49b   : > { %7022 = vrot.lane.b32.xlu1 %v14032_v39, %s9772_s29  ;;  %6292 = vmatpush.bf16.msra.mxu3 %v9072_v17  ;;  %v5512_v17 = vadd.f32 %v5511_v57, %v5493_v16 }
 0x49c   : > { %v6177_v15 = vpop.permute.xlu0 %6176  ;;  %v14044_v28 = vpop.permute.xlu2 %6160 }
 0x49d   : > { %v6185_v12 = vpop.permute.xlu1 %6184  ;;  %v6179_v37 = vsel %vm3701_vm7, %v13990_v7, %v6177_v15  ;;  %v5520_v33 = vmax.f32 %v5512_v17, 0.0 }
 0x49e   : > { %v6190_v30 = vsel %vm3714_vm5, %v6183_v41, %v6185_v12  ;;  %v5514_v6 = vpop.f32.mrf.mxu3  ;;  %v5498_v41 = vadd.f32 %v5497_v0, %v5479_v5 }
 0x49f   : > { %6293 = vmatpush.bf16.msra.mxu3 %v9068_v63  ;;  %6308 = vmatpush.bf16.msra.mxu0 %v6190_v30  ;;  %v5515_v47 = vadd.f32 %v5514_v6, %v5496_v2  ;;  %v5519_v63 = vmax.f32 %v5510_v29, 0.0  ;;  %v9666_v30 = vld [vmem:[%s14720_s9] sm:$0xff]  ;;  %v9093_v29 = vld [vmem:[%s14718_s7 + $0xc] sm:$0xf0] }
 0x4a1   : > { %8923 = vmatmul.msk.bf16.gmra.mxu0 %vm3807_vm9, %v9652_v23  ;;  %6976 = vrot.lane.b32.xlu0 %v14028_v3, %s9768_s16  ;;  %v5521_v45 = vmax.f32 %v5515_v47, 0.0  ;;  %v5531_v23 = vpack.c.bf16 %v5520_v33, %v5519_v63  ;;  %v9669_v33 = vld [vmem:[%s14720_s9 + $0x18] sm:$0xff] }
 0x4a2   : > { %6294 = vmatmul.bf16.vlgmr.msra.gmra.mxu3 %v9092_v24  ;;  %6974 = vrot.lane.b32.xlu2 %v14032_v39, %s9768_s16  ;;  %v9695_v63 = vld [vmem:[%s14718_s7 + $0x1c] sm:$0xf] }
 0x4a3   : > { %6564 = vrot.lane.b32.xlu1 %v13881_v20, %s9768_s16  ;;  %6309 = vmatpush.bf16.msra.mxu0 %v6179_v37  ;;  %v9678_v37 = vld [vmem:[%s14718_s7 + $0x10] sm:$0xf0] }
 0x4a4   : > { %v6163_v60 = vpop.permute.xlu0 %6162  ;;  %v14061_v36 = vpop.permute.xlu2 %5830 }
 0x4a5   : > { %v6171_v27 = vpop.permute.xlu1 %6170 }
 0x4a6   : > { %v6178_v7 = vsel %vm3701_vm7, %v6171_v27, %v14005_v50  ;;  %v5516_v38 = vpop.f32.mrf.mxu3  ;;  %v9103_v50 = vld [vmem:[%s14718_s7 + $0x18] sm:$0xf] }
 0x4a7   : > { %6310 = vmatpush.bf16.msra.mxu0 %v6178_v7  ;;  %v5517_v34 = vadd.f32 %v5516_v38, %v5498_v41  ;;  %v9104_v12 = vor.u32 %v9696_v13, %v9103_v50  ;;  %v9667_v41 = vld [vmem:[%s14720_s9 + $0x8] sm:$0xff] }
 0x4a8   : > { %v9681_v7 = vld [vmem:[%s14718_s7 + $0x28] sm:$0xf0] }
 0x4a9   : > { %v5522_v19 = vmax.f32 %v5517_v34, 0.0  ;;  %6558 = vrot.lane.b32.xlu0 %v13914_v10, %s9768_s16  ;;  %v9042_v34 = vor.u32 %v9681_v7, %v9041_v52 }
 0x4aa   : > { %7020 = vrot.lane.b32.xlu2 %v14070_v58, %s9772_s29 }
 0x4ab   : > { %v5532_v46 = vpack.c.bf16 %v5522_v19, %v5521_v45  ;;  %7018 = vrot.lane.b32.xlu1 %v14072_v9, %s9772_s29  ;;  %v9692_v19 = vld [vmem:[%s14718_s7 + $0x4] sm:$0xf] }
 0x4ac   : > { %v6213_v8 = vpop.permute.xlu0 %6212  ;;  %v14088_v57 = vpop.permute.xlu2 %5825 }
 0x4ad   : > { %v6165_v15 = vpop.permute.xlu1 %6164  ;;  %5619 = vmatpush.bf16.msra.mxu1 %v5532_v46  ;;  %v6215_v6 = vsel %vm3740_vm6, %v14025_v43, %v6213_v8  ;;  %v9029_v43 = vld [vmem:[%s14718_s7 + $0x8] sm:$0xf]  ;;  %v9096_v8 = vor.u32 %v9692_v19, %v9093_v29 }
 0x4ae   : > { %v6167_v48 = vsel %vm3688_vm8, %v6163_v60, %v6165_v15  ;;  %v9030_v60 = vor.u32 %v9678_v37, %v9029_v43  ;;  %v9694_v43 = vld [vmem:[%s14718_s7 + $0x10] sm:$0xf0] }
 0x4af   : > { %6311 = vmatpush.bf16.msra.mxu0 %v6167_v48 }
 0x4b1   : > { %8924 = vmatmul.msk.bf16.gmra.mxu0 %vm3807_vm9, %v9653_v18  ;;  %6972 = vrot.lane.b32.xlu0 %v14070_v58, %s9768_s16 }
 0x4b2   : > { %6299 = vmatmul.bf16.gmra.mxu3 %v9104_v12  ;;  %6970 = vrot.lane.b32.xlu2 %v14072_v9, %s9768_s16 }
 0x4b3   : > { %6560 = vrot.lane.b32.xlu1 %v13910_v61, %s9768_s16  ;;  %5620 = vmatpush.bf16.msra.mxu1 %v5531_v23 }
 0x4b4   : > { %v6207_v24 = vpop.permute.xlu0 %6206  ;;  %v14106_v21 = vpop.permute.xlu2 %6247 }
 0x4b5   : > { %v6159_v35 = vpop.permute.xlu1 %6158 }
 0x4b6   : > { %8991 = vmatmul.msk.bf16.vlgmr.msra.gmra.mxu1 %vm3807_vm9, %v9666_v30  ;;  %v6166_v0 = vsel %vm3688_vm8, %v6159_v35, %v14044_v28 }
 0x4b7   : > { %6330 = vmatpush.bf16.msrb.mxu1 %v6215_v6  ;;  %6312 = vmatpush.bf16.msra.mxu0 %v6166_v0  ;;  %v9099_v0 = vld [vmem:[%s14718_s7 + $0x8] sm:$0xf] }
 0x4b8   : > { %v9100_v37 = vor.u32 %v9694_v43, %v9099_v0 }
 0x4b9   : > { %6550 = vrot.lane.b32.xlu0 %v13883_v26, %s9767_s27 }
 0x4ba   : > { %7012 = vrot.lane.b32.xlu2 %v14028_v3, %s14737_s20 }
 0x4bb   : > { %7010 = vrot.lane.b32.xlu1 %v14032_v39, %s14737_s20 }
 0x4bc   : > { %v14123_v5 = vpop.permute.xlu0 %5835  ;;  %v6611_v28 = vpop.permute.xlu2 %6610 }
 0x4bd   : > { %v6209_v2 = vpop.permute.xlu1 %6208 }
 0x4be   : > { %v6214_v42 = vsel %vm3740_vm6, %v6207_v24, %v6209_v2 }
 0x4bf   : > { %6331 = vmatpush.bf16.msrb.mxu1 %v6214_v42 }
 0x4c1   : > { %9043 = vmatmul.msk.bf16.vlgmr.msrb.gmra.mxu0 %vm3807_vm9, %v9030_v60  ;;  %6964 = vrot.lane.b32.xlu0 %v14028_v3, %s9767_s27 }
 0x4c2   : > { %6962 = vrot.lane.b32.xlu2 %v14032_v39, %s9767_s27 }
 0x4c3   : > { %6552 = vrot.lane.b32.xlu1 %v13881_v20, %s9767_s27 }
 0x4c4   : > { %v14136_v47 = vpop.permute.xlu0 %5563  ;;  %v6609_v27 = vpop.permute.xlu2 %6608 }
 0x4c5   : > { %v14138_v11 = vpop.permute.xlu1 %5820 }
 0x4c6   : > { %8992 = vmatmul.msk.bf16.gmra.mxu1 %vm3807_vm9, %v9667_v41 }
 0x4c9   : > { %6546 = vrot.lane.b32.xlu0 %v13914_v10, %s9767_s27 }
 0x4ca   : > { %7008 = vrot.lane.b32.xlu2 %v14070_v58, %s14737_s20 }
 0x4cb   : > { %7006 = vrot.lane.b32.xlu1 %v14072_v9, %s14737_s20 }
 0x4cc   : > { %v14153_v38 = vpop.permute.xlu0 %6232  ;;  %v6595_v1 = vpop.permute.xlu2 %6594 }
 0x4cd   : > { %v14155_v16 = vpop.permute.xlu1 %6242 }
 0x4d1   : > { %9044 = vmatmul.msk.bf16.gmra.mxu0 %vm3807_vm9, %v9042_v34  ;;  %6960 = vrot.lane.b32.xlu0 %v14070_v58, %s9767_s27 }
 0x4d2   : > { %6958 = vrot.lane.b32.xlu2 %v14072_v9, %s9767_s27 }
 0x4d3   : > { %6548 = vrot.lane.b32.xlu1 %v13910_v61, %s9767_s27 }
 0x4d4   : > { %v6613_v54 = vpop.permute.xlu0 %6612  ;;  %v6589_v44 = vpop.permute.xlu2 %6588 }
 0x4d5   : > { %v6615_v17 = vsel %vm3727_vm4, %v6611_v28, %v6613_v54  ;;  %v14168_v45 = vpop.permute.xlu1 %6237  ;;  %v9697_v54 = vld [vmem:[%s14718_s7 + $0x28] sm:$0xf0] }
 0x4d6   : > { %8993 = vmatmul.msk.bf16.gmra.mxu1 %vm3807_vm9, %v9668_v49  ;;  %v9111_v49 = vld [vmem:[%s14718_s7 + $0x20] sm:$0xf] }
 0x4d7   : > { %6717 = vmatpush.bf16.msra.mxu1 %v6615_v17 }
 0x4d9   : > { %6538 = vrot.lane.b32.xlu0 %v13883_v26, %s9766_s26 }
 0x4da   : > { %7000 = vrot.lane.b32.xlu2 %v14028_v3, %s14748_s22 }
 0x4db   : > { %6998 = vrot.lane.b32.xlu1 %v14032_v39, %s14748_s22 }
 0x4dc   : > { %v6599_v46 = vpop.permute.xlu0 %6598  ;;  %v6623_v50 = vpop.permute.xlu2 %6622 }
 0x4dd   : > { %v6607_v13 = vpop.permute.xlu1 %6606 }
 0x4de   : > { %v6614_v26 = vsel %vm3727_vm4, %v6607_v13, %v6609_v27 }
 0x4df   : > { %6718 = vmatpush.bf16.msra.mxu1 %v6614_v26 }
 0x4e1   : > { %6313 = vmatmul.bf16.vlgmr.msra.gmra.mxu0 %v9096_v8  ;;  %6952 = vrot.lane.b32.xlu0 %v14028_v3, %s9766_s26  ;;  %v14253_v8 = vld [vmem:[%s14721_s10 + $0x28] sm:$0xff] }
 0x4e2   : > { %6950 = vrot.lane.b32.xlu2 %v14032_v39, %s9766_s26 }
 0x4e3   : > { %6540 = vrot.lane.b32.xlu1 %v13881_v20, %s9766_s26  ;;  %v9105_v20 = vld [vmem:[%s14718_s7 + $0x24] sm:$0xf0] }
 0x4e4   : > { %v6597_v15 = vpop.permute.xlu0 %6596  ;;  %v6577_v18 = vpop.permute.xlu2 %6576 }
 0x4e5   : > { %v6601_v48 = vpop.permute.xlu1 %6600  ;;  %v6602_v23 = vsel %vm3714_vm5, %v6595_v1, %v6597_v15  ;;  %v5239_v15 = vld [vmem:[%s11744_s28 + $0x60] sm:$0xff] }
 0x4e6   : > { %8994 = vmatmul.msk.bf16.gmra.mxu1 %vm3807_vm9, %v9669_v33  ;;  %v6603_v12 = vsel %vm3714_vm5, %v6599_v46, %v6601_v48 }
 0x4e7   : > { %6719 = vmatpush.bf16.msra.mxu1 %v6603_v12 }
 0x4e9   : > { %6534 = vrot.lane.b32.xlu0 %v13914_v10, %s9766_s26  ;;  %v9108_v10 = vor.u32 %v9695_v63, %v9105_v20  ;;  %v6640_v20 = vld [vmem:[%s14719_s8 + $0x10] sm:$0xff] }
 0x4ea   : > { %6996 = vrot.lane.b32.xlu2 %v14070_v58, %s14748_s22 }
 0x4eb   : > { %6994 = vrot.lane.b32.xlu1 %v14072_v9, %s14748_s22  ;;  %6720 = vmatpush.bf16.msra.mxu1 %v6602_v23 }
 0x4ec   : > { %v6583_v30 = vpop.permute.xlu0 %6582  ;;  %v6571_v6 = vpop.permute.xlu2 %6570 }
 0x4ed   : > { %v6587_v24 = vpop.permute.xlu1 %6586 }
 0x4ee   : > { %v6591_v35 = vsel %vm3701_vm7, %v6587_v24, %v6589_v44 }
 0x4ef   : > { %6721 = vmatpush.bf16.msra.mxu1 %v6591_v35 }
 0x4f1   : > { %6318 = vmatmul.bf16.gmra.mxu0 %v9108_v10  ;;  %6948 = vrot.lane.b32.xlu0 %v14070_v58, %s9766_s26  ;;  %v5240_v10 = vld [vmem:[%s11744_s28 + $0xa8] sm:$0xff] }
 0x4f2   : > { %6946 = vrot.lane.b32.xlu2 %v14072_v9, %s9766_s26 }
 0x4f3   : > { %6536 = vrot.lane.b32.xlu1 %v13910_v61, %s9766_s26 }
 0x4f4   : > { %v6625_v28 = vpop.permute.xlu0 %6624  ;;  %v7025_v2 = vpop.permute.xlu2 %7024 }
 0x4f5   : > { %v14222_v60 = vsel %vm3740_vm6, %v6623_v50, %v6625_v28  ;;  %v6585_v42 = vpop.permute.xlu1 %6584  ;;  %v7053_v28 = vld [vmem:[%s14719_s8 + $0x18] sm:$0xff] }
 0x4f6   : > { %9113 = vmatmul.msk.bf16.vlgmr.msrb.gmra.mxu1 %vm3807_vm9, %v9100_v37  ;;  %v6590_v41 = vsel %vm3701_vm7, %v6583_v30, %v6585_v42 }
 0x4f7   : > { %6722 = vmatpush.bf16.msra.mxu1 %v6590_v41 }
 0x4f9   : > { %7034 = vrot.lane.b32.xlu0 %v14032_v39, %s9773_s15 }
 0x4fa   : > { %6988 = vrot.lane.b32.xlu2 %v14028_v3, %s9769_s23 }
 0x4fb   : > { %6986 = vrot.lane.b32.xlu1 %v14032_v39, %s9769_s23  ;;  %v5238_v39 = vld [vmem:[%s11744_s28 + $0x18] sm:$0xff] }
 0x4fc   : > { %v6619_v61 = vpop.permute.xlu0 %6618  ;;  %v6975_v27 = vpop.permute.xlu2 %6974 }
 0x4fd   : > { %v6575_v52 = vpop.permute.xlu1 %6574 }
 0x4fe   : > { %v5210_v7 = vpop.f32.mrf.mxu0  ;;  %v6579_v34 = vsel %vm3688_vm8, %v6575_v52, %v6577_v18 }
 0x4ff   : > { %v5211_v1 = vadd.f32 %v5210_v7, %v13645_v25  ;;  %6723 = vmatpush.bf16.msra.mxu1 %v6579_v34  ;;  %v9112_v25 = vor.u32 %v9697_v54, %v9111_v49  ;;  %v7050_v49 = vld [vmem:[%s14719_s8] sm:$0xff] }
 0x501   : > { %v5230_v44 = vmax.f32 %v5211_v1, 0.0  ;;  %6984 = vrot.lane.b32.xlu0 %v14070_v58, %s9769_s23 }
 0x502   : > { %6982 = vrot.lane.b32.xlu2 %v14072_v9, %s9769_s23 }
 0x503   : > { %v5246_v17 = vadd.f32 %v5238_v39, %v5230_v44  ;;  %7036 = vrot.lane.b32.xlu1 %v14028_v3, %s9773_s15  ;;  %v5242_v39 = vld [vmem:[%s11744_s28 + $0x138] sm:$0xff] }
 0x504   : > { %v6573_v19 = vpop.permute.xlu0 %6572  ;;  %v7021_v29 = vpop.permute.xlu2 %7020 }
 0x505   : > { %5254 = vst [vmem:[%s11744_s28 + $0x18] sm:$0xff] %v5246_v17  ;;  %v6578_v46 = vsel %vm3688_vm8, %v6571_v6, %v6573_v19  ;;  %v6621_v50 = vpop.permute.xlu1 %6620 }
 0x506   : > { %9114 = vmatmul.msk.bf16.gmra.mxu1 %vm3807_vm9, %v9112_v25  ;;  %v5212_v13 = vpop.f32.mrf.mxu0  ;;  %v14257_v3 = vsel %vm3740_vm6, %v6619_v61, %v6621_v50  ;;  %v5241_v61 = vld [vmem:[%s11744_s28 + $0xf0] sm:$0xff] }
 0x507   : > { %v5213_v26 = vadd.f32 %v5212_v13, %v13665_v31  ;;  %6724 = vmatpush.bf16.msra.mxu1 %v6578_v46 }
 0x509   : > { %v5231_v33 = vmax.f32 %v5213_v26, 0.0  ;;  %5568 = vperm.xlu0 %9753, %v14253_v8  }
 0x50a   : > { %7032 = vrot.lane.b32.xlu2 %v14070_v58, %s9773_s15  ;;  %v14276_v58 = vld [vmem:[%s14721_s10 + $0x38] sm:$0xff] }
 0x50b   : > { %v5247_v18 = vadd.f32 %v5239_v15, %v5231_v33  ;;  %7030 = vrot.lane.b32.xlu1 %v14072_v9, %s9773_s15  ;;  %v14281_v9 = vld [vmem:[%s14721_s10 + $0x30] sm:$0xff]  ;;  %v14320_v33 = vld [vmem:[%s14721_s10] sm:$0xff] }
 0x50c   : > { %v6563_v48 = vpop.permute.xlu0 %6562  ;;  %v6971_v12 = vpop.permute.xlu2 %6970 }
 0x50d   : > { %5255 = vst [vmem:[%s11744_s28 + $0x60] sm:$0xff] %v5247_v18  ;;  %v7023_v31 = vpop.permute.xlu1 %7022  ;;  %v5243_v18 = vld [vmem:[%s11744_s28 + $0x180] sm:$0xff] }
 0x50e   : > { %v5215_v63 = vpop.f32.mrf.mxu0  ;;  %v14270_v23 = vsel %vm3727_vm4, %v7023_v31, %v7025_v2 }
 0x50f   : > { %v5216_v30 = vadd.f32 %v5215_v63, %v13609_v4 }
 0x511   : > { %v5232_v6 = vmax.f32 %v5216_v30, 0.0  ;;  %6654 = vperm.xlu0 %9753, %v6640_v20  }
 0x512   : > { %5578 = vperm.xlu2 %9755, %v14276_v58  }
 0x513   : > { %v5248_v24 = vadd.f32 %v5240_v10, %v5232_v6  ;;  %5573 = vperm.xlu1 %9754, %v14281_v9   ;;  %v14340_v6 = vld [vmem:[%s14721_s10 + $0x18] sm:$0xff]  ;;  %v5883_v10 = vpop.f32.mrf.mxu2 }
 0x514   : > { %v6977_v4 = vpop.permute.xlu0 %6976  ;;  %v14286_v35 = vpop.permute.xlu2 %7012 }
 0x515   : > { %5256 = vst [vmem:[%s11744_s28 + $0xa8] sm:$0xff] %v5248_v24  ;;  %v6979_v0 = vsel %vm3675_vm1, %v6975_v27, %v6977_v4  ;;  %v6565_v43 = vpop.permute.xlu1 %6564  ;;  %v5244_v4 = vld [vmem:[%s11744_s28 + $0x1c8] sm:$0xff] }
 0x516   : > { %v5217_v37 = vpop.f32.mrf.mxu0  ;;  %7110 = vmatpush.bf16.msrb.mxu1 %v6979_v0  ;;  %v6567_v2 = vsel %vm3675_vm1, %v6563_v48, %v6565_v43  ;;  %v9163_v0 = vld [vmem:[%s14718_s7 + $0xc] sm:$0xf0]  ;;  %v5902_v43 = vpop.f32.mrf.mxu3 }
 0x517   : > { %v5218_v42 = vadd.f32 %v5217_v37, %v13661_v56  ;;  %6698 = vmatpush.bf16.msrb.mxu0 %v6567_v2 }
 0x519   : > { %v5233_v41 = vmax.f32 %v5218_v42, 0.0  ;;  %7071 = vperm.xlu0 %9753, %v7053_v28  }
 0x51a   : > { %7066 = vperm.xlu2 %9755, %v6640_v20   ;;  %v14334_v20 = vld [vmem:[%s14721_s10 + $0x20] sm:$0xff] }
 0x51b   : > { %v5249_v52 = vadd.f32 %v5241_v61, %v5233_v41  ;;  %6659 = vperm.xlu1 %9754, %v7053_v28  }
 0x51c   : > { %v6559_v27 = vpop.permute.xlu0 %6558  ;;  %v6963_v7 = vpop.permute.xlu2 %6962 }
 0x51d   : > { %5257 = vst [vmem:[%s11744_s28 + $0xf0] sm:$0xff] %v5249_v52  ;;  %v7019_v1 = vpop.permute.xlu1 %7018 }
 0x51e   : > { %v5220_v34 = vpop.f32.mrf.mxu0  ;;  %v14302_v54 = vsel %vm3727_vm4, %v7019_v1, %v7021_v29  ;;  %v14313_v29 = vld [vmem:[%s14721_s10 + $0x8] sm:$0xff] }
 0x51f   : > { %v5221_v56 = vadd.f32 %v5220_v34, %v13687_v51 }
 0x521   : > { %v5234_v44 = vmax.f32 %v5221_v56, 0.0  ;;  %7056 = vperm.xlu0 %9753, %v7050_v49  }
 0x522   : > { %6649 = vperm.xlu2 %9755, %v13888_v62  }
 0x523   : > { %v5250_v25 = vadd.f32 %v5242_v39, %v5234_v44  ;;  %6644 = vperm.xlu1 %9754, %v7050_v49   ;;  %v5650_v49 = vld [vmem:[%s11744_s28 + $0x20] sm:$0xff] }
 0x524   : > { %v6973_v17 = vpop.permute.xlu0 %6972  ;;  %v14306_v19 = vpop.permute.xlu2 %7008 }
 0x525   : > { %5258 = vst [vmem:[%s11744_s28 + $0x138] sm:$0xff] %v5250_v25  ;;  %v6978_v46 = vsel %vm3675_vm1, %v6971_v12, %v6973_v17  ;;  %v6561_v50 = vpop.permute.xlu1 %6560  ;;  %v5245_v25 = vld [vmem:[%s11744_s28 + $0x210] sm:$0xff] }
 0x526   : > { %v5222_v51 = vpop.f32.mrf.mxu0  ;;  %7111 = vmatpush.bf16.msrb.mxu1 %v6978_v46  ;;  %v6566_v26 = vsel %vm3675_vm1, %v6559_v27, %v6561_v50 }
 0x527   : > { %v5223_v13 = vadd.f32 %v5222_v51, %v13623_v14  ;;  %6699 = vmatpush.bf16.msrb.mxu0 %v6566_v26 }
 0x529   : > { %v5235_v15 = vmax.f32 %v5223_v13, 0.0  ;;  %5960 = vperm.xlu0 %9753, %v14313_v29   ;;  %v5904_v13 = vpop.f32.mrf.mxu3 }
 0x52a   : > { %5955 = vperm.xlu2 %9755, %v14320_v33  }
 0x52b   : > { %v5251_v48 = vadd.f32 %v5243_v18, %v5235_v15  ;;  %7061 = vperm.xlu1 %9754, %v13888_v62   ;;  %v14345_v62 = vld [vmem:[%s14721_s10 + $0x10] sm:$0xff] }
 0x52c   : > { %v6551_v12 = vpop.permute.xlu0 %6550  ;;  %v14326_v14 = vpop.permute.xlu2 %6958 }
 0x52d   : > { %5259 = vst [vmem:[%s11744_s28 + $0x180] sm:$0xff] %v5251_v48  ;;  %v14329_v31 = vpop.permute.xlu1 %7010  ;;  %v5651_v48 = vld [vmem:[%s11744_s28 + $0x68] sm:$0xff] }
 0x52e   : > { %v5225_v63 = vpop.f32.mrf.mxu0 }
 0x52f   : > { %v5226_v30 = vadd.f32 %v5225_v63, %v13683_v55  ;;  %v9708_v55 = vld [vmem:[%s14718_s7 + $0x4] sm:$0xf]  ;;  %v5884_v63 = vadd.f32 %v5883_v10, %v14138_v11 }
 0x530   : > { %v9166_v2 = vor.u32 %v9708_v55, %v9163_v0 }
 0x531   : > { %v5236_v24 = vmax.f32 %v5226_v30, 0.0  ;;  %5975 = vperm.xlu0 %9753, %v14334_v20   ;;  %v9711_v30 = vld [vmem:[%s14718_s7 + $0x1c] sm:$0xf]  ;;  %v5903_v55 = vadd.f32 %v5902_v43, %v5884_v63  ;;  %v5652_v43 = vld [vmem:[%s11744_s28 + $0xb0] sm:$0xff] }
 0x532   : > { %5970 = vperm.xlu2 %9755, %v14340_v6   ;;  %6725 = vmatmul.bf16.vlgmr.msra.gmra.mxu1 %v9166_v2 }
 0x533   : > { %v5252_v37 = vadd.f32 %v5244_v4, %v5236_v24  ;;  %v5622_v28 = vpop.f32.mrf.mxu1  ;;  %5965 = vperm.xlu1 %9754, %v14345_v62  }
 0x534   : > { %v5623_v42 = vadd.f32 %v5622_v28, %v13719_v53  ;;  %v6965_v41 = vpop.permute.xlu0 %6964  ;;  %v14358_v61 = vpop.permute.xlu2 %7000 }
 0x535   : > { %5260 = vst [vmem:[%s11744_s28 + $0x1c8] sm:$0xff] %v5252_v37  ;;  %v6967_v52 = vsel %vm3662_vm2, %v6963_v7, %v6965_v41  ;;  %v6553_v1 = vpop.permute.xlu1 %6552  ;;  %v5885_v7 = vpop.f32.mrf.mxu2 }
 0x536   : > { %v5642_v27 = vmax.f32 %v5623_v42, 0.0  ;;  %v5227_v34 = vpop.f32.mrf.mxu0  ;;  %7112 = vmatpush.bf16.msrb.mxu1 %v6967_v52  ;;  %v6555_v44 = vsel %vm3662_vm2, %v6551_v12, %v6553_v1  ;;  %v5886_v4 = vadd.f32 %v5885_v7, %v14088_v57 }
 0x537   : > { %v5228_v56 = vadd.f32 %v5227_v34, %v13705_v59  ;;  %6700 = vmatpush.bf16.msrb.mxu0 %v6555_v44 }
 0x538   : > { %v5658_v53 = vadd.f32 %v5650_v49, %v5642_v27  ;;  %v5905_v2 = vadd.f32 %v5904_v13, %v5886_v4 }
 0x539   : > { %v5237_v39 = vmax.f32 %v5228_v56, 0.0  ;;  %5990 = vperm.xlu0 %9753, %v14276_v58  }
 0x53a   : > { %5666 = vst [vmem:[%s11744_s28 + $0x20] sm:$0xff] %v5658_v53  ;;  %5985 = vperm.xlu2 %9755, %v14281_v9  }
 0x53b   : > { %v5253_v17 = vadd.f32 %v5245_v25, %v5237_v39  ;;  %v5624_v46 = vpop.f32.mrf.mxu1  ;;  %5980 = vperm.xlu1 %9754, %v14253_v8  }
 0x53c   : > { %v5625_v59 = vadd.f32 %v5624_v46, %v13738_v40  ;;  %v6547_v50 = vpop.permute.xlu0 %6546  ;;  %v14371_v51 = vpop.permute.xlu2 %6950  ;;  %v9175_v40 = vld [vmem:[%s14718_s7 + $0x24] sm:$0xf0] }
 0x53d   : > { %5261 = vst [vmem:[%s11744_s28 + $0x210] sm:$0xff] %v5253_v17  ;;  %v14374_v15 = vpop.permute.xlu1 %7006  ;;  %v9178_v24 = vor.u32 %v9711_v30, %v9175_v40  ;;  %v5888_v28 = vpop.f32.mrf.mxu2 }
 0x53e   : > { %v5643_v26 = vmax.f32 %v5625_v59, 0.0  ;;  %v5921_v18 = vpop.f32.mrf.mxu0 }
 0x53f   : > { %v5922_v42 = vadd.f32 %v5921_v18, %v5903_v55  ;;  %v5889_v18 = vadd.f32 %v5888_v28, %v14061_v36 }
 0x540   : > { %v5659_v12 = vadd.f32 %v5651_v48, %v5643_v26 }
 0x541   : > { %6377 = vperm.xlu0 %9753, %v14345_v62   ;;  %v5931_v56 = vmax.f32 %v5922_v42, 0.0 }
 0x542   : > { %5667 = vst [vmem:[%s11744_s28 + $0x68] sm:$0xff] %v5659_v12  ;;  %6372 = vperm.xlu2 %9755, %v14313_v29   ;;  %6730 = vmatmul.bf16.gmra.mxu1 %v9178_v24 }
 0x543   : > { %v5627_v0 = vpop.f32.mrf.mxu1  ;;  %6367 = vperm.xlu1 %9754, %v14320_v33  }
 0x544   : > { %v5628_v11 = vadd.f32 %v5627_v0, %v13685_v32  ;;  %v6961_v10 = vpop.permute.xlu0 %6960  ;;  %v14390_v37 = vpop.permute.xlu2 %6996 }
 0x545   : > { %v6966_v41 = vsel %vm3662_vm2, %v14326_v14, %v6961_v10  ;;  %v6549_v57 = vpop.permute.xlu1 %6548  ;;  %v5907_v32 = vpop.f32.mrf.mxu3 }
 0x546   : > { %v5644_v52 = vmax.f32 %v5628_v11, 0.0  ;;  %v5923_v27 = vpop.f32.mrf.mxu0  ;;  %7113 = vmatpush.bf16.msrb.mxu1 %v6966_v41  ;;  %v6554_v34 = vsel %vm3662_vm2, %v6547_v50, %v6549_v57  ;;  %v5653_v50 = vld [vmem:[%s11744_s28 + $0xf8] sm:$0xff]  ;;  %v5890_v13 = vpop.f32.mrf.mxu2  ;;  %v5908_v12 = vadd.f32 %v5907_v32, %v5889_v18  ;;  %v9207_v18 = vld [vmem:[#allocation2 + $0x20] sm:$0xf] }
 0x547   : > { %v5924_v1 = vadd.f32 %v5923_v27, %v5905_v2  ;;  %6701 = vmatpush.bf16.msrb.mxu0 %v6554_v34 }
 0x548   : > { %v5660_v49 = vadd.f32 %v5652_v43, %v5644_v52 }
 0x549   : > { %v5932_v44 = vmax.f32 %v5924_v1, 0.0  ;;  %6392 = vperm.xlu0 %9753, %v14253_v8   ;;  %v9682_v1 = vld [vmem:[%s14720_s9] sm:$0xff] }
 0x54a   : > { %5668 = vst [vmem:[%s11744_s28 + $0xb0] sm:$0xff] %v5660_v49  ;;  %6387 = vperm.xlu2 %9755, %v14334_v20  }
 0x54b   : > { %v5943_v14 = vpack.c.bf16 %v5932_v44, %v5931_v56  ;;  %v5629_v53 = vpop.f32.mrf.mxu1  ;;  %6382 = vperm.xlu1 %9754, %v14340_v6   ;;  %v9719_v44 = vld [vmem:[#allocation2 + $0x94] sm:$0xf0] }
 0x54c   : > { %v5630_v39 = vadd.f32 %v5629_v53, %v13736_v22  ;;  %v6539_v25 = vpop.permute.xlu0 %6538  ;;  %v6947_v7 = vpop.permute.xlu2 %6946  ;;  %v5891_v22 = vadd.f32 %v5890_v13, %v14123_v5  ;;  %v5654_v5 = vld [vmem:[%s11744_s28 + $0x140] sm:$0xff] }
 0x54d   : > { %v14401_v46 = vpop.permute.xlu1 %6998  ;;  %v5909_v48 = vpop.f32.mrf.mxu3  ;;  %v9231_v13 = vld [vmem:[%s14718_s7] sm:$0xf] }
 0x54e   : > { %v5645_v17 = vmax.f32 %v5630_v39, 0.0  ;;  %v5926_v59 = vpop.f32.mrf.mxu0  ;;  %v5910_v36 = vadd.f32 %v5909_v48, %v5891_v22  ;;  %v9703_v39 = vld [vmem:[#allocation2 + $0x90] sm:$0xf0] }
 0x54f   : > { %v5927_v4 = vadd.f32 %v5926_v59, %v5908_v12  ;;  %v9161_v12 = vld [vmem:[%s14718_s7] sm:$0xf] }
 0x550   : > { %v5661_v26 = vadd.f32 %v5653_v50, %v5645_v17  ;;  %v9718_v50 = vld [vmem:[#allocation2 + $0x44] sm:$0xf0] }
 0x551   : > { %6779 = vperm.xlu0 %9753, %v14320_v33   ;;  %v9208_v22 = vor.u32 %v9718_v50, %v9207_v18 }
 0x552   : > { %5669 = vst [vmem:[%s11744_s28 + $0xf8] sm:$0xff] %v5661_v26  ;;  %6402 = vperm.xlu2 %9755, %v14276_v58  }
 0x553   : > { %v5632_v63 = vpop.f32.mrf.mxu1  ;;  %6397 = vperm.xlu1 %9754, %v14281_v9  }
 0x554   : > { %v5633_v30 = vadd.f32 %v5632_v63, %v14136_v47  ;;  %v6953_v40 = vpop.permute.xlu0 %6952  ;;  %v14411_v24 = vpop.permute.xlu2 %6988  ;;  %v5933_v47 = vmax.f32 %v5927_v4, 0.0  ;;  %v9709_v63 = vld [vmem:[%s14718_s7 + $0x8] sm:$0xf0] }
 0x555   : > { %v6955_v55 = vsel %vm3649_vm3, %v14371_v51, %v6953_v40  ;;  %v6541_v11 = vpop.permute.xlu1 %6540  ;;  %v9137_v40 = vld [vmem:[#allocation2 + $0x1c] sm:$0xf] }
 0x556   : > { %v5646_v0 = vmax.f32 %v5633_v30, 0.0  ;;  %v5928_v10 = vpop.f32.mrf.mxu0  ;;  %7114 = vmatpush.bf16.msrb.mxu1 %v6955_v55  ;;  %v6543_v2 = vsel %vm3649_vm3, %v6539_v25, %v6541_v11  ;;  %v9211_v25 = vld [vmem:[#allocation2 + $0x70] sm:$0xf]  ;;  %v7015_v55 = vsel %vm3714_vm5, %v14329_v31, %v14286_v35  ;;  %v9162_v11 = vor.u32 %v9709_v63, %v9161_v12 }
 0x557   : > { %v5929_v28 = vadd.f32 %v5928_v10, %v5910_v36  ;;  %6702 = vmatpush.bf16.msrb.mxu0 %v6543_v2  ;;  %v9212_v17 = vor.u32 %v9719_v44, %v9211_v25  ;;  %v5657_v10 = vld [vmem:[%s11744_s28 + $0x218] sm:$0xff]  ;;  %v9683_v2 = vld [vmem:[%s14720_s9 + $0x8] sm:$0xff]  ;;  %v7014_v31 = vsel %vm3714_vm5, %v14374_v15, %v14306_v19  ;;  %v9728_v19 = vld [vmem:[%s14718_s7 + $0x20] sm:$0xf0] }
 0x558   : > { %v5662_v42 = vadd.f32 %v5654_v5, %v5646_v0 }
 0x559   : > { %v5934_v41 = vmax.f32 %v5929_v28, 0.0  ;;  %6794 = vperm.xlu0 %9753, %v14340_v6  }
 0x55a   : > { %5670 = vst [vmem:[%s11744_s28 + $0x140] sm:$0xff] %v5662_v42  ;;  %6789 = vperm.xlu2 %9755, %v14345_v62  }
 0x55b   : > { %v5944_v52 = vpack.c.bf16 %v5934_v41, %v5933_v47  ;;  %v14420_v57 = vpop.f32.mrf.mxu1  ;;  %6784 = vperm.xlu1 %9754, %v14313_v29  }
 0x55c   : > { %v6535_v51 = vpop.permute.xlu0 %6534  ;;  %v14423_v27 = vpop.permute.xlu2 %6982 }
 0x55d   : > { %6031 = vmatpush.bf16.msrb.mxu2 %v5944_v52  ;;  %v14425_v43 = vpop.permute.xlu1 %6994 }
 0x55e   : > { %v14445_v59 = vpop.f32.mrf.mxu0 }
 0x561   : > { %6032 = vmatpush.bf16.msrb.mxu2 %v5943_v14  ;;  %6809 = vperm.xlu0 %9753, %v14281_v9   ;;  %v14441_v14 = vpop.f32.mrf.mxu3 }
 0x562   : > { %6804 = vperm.xlu2 %9755, %v14253_v8  }
 0x563   : > { %v14433_v34 = vpop.f32.mrf.mxu1  ;;  %6799 = vperm.xlu1 %9754, %v14334_v20  }
 0x564   : > { %v6949_v32 = vpop.permute.xlu0 %6948  ;;  %v14436_v49 = vpop.permute.xlu2 %7032  ;;  %9061 = vmatmul.msk.bf16.vlgmr.msrb.gmra.mxu2 %vm3807_vm9, %v9682_v1 }
 0x565   : > { %6742 = vmatpush.bf16.msra.mxu2 %v14222_v60  ;;  %v6954_v56 = vsel %vm3649_vm3, %v6947_v7, %v6949_v32  ;;  %v6537_v53 = vpop.permute.xlu1 %6536  ;;  %v9141_v7 = vld [vmem:[#allocation2 + $0x6c] sm:$0xf] }
 0x566   : > { %7115 = vmatpush.bf16.msrb.mxu1 %v6954_v56  ;;  %v6542_v60 = vsel %vm3649_vm3, %v6535_v51, %v6537_v53  ;;  %v6316_v42 = vpop.f32.mrf.mxu0  ;;  %v5655_v56 = vld [vmem:[%s11744_s28 + $0x188] sm:$0xff]  ;;  %v9684_v53 = vld [vmem:[%s14720_s9 + $0x10] sm:$0xff] }
 0x567   : > { %6703 = vmatpush.bf16.msrb.mxu0 %v6542_v60 }
 0x569   : > { %6743 = vmatpush.bf16.msra.mxu2 %v14257_v3  ;;  %7196 = vperm.xlu0 %9753, %v14313_v29   ;;  %v9142_v3 = vor.u32 %v9703_v39, %v9141_v7  ;;  %v9702_v29 = vld [vmem:[#allocation2 + $0x40] sm:$0xf0]  ;;  %v6297_v5 = vpop.f32.mrf.mxu3 }
 0x56a   : > { %7191 = vperm.xlu2 %9755, %v14320_v33   ;;  %7116 = vmatpush.bf16.msrb.mxu1 %v9212_v17  ;;  %v9138_v4 = vor.u32 %v9702_v29, %v9137_v40  ;;  %v6298_v50 = vadd.f32 %v6297_v5, %v14168_v45  ;;  %v9713_v5 = vld [vmem:[%s14718_s7 + $0x28] sm:$0xf0] }
 0x56b   : > { %v5639_v26 = vpop.f32.mrf.mxu1  ;;  %6814 = vperm.xlu1 %9754, %v14276_v58   ;;  %6704 = vmatpush.bf16.msrb.mxu0 %v9142_v3 }
 0x56c   : > { %v14457_v33 = vpop.permute.xlu0 %7034  ;;  %v5579_v48 = vpop.permute.xlu2 %5578 }
 0x56d   : > { %7129 = vmatpush.bf16.msrb.mxu2 %v14270_v23  ;;  %v9725_v23 = vld [vmem:[%s14718_s7 + $0x8] sm:$0xf0]  ;;  %v5640_v30 = vadd.f32 %v5639_v26, %v5579_v48  ;;  %v6317_v26 = vadd.f32 %v6316_v42, %v6298_v50  ;;  %v5656_v48 = vld [vmem:[%s11744_s28 + $0x1d0] sm:$0xff]  ;;  %v9724_v42 = vld [vmem:[%s14718_s7 + $0x4] sm:$0xf] }
 0x56e   : > { %v9232_v36 = vor.u32 %v9725_v23, %v9231_v13  ;;  %7117 = vmatpush.bf16.msrb.mxu1 %v9208_v22  ;;  %v6319_v52 = vpop.f32.mrf.mxu0  ;;  %v6063_v50 = vld [vmem:[%s11744_s28 + $0x70] sm:$0xff] }
 0x56f   : > { %v5649_v0 = vmax.f32 %v5640_v30, 0.0  ;;  %6705 = vmatpush.bf16.msrb.mxu0 %v9138_v4 }
 0x571   : > { %7130 = vmatpush.bf16.msrb.mxu2 %v14302_v54  ;;  %v6987_v54 = vpop.permute.xlu1 %6986  ;;  %v5665_v28 = vadd.f32 %v5657_v10, %v5649_v0  ;;  %7118 = vmatmul.bf16.vlgmr.msrb.gmra.mxu1 %v9232_v36  ;;  %v6300_v15 = vpop.f32.mrf.mxu3  ;;  %v9169_v0 = vld [vmem:[%s14718_s7 + $0x8] sm:$0xf] }
 0x572   : > { %7211 = vperm.xlu0 %9753, %v14334_v20   ;;  %7206 = vperm.xlu2 %9755, %v14340_v6   ;;  %v7003_v6 = vsel %vm3701_vm7, %v14401_v46, %v14358_v61  ;;  %v7002_v61 = vsel %vm3701_vm7, %v14425_v43, %v14390_v37  ;;  %v9712_v46 = vld [vmem:[%s14718_s7 + $0x20] sm:$0xf0]  ;;  %v6991_v37 = vsel %vm3688_vm8, %v6987_v54, %v14411_v24 }
 0x573   : > { %5673 = vst [vmem:[%s11744_s28 + $0x218] sm:$0xff] %v5665_v28  ;;  %6706 = vmatmul.bf16.vlgmr.msrb.gmra.mxu0 %v9162_v11  ;;  %7201 = vperm.xlu1 %9754, %v14345_v62   ;;  %v6333_v35 = vpop.f32.mrf.mxu1  ;;  %v9243_v62 = vld [vmem:[%s14718_s7 + $0x18] sm:$0xf]  ;;  %v6301_v24 = vadd.f32 %v6300_v15, %v14155_v16  ;;  %v9710_v11 = vld [vmem:[%s14718_s7 + $0x10] sm:$0xf0] }
 0x574   : > { %v6985_v47 = vpop.permute.xlu0 %6984  ;;  %9062 = vmatmul.msk.bf16.gmra.mxu2 %vm3807_vm9, %v9683_v2  ;;  %v9170_v10 = vor.u32 %v9710_v11, %v9169_v0  ;;  %v9700_v2 = vld [vmem:[%s14720_s9 + $0x10] sm:$0xff]  ;;  %v9239_v15 = vld [vmem:[%s14718_s7 + $0x8] sm:$0xf] }
 0x575   : > { %7131 = vmatpush.bf16.msrb.mxu2 %v7015_v55  ;;  %v6320_v13 = vadd.f32 %v6319_v52, %v6301_v24 }
 0x576   : > { %v6321_v17 = vpop.f32.mrf.mxu0 }
 0x579   : > { %7132 = vmatpush.bf16.msrb.mxu2 %v7014_v31  ;;  %v14480_v20 = vpop.permute.xlu1 %7036  ;;  %v6302_v39 = vpop.f32.mrf.mxu3 }
 0x57a   : > { %7226 = vperm.xlu0 %9753, %v14276_v58   ;;  %7221 = vperm.xlu2 %9755, %v14281_v9   ;;  %v9173_v9 = vld [vmem:[%s14718_s7 + $0x18] sm:$0xf]  ;;  %v6303_v3 = vadd.f32 %v6302_v39, %v14106_v21  ;;  %v7039_v4 = vsel %vm3740_vm6, %v14457_v33, %v14480_v20  ;;  %v9699_v33 = vld [vmem:[%s14720_s9 + $0x8] sm:$0xff]  ;;  %v9727_v20 = vld [vmem:[%s14718_s7 + $0x1c] sm:$0xf] }
 0x57b   : > { %7216 = vperm.xlu1 %9754, %v14253_v8   ;;  %v6335_v41 = vpop.f32.mrf.mxu1  ;;  %v9244_v8 = vor.u32 %v9728_v19, %v9243_v62  ;;  %v9174_v43 = vor.u32 %v9712_v46, %v9173_v9 }
 0x57c   : > { %v5569_v58 = vpop.permute.xlu0 %5568  ;;  %v6322_v29 = vadd.f32 %v6321_v17, %v6303_v3  ;;  %v6336_v63 = vadd.f32 %v6335_v41, %v6317_v26  ;;  %v9726_v41 = vld [vmem:[%s14718_s7 + $0x10] sm:$0xf0] }
 0x57d   : > { %7133 = vmatpush.bf16.msrb.mxu2 %v7003_v6  ;;  %v5635_v51 = vadd.f32 %v14420_v57, %v5569_v58  ;;  %v6990_v57 = vsel %vm3688_vm8, %v14423_v27, %v6985_v47  ;;  %v6296_v27 = vadd.f32 %v14441_v14, %v14153_v38  ;;  %v9685_v38 = vld [vmem:[%s14720_s9 + $0x18] sm:$0xff]  ;;  %v9245_v6 = vld [vmem:[%s14718_s7 + $0x24] sm:$0xf0]  ;;  %v9240_v58 = vor.u32 %v9726_v41, %v9239_v15 }
 0x57e   : > { %v6344_v21 = vmax.f32 %v6336_v63, 0.0  ;;  %v9701_v47 = vld [vmem:[%s14720_s9 + $0x18] sm:$0xff]  ;;  %v9248_v19 = vor.u32 %v9727_v20, %v9245_v6  ;;  %v6065_v63 = vld [vmem:[%s11744_s28 + $0x100] sm:$0xff] }
 0x57f   : > { %v5647_v32 = vmax.f32 %v5635_v51, 0.0  ;;  %v6315_v12 = vadd.f32 %v14445_v59, %v6296_v27  ;;  %v9698_v59 = vld [vmem:[%s14720_s9] sm:$0xff] }
 0x580   : > { %v9251_v51 = vld [vmem:[%s14718_s7 + $0x20] sm:$0xf] }
 0x581   : > { %7134 = vmatpush.bf16.msrb.mxu2 %v7002_v61  ;;  %v7031_v1 = vpop.permute.xlu1 %7030  ;;  %v5663_v44 = vadd.f32 %v5655_v56, %v5647_v32  ;;  %7123 = vmatmul.bf16.gmra.mxu1 %v9244_v8  ;;  %v14582_v61 = vpop.permute.xlu2 %7066  ;;  %v9729_v8 = vld [vmem:[%s14718_s7 + $0x28] sm:$0xf0] }
 0x582   : > { %v7038_v55 = vsel %vm3740_vm6, %v7031_v1, %v14436_v49  ;;  %v9181_v49 = vld [vmem:[%s14718_s7 + $0x20] sm:$0xf] }
 0x583   : > { %5671 = vst [vmem:[%s11744_s28 + $0x188] sm:$0xff] %v5663_v44  ;;  %6711 = vmatmul.bf16.gmra.mxu0 %v9174_v43  ;;  %v6338_v60 = vpop.f32.mrf.mxu1  ;;  %v9182_v28 = vor.u32 %v9713_v5, %v9181_v49 }
 0x584   : > { %9063 = vmatmul.msk.bf16.gmra.mxu2 %vm3807_vm9, %v9684_v53  ;;  %v6339_v18 = vadd.f32 %v6338_v60, %v6320_v13  ;;  %v14574_v62 = vpop.permute.xlu0 %6654  ;;  %v6062_v60 = vld [vmem:[%s11744_s28 + $0x28] sm:$0xff] }
 0x585   : > { %7135 = vmatpush.bf16.msrb.mxu2 %v6991_v37  ;;  %v9252_v37 = vor.u32 %v9729_v8, %v9251_v51 }
 0x586   : > { %v6345_v45 = vmax.f32 %v6339_v18, 0.0 }
 0x589   : > { %7136 = vmatpush.bf16.msrb.mxu2 %v6990_v57  ;;  %v5574_v25 = vpop.permute.xlu1 %5573  ;;  %v14589_v52 = vpop.permute.xlu2 %6649 }
 0x58a   : > { %v5638_v7 = vadd.f32 %v14433_v34, %v5574_v25  ;;  %v6334_v34 = vadd.f32 %v6333_v35, %v6315_v12  ;;  %v9233_v35 = vld [vmem:[%s14718_s7 + $0xc] sm:$0xf0] }
 0x58b   : > { %v6340_v16 = vpop.f32.mrf.mxu1  ;;  %v9236_v31 = vor.u32 %v9724_v42, %v9233_v35 }
 0x58c   : > { %v5648_v23 = vmax.f32 %v5638_v7, 0.0  ;;  %v6341_v30 = vadd.f32 %v6340_v16, %v6322_v29  ;;  %v6343_v14 = vmax.f32 %v6334_v34, 0.0  ;;  %v14587_v46 = vpop.permute.xlu0 %7071  ;;  %v6064_v29 = vld [vmem:[%s11744_s28 + $0xb8] sm:$0xff] }
 0x58e   : > { %v5664_v22 = vadd.f32 %v5656_v48, %v5648_v23  ;;  %v6346_v40 = vmax.f32 %v6341_v30, 0.0  ;;  %v6355_v54 = vpack.c.bf16 %v6344_v21, %v6343_v14 }
 0x590   : > { %5672 = vst [vmem:[%s11744_s28 + $0x1d0] sm:$0xff] %v5664_v22  ;;  %v6356_v36 = vpack.c.bf16 %v6346_v40, %v6345_v45 }
 0x591   : > { %v14585_v9 = vpop.permute.xlu1 %6659  ;;  %v5956_v43 = vpop.permute.xlu2 %5955 }
 0x592   : > { %6443 = vmatpush.bf16.msrb.mxu3 %v6356_v36  ;;  %v6066_v36 = vld [vmem:[%s11744_s28 + $0x148] sm:$0xff] }
 0x594   : > { %9064 = vmatmul.msk.bf16.gmra.mxu2 %vm3807_vm9, %v9685_v38  ;;  %v14599_v32 = vpop.permute.xlu0 %7056 }
 0x596   : > { %6444 = vmatpush.bf16.msrb.mxu3 %v6355_v54 }
 0x599   : > { %9131 = vmatmul.msk.bf16.vlgmr.msrb.gmra.mxu3 %vm3807_vm9, %v9698_v59  ;;  %v14597_v1 = vpop.permute.xlu1 %6644  ;;  %v5971_v48 = vpop.permute.xlu2 %5970 }
 0x59a   : > { %7154 = vmatpush.bf16.msra.mxu3 %v7039_v4 }
 0x59c   : > { %v5961_v24 = vpop.permute.xlu0 %5960 }
 0x59e   : > { %7155 = vmatpush.bf16.msra.mxu3 %v7038_v55  ;;  %v6067_v55 = vld [vmem:[%s11744_s28 + $0x190] sm:$0xff] }
 0x5a1   : > { %v14603_v39 = vpop.permute.xlu1 %7061  ;;  %v5986_v11 = vpop.permute.xlu2 %5985 }
 0x5a4   : > { %9183 = vmatmul.msk.bf16.vlgmr.msra.gmra.mxu2 %vm3807_vm9, %v9170_v10  ;;  %v5976_v34 = vpop.permute.xlu0 %5975 }
 0x5a9   : > { %9132 = vmatmul.msk.bf16.gmra.mxu3 %vm3807_vm9, %v9699_v33  ;;  %v5966_v13 = vpop.permute.xlu1 %5965  ;;  %v6373_v51 = vpop.permute.xlu2 %6372 }
 0x5af   : > { %v6726_v6 = vpop.f32.mrf.mxu1 }
 0x5b1   : > { %v5981_v14 = vpop.permute.xlu1 %5980 }
 0x5b4   : > { %9184 = vmatmul.msk.bf16.gmra.mxu2 %vm3807_vm9, %v9182_v28 }
 0x5b9   : > { %9133 = vmatmul.msk.bf16.gmra.mxu3 %vm3807_vm9, %v9700_v2  ;;  %v6368_v28 = vpop.permute.xlu1 %6367  ;;  %v6068_v2 = vld [vmem:[%s11744_s28 + $0x1d8] sm:$0xff] }
 0x5c4   : > { %7137 = vmatmul.bf16.vlgmr.msrb.gmra.mxu2 %v9236_v31 }
 0x5c9   : > { %9134 = vmatmul.msk.bf16.gmra.mxu3 %vm3807_vm9, %v9701_v47  ;;  %v5991_v47 = vpop.permute.xlu0 %5990 }
 0x5d4   : > { %7142 = vmatmul.bf16.gmra.mxu2 %v9248_v19  ;;  %v6474_v19 = vld [vmem:[%s11744_s28 + $0x30] sm:$0xff] }
 0x5d9   : > { %9253 = vmatmul.msk.bf16.vlgmr.msra.gmra.mxu3 %vm3807_vm9, %v9240_v58 }
 0x5e7   : > { %v6034_v56 = vpop.f32.mrf.mxu2 }
 0x5e8   : > { %v6035_v44 = vadd.f32 %v6034_v56, %v5956_v43  ;;  %v6069_v43 = vld [vmem:[%s11744_s28 + $0x220] sm:$0xff] }
 0x5e9   : > { %9254 = vmatmul.msk.bf16.gmra.mxu3 %vm3807_vm9, %v9252_v37 }
 0x5ea   : > { %v6054_v53 = vmax.f32 %v6035_v44, 0.0 }
 0x5ec   : > { %v6070_v57 = vadd.f32 %v6062_v60, %v6054_v53 }
 0x5ee   : > { %6078 = vst [vmem:[%s11744_s28 + $0x28] sm:$0xff] %v6070_v57  ;;  %v6475_v57 = vld [vmem:[%s11744_s28 + $0x78] sm:$0xff] }
 0x5ef   : > { %v6036_v25 = vpop.f32.mrf.mxu2 }
 0x5f0   : > { %v6037_v17 = vadd.f32 %v6036_v25, %v5961_v24  ;;  %v6707_v49 = vpop.f32.mrf.mxu0 }
 0x5f2   : > { %v6055_v7 = vmax.f32 %v6037_v17, 0.0  ;;  %v6728_v17 = vpop.f32.mrf.mxu1 }
 0x5f4   : > { %v6071_v3 = vadd.f32 %v6063_v50, %v6055_v7  ;;  %v6378_v7 = vpop.permute.xlu0 %6377 }
 0x5f6   : > { %6079 = vst [vmem:[%s11744_s28 + $0x70] sm:$0xff] %v6071_v3 }
 0x5f7   : > { %v6039_v23 = vpop.f32.mrf.mxu2 }
 0x5f8   : > { %v6040_v27 = vadd.f32 %v6039_v23, %v5966_v13  ;;  %v6709_v37 = vpop.f32.mrf.mxu0 }
 0x5fa   : > { %v6056_v26 = vmax.f32 %v6040_v27, 0.0  ;;  %v6476_v27 = vld [vmem:[%s11744_s28 + $0xc0] sm:$0xff] }
 0x5fc   : > { %v6072_v18 = vadd.f32 %v6064_v29, %v6056_v26 }
 0x5fe   : > { %6080 = vst [vmem:[%s11744_s28 + $0xb8] sm:$0xff] %v6072_v18  ;;  %v6383_v18 = vpop.permute.xlu1 %6382 }
 0x5ff   : > { %v6041_v22 = vpop.f32.mrf.mxu2 }
 0x600   : > { %v6042_v16 = vadd.f32 %v6041_v22, %v5971_v48  ;;  %v6712_v13 = vpop.f32.mrf.mxu0  ;;  %v6731_v48 = vpop.f32.mrf.mxu1 }
 0x602   : > { %v6057_v12 = vmax.f32 %v6042_v16, 0.0 }
 0x604   : > { %v6073_v30 = vadd.f32 %v6065_v63, %v6057_v12 }
 0x606   : > { %6081 = vst [vmem:[%s11744_s28 + $0x100] sm:$0xff] %v6073_v30  ;;  %v6477_v30 = vld [vmem:[%s11744_s28 + $0x108] sm:$0xff] }
 0x607   : > { %v6044_v45 = vpop.f32.mrf.mxu2 }
 0x608   : > { %v6045_v40 = vadd.f32 %v6044_v45, %v5976_v34  ;;  %v6714_v63 = vpop.f32.mrf.mxu0  ;;  %v6713_v45 = vadd.f32 %v6712_v13, %v14574_v62 }
 0x60a   : > { %v6058_v21 = vmax.f32 %v6045_v40, 0.0 }
 0x60c   : > { %v6074_v38 = vadd.f32 %v6066_v36, %v6058_v21  ;;  %v6710_v21 = vadd.f32 %v6709_v37, %v14589_v52  ;;  %v6715_v36 = vadd.f32 %v6714_v63, %v14585_v9  ;;  %v6398_v37 = vpop.permute.xlu1 %6397 }
 0x60e   : > { %6082 = vst [vmem:[%s11744_s28 + $0x148] sm:$0xff] %v6074_v38  ;;  %v6388_v38 = vpop.permute.xlu2 %6387 }
 0x60f   : > { %v6046_v54 = vpop.f32.mrf.mxu2 }
 0x610   : > { %v6047_v59 = vadd.f32 %v6046_v54, %v5981_v14  ;;  %v6708_v54 = vadd.f32 %v6707_v49, %v14597_v1  ;;  %v6393_v49 = vpop.permute.xlu0 %6392 }
 0x612   : > { %v6059_v4 = vmax.f32 %v6047_v59, 0.0  ;;  %v6732_v59 = vadd.f32 %v6731_v48, %v6713_v45 }
 0x614   : > { %v6075_v0 = vadd.f32 %v6067_v55, %v6059_v4  ;;  %v6733_v55 = vpop.f32.mrf.mxu1 }
 0x616   : > { %6083 = vst [vmem:[%s11744_s28 + $0x190] sm:$0xff] %v6075_v0  ;;  %v6729_v0 = vadd.f32 %v6728_v17, %v6710_v21 }
 0x617   : > { %v6049_v10 = vpop.f32.mrf.mxu2 }
 0x618   : > { %v6050_v33 = vadd.f32 %v6049_v10, %v5986_v11 }
 0x61a   : > { %v6060_v5 = vmax.f32 %v6050_v33, 0.0  ;;  %v6734_v33 = vadd.f32 %v6733_v55, %v6715_v36 }
 0x61c   : > { %v6446_v42 = vpop.f32.mrf.mxu3  ;;  %v6076_v35 = vadd.f32 %v6068_v2, %v6060_v5  ;;  %v6478_v5 = vld [vmem:[%s11744_s28 + $0x150] sm:$0xff] }
 0x61d   : > { %v6447_v31 = vadd.f32 %v6446_v42, %v6368_v28  ;;  %v6727_v28 = vadd.f32 %v6726_v6, %v6708_v54  ;;  %v6479_v6 = vld [vmem:[%s11744_s28 + $0x198] sm:$0xff] }
 0x61e   : > { %6084 = vst [vmem:[%s11744_s28 + $0x1d8] sm:$0xff] %v6076_v35 }
 0x61f   : > { %v6466_v20 = vmax.f32 %v6447_v31, 0.0  ;;  %v6051_v15 = vpop.f32.mrf.mxu2 }
 0x620   : > { %v6052_v58 = vadd.f32 %v6051_v15, %v5991_v47 }
 0x621   : > { %v6482_v41 = vadd.f32 %v6474_v19, %v6466_v20 }
 0x622   : > { %v6061_v8 = vmax.f32 %v6052_v58, 0.0 }
 0x623   : > { %6490 = vst [vmem:[%s11744_s28 + $0x30] sm:$0xff] %v6482_v41 }
 0x624   : > { %v6448_v56 = vpop.f32.mrf.mxu3  ;;  %v6077_v44 = vadd.f32 %v6069_v43, %v6061_v8  ;;  %v9714_v8 = vld [vmem:[%s14720_s9] sm:$0xff] }
 0x625   : > { %v6449_v53 = vadd.f32 %v6448_v56, %v6373_v51 }
 0x626   : > { %6085 = vst [vmem:[%s11744_s28 + $0x220] sm:$0xff] %v6077_v44 }
 0x627   : > { %v6467_v60 = vmax.f32 %v6449_v53, 0.0  ;;  %v6745_v24 = vpop.f32.mrf.mxu2  ;;  %v7119_v53 = vpop.f32.mrf.mxu1 }
 0x628   : > { %v6746_v42 = vadd.f32 %v6745_v24, %v6727_v28  ;;  %v7120_v36 = vadd.f32 %v7119_v53, %v14599_v32  ;;  %v9731_v28 = vld [vmem:[%s14720_s9 + $0x8] sm:$0xff] }
 0x629   : > { %v6483_v25 = vadd.f32 %v6475_v57, %v6467_v60  ;;  %v6480_v60 = vld [vmem:[%s11744_s28 + $0x1e0] sm:$0xff] }
 0x62a   : > { %v6755_v15 = vmax.f32 %v6746_v42, 0.0 }
 0x62b   : > { %6491 = vst [vmem:[%s11744_s28 + $0x78] sm:$0xff] %v6483_v25  ;;  %v6403_v25 = vpop.permute.xlu2 %6402 }
 0x62c   : > { %v6451_v50 = vpop.f32.mrf.mxu3 }
 0x62d   : > { %v6452_v3 = vadd.f32 %v6451_v50, %v6378_v7 }
 0x62f   : > { %v6468_v23 = vmax.f32 %v6452_v3, 0.0  ;;  %v6747_v26 = vpop.f32.mrf.mxu2  ;;  %v6481_v3 = vld [vmem:[%s11744_s28 + $0x228] sm:$0xff] }
 0x630   : > { %v6748_v52 = vadd.f32 %v6747_v26, %v6729_v0 }
 0x631   : > { %v6484_v29 = vadd.f32 %v6476_v27, %v6468_v23  ;;  %v7121_v23 = vpop.f32.mrf.mxu1  ;;  %v9715_v27 = vld [vmem:[%s14720_s9 + $0x8] sm:$0xff] }
 0x632   : > { %v6756_v47 = vmax.f32 %v6748_v52, 0.0  ;;  %v7122_v45 = vadd.f32 %v7121_v23, %v14603_v39  ;;  %v9717_v39 = vld [vmem:[%s14720_s9 + $0x18] sm:$0xff]  ;;  %v9732_v52 = vld [vmem:[%s14720_s9 + $0x10] sm:$0xff] }
 0x633   : > { %6492 = vst [vmem:[%s11744_s28 + $0xc0] sm:$0xff] %v6484_v29 }
 0x634   : > { %v6453_v22 = vpop.f32.mrf.mxu3  ;;  %v6767_v58 = vpack.c.bf16 %v6756_v47, %v6755_v15  ;;  %v6785_v47 = vpop.permute.xlu1 %6784 }
 0x635   : > { %v6454_v16 = vadd.f32 %v6453_v22, %v6383_v18 }
 0x637   : > { %v6469_v12 = vmax.f32 %v6454_v16, 0.0  ;;  %v6750_v34 = vpop.f32.mrf.mxu2  ;;  %v9716_v16 = vld [vmem:[%s14720_s9 + $0x10] sm:$0xff] }
 0x638   : > { %v6751_v11 = vadd.f32 %v6750_v34, %v6732_v59 }
 0x639   : > { %v6485_v40 = vadd.f32 %v6477_v30, %v6469_v12  ;;  %v7124_v18 = vpop.f32.mrf.mxu1 }
 0x63a   : > { %v6757_v35 = vmax.f32 %v6751_v11, 0.0  ;;  %v7125_v30 = vadd.f32 %v7124_v18, %v14582_v61 }
 0x63b   : > { %6493 = vst [vmem:[%s11744_s28 + $0x108] sm:$0xff] %v6485_v40 }
 0x63c   : > { %v6456_v14 = vpop.f32.mrf.mxu3 }
 0x63d   : > { %v6457_v4 = vadd.f32 %v6456_v14, %v6388_v38 }
 0x63f   : > { %v6470_v10 = vmax.f32 %v6457_v4, 0.0  ;;  %v6752_v62 = vpop.f32.mrf.mxu2 }
 0x640   : > { %v6753_v9 = vadd.f32 %v6752_v62, %v6734_v33  ;;  %v9730_v62 = vld [vmem:[%s14720_s9] sm:$0xff] }
 0x641   : > { %v6486_v2 = vadd.f32 %v6478_v5, %v6470_v10  ;;  %v7126_v63 = vpop.f32.mrf.mxu1 }
 0x642   : > { %v6758_v1 = vmax.f32 %v6753_v9, 0.0  ;;  %v7127_v40 = vadd.f32 %v7126_v63, %v14587_v46  ;;  %v6780_v9 = vpop.permute.xlu0 %6779 }
 0x643   : > { %6494 = vst [vmem:[%s11744_s28 + $0x150] sm:$0xff] %v6486_v2  ;;  %v9733_v2 = vld [vmem:[%s14720_s9 + $0x18] sm:$0xff] }
 0x644   : > { %v6458_v31 = vpop.f32.mrf.mxu3  ;;  %v6768_v20 = vpack.c.bf16 %v6758_v1, %v6757_v35 }
 0x645   : > { %v6459_v19 = vadd.f32 %v6458_v31, %v6393_v49  ;;  %v6886_v49 = vld [vmem:[%s11744_s28 + $0x38] sm:$0xff] }
 0x646   : > { %6855 = vmatpush.bf16.msra.mxu0 %v6768_v20 }
 0x647   : > { %v6471_v41 = vmax.f32 %v6459_v19, 0.0  ;;  %v7138_v24 = vpop.f32.mrf.mxu2 }
 0x648   : > { %v7139_v4 = vadd.f32 %v7138_v24, %v7120_v36  ;;  %v6889_v24 = vld [vmem:[%s11744_s28 + $0x110] sm:$0xff] }
 0x649   : > { %v6487_v51 = vadd.f32 %v6479_v6, %v6471_v41  ;;  %v6887_v41 = vld [vmem:[%s11744_s28 + $0x80] sm:$0xff] }
 0x64a   : > { %6856 = vmatpush.bf16.msra.mxu0 %v6767_v58  ;;  %v6790_v58 = vpop.permute.xlu2 %6789 }
 0x64b   : > { %6495 = vst [vmem:[%s11744_s28 + $0x198] sm:$0xff] %v6487_v51 }
 0x64c   : > { %v6461_v43 = vpop.f32.mrf.mxu3 }
 0x64d   : > { %v6462_v56 = vadd.f32 %v6461_v43, %v6398_v37  ;;  %9201 = vmatmul.msk.bf16.vlgmr.msra.gmra.mxu0 %vm3807_vm9, %v9714_v8  ;;  %v6888_v43 = vld [vmem:[%s11744_s28 + $0xc8] sm:$0xff] }
 0x64f   : > { %v6472_v44 = vmax.f32 %v6462_v56, 0.0  ;;  %v7140_v26 = vpop.f32.mrf.mxu2 }
 0x650   : > { %v7141_v38 = vadd.f32 %v7140_v26, %v7122_v45  ;;  %v6892_v45 = vld [vmem:[%s11744_s28 + $0x1e8] sm:$0xff] }
 0x651   : > { %v6488_v57 = vadd.f32 %v6480_v60, %v6472_v44  ;;  %v6795_v44 = vpop.permute.xlu0 %6794 }
 0x653   : > { %6496 = vst [vmem:[%s11744_s28 + $0x1e0] sm:$0xff] %v6488_v57 }
 0x654   : > { %v6463_v17 = vpop.f32.mrf.mxu3 }
 0x655   : > { %v6464_v7 = vadd.f32 %v6463_v17, %v6403_v25  ;;  %v6800_v17 = vpop.permute.xlu1 %6799 }
 0x657   : > { %v6473_v50 = vmax.f32 %v6464_v7, 0.0  ;;  %v7143_v22 = vpop.f32.mrf.mxu2 }
 0x658   : > { %v7144_v21 = vadd.f32 %v7143_v22, %v7125_v30 }
 0x659   : > { %v6489_v13 = vadd.f32 %v6481_v3, %v6473_v50 }
 0x65b   : > { %6497 = vst [vmem:[%s11744_s28 + $0x228] sm:$0xff] %v6489_v13  ;;  %v6890_v13 = vld [vmem:[%s11744_s28 + $0x158] sm:$0xff] }
 0x65c   : > { %v7157_v29 = vpop.f32.mrf.mxu3 }
 0x65d   : > { %9202 = vmatmul.msk.bf16.gmra.mxu0 %vm3807_vm9, %v9715_v27  ;;  %v7158_v11 = vadd.f32 %v7157_v29, %v7139_v4  ;;  %v6805_v27 = vpop.permute.xlu2 %6804 }
 0x65f   : > { %v7145_v34 = vpop.f32.mrf.mxu2  ;;  %v7167_v46 = vmax.f32 %v7158_v11, 0.0 }
 0x660   : > { %v7146_v14 = vadd.f32 %v7145_v34, %v7127_v40 }
 0x664   : > { %v7159_v48 = vpop.f32.mrf.mxu3 }
 0x665   : > { %v7160_v55 = vadd.f32 %v7159_v48, %v7141_v38  ;;  %v6891_v48 = vld [vmem:[%s11744_s28 + $0x1a0] sm:$0xff]  ;;  %v7192_v34 = vpop.permute.xlu2 %7191 }
 0x667   : > { %v7168_v5 = vmax.f32 %v7160_v55, 0.0 }
 0x669   : > { %v7179_v32 = vpack.c.bf16 %v7168_v5, %v7167_v46  ;;  %v7299_v46 = vld [vmem:[%s11744_s28 + $0x88] sm:$0xff] }
 0x66c   : > { %v7162_v12 = vpop.f32.mrf.mxu3 }
 0x66d   : > { %9203 = vmatmul.msk.bf16.gmra.mxu0 %vm3807_vm9, %v9716_v16  ;;  %v7163_v54 = vadd.f32 %v7162_v12, %v7144_v21  ;;  %v6810_v16 = vpop.permute.xlu0 %6809 }
 0x66f   : > { %v7169_v10 = vmax.f32 %v7163_v54, 0.0  ;;  %v7298_v54 = vld [vmem:[%s11744_s28 + $0x40] sm:$0xff] }
 0x674   : > { %v7164_v59 = vpop.f32.mrf.mxu3 }
 0x675   : > { %v7165_v0 = vadd.f32 %v7164_v59, %v7146_v14  ;;  %v6815_v14 = vpop.permute.xlu1 %6814  ;;  %v7197_v11 = vpop.permute.xlu0 %7196 }
 0x677   : > { %v7170_v33 = vmax.f32 %v7165_v0, 0.0 }
 0x679   : > { %v7180_v61 = vpack.c.bf16 %v7170_v33, %v7169_v10  ;;  %v6893_v10 = vld [vmem:[%s11744_s28 + $0x230] sm:$0xff] }
 0x67b   : > { %7267 = vmatpush.bf16.msra.mxu1 %v7180_v61 }
 0x67d   : > { %9204 = vmatmul.msk.bf16.gmra.mxu0 %vm3807_vm9, %v9717_v39 }
 0x67f   : > { %7268 = vmatpush.bf16.msra.mxu1 %v7179_v32 }
 0x682   : > { %9271 = vmatmul.msk.bf16.vlgmr.msra.gmra.mxu1 %vm3807_vm9, %v9730_v62  ;;  %v7202_v62 = vpop.permute.xlu1 %7201 }
 0x692   : > { %9272 = vmatmul.msk.bf16.gmra.mxu1 %vm3807_vm9, %v9731_v28 }
 0x6a2   : > { %9273 = vmatmul.msk.bf16.gmra.mxu1 %vm3807_vm9, %v9732_v52 }
 0x6b2   : > { %9274 = vmatmul.msk.bf16.gmra.mxu1 %vm3807_vm9, %v9733_v2 }
 0x6ca   : > { %v6858_v42 = vpop.f32.mrf.mxu0 }
 0x6cb   : > { %v6859_v35 = vadd.f32 %v6858_v42, %v6780_v9  ;;  %v7300_v9 = vld [vmem:[%s11744_s28 + $0xd0] sm:$0xff] }
 0x6cd   : > { %v6878_v1 = vmax.f32 %v6859_v35, 0.0  ;;  %v7207_v35 = vpop.permute.xlu2 %7206 }
 0x6cf   : > { %v6894_v31 = vadd.f32 %v6886_v49, %v6878_v1 }
 0x6d1   : > { %6902 = vst [vmem:[%s11744_s28 + $0x38] sm:$0xff] %v6894_v31 }
 0x6d2   : > { %v6860_v20 = vpop.f32.mrf.mxu0 }
 0x6d3   : > { %v6861_v19 = vadd.f32 %v6860_v20, %v6785_v47  ;;  %v7301_v47 = vld [vmem:[%s11744_s28 + $0x118] sm:$0xff] }
 0x6d5   : > { %v6879_v15 = vmax.f32 %v6861_v19, 0.0  ;;  %v7212_v19 = vpop.permute.xlu0 %7211 }
 0x6d7   : > { %v6895_v6 = vadd.f32 %v6887_v41, %v6879_v15 }
 0x6d9   : > { %6903 = vst [vmem:[%s11744_s28 + $0x80] sm:$0xff] %v6895_v6 }
 0x6da   : > { %v6863_v51 = vpop.f32.mrf.mxu0 }
 0x6db   : > { %v6864_v8 = vadd.f32 %v6863_v51, %v6790_v58  ;;  %v7302_v58 = vld [vmem:[%s11744_s28 + $0x160] sm:$0xff] }
 0x6dd   : > { %v6880_v37 = vmax.f32 %v6864_v8, 0.0  ;;  %v7217_v8 = vpop.permute.xlu1 %7216 }
 0x6df   : > { %v6896_v56 = vadd.f32 %v6888_v43, %v6880_v37 }
 0x6e1   : > { %6904 = vst [vmem:[%s11744_s28 + $0xc8] sm:$0xff] %v6896_v56 }
 0x6e2   : > { %v6865_v53 = vpop.f32.mrf.mxu0 }
 0x6e3   : > { %v6866_v60 = vadd.f32 %v6865_v53, %v6795_v44  ;;  %v7303_v44 = vld [vmem:[%s11744_s28 + $0x1a8] sm:$0xff] }
 0x6e5   : > { %v6881_v57 = vmax.f32 %v6866_v60, 0.0  ;;  %v7222_v60 = vpop.permute.xlu2 %7221 }
 0x6e7   : > { %v6897_v25 = vadd.f32 %v6889_v24, %v6881_v57 }
 0x6e9   : > { %6905 = vst [vmem:[%s11744_s28 + $0x110] sm:$0xff] %v6897_v25 }
 0x6ea   : > { %v6868_v7 = vpop.f32.mrf.mxu0 }
 0x6eb   : > { %v6869_v50 = vadd.f32 %v6868_v7, %v6800_v17  ;;  %v7304_v17 = vld [vmem:[%s11744_s28 + $0x1f0] sm:$0xff] }
 0x6ed   : > { %v6882_v3 = vmax.f32 %v6869_v50, 0.0  ;;  %v7227_v50 = vpop.permute.xlu0 %7226 }
 0x6ef   : > { %v6898_v23 = vadd.f32 %v6890_v13, %v6882_v3 }
 0x6f1   : > { %6906 = vst [vmem:[%s11744_s28 + $0x158] sm:$0xff] %v6898_v23 }
 0x6f2   : > { %v6870_v26 = vpop.f32.mrf.mxu0 }
 0x6f3   : > { %v6871_v29 = vadd.f32 %v6870_v26, %v6805_v27  ;;  %v7305_v27 = vld [vmem:[%s11744_s28 + $0x238] sm:$0xff] }
 0x6f5   : > { %v6883_v18 = vmax.f32 %v6871_v29, 0.0 }
 0x6f7   : > { %v6899_v22 = vadd.f32 %v6891_v48, %v6883_v18 }
 0x6f9   : > { %6907 = vst [vmem:[%s11744_s28 + $0x1a0] sm:$0xff] %v6899_v22 }
 0x6fa   : > { %v6873_v12 = vpop.f32.mrf.mxu0 }
 0x6fb   : > { %v6874_v63 = vadd.f32 %v6873_v12, %v6810_v16 }
 0x6fd   : > { %v6884_v30 = vmax.f32 %v6874_v63, 0.0 }
 0x6ff   : > { %v7270_v40 = vpop.f32.mrf.mxu1  ;;  %v6900_v21 = vadd.f32 %v6892_v45, %v6884_v30 }
 0x700   : > { %v7271_v36 = vadd.f32 %v7270_v40, %v7192_v34 }
 0x701   : > { %6908 = vst [vmem:[%s11744_s28 + $0x1e8] sm:$0xff] %v6900_v21 }
 0x702   : > { %v7290_v38 = vmax.f32 %v7271_v36, 0.0  ;;  %v6875_v59 = vpop.f32.mrf.mxu0 }
 0x703   : > { %v6876_v55 = vadd.f32 %v6875_v59, %v6815_v14 }
 0x704   : > { %v7306_v4 = vadd.f32 %v7298_v54, %v7290_v38 }
 0x705   : > { %v6885_v0 = vmax.f32 %v6876_v55, 0.0 }
 0x706   : > { %7314 = vst [vmem:[%s11744_s28 + $0x40] sm:$0xff] %v7306_v4 }
 0x707   : > { %v7272_v33 = vpop.f32.mrf.mxu1  ;;  %v6901_v5 = vadd.f32 %v6893_v10, %v6885_v0 }
 0x708   : > { %v7273_v61 = vadd.f32 %v7272_v33, %v7197_v11 }
 0x709   : > { %6909 = vst [vmem:[%s11744_s28 + $0x230] sm:$0xff] %v6901_v5 }
 0x70a   : > { %v7291_v39 = vmax.f32 %v7273_v61, 0.0 }
 0x70c   : > { %v7307_v32 = vadd.f32 %v7299_v46, %v7291_v39 }
 0x70e   : > { %7315 = vst [vmem:[%s11744_s28 + $0x88] sm:$0xff] %v7307_v32 }
 0x70f   : > { %v7275_v28 = vpop.f32.mrf.mxu1 }
 0x710   : > { %v7276_v52 = vadd.f32 %v7275_v28, %v7202_v62 }
 0x712   : > { %v7292_v2 = vmax.f32 %v7276_v52, 0.0 }
 0x714   : > { %v7308_v42 = vadd.f32 %v7300_v9, %v7292_v2 }
 0x716   : > { %7316 = vst [vmem:[%s11744_s28 + $0xd0] sm:$0xff] %v7308_v42 }
 0x717   : > { %v7277_v1 = vpop.f32.mrf.mxu1 }
 0x718   : > { %v7278_v49 = vadd.f32 %v7277_v1, %v7207_v35 }
 0x71a   : > { %v7293_v31 = vmax.f32 %v7278_v49, 0.0 }
 0x71c   : > { %v7309_v20 = vadd.f32 %v7301_v47, %v7293_v31 }
 0x71e   : > { %7317 = vst [vmem:[%s11744_s28 + $0x118] sm:$0xff] %v7309_v20 }
 0x71f   : > { %v7280_v15 = vpop.f32.mrf.mxu1 }
 0x720   : > { %v7281_v41 = vadd.f32 %v7280_v15, %v7212_v19 }
 0x722   : > { %v7294_v6 = vmax.f32 %v7281_v41, 0.0 }
 0x724   : > { %v7310_v51 = vadd.f32 %v7302_v58, %v7294_v6 }
 0x726   : > { %7318 = vst [vmem:[%s11744_s28 + $0x160] sm:$0xff] %v7310_v51 }
 0x727   : > { %v7282_v37 = vpop.f32.mrf.mxu1 }
 0x728   : > { %v7283_v43 = vadd.f32 %v7282_v37, %v7217_v8 }
 0x72a   : > { %v7295_v56 = vmax.f32 %v7283_v43, 0.0 }
 0x72c   : > { %v7311_v53 = vadd.f32 %v7303_v44, %v7295_v56 }
 0x72e   : > { %7319 = vst [vmem:[%s11744_s28 + $0x1a8] sm:$0xff] %v7311_v53 }
 0x72f   : > { %v7285_v57 = vpop.f32.mrf.mxu1 }
 0x730   : > { %v7286_v24 = vadd.f32 %v7285_v57, %v7222_v60 }
 0x732   : > { %v7296_v25 = vmax.f32 %v7286_v24, 0.0 }
 0x734   : > { %v7312_v7 = vadd.f32 %v7304_v17, %v7296_v25 }
 0x736   : > { %7320 = vst [vmem:[%s11744_s28 + $0x1f0] sm:$0xff] %v7312_v7 }
 0x737   : > { %v7287_v3 = vpop.f32.mrf.mxu1 }
 0x738   : > { %v7288_v13 = vadd.f32 %v7287_v3, %v7227_v50 }
 0x73a   : > { %v7297_v23 = vmax.f32 %v7288_v13, 0.0 }
 0x73c   : > { %v7313_v26 = vadd.f32 %v7305_v27, %v7297_v23 }
 0x73e   : > { %7321 = vst [vmem:[%s11744_s28 + $0x238] sm:$0xff] %v7313_v26 }
 0x73f PF: > { %s21_s17 = sadd.s32 1, %s9763_s17  }
 0x740   : > { %p18_p4 = scmp.ge.s32.totalorder %s21_s17, 4  }
 0x742   :  { %20 = sbr.rel (!%p18_p4) target bundleno = 1 (0x1), region = 94 }

</bundles_post_ra>
